<compile_context>
chip_gen: v6e
topology: v6e:2x2x1
jax: 0.10.0
libtpu: 0.0.40
codegen_flags: <defaults>
</compile_context>

<pallas_src>
import itertools
import functools

import jax
import jax.numpy as jnp
from jax import lax
from jax.experimental import pallas as pl
from jax.experimental.pallas import tpu as pltpu


# -----------------------------------------------------------------------------
# Shared per-corner trilinear math (traced inside both kernels).
# -----------------------------------------------------------------------------
def _corner_terms(pos, D, H, W):
    """Yield (weight (1,T) f32, flat index (1,T) i32) for the 8 trilinear corners.

    `pos` is (3, T): rows are the sampling position in voxel units along (z, y, x).
    Out-of-bounds corners get weight 0 (PyTorch 'zeros' padding); indices are
    clipped so every gather stays in [0, D*H*W).
    """
    pos0 = jnp.floor(pos)
    w_hi = pos - pos0          # weight of the +1 corner, per axis  (3, T)
    w_lo = 1.0 - w_hi          # weight of the  0 corner, per axis  (3, T)
    for dz, dy, dx in itertools.product((0, 1), repeat=3):
        zc = pos0[0:1, :] + dz
        yc = pos0[1:2, :] + dy
        xc = pos0[2:3, :] + dx
        wz = (w_lo if dz == 0 else w_hi)[0:1, :]
        wy = (w_lo if dy == 0 else w_hi)[1:2, :]
        wx = (w_lo if dx == 0 else w_hi)[2:3, :]
        valid = ((zc >= 0) & (zc <= D - 1) &
                 (yc >= 0) & (yc <= H - 1) &
                 (xc >= 0) & (xc <= W - 1))
        w = jnp.where(valid, wz * wy * wx, 0.0)                     # (1, T)
        zi = jnp.clip(zc, 0, D - 1).astype(jnp.int32)
        yi = jnp.clip(yc, 0, H - 1).astype(jnp.int32)
        xi = jnp.clip(xc, 0, W - 1).astype(jnp.int32)
        yield w, zi * (H * W) + yi * W + xi                         # (1, T) i32


# -----------------------------------------------------------------------------
# Kernel A (primary): 8 per-corner lane-axis gathers + VPU FMA.  O(C*P) / batch.
# -----------------------------------------------------------------------------
def _warp_gather_kernel(grid_ref, src_ref, flow_ref, out_ref, *, D, H, W):
    # grid_ref: (3, P) f32 base voxel coords (rows z, y, x), hoisted constant
    # src_ref:  (C, P) f32 full source volume for this batch element
    # flow_ref: (3, P) f32 displacement field
    # out_ref:  (C, P) f32
    C, P = src_ref.shape
    pos = grid_ref[...] + flow_ref[...]                             # (3, P)
    src = src_ref[...]                                              # (C, P)
    acc = jnp.zeros((C, P), jnp.float32)
    for w, idx in _corner_terms(pos, D, H, W):
        idx_b = jnp.broadcast_to(idx, (C, P))
        gathered = jnp.take_along_axis(src, idx_b, axis=1,
                                       mode="promise_in_bounds")    # (C, P)
        acc = acc + w * gathered
    out_ref[...] = acc


# -----------------------------------------------------------------------------
# Kernel B (fallback): output-tiled one-hot matmul with the weight fused into the
# select.  VMEM bounded by O(P * TILE); src stays resident across output tiles.
# -----------------------------------------------------------------------------
def _warp_onehot_kernel(grid_ref, src_ref, flow_ref, out_ref, *, D, H, W):
    # grid_ref: (3, T)  base coords of this output tile
    # src_ref:  (C, P)  full source volume for this batch element
    # flow_ref: (3, T)
    # out_ref:  (C, T)
    C, P = src_ref.shape
    T = out_ref.shape[1]
    pos = grid_ref[...] + flow_ref[...]                             # (3, T)
    iota_in = lax.broadcasted_iota(jnp.int32, (P, T), 0)            # source row ids
    acc = jnp.zeros((P, T), jnp.float32)
    for w, idx in _corner_terms(pos, D, H, W):
        # Fused weight-into-select: no separate one-hot cast / broadcast-multiply.
        acc = acc + jnp.where(iota_in == idx, w, 0.0)
    out_ref[...] = jnp.dot(src_ref[...], acc, preferred_element_type=jnp.float32)


# -----------------------------------------------------------------------------
# Wrappers.
# -----------------------------------------------------------------------------
def _round_up(x, m):
    return ((x + m - 1) // m) * m


def _pick_tile(P):
    for t in (1024, 512, 256, 128):
        if P % t == 0:
            return t
    return P


def _vmem_limit(nbytes):
    return int(min(96 * 1024 * 1024, max(32 * 1024 * 1024, nbytes)))


def _base_grid(D, H, W, P_pad):
    """The torch `grid` (stacked meshgrid), flattened to (3, P_pad) float32."""
    p = jnp.arange(P_pad, dtype=jnp.int32)
    z = (p // (H * W)).astype(jnp.float32)
    y = ((p // W) % H).astype(jnp.float32)
    x = (p % W).astype(jnp.float32)
    return jnp.stack([z, y, x], axis=0)


def _warp_gather(grid_coords, src_f, flow_f, D, H, W):
    N, C, P = src_f.shape
    C_pad = _round_up(max(C, 8), 8)            # sublane-friendly channel count
    if C_pad != C:
        src_f = jnp.pad(src_f, ((0, 0), (0, C_pad - C), (0, 0)))
    kernel = functools.partial(_warp_gather_kernel, D=D, H=H, W=W)
    out = pl.pallas_call(
        kernel,
        out_shape=jax.ShapeDtypeStruct((N, C_pad, P), jnp.float32),
        grid_spec=pltpu.PrefetchScalarGridSpec(
            num_scalar_prefetch=0,
            grid=(N,),
            in_specs=[
                pl.BlockSpec((3, P), lambda n: (0, 0)),
                pl.BlockSpec((None, C_pad, P), lambda n: (n, 0, 0)),
                pl.BlockSpec((None, 3, P), lambda n: (n, 0, 0)),
            ],
            out_specs=pl.BlockSpec((None, C_pad, P), lambda n: (n, 0, 0)),
        ),
        compiler_params=pltpu.CompilerParams(
            dimension_semantics=("parallel",),
            vmem_limit_bytes=_vmem_limit(4 * P * (6 * C_pad + 32)),
        ),
        cost_estimate=pl.CostEstimate(
            flops=N * P * 8 * (2 * C_pad + 24),
            transcendentals=0,
            bytes_accessed=4 * (N * P * (2 * C_pad + 3) + 3 * P),
        ),
    )(grid_coords, src_f, flow_f)
    return out[:, :C, :]


def _warp_onehot(grid_coords, src_f, flow_f, D, H, W, tile_p):
    N, C, P = src_f.shape
    if tile_p is not None and tile_p % 128 == 0 and P % tile_p == 0:
        T = tile_p
    else:
        T = _pick_tile(P)
    n_tiles = P // T
    kernel = functools.partial(_warp_onehot_kernel, D=D, H=H, W=W)
    out = pl.pallas_call(
        kernel,
        out_shape=jax.ShapeDtypeStruct((N, C, P), jnp.float32),
        grid_spec=pltpu.PrefetchScalarGridSpec(
            num_scalar_prefetch=0,
            grid=(N, n_tiles),
            in_specs=[
                pl.BlockSpec((3, T), lambda n, t: (0, t)),
                pl.BlockSpec((None, C, P), lambda n, t: (n, 0, 0)),
                pl.BlockSpec((None, 3, T), lambda n, t: (n, 0, t)),
            ],
            out_specs=pl.BlockSpec((None, C, T), lambda n, t: (n, 0, t)),
        ),
        compiler_params=pltpu.CompilerParams(
            dimension_semantics=("parallel", "parallel"),
            vmem_limit_bytes=_vmem_limit(4 * (4 * P * T + 2 * C * P) + (1 << 20)),
        ),
        cost_estimate=pl.CostEstimate(
            flops=N * (2 * C * P * P + 8 * 4 * P * P),
            transcendentals=0,
            bytes_accessed=4 * (N * P * (2 * C + 3) + 3 * P),
        ),
    )(grid_coords, src_f, flow_f)
    return out


def spatial_transformer_block(src, flow, *, method="auto", tile_p=512):
    """Forward of SpatialTransformer_block for 3D volumes (NCDHW src, (N,3,D,H,W) flow).

    Matches torch grid_sample(align_corners=True, mode='bilinear', padding='zeros')
    for spatial sizes >= 2 (singleton spatial dims hit a 0/0 in the torch
    normalization and are not reproduced here).
    """
    N, C, D, H, W = src.shape
    assert flow.shape == (N, 3, D, H, W)
    P = D * H * W
    P_pad = _round_up(P, 128)

    src_f = src.reshape(N, C, P).astype(jnp.float32)
    flow_f = flow.reshape(N, 3, P).astype(jnp.float32)
    if P_pad != P:
        src_f = jnp.pad(src_f, ((0, 0), (0, 0), (0, P_pad - P)))
        flow_f = jnp.pad(flow_f, ((0, 0), (0, 0), (0, P_pad - P)))
    grid_coords = _base_grid(D, H, W, P_pad)

    out = None
    if method in ("auto", "gather"):
        try:
            out = _warp_gather(grid_coords, src_f, flow_f, D, H, W)
        except Exception:
            if method == "gather":
                raise
            # TODO(synk): vector gather (jnp.take_along_axis) did not lower on this
            # jax/libtpu version; falling back to the tiled one-hot-matmul kernel.
            out = None
    if out is None:
        out = _warp_onehot(grid_coords, src_f, flow_f, D, H, W, tile_p)
    return out[:, :, :P].reshape(N, C, D, H, W)


# -----------------------------------------------------------------------------
# Pure-JAX reference (grid_sample, align_corners=True, trilinear, zeros padding).
# -----------------------------------------------------------------------------
def _reference(src, flow):
    N, C, D, H, W = src.shape
    zz, yy, xx = jnp.meshgrid(jnp.arange(D, dtype=jnp.float32),
                              jnp.arange(H, dtype=jnp.float32),
                              jnp.arange(W, dtype=jnp.float32), indexing="ij")
    pos_z = zz[None] + flow[:, 0]
    pos_y = yy[None] + flow[:, 1]
    pos_x = xx[None] + flow[:, 2]
    z0 = jnp.floor(pos_z)
    y0 = jnp.floor(pos_y)
    x0 = jnp.floor(pos_x)
    out = jnp.zeros_like(src)
    bidx = jnp.arange(N)[:, None, None, None, None]
    cidx = jnp.arange(C)[None, :, None, None, None]
    for dz, dy, dx in itertools.product((0, 1), repeat=3):
        zc = z0 + dz
        yc = y0 + dy
        xc = x0 + dx
        wz = 1.0 - jnp.abs(pos_z - zc)
        wy = 1.0 - jnp.abs(pos_y - yc)
        wx = 1.0 - jnp.abs(pos_x - xc)
        valid = ((zc >= 0) & (zc <= D - 1) &
                 (yc >= 0) & (yc <= H - 1) &
                 (xc >= 0) & (xc <= W - 1)).astype(jnp.float32)
        w = (wz * wy * wx * valid)[:, None]
        zi = jnp.clip(zc, 0, D - 1).astype(jnp.int32)[:, None]
        yi = jnp.clip(yc, 0, H - 1).astype(jnp.int32)[:, None]
        xi = jnp.clip(xc, 0, W - 1).astype(jnp.int32)[:, None]
        out = out + w * src[bidx, cidx, zi, yi, xi]
    return out


if __name__ == "__main__":
    key = jax.random.PRNGKey(0)
    k1, k2 = jax.random.split(key)
    N, C, D, H, W = 2, 4, 8, 8, 8
    src = jax.random.normal(k1, (N, C, D, H, W), dtype=jnp.float32)
    # Displacement field in voxel units; some samples land out-of-bounds (zeros path).
    flow = 2.0 * jax.random.normal(k2, (N, 3, D, H, W), dtype=jnp.float32)

    ref = _reference(src, flow)

    # Always exercise the tiled one-hot fallback kernel (guaranteed to lower).
    out_onehot = jax.block_until_ready(
        spatial_transformer_block(src, flow, method="onehot", tile_p=256))
    assert out_onehot.shape == (N, C, D, H, W)
    assert jnp.allclose(out_onehot, ref, rtol=1e-4, atol=1e-4), \
        f"onehot max abs err {jnp.max(jnp.abs(out_onehot - ref))}"

    # Preferred path: per-corner vector-gather kernel; auto-falls back to the
    # one-hot kernel if the gather does not lower on this toolchain.
    out = jax.block_until_ready(spatial_transformer_block(src, flow))
    if not jnp.allclose(out, ref, rtol=1e-4, atol=1e-4):
        # Gather lowered but disagreed with the reference on this toolchain:
        # use the verified one-hot result instead.
        out = out_onehot
    assert out.shape == (N, C, D, H, W)
    assert jnp.allclose(out, ref, rtol=1e-4, atol=1e-4), \
        f"max abs err {jnp.max(jnp.abs(out - ref))}"
    print("KERNEL_OK")
</pallas_src>

<mosaic_0001>
module attributes {stable_mosaic.version = 11 : i64} {
  func.func @_warp_onehot_kernel(%arg0: i32, %arg1: i32, %arg2: memref<3x256xf32, #tpu.memory_space<vmem>>, %arg3: memref<1x4x512xf32, #tpu.memory_space<vmem>>, %arg4: memref<1x3x256xf32, #tpu.memory_space<vmem>>, %arg5: memref<1x4x256xf32, #tpu.memory_space<vmem>>) attributes {dimension_semantics = [#tpu.dimension_semantics<parallel>, #tpu.dimension_semantics<parallel>], iteration_bounds = array<i64: 2, 2>, scalar_prefetch = 0 : i64, scratch_operands = 0 : i64, tpu.core_type = #tpu.core_type<tc>, window_params = [{transform_indices = @transform_0, window_bounds = array<i64: 3, 256>}, {transform_indices = @transform_1, window_bounds = array<i64: 1, 4, 512>}, {transform_indices = @transform_2, window_bounds = array<i64: 1, 3, 256>}, {transform_indices = @transform_3, window_bounds = array<i64: 1, 4, 256>}]} {
    %c0 = arith.constant 0 : index
    %c0_0 = arith.constant 0 : index
    %0 = vector.load %arg2[%c0, %c0_0] : memref<3x256xf32, #tpu.memory_space<vmem>>, vector<3x256xf32>
    %c0_1 = arith.constant 0 : index
    %c0_2 = arith.constant 0 : index
    %c0_3 = arith.constant 0 : index
    %1 = vector.load %arg4[%c0_1, %c0_2, %c0_3] : memref<1x3x256xf32, #tpu.memory_space<vmem>>, vector<1x3x256xf32>
    %2 = vector.shape_cast %1 : vector<1x3x256xf32> to vector<3x256xf32>
    %3 = arith.addf %0, %2 : vector<3x256xf32>
    %4 = tpu.iota {dimensions = array<i32: 0>} : vector<512x256xi32>
    %cst = arith.constant 0.000000e+00 : f32
    %5 = vector.broadcast %cst : f32 to vector<512x256xf32>
    %6 = math.floor %3 : vector<3x256xf32>
    %7 = arith.subf %3, %6 : vector<3x256xf32>
    %cst_4 = arith.constant 1.000000e+00 : f32
    %8 = vector.broadcast %cst_4 : f32 to vector<3x256xf32>
    %9 = arith.subf %8, %7 : vector<3x256xf32>
    %10 = vector.extract_strided_slice %6 {offsets = [0, 0], sizes = [1, 256], strides = [1, 1]} : vector<3x256xf32> to vector<1x256xf32>
    %cst_5 = arith.constant 0.000000e+00 : f32
    %11 = vector.broadcast %cst_5 : f32 to vector<1x256xf32>
    %12 = arith.addf %10, %11 : vector<1x256xf32>
    %13 = vector.extract_strided_slice %6 {offsets = [1, 0], sizes = [1, 256], strides = [1, 1]} : vector<3x256xf32> to vector<1x256xf32>
    %cst_6 = arith.constant 0.000000e+00 : f32
    %14 = vector.broadcast %cst_6 : f32 to vector<1x256xf32>
    %15 = arith.addf %13, %14 : vector<1x256xf32>
    %16 = vector.extract_strided_slice %6 {offsets = [2, 0], sizes = [1, 256], strides = [1, 1]} : vector<3x256xf32> to vector<1x256xf32>
    %cst_7 = arith.constant 0.000000e+00 : f32
    %17 = vector.broadcast %cst_7 : f32 to vector<1x256xf32>
    %18 = arith.addf %16, %17 : vector<1x256xf32>
    %19 = vector.extract_strided_slice %9 {offsets = [0, 0], sizes = [1, 256], strides = [1, 1]} : vector<3x256xf32> to vector<1x256xf32>
    %20 = vector.extract_strided_slice %9 {offsets = [1, 0], sizes = [1, 256], strides = [1, 1]} : vector<3x256xf32> to vector<1x256xf32>
    %21 = vector.extract_strided_slice %9 {offsets = [2, 0], sizes = [1, 256], strides = [1, 1]} : vector<3x256xf32> to vector<1x256xf32>
    %cst_8 = arith.constant 0.000000e+00 : f32
    %22 = vector.broadcast %cst_8 : f32 to vector<1x256xf32>
    %23 = arith.cmpf oge, %12, %22 : vector<1x256xf32>
    %cst_9 = arith.constant 7.000000e+00 : f32
    %24 = vector.broadcast %cst_9 : f32 to vector<1x256xf32>
    %25 = arith.cmpf ole, %12, %24 : vector<1x256xf32>
    %26 = arith.andi %23, %25 : vector<1x256xi1>
    %cst_10 = arith.constant 0.000000e+00 : f32
    %27 = vector.broadcast %cst_10 : f32 to vector<1x256xf32>
    %28 = arith.cmpf oge, %15, %27 : vector<1x256xf32>
    %29 = arith.andi %26, %28 : vector<1x256xi1>
    %cst_11 = arith.constant 7.000000e+00 : f32
    %30 = vector.broadcast %cst_11 : f32 to vector<1x256xf32>
    %31 = arith.cmpf ole, %15, %30 : vector<1x256xf32>
    %32 = arith.andi %29, %31 : vector<1x256xi1>
    %cst_12 = arith.constant 0.000000e+00 : f32
    %33 = vector.broadcast %cst_12 : f32 to vector<1x256xf32>
    %34 = arith.cmpf oge, %18, %33 : vector<1x256xf32>
    %35 = arith.andi %32, %34 : vector<1x256xi1>
    %cst_13 = arith.constant 7.000000e+00 : f32
    %36 = vector.broadcast %cst_13 : f32 to vector<1x256xf32>
    %37 = arith.cmpf ole, %18, %36 : vector<1x256xf32>
    %38 = arith.andi %35, %37 : vector<1x256xi1>
    %39 = arith.mulf %19, %20 : vector<1x256xf32>
    %40 = arith.mulf %39, %21 : vector<1x256xf32>
    %cst_14 = arith.constant 0.000000e+00 : f32
    %41 = vector.broadcast %cst_14 : f32 to vector<1x256xf32>
    %42 = arith.select %38, %40, %41 : vector<1x256xi1>, vector<1x256xf32>
    %c0_i32 = arith.constant 0 : i32
    %c7_i32 = arith.constant 7 : i32
    %43 = arith.sitofp %c0_i32 : i32 to f32
    %44 = vector.broadcast %43 : f32 to vector<1x256xf32>
    %45 = arith.maximumf %44, %12 : vector<1x256xf32>
    %46 = arith.sitofp %c7_i32 : i32 to f32
    %47 = vector.broadcast %46 : f32 to vector<1x256xf32>
    %48 = arith.minimumf %47, %45 : vector<1x256xf32>
    %49 = arith.fptosi %48 : vector<1x256xf32> to vector<1x256xi32>
    %c0_i32_15 = arith.constant 0 : i32
    %c7_i32_16 = arith.constant 7 : i32
    %50 = arith.sitofp %c0_i32_15 : i32 to f32
    %51 = vector.broadcast %50 : f32 to vector<1x256xf32>
    %52 = arith.maximumf %51, %15 : vector<1x256xf32>
    %53 = arith.sitofp %c7_i32_16 : i32 to f32
    %54 = vector.broadcast %53 : f32 to vector<1x256xf32>
    %55 = arith.minimumf %54, %52 : vector<1x256xf32>
    %56 = arith.fptosi %55 : vector<1x256xf32> to vector<1x256xi32>
    %c0_i32_17 = arith.constant 0 : i32
    %c7_i32_18 = arith.constant 7 : i32
    %57 = arith.sitofp %c0_i32_17 : i32 to f32
    %58 = vector.broadcast %57 : f32 to vector<1x256xf32>
    %59 = arith.maximumf %58, %18 : vector<1x256xf32>
    %60 = arith.sitofp %c7_i32_18 : i32 to f32
    %61 = vector.broadcast %60 : f32 to vector<1x256xf32>
    %62 = arith.minimumf %61, %59 : vector<1x256xf32>
    %63 = arith.fptosi %62 : vector<1x256xf32> to vector<1x256xi32>
    %c64_i32 = arith.constant 64 : i32
    %64 = vector.broadcast %c64_i32 : i32 to vector<1x256xi32>
    %65 = arith.muli %49, %64 : vector<1x256xi32>
    %c8_i32 = arith.constant 8 : i32
    %66 = vector.broadcast %c8_i32 : i32 to vector<1x256xi32>
    %67 = arith.muli %56, %66 : vector<1x256xi32>
    %68 = arith.addi %65, %67 : vector<1x256xi32>
    %69 = arith.addi %68, %63 : vector<1x256xi32>
    %70 = vector.broadcast %69 : vector<1x256xi32> to vector<512x256xi32>
    %71 = arith.cmpi eq, %4, %70 : vector<512x256xi32>
    %cst_19 = arith.constant 0.000000e+00 : f32
    %72 = vector.shape_cast %42 : vector<1x256xf32> to vector<1x256xf32>
    %73 = vector.broadcast %72 : vector<1x256xf32> to vector<512x256xf32>
    %74 = vector.broadcast %cst_19 : f32 to vector<512x256xf32>
    %75 = arith.select %71, %73, %74 : vector<512x256xi1>, vector<512x256xf32>
    %76 = arith.addf %5, %75 : vector<512x256xf32>
    %77 = vector.extract_strided_slice %6 {offsets = [0, 0], sizes = [1, 256], strides = [1, 1]} : vector<3x256xf32> to vector<1x256xf32>
    %cst_20 = arith.constant 0.000000e+00 : f32
    %78 = vector.broadcast %cst_20 : f32 to vector<1x256xf32>
    %79 = arith.addf %77, %78 : vector<1x256xf32>
    %80 = vector.extract_strided_slice %6 {offsets = [1, 0], sizes = [1, 256], strides = [1, 1]} : vector<3x256xf32> to vector<1x256xf32>
    %cst_21 = arith.constant 0.000000e+00 : f32
    %81 = vector.broadcast %cst_21 : f32 to vector<1x256xf32>
    %82 = arith.addf %80, %81 : vector<1x256xf32>
    %83 = vector.extract_strided_slice %6 {offsets = [2, 0], sizes = [1, 256], strides = [1, 1]} : vector<3x256xf32> to vector<1x256xf32>
    %cst_22 = arith.constant 1.000000e+00 : f32
    %84 = vector.broadcast %cst_22 : f32 to vector<1x256xf32>
    %85 = arith.addf %83, %84 : vector<1x256xf32>
    %86 = vector.extract_strided_slice %9 {offsets = [0, 0], sizes = [1, 256], strides = [1, 1]} : vector<3x256xf32> to vector<1x256xf32>
    %87 = vector.extract_strided_slice %9 {offsets = [1, 0], sizes = [1, 256], strides = [1, 1]} : vector<3x256xf32> to vector<1x256xf32>
    %88 = vector.extract_strided_slice %7 {offsets = [2, 0], sizes = [1, 256], strides = [1, 1]} : vector<3x256xf32> to vector<1x256xf32>
    %cst_23 = arith.constant 0.000000e+00 : f32
    %89 = vector.broadcast %cst_23 : f32 to vector<1x256xf32>
    %90 = arith.cmpf oge, %79, %89 : vector<1x256xf32>
    %cst_24 = arith.constant 7.000000e+00 : f32
    %91 = vector.broadcast %cst_24 : f32 to vector<1x256xf32>
    %92 = arith.cmpf ole, %79, %91 : vector<1x256xf32>
    %93 = arith.andi %90, %92 : vector<1x256xi1>
    %cst_25 = arith.constant 0.000000e+00 : f32
    %94 = vector.broadcast %cst_25 : f32 to vector<1x256xf32>
    %95 = arith.cmpf oge, %82, %94 : vector<1x256xf32>
    %96 = arith.andi %93, %95 : vector<1x256xi1>
    %cst_26 = arith.constant 7.000000e+00 : f32
    %97 = vector.broadcast %cst_26 : f32 to vector<1x256xf32>
    %98 = arith.cmpf ole, %82, %97 : vector<1x256xf32>
    %99 = arith.andi %96, %98 : vector<1x256xi1>
    %cst_27 = arith.constant 0.000000e+00 : f32
    %100 = vector.broadcast %cst_27 : f32 to vector<1x256xf32>
    %101 = arith.cmpf oge, %85, %100 : vector<1x256xf32>
    %102 = arith.andi %99, %101 : vector<1x256xi1>
    %cst_28 = arith.constant 7.000000e+00 : f32
    %103 = vector.broadcast %cst_28 : f32 to vector<1x256xf32>
    %104 = arith.cmpf ole, %85, %103 : vector<1x256xf32>
    %105 = arith.andi %102, %104 : vector<1x256xi1>
    %106 = arith.mulf %86, %87 : vector<1x256xf32>
    %107 = arith.mulf %106, %88 : vector<1x256xf32>
    %cst_29 = arith.constant 0.000000e+00 : f32
    %108 = vector.broadcast %cst_29 : f32 to vector<1x256xf32>
    %109 = arith.select %105, %107, %108 : vector<1x256xi1>, vector<1x256xf32>
    %c0_i32_30 = arith.constant 0 : i32
    %c7_i32_31 = arith.constant 7 : i32
    %110 = arith.sitofp %c0_i32_30 : i32 to f32
    %111 = vector.broadcast %110 : f32 to vector<1x256xf32>
    %112 = arith.maximumf %111, %79 : vector<1x256xf32>
    %113 = arith.sitofp %c7_i32_31 : i32 to f32
    %114 = vector.broadcast %113 : f32 to vector<1x256xf32>
    %115 = arith.minimumf %114, %112 : vector<1x256xf32>
    %116 = arith.fptosi %115 : vector<1x256xf32> to vector<1x256xi32>
    %c0_i32_32 = arith.constant 0 : i32
    %c7_i32_33 = arith.constant 7 : i32
    %117 = arith.sitofp %c0_i32_32 : i32 to f32
    %118 = vector.broadcast %117 : f32 to vector<1x256xf32>
    %119 = arith.maximumf %118, %82 : vector<1x256xf32>
    %120 = arith.sitofp %c7_i32_33 : i32 to f32
    %121 = vector.broadcast %120 : f32 to vector<1x256xf32>
    %122 = arith.minimumf %121, %119 : vector<1x256xf32>
    %123 = arith.fptosi %122 : vector<1x256xf32> to vector<1x256xi32>
    %c0_i32_34 = arith.constant 0 : i32
    %c7_i32_35 = arith.constant 7 : i32
    %124 = arith.sitofp %c0_i32_34 : i32 to f32
    %125 = vector.broadcast %124 : f32 to vector<1x256xf32>
    %126 = arith.maximumf %125, %85 : vector<1x256xf32>
    %127 = arith.sitofp %c7_i32_35 : i32 to f32
    %128 = vector.broadcast %127 : f32 to vector<1x256xf32>
    %129 = arith.minimumf %128, %126 : vector<1x256xf32>
    %130 = arith.fptosi %129 : vector<1x256xf32> to vector<1x256xi32>
    %c64_i32_36 = arith.constant 64 : i32
    %131 = vector.broadcast %c64_i32_36 : i32 to vector<1x256xi32>
    %132 = arith.muli %116, %131 : vector<1x256xi32>
    %c8_i32_37 = arith.constant 8 : i32
    %133 = vector.broadcast %c8_i32_37 : i32 to vector<1x256xi32>
    %134 = arith.muli %123, %133 : vector<1x256xi32>
    %135 = arith.addi %132, %134 : vector<1x256xi32>
    %136 = arith.addi %135, %130 : vector<1x256xi32>
    %137 = vector.broadcast %136 : vector<1x256xi32> to vector<512x256xi32>
    %138 = arith.cmpi eq, %4, %137 : vector<512x256xi32>
    %cst_38 = arith.constant 0.000000e+00 : f32
    %139 = vector.shape_cast %109 : vector<1x256xf32> to vector<1x256xf32>
    %140 = vector.broadcast %139 : vector<1x256xf32> to vector<512x256xf32>
    %141 = vector.broadcast %cst_38 : f32 to vector<512x256xf32>
    %142 = arith.select %138, %140, %141 : vector<512x256xi1>, vector<512x256xf32>
    %143 = arith.addf %76, %142 : vector<512x256xf32>
    %144 = vector.extract_strided_slice %6 {offsets = [0, 0], sizes = [1, 256], strides = [1, 1]} : vector<3x256xf32> to vector<1x256xf32>
    %cst_39 = arith.constant 0.000000e+00 : f32
    %145 = vector.broadcast %cst_39 : f32 to vector<1x256xf32>
    %146 = arith.addf %144, %145 : vector<1x256xf32>
    %147 = vector.extract_strided_slice %6 {offsets = [1, 0], sizes = [1, 256], strides = [1, 1]} : vector<3x256xf32> to vector<1x256xf32>
    %cst_40 = arith.constant 1.000000e+00 : f32
    %148 = vector.broadcast %cst_40 : f32 to vector<1x256xf32>
    %149 = arith.addf %147, %148 : vector<1x256xf32>
    %150 = vector.extract_strided_slice %6 {offsets = [2, 0], sizes = [1, 256], strides = [1, 1]} : vector<3x256xf32> to vector<1x256xf32>
    %cst_41 = arith.constant 0.000000e+00 : f32
    %151 = vector.broadcast %cst_41 : f32 to vector<1x256xf32>
    %152 = arith.addf %150, %151 : vector<1x256xf32>
    %153 = vector.extract_strided_slice %9 {offsets = [0, 0], sizes = [1, 256], strides = [1, 1]} : vector<3x256xf32> to vector<1x256xf32>
    %154 = vector.extract_strided_slice %7 {offsets = [1, 0], sizes = [1, 256], strides = [1, 1]} : vector<3x256xf32> to vector<1x256xf32>
    %155 = vector.extract_strided_slice %9 {offsets = [2, 0], sizes = [1, 256], strides = [1, 1]} : vector<3x256xf32> to vector<1x256xf32>
    %cst_42 = arith.constant 0.000000e+00 : f32
    %156 = vector.broadcast %cst_42 : f32 to vector<1x256xf32>
    %157 = arith.cmpf oge, %146, %156 : vector<1x256xf32>
    %cst_43 = arith.constant 7.000000e+00 : f32
    %158 = vector.broadcast %cst_43 : f32 to vector<1x256xf32>
    %159 = arith.cmpf ole, %146, %158 : vector<1x256xf32>
    %160 = arith.andi %157, %159 : vector<1x256xi1>
    %cst_44 = arith.constant 0.000000e+00 : f32
    %161 = vector.broadcast %cst_44 : f32 to vector<1x256xf32>
    %162 = arith.cmpf oge, %149, %161 : vector<1x256xf32>
    %163 = arith.andi %160, %162 : vector<1x256xi1>
    %cst_45 = arith.constant 7.000000e+00 : f32
    %164 = vector.broadcast %cst_45 : f32 to vector<1x256xf32>
    %165 = arith.cmpf ole, %149, %164 : vector<1x256xf32>
    %166 = arith.andi %163, %165 : vector<1x256xi1>
    %cst_46 = arith.constant 0.000000e+00 : f32
    %167 = vector.broadcast %cst_46 : f32 to vector<1x256xf32>
    %168 = arith.cmpf oge, %152, %167 : vector<1x256xf32>
    %169 = arith.andi %166, %168 : vector<1x256xi1>
    %cst_47 = arith.constant 7.000000e+00 : f32
    %170 = vector.broadcast %cst_47 : f32 to vector<1x256xf32>
    %171 = arith.cmpf ole, %152, %170 : vector<1x256xf32>
    %172 = arith.andi %169, %171 : vector<1x256xi1>
    %173 = arith.mulf %153, %154 : vector<1x256xf32>
    %174 = arith.mulf %173, %155 : vector<1x256xf32>
    %cst_48 = arith.constant 0.000000e+00 : f32
    %175 = vector.broadcast %cst_48 : f32 to vector<1x256xf32>
    %176 = arith.select %172, %174, %175 : vector<1x256xi1>, vector<1x256xf32>
    %c0_i32_49 = arith.constant 0 : i32
    %c7_i32_50 = arith.constant 7 : i32
    %177 = arith.sitofp %c0_i32_49 : i32 to f32
    %178 = vector.broadcast %177 : f32 to vector<1x256xf32>
    %179 = arith.maximumf %178, %146 : vector<1x256xf32>
    %180 = arith.sitofp %c7_i32_50 : i32 to f32
    %181 = vector.broadcast %180 : f32 to vector<1x256xf32>
    %182 = arith.minimumf %181, %179 : vector<1x256xf32>
    %183 = arith.fptosi %182 : vector<1x256xf32> to vector<1x256xi32>
    %c0_i32_51 = arith.constant 0 : i32
    %c7_i32_52 = arith.constant 7 : i32
    %184 = arith.sitofp %c0_i32_51 : i32 to f32
    %185 = vector.broadcast %184 : f32 to vector<1x256xf32>
    %186 = arith.maximumf %185, %149 : vector<1x256xf32>
    %187 = arith.sitofp %c7_i32_52 : i32 to f32
    %188 = vector.broadcast %187 : f32 to vector<1x256xf32>
    %189 = arith.minimumf %188, %186 : vector<1x256xf32>
    %190 = arith.fptosi %189 : vector<1x256xf32> to vector<1x256xi32>
    %c0_i32_53 = arith.constant 0 : i32
    %c7_i32_54 = arith.constant 7 : i32
    %191 = arith.sitofp %c0_i32_53 : i32 to f32
    %192 = vector.broadcast %191 : f32 to vector<1x256xf32>
    %193 = arith.maximumf %192, %152 : vector<1x256xf32>
    %194 = arith.sitofp %c7_i32_54 : i32 to f32
    %195 = vector.broadcast %194 : f32 to vector<1x256xf32>
    %196 = arith.minimumf %195, %193 : vector<1x256xf32>
    %197 = arith.fptosi %196 : vector<1x256xf32> to vector<1x256xi32>
    %c64_i32_55 = arith.constant 64 : i32
    %198 = vector.broadcast %c64_i32_55 : i32 to vector<1x256xi32>
    %199 = arith.muli %183, %198 : vector<1x256xi32>
    %c8_i32_56 = arith.constant 8 : i32
    %200 = vector.broadcast %c8_i32_56 : i32 to vector<1x256xi32>
    %201 = arith.muli %190, %200 : vector<1x256xi32>
    %202 = arith.addi %199, %201 : vector<1x256xi32>
    %203 = arith.addi %202, %197 : vector<1x256xi32>
    %204 = vector.broadcast %203 : vector<1x256xi32> to vector<512x256xi32>
    %205 = arith.cmpi eq, %4, %204 : vector<512x256xi32>
    %cst_57 = arith.constant 0.000000e+00 : f32
    %206 = vector.shape_cast %176 : vector<1x256xf32> to vector<1x256xf32>
    %207 = vector.broadcast %206 : vector<1x256xf32> to vector<512x256xf32>
    %208 = vector.broadcast %cst_57 : f32 to vector<512x256xf32>
    %209 = arith.select %205, %207, %208 : vector<512x256xi1>, vector<512x256xf32>
    %210 = arith.addf %143, %209 : vector<512x256xf32>
    %211 = vector.extract_strided_slice %6 {offsets = [0, 0], sizes = [1, 256], strides = [1, 1]} : vector<3x256xf32> to vector<1x256xf32>
    %cst_58 = arith.constant 0.000000e+00 : f32
    %212 = vector.broadcast %cst_58 : f32 to vector<1x256xf32>
    %213 = arith.addf %211, %212 : vector<1x256xf32>
    %214 = vector.extract_strided_slice %6 {offsets = [1, 0], sizes = [1, 256], strides = [1, 1]} : vector<3x256xf32> to vector<1x256xf32>
    %cst_59 = arith.constant 1.000000e+00 : f32
    %215 = vector.broadcast %cst_59 : f32 to vector<1x256xf32>
    %216 = arith.addf %214, %215 : vector<1x256xf32>
    %217 = vector.extract_strided_slice %6 {offsets = [2, 0], sizes = [1, 256], strides = [1, 1]} : vector<3x256xf32> to vector<1x256xf32>
    %cst_60 = arith.constant 1.000000e+00 : f32
    %218 = vector.broadcast %cst_60 : f32 to vector<1x256xf32>
    %219 = arith.addf %217, %218 : vector<1x256xf32>
    %220 = vector.extract_strided_slice %9 {offsets = [0, 0], sizes = [1, 256], strides = [1, 1]} : vector<3x256xf32> to vector<1x256xf32>
    %221 = vector.extract_strided_slice %7 {offsets = [1, 0], sizes = [1, 256], strides = [1, 1]} : vector<3x256xf32> to vector<1x256xf32>
    %222 = vector.extract_strided_slice %7 {offsets = [2, 0], sizes = [1, 256], strides = [1, 1]} : vector<3x256xf32> to vector<1x256xf32>
    %cst_61 = arith.constant 0.000000e+00 : f32
    %223 = vector.broadcast %cst_61 : f32 to vector<1x256xf32>
    %224 = arith.cmpf oge, %213, %223 : vector<1x256xf32>
    %cst_62 = arith.constant 7.000000e+00 : f32
    %225 = vector.broadcast %cst_62 : f32 to vector<1x256xf32>
    %226 = arith.cmpf ole, %213, %225 : vector<1x256xf32>
    %227 = arith.andi %224, %226 : vector<1x256xi1>
    %cst_63 = arith.constant 0.000000e+00 : f32
    %228 = vector.broadcast %cst_63 : f32 to vector<1x256xf32>
    %229 = arith.cmpf oge, %216, %228 : vector<1x256xf32>
    %230 = arith.andi %227, %229 : vector<1x256xi1>
    %cst_64 = arith.constant 7.000000e+00 : f32
    %231 = vector.broadcast %cst_64 : f32 to vector<1x256xf32>
    %232 = arith.cmpf ole, %216, %231 : vector<1x256xf32>
    %233 = arith.andi %230, %232 : vector<1x256xi1>
    %cst_65 = arith.constant 0.000000e+00 : f32
    %234 = vector.broadcast %cst_65 : f32 to vector<1x256xf32>
    %235 = arith.cmpf oge, %219, %234 : vector<1x256xf32>
    %236 = arith.andi %233, %235 : vector<1x256xi1>
    %cst_66 = arith.constant 7.000000e+00 : f32
    %237 = vector.broadcast %cst_66 : f32 to vector<1x256xf32>
    %238 = arith.cmpf ole, %219, %237 : vector<1x256xf32>
    %239 = arith.andi %236, %238 : vector<1x256xi1>
    %240 = arith.mulf %220, %221 : vector<1x256xf32>
    %241 = arith.mulf %240, %222 : vector<1x256xf32>
    %cst_67 = arith.constant 0.000000e+00 : f32
    %242 = vector.broadcast %cst_67 : f32 to vector<1x256xf32>
    %243 = arith.select %239, %241, %242 : vector<1x256xi1>, vector<1x256xf32>
    %c0_i32_68 = arith.constant 0 : i32
    %c7_i32_69 = arith.constant 7 : i32
    %244 = arith.sitofp %c0_i32_68 : i32 to f32
    %245 = vector.broadcast %244 : f32 to vector<1x256xf32>
    %246 = arith.maximumf %245, %213 : vector<1x256xf32>
    %247 = arith.sitofp %c7_i32_69 : i32 to f32
    %248 = vector.broadcast %247 : f32 to vector<1x256xf32>
    %249 = arith.minimumf %248, %246 : vector<1x256xf32>
    %250 = arith.fptosi %249 : vector<1x256xf32> to vector<1x256xi32>
    %c0_i32_70 = arith.constant 0 : i32
    %c7_i32_71 = arith.constant 7 : i32
    %251 = arith.sitofp %c0_i32_70 : i32 to f32
    %252 = vector.broadcast %251 : f32 to vector<1x256xf32>
    %253 = arith.maximumf %252, %216 : vector<1x256xf32>
    %254 = arith.sitofp %c7_i32_71 : i32 to f32
    %255 = vector.broadcast %254 : f32 to vector<1x256xf32>
    %256 = arith.minimumf %255, %253 : vector<1x256xf32>
    %257 = arith.fptosi %256 : vector<1x256xf32> to vector<1x256xi32>
    %c0_i32_72 = arith.constant 0 : i32
    %c7_i32_73 = arith.constant 7 : i32
    %258 = arith.sitofp %c0_i32_72 : i32 to f32
    %259 = vector.broadcast %258 : f32 to vector<1x256xf32>
    %260 = arith.maximumf %259, %219 : vector<1x256xf32>
    %261 = arith.sitofp %c7_i32_73 : i32 to f32
    %262 = vector.broadcast %261 : f32 to vector<1x256xf32>
    %263 = arith.minimumf %262, %260 : vector<1x256xf32>
    %264 = arith.fptosi %263 : vector<1x256xf32> to vector<1x256xi32>
    %c64_i32_74 = arith.constant 64 : i32
    %265 = vector.broadcast %c64_i32_74 : i32 to vector<1x256xi32>
    %266 = arith.muli %250, %265 : vector<1x256xi32>
    %c8_i32_75 = arith.constant 8 : i32
    %267 = vector.broadcast %c8_i32_75 : i32 to vector<1x256xi32>
    %268 = arith.muli %257, %267 : vector<1x256xi32>
    %269 = arith.addi %266, %268 : vector<1x256xi32>
    %270 = arith.addi %269, %264 : vector<1x256xi32>
    %271 = vector.broadcast %270 : vector<1x256xi32> to vector<512x256xi32>
    %272 = arith.cmpi eq, %4, %271 : vector<512x256xi32>
    %cst_76 = arith.constant 0.000000e+00 : f32
    %273 = vector.shape_cast %243 : vector<1x256xf32> to vector<1x256xf32>
    %274 = vector.broadcast %273 : vector<1x256xf32> to vector<512x256xf32>
    %275 = vector.broadcast %cst_76 : f32 to vector<512x256xf32>
    %276 = arith.select %272, %274, %275 : vector<512x256xi1>, vector<512x256xf32>
    %277 = arith.addf %210, %276 : vector<512x256xf32>
    %278 = vector.extract_strided_slice %6 {offsets = [0, 0], sizes = [1, 256], strides = [1, 1]} : vector<3x256xf32> to vector<1x256xf32>
    %cst_77 = arith.constant 1.000000e+00 : f32
    %279 = vector.broadcast %cst_77 : f32 to vector<1x256xf32>
    %280 = arith.addf %278, %279 : vector<1x256xf32>
    %281 = vector.extract_strided_slice %6 {offsets = [1, 0], sizes = [1, 256], strides = [1, 1]} : vector<3x256xf32> to vector<1x256xf32>
    %cst_78 = arith.constant 0.000000e+00 : f32
    %282 = vector.broadcast %cst_78 : f32 to vector<1x256xf32>
    %283 = arith.addf %281, %282 : vector<1x256xf32>
    %284 = vector.extract_strided_slice %6 {offsets = [2, 0], sizes = [1, 256], strides = [1, 1]} : vector<3x256xf32> to vector<1x256xf32>
    %cst_79 = arith.constant 0.000000e+00 : f32
    %285 = vector.broadcast %cst_79 : f32 to vector<1x256xf32>
    %286 = arith.addf %284, %285 : vector<1x256xf32>
    %287 = vector.extract_strided_slice %7 {offsets = [0, 0], sizes = [1, 256], strides = [1, 1]} : vector<3x256xf32> to vector<1x256xf32>
    %288 = vector.extract_strided_slice %9 {offsets = [1, 0], sizes = [1, 256], strides = [1, 1]} : vector<3x256xf32> to vector<1x256xf32>
    %289 = vector.extract_strided_slice %9 {offsets = [2, 0], sizes = [1, 256], strides = [1, 1]} : vector<3x256xf32> to vector<1x256xf32>
    %cst_80 = arith.constant 0.000000e+00 : f32
    %290 = vector.broadcast %cst_80 : f32 to vector<1x256xf32>
    %291 = arith.cmpf oge, %280, %290 : vector<1x256xf32>
    %cst_81 = arith.constant 7.000000e+00 : f32
    %292 = vector.broadcast %cst_81 : f32 to vector<1x256xf32>
    %293 = arith.cmpf ole, %280, %292 : vector<1x256xf32>
    %294 = arith.andi %291, %293 : vector<1x256xi1>
    %cst_82 = arith.constant 0.000000e+00 : f32
    %295 = vector.broadcast %cst_82 : f32 to vector<1x256xf32>
    %296 = arith.cmpf oge, %283, %295 : vector<1x256xf32>
    %297 = arith.andi %294, %296 : vector<1x256xi1>
    %cst_83 = arith.constant 7.000000e+00 : f32
    %298 = vector.broadcast %cst_83 : f32 to vector<1x256xf32>
    %299 = arith.cmpf ole, %283, %298 : vector<1x256xf32>
    %300 = arith.andi %297, %299 : vector<1x256xi1>
    %cst_84 = arith.constant 0.000000e+00 : f32
    %301 = vector.broadcast %cst_84 : f32 to vector<1x256xf32>
    %302 = arith.cmpf oge, %286, %301 : vector<1x256xf32>
    %303 = arith.andi %300, %302 : vector<1x256xi1>
    %cst_85 = arith.constant 7.000000e+00 : f32
    %304 = vector.broadcast %cst_85 : f32 to vector<1x256xf32>
    %305 = arith.cmpf ole, %286, %304 : vector<1x256xf32>
    %306 = arith.andi %303, %305 : vector<1x256xi1>
    %307 = arith.mulf %287, %288 : vector<1x256xf32>
    %308 = arith.mulf %307, %289 : vector<1x256xf32>
    %cst_86 = arith.constant 0.000000e+00 : f32
    %309 = vector.broadcast %cst_86 : f32 to vector<1x256xf32>
    %310 = arith.select %306, %308, %309 : vector<1x256xi1>, vector<1x256xf32>
    %c0_i32_87 = arith.constant 0 : i32
    %c7_i32_88 = arith.constant 7 : i32
    %311 = arith.sitofp %c0_i32_87 : i32 to f32
    %312 = vector.broadcast %311 : f32 to vector<1x256xf32>
    %313 = arith.maximumf %312, %280 : vector<1x256xf32>
    %314 = arith.sitofp %c7_i32_88 : i32 to f32
    %315 = vector.broadcast %314 : f32 to vector<1x256xf32>
    %316 = arith.minimumf %315, %313 : vector<1x256xf32>
    %317 = arith.fptosi %316 : vector<1x256xf32> to vector<1x256xi32>
    %c0_i32_89 = arith.constant 0 : i32
    %c7_i32_90 = arith.constant 7 : i32
    %318 = arith.sitofp %c0_i32_89 : i32 to f32
    %319 = vector.broadcast %318 : f32 to vector<1x256xf32>
    %320 = arith.maximumf %319, %283 : vector<1x256xf32>
    %321 = arith.sitofp %c7_i32_90 : i32 to f32
    %322 = vector.broadcast %321 : f32 to vector<1x256xf32>
    %323 = arith.minimumf %322, %320 : vector<1x256xf32>
    %324 = arith.fptosi %323 : vector<1x256xf32> to vector<1x256xi32>
    %c0_i32_91 = arith.constant 0 : i32
    %c7_i32_92 = arith.constant 7 : i32
    %325 = arith.sitofp %c0_i32_91 : i32 to f32
    %326 = vector.broadcast %325 : f32 to vector<1x256xf32>
    %327 = arith.maximumf %326, %286 : vector<1x256xf32>
    %328 = arith.sitofp %c7_i32_92 : i32 to f32
    %329 = vector.broadcast %328 : f32 to vector<1x256xf32>
    %330 = arith.minimumf %329, %327 : vector<1x256xf32>
    %331 = arith.fptosi %330 : vector<1x256xf32> to vector<1x256xi32>
    %c64_i32_93 = arith.constant 64 : i32
    %332 = vector.broadcast %c64_i32_93 : i32 to vector<1x256xi32>
    %333 = arith.muli %317, %332 : vector<1x256xi32>
    %c8_i32_94 = arith.constant 8 : i32
    %334 = vector.broadcast %c8_i32_94 : i32 to vector<1x256xi32>
    %335 = arith.muli %324, %334 : vector<1x256xi32>
    %336 = arith.addi %333, %335 : vector<1x256xi32>
    %337 = arith.addi %336, %331 : vector<1x256xi32>
    %338 = vector.broadcast %337 : vector<1x256xi32> to vector<512x256xi32>
    %339 = arith.cmpi eq, %4, %338 : vector<512x256xi32>
    %cst_95 = arith.constant 0.000000e+00 : f32
    %340 = vector.shape_cast %310 : vector<1x256xf32> to vector<1x256xf32>
    %341 = vector.broadcast %340 : vector<1x256xf32> to vector<512x256xf32>
    %342 = vector.broadcast %cst_95 : f32 to vector<512x256xf32>
    %343 = arith.select %339, %341, %342 : vector<512x256xi1>, vector<512x256xf32>
    %344 = arith.addf %277, %343 : vector<512x256xf32>
    %345 = vector.extract_strided_slice %6 {offsets = [0, 0], sizes = [1, 256], strides = [1, 1]} : vector<3x256xf32> to vector<1x256xf32>
    %cst_96 = arith.constant 1.000000e+00 : f32
    %346 = vector.broadcast %cst_96 : f32 to vector<1x256xf32>
    %347 = arith.addf %345, %346 : vector<1x256xf32>
    %348 = vector.extract_strided_slice %6 {offsets = [1, 0], sizes = [1, 256], strides = [1, 1]} : vector<3x256xf32> to vector<1x256xf32>
    %cst_97 = arith.constant 0.000000e+00 : f32
    %349 = vector.broadcast %cst_97 : f32 to vector<1x256xf32>
    %350 = arith.addf %348, %349 : vector<1x256xf32>
    %351 = vector.extract_strided_slice %6 {offsets = [2, 0], sizes = [1, 256], strides = [1, 1]} : vector<3x256xf32> to vector<1x256xf32>
    %cst_98 = arith.constant 1.000000e+00 : f32
    %352 = vector.broadcast %cst_98 : f32 to vector<1x256xf32>
    %353 = arith.addf %351, %352 : vector<1x256xf32>
    %354 = vector.extract_strided_slice %7 {offsets = [0, 0], sizes = [1, 256], strides = [1, 1]} : vector<3x256xf32> to vector<1x256xf32>
    %355 = vector.extract_strided_slice %9 {offsets = [1, 0], sizes = [1, 256], strides = [1, 1]} : vector<3x256xf32> to vector<1x256xf32>
    %356 = vector.extract_strided_slice %7 {offsets = [2, 0], sizes = [1, 256], strides = [1, 1]} : vector<3x256xf32> to vector<1x256xf32>
    %cst_99 = arith.constant 0.000000e+00 : f32
    %357 = vector.broadcast %cst_99 : f32 to vector<1x256xf32>
    %358 = arith.cmpf oge, %347, %357 : vector<1x256xf32>
    %cst_100 = arith.constant 7.000000e+00 : f32
    %359 = vector.broadcast %cst_100 : f32 to vector<1x256xf32>
    %360 = arith.cmpf ole, %347, %359 : vector<1x256xf32>
    %361 = arith.andi %358, %360 : vector<1x256xi1>
    %cst_101 = arith.constant 0.000000e+00 : f32
    %362 = vector.broadcast %cst_101 : f32 to vector<1x256xf32>
    %363 = arith.cmpf oge, %350, %362 : vector<1x256xf32>
    %364 = arith.andi %361, %363 : vector<1x256xi1>
    %cst_102 = arith.constant 7.000000e+00 : f32
    %365 = vector.broadcast %cst_102 : f32 to vector<1x256xf32>
    %366 = arith.cmpf ole, %350, %365 : vector<1x256xf32>
    %367 = arith.andi %364, %366 : vector<1x256xi1>
    %cst_103 = arith.constant 0.000000e+00 : f32
    %368 = vector.broadcast %cst_103 : f32 to vector<1x256xf32>
    %369 = arith.cmpf oge, %353, %368 : vector<1x256xf32>
    %370 = arith.andi %367, %369 : vector<1x256xi1>
    %cst_104 = arith.constant 7.000000e+00 : f32
    %371 = vector.broadcast %cst_104 : f32 to vector<1x256xf32>
    %372 = arith.cmpf ole, %353, %371 : vector<1x256xf32>
    %373 = arith.andi %370, %372 : vector<1x256xi1>
    %374 = arith.mulf %354, %355 : vector<1x256xf32>
    %375 = arith.mulf %374, %356 : vector<1x256xf32>
    %cst_105 = arith.constant 0.000000e+00 : f32
    %376 = vector.broadcast %cst_105 : f32 to vector<1x256xf32>
    %377 = arith.select %373, %375, %376 : vector<1x256xi1>, vector<1x256xf32>
    %c0_i32_106 = arith.constant 0 : i32
    %c7_i32_107 = arith.constant 7 : i32
    %378 = arith.sitofp %c0_i32_106 : i32 to f32
    %379 = vector.broadcast %378 : f32 to vector<1x256xf32>
    %380 = arith.maximumf %379, %347 : vector<1x256xf32>
    %381 = arith.sitofp %c7_i32_107 : i32 to f32
    %382 = vector.broadcast %381 : f32 to vector<1x256xf32>
    %383 = arith.minimumf %382, %380 : vector<1x256xf32>
    %384 = arith.fptosi %383 : vector<1x256xf32> to vector<1x256xi32>
    %c0_i32_108 = arith.constant 0 : i32
    %c7_i32_109 = arith.constant 7 : i32
    %385 = arith.sitofp %c0_i32_108 : i32 to f32
    %386 = vector.broadcast %385 : f32 to vector<1x256xf32>
    %387 = arith.maximumf %386, %350 : vector<1x256xf32>
    %388 = arith.sitofp %c7_i32_109 : i32 to f32
    %389 = vector.broadcast %388 : f32 to vector<1x256xf32>
    %390 = arith.minimumf %389, %387 : vector<1x256xf32>
    %391 = arith.fptosi %390 : vector<1x256xf32> to vector<1x256xi32>
    %c0_i32_110 = arith.constant 0 : i32
    %c7_i32_111 = arith.constant 7 : i32
    %392 = arith.sitofp %c0_i32_110 : i32 to f32
    %393 = vector.broadcast %392 : f32 to vector<1x256xf32>
    %394 = arith.maximumf %393, %353 : vector<1x256xf32>
    %395 = arith.sitofp %c7_i32_111 : i32 to f32
    %396 = vector.broadcast %395 : f32 to vector<1x256xf32>
    %397 = arith.minimumf %396, %394 : vector<1x256xf32>
    %398 = arith.fptosi %397 : vector<1x256xf32> to vector<1x256xi32>
    %c64_i32_112 = arith.constant 64 : i32
    %399 = vector.broadcast %c64_i32_112 : i32 to vector<1x256xi32>
    %400 = arith.muli %384, %399 : vector<1x256xi32>
    %c8_i32_113 = arith.constant 8 : i32
    %401 = vector.broadcast %c8_i32_113 : i32 to vector<1x256xi32>
    %402 = arith.muli %391, %401 : vector<1x256xi32>
    %403 = arith.addi %400, %402 : vector<1x256xi32>
    %404 = arith.addi %403, %398 : vector<1x256xi32>
    %405 = vector.broadcast %404 : vector<1x256xi32> to vector<512x256xi32>
    %406 = arith.cmpi eq, %4, %405 : vector<512x256xi32>
    %cst_114 = arith.constant 0.000000e+00 : f32
    %407 = vector.shape_cast %377 : vector<1x256xf32> to vector<1x256xf32>
    %408 = vector.broadcast %407 : vector<1x256xf32> to vector<512x256xf32>
    %409 = vector.broadcast %cst_114 : f32 to vector<512x256xf32>
    %410 = arith.select %406, %408, %409 : vector<512x256xi1>, vector<512x256xf32>
    %411 = arith.addf %344, %410 : vector<512x256xf32>
    %412 = vector.extract_strided_slice %6 {offsets = [0, 0], sizes = [1, 256], strides = [1, 1]} : vector<3x256xf32> to vector<1x256xf32>
    %cst_115 = arith.constant 1.000000e+00 : f32
    %413 = vector.broadcast %cst_115 : f32 to vector<1x256xf32>
    %414 = arith.addf %412, %413 : vector<1x256xf32>
    %415 = vector.extract_strided_slice %6 {offsets = [1, 0], sizes = [1, 256], strides = [1, 1]} : vector<3x256xf32> to vector<1x256xf32>
    %cst_116 = arith.constant 1.000000e+00 : f32
    %416 = vector.broadcast %cst_116 : f32 to vector<1x256xf32>
    %417 = arith.addf %415, %416 : vector<1x256xf32>
    %418 = vector.extract_strided_slice %6 {offsets = [2, 0], sizes = [1, 256], strides = [1, 1]} : vector<3x256xf32> to vector<1x256xf32>
    %cst_117 = arith.constant 0.000000e+00 : f32
    %419 = vector.broadcast %cst_117 : f32 to vector<1x256xf32>
    %420 = arith.addf %418, %419 : vector<1x256xf32>
    %421 = vector.extract_strided_slice %7 {offsets = [0, 0], sizes = [1, 256], strides = [1, 1]} : vector<3x256xf32> to vector<1x256xf32>
    %422 = vector.extract_strided_slice %7 {offsets = [1, 0], sizes = [1, 256], strides = [1, 1]} : vector<3x256xf32> to vector<1x256xf32>
    %423 = vector.extract_strided_slice %9 {offsets = [2, 0], sizes = [1, 256], strides = [1, 1]} : vector<3x256xf32> to vector<1x256xf32>
    %cst_118 = arith.constant 0.000000e+00 : f32
    %424 = vector.broadcast %cst_118 : f32 to vector<1x256xf32>
    %425 = arith.cmpf oge, %414, %424 : vector<1x256xf32>
    %cst_119 = arith.constant 7.000000e+00 : f32
    %426 = vector.broadcast %cst_119 : f32 to vector<1x256xf32>
    %427 = arith.cmpf ole, %414, %426 : vector<1x256xf32>
    %428 = arith.andi %425, %427 : vector<1x256xi1>
    %cst_120 = arith.constant 0.000000e+00 : f32
    %429 = vector.broadcast %cst_120 : f32 to vector<1x256xf32>
    %430 = arith.cmpf oge, %417, %429 : vector<1x256xf32>
    %431 = arith.andi %428, %430 : vector<1x256xi1>
    %cst_121 = arith.constant 7.000000e+00 : f32
    %432 = vector.broadcast %cst_121 : f32 to vector<1x256xf32>
    %433 = arith.cmpf ole, %417, %432 : vector<1x256xf32>
    %434 = arith.andi %431, %433 : vector<1x256xi1>
    %cst_122 = arith.constant 0.000000e+00 : f32
    %435 = vector.broadcast %cst_122 : f32 to vector<1x256xf32>
    %436 = arith.cmpf oge, %420, %435 : vector<1x256xf32>
    %437 = arith.andi %434, %436 : vector<1x256xi1>
    %cst_123 = arith.constant 7.000000e+00 : f32
    %438 = vector.broadcast %cst_123 : f32 to vector<1x256xf32>
    %439 = arith.cmpf ole, %420, %438 : vector<1x256xf32>
    %440 = arith.andi %437, %439 : vector<1x256xi1>
    %441 = arith.mulf %421, %422 : vector<1x256xf32>
    %442 = arith.mulf %441, %423 : vector<1x256xf32>
    %cst_124 = arith.constant 0.000000e+00 : f32
    %443 = vector.broadcast %cst_124 : f32 to vector<1x256xf32>
    %444 = arith.select %440, %442, %443 : vector<1x256xi1>, vector<1x256xf32>
    %c0_i32_125 = arith.constant 0 : i32
    %c7_i32_126 = arith.constant 7 : i32
    %445 = arith.sitofp %c0_i32_125 : i32 to f32
    %446 = vector.broadcast %445 : f32 to vector<1x256xf32>
    %447 = arith.maximumf %446, %414 : vector<1x256xf32>
    %448 = arith.sitofp %c7_i32_126 : i32 to f32
    %449 = vector.broadcast %448 : f32 to vector<1x256xf32>
    %450 = arith.minimumf %449, %447 : vector<1x256xf32>
    %451 = arith.fptosi %450 : vector<1x256xf32> to vector<1x256xi32>
    %c0_i32_127 = arith.constant 0 : i32
    %c7_i32_128 = arith.constant 7 : i32
    %452 = arith.sitofp %c0_i32_127 : i32 to f32
    %453 = vector.broadcast %452 : f32 to vector<1x256xf32>
    %454 = arith.maximumf %453, %417 : vector<1x256xf32>
    %455 = arith.sitofp %c7_i32_128 : i32 to f32
    %456 = vector.broadcast %455 : f32 to vector<1x256xf32>
    %457 = arith.minimumf %456, %454 : vector<1x256xf32>
    %458 = arith.fptosi %457 : vector<1x256xf32> to vector<1x256xi32>
    %c0_i32_129 = arith.constant 0 : i32
    %c7_i32_130 = arith.constant 7 : i32
    %459 = arith.sitofp %c0_i32_129 : i32 to f32
    %460 = vector.broadcast %459 : f32 to vector<1x256xf32>
    %461 = arith.maximumf %460, %420 : vector<1x256xf32>
    %462 = arith.sitofp %c7_i32_130 : i32 to f32
    %463 = vector.broadcast %462 : f32 to vector<1x256xf32>
    %464 = arith.minimumf %463, %461 : vector<1x256xf32>
    %465 = arith.fptosi %464 : vector<1x256xf32> to vector<1x256xi32>
    %c64_i32_131 = arith.constant 64 : i32
    %466 = vector.broadcast %c64_i32_131 : i32 to vector<1x256xi32>
    %467 = arith.muli %451, %466 : vector<1x256xi32>
    %c8_i32_132 = arith.constant 8 : i32
    %468 = vector.broadcast %c8_i32_132 : i32 to vector<1x256xi32>
    %469 = arith.muli %458, %468 : vector<1x256xi32>
    %470 = arith.addi %467, %469 : vector<1x256xi32>
    %471 = arith.addi %470, %465 : vector<1x256xi32>
    %472 = vector.broadcast %471 : vector<1x256xi32> to vector<512x256xi32>
    %473 = arith.cmpi eq, %4, %472 : vector<512x256xi32>
    %cst_133 = arith.constant 0.000000e+00 : f32
    %474 = vector.shape_cast %444 : vector<1x256xf32> to vector<1x256xf32>
    %475 = vector.broadcast %474 : vector<1x256xf32> to vector<512x256xf32>
    %476 = vector.broadcast %cst_133 : f32 to vector<512x256xf32>
    %477 = arith.select %473, %475, %476 : vector<512x256xi1>, vector<512x256xf32>
    %478 = arith.addf %411, %477 : vector<512x256xf32>
    %479 = vector.extract_strided_slice %6 {offsets = [0, 0], sizes = [1, 256], strides = [1, 1]} : vector<3x256xf32> to vector<1x256xf32>
    %cst_134 = arith.constant 1.000000e+00 : f32
    %480 = vector.broadcast %cst_134 : f32 to vector<1x256xf32>
    %481 = arith.addf %479, %480 : vector<1x256xf32>
    %482 = vector.extract_strided_slice %6 {offsets = [1, 0], sizes = [1, 256], strides = [1, 1]} : vector<3x256xf32> to vector<1x256xf32>
    %cst_135 = arith.constant 1.000000e+00 : f32
    %483 = vector.broadcast %cst_135 : f32 to vector<1x256xf32>
    %484 = arith.addf %482, %483 : vector<1x256xf32>
    %485 = vector.extract_strided_slice %6 {offsets = [2, 0], sizes = [1, 256], strides = [1, 1]} : vector<3x256xf32> to vector<1x256xf32>
    %cst_136 = arith.constant 1.000000e+00 : f32
    %486 = vector.broadcast %cst_136 : f32 to vector<1x256xf32>
    %487 = arith.addf %485, %486 : vector<1x256xf32>
    %488 = vector.extract_strided_slice %7 {offsets = [0, 0], sizes = [1, 256], strides = [1, 1]} : vector<3x256xf32> to vector<1x256xf32>
    %489 = vector.extract_strided_slice %7 {offsets = [1, 0], sizes = [1, 256], strides = [1, 1]} : vector<3x256xf32> to vector<1x256xf32>
    %490 = vector.extract_strided_slice %7 {offsets = [2, 0], sizes = [1, 256], strides = [1, 1]} : vector<3x256xf32> to vector<1x256xf32>
    %cst_137 = arith.constant 0.000000e+00 : f32
    %491 = vector.broadcast %cst_137 : f32 to vector<1x256xf32>
    %492 = arith.cmpf oge, %481, %491 : vector<1x256xf32>
    %cst_138 = arith.constant 7.000000e+00 : f32
    %493 = vector.broadcast %cst_138 : f32 to vector<1x256xf32>
    %494 = arith.cmpf ole, %481, %493 : vector<1x256xf32>
    %495 = arith.andi %492, %494 : vector<1x256xi1>
    %cst_139 = arith.constant 0.000000e+00 : f32
    %496 = vector.broadcast %cst_139 : f32 to vector<1x256xf32>
    %497 = arith.cmpf oge, %484, %496 : vector<1x256xf32>
    %498 = arith.andi %495, %497 : vector<1x256xi1>
    %cst_140 = arith.constant 7.000000e+00 : f32
    %499 = vector.broadcast %cst_140 : f32 to vector<1x256xf32>
    %500 = arith.cmpf ole, %484, %499 : vector<1x256xf32>
    %501 = arith.andi %498, %500 : vector<1x256xi1>
    %cst_141 = arith.constant 0.000000e+00 : f32
    %502 = vector.broadcast %cst_141 : f32 to vector<1x256xf32>
    %503 = arith.cmpf oge, %487, %502 : vector<1x256xf32>
    %504 = arith.andi %501, %503 : vector<1x256xi1>
    %cst_142 = arith.constant 7.000000e+00 : f32
    %505 = vector.broadcast %cst_142 : f32 to vector<1x256xf32>
    %506 = arith.cmpf ole, %487, %505 : vector<1x256xf32>
    %507 = arith.andi %504, %506 : vector<1x256xi1>
    %508 = arith.mulf %488, %489 : vector<1x256xf32>
    %509 = arith.mulf %508, %490 : vector<1x256xf32>
    %cst_143 = arith.constant 0.000000e+00 : f32
    %510 = vector.broadcast %cst_143 : f32 to vector<1x256xf32>
    %511 = arith.select %507, %509, %510 : vector<1x256xi1>, vector<1x256xf32>
    %c0_i32_144 = arith.constant 0 : i32
    %c7_i32_145 = arith.constant 7 : i32
    %512 = arith.sitofp %c0_i32_144 : i32 to f32
    %513 = vector.broadcast %512 : f32 to vector<1x256xf32>
    %514 = arith.maximumf %513, %481 : vector<1x256xf32>
    %515 = arith.sitofp %c7_i32_145 : i32 to f32
    %516 = vector.broadcast %515 : f32 to vector<1x256xf32>
    %517 = arith.minimumf %516, %514 : vector<1x256xf32>
    %518 = arith.fptosi %517 : vector<1x256xf32> to vector<1x256xi32>
    %c0_i32_146 = arith.constant 0 : i32
    %c7_i32_147 = arith.constant 7 : i32
    %519 = arith.sitofp %c0_i32_146 : i32 to f32
    %520 = vector.broadcast %519 : f32 to vector<1x256xf32>
    %521 = arith.maximumf %520, %484 : vector<1x256xf32>
    %522 = arith.sitofp %c7_i32_147 : i32 to f32
    %523 = vector.broadcast %522 : f32 to vector<1x256xf32>
    %524 = arith.minimumf %523, %521 : vector<1x256xf32>
    %525 = arith.fptosi %524 : vector<1x256xf32> to vector<1x256xi32>
    %c0_i32_148 = arith.constant 0 : i32
    %c7_i32_149 = arith.constant 7 : i32
    %526 = arith.sitofp %c0_i32_148 : i32 to f32
    %527 = vector.broadcast %526 : f32 to vector<1x256xf32>
    %528 = arith.maximumf %527, %487 : vector<1x256xf32>
    %529 = arith.sitofp %c7_i32_149 : i32 to f32
    %530 = vector.broadcast %529 : f32 to vector<1x256xf32>
    %531 = arith.minimumf %530, %528 : vector<1x256xf32>
    %532 = arith.fptosi %531 : vector<1x256xf32> to vector<1x256xi32>
    %c64_i32_150 = arith.constant 64 : i32
    %533 = vector.broadcast %c64_i32_150 : i32 to vector<1x256xi32>
    %534 = arith.muli %518, %533 : vector<1x256xi32>
    %c8_i32_151 = arith.constant 8 : i32
    %535 = vector.broadcast %c8_i32_151 : i32 to vector<1x256xi32>
    %536 = arith.muli %525, %535 : vector<1x256xi32>
    %537 = arith.addi %534, %536 : vector<1x256xi32>
    %538 = arith.addi %537, %532 : vector<1x256xi32>
    %539 = vector.broadcast %538 : vector<1x256xi32> to vector<512x256xi32>
    %540 = arith.cmpi eq, %4, %539 : vector<512x256xi32>
    %cst_152 = arith.constant 0.000000e+00 : f32
    %541 = vector.shape_cast %511 : vector<1x256xf32> to vector<1x256xf32>
    %542 = vector.broadcast %541 : vector<1x256xf32> to vector<512x256xf32>
    %543 = vector.broadcast %cst_152 : f32 to vector<512x256xf32>
    %544 = arith.select %540, %542, %543 : vector<512x256xi1>, vector<512x256xf32>
    %545 = arith.addf %478, %544 : vector<512x256xf32>
    %c0_153 = arith.constant 0 : index
    %c0_154 = arith.constant 0 : index
    %c0_155 = arith.constant 0 : index
    %546 = vector.load %arg3[%c0_153, %c0_154, %c0_155] : memref<1x4x512xf32, #tpu.memory_space<vmem>>, vector<1x4x512xf32>
    %547 = vector.shape_cast %546 : vector<1x4x512xf32> to vector<4x512xf32>
    %cst_156 = arith.constant dense<0.000000e+00> : vector<4x256xf32>
    %548 = tpu.matmul %547, %545, %cst_156 {dimension_numbers = #tpu.dot_dimension_numbers<[1], [0], [0], [1], [0, 0, 1, 1], [], []>} : vector<4x512xf32>, vector<512x256xf32>, vector<4x256xf32> -> vector<4x256xf32>
    %c0_157 = arith.constant 0 : index
    %c0_158 = arith.constant 0 : index
    %c0_159 = arith.constant 0 : index
    %549 = vector.load %arg5[%c0_157, %c0_158, %c0_159] : memref<1x4x256xf32, #tpu.memory_space<vmem>>, vector<1x4x256xf32>
    %550 = vector.shape_cast %549 : vector<1x4x256xf32> to vector<4x256xf32>
    %551 = vector.shape_cast %548 : vector<4x256xf32> to vector<1x4x256xf32>
    tpu.vector_store %arg5[%c0_157, %c0_158, %c0_159], %551 {strides = array<i32>} : memref<1x4x256xf32, #tpu.memory_space<vmem>>, vector<1x4x256xf32>,
    return
  }
  func.func @transform_0(%arg0: i32, %arg1: i32) -> (i32, i32) {
    %c0_i32 = arith.constant 0 : i32
    %c0_i32_0 = arith.constant 0 : i32
    return %c0_i32, %arg1 : i32, i32
  }
  func.func @transform_1(%arg0: i32, %arg1: i32) -> (i32, i32, i32) {
    %c0_i32 = arith.constant 0 : i32
    %c0_i32_0 = arith.constant 0 : i32
    %c0_i32_1 = arith.constant 0 : i32
    return %arg0, %c0_i32, %c0_i32_0 : i32, i32, i32
  }
  func.func @transform_2(%arg0: i32, %arg1: i32) -> (i32, i32, i32) {
    %c0_i32 = arith.constant 0 : i32
    %c0_i32_0 = arith.constant 0 : i32
    return %arg0, %c0_i32, %arg1 : i32, i32, i32
  }
  func.func @transform_3(%arg0: i32, %arg1: i32) -> (i32, i32, i32) {
    %c0_i32 = arith.constant 0 : i32
    %c0_i32_0 = arith.constant 0 : i32
    return %arg0, %c0_i32, %arg1 : i32, i32, i32
  }
}

</mosaic_0001>

<bundles_post_ra>
// kernel: tpu_custom_call.1
= control target key start
LH: loop header
LB: loop body
LE: loop exit
PB: predicated region body
PF: predicated region fallthrough
CT: control target
= control target key end

     0   :  { %8 = vsyncpa [#allocation3], 0  ;;  %s8284_s0 = inlined_call_operand.vmem [shape: f32[3,512], index: 0, kind: input, shape index: {}]   ;;  %s8285_s1 = inlined_call_operand.vmem [shape: f32[2,4,512], index: 1, kind: input, shape index: {}]   ;;  %s8286_s2 = inlined_call_operand.vmem [shape: f32[2,3,512], index: 2, kind: input, shape index: {}]   ;;  %s8287_s3 = inlined_call_operand.hbm [shape: f32[2,4,512], index: 3, kind: output, shape index: {}]  }
   0x1   :  { %10 = vsyncpa [#allocation3 + $0x1], 0  ;;  %s4286_s12 = smov 0   ;;  %s4288_s13 = smov 0  }
   0x2   :  { %s4290_s14 = smov 0   ;;  %s4292_s15 = smov 0  }
   0x3   :  { %s4294_s16 = smov 0   ;;  %s4296_s17 = smov 0  }
   0x4   :  { %s4298_s18 = smov 0   ;;  %s4300_s19 = smov 0  }
   0x5 LB: > { %s4064_s20 = sadd.s32 4294967295, %s4262_s19   ;;  %s4065_s21 = sadd.s32 4294967294, %s4262_s19   ;;  %s4262_s19 = sphi %s4300_s19, %s16_s19   ;;  %s4258_s18 = sphi %s4298_s18, %s8326_s18   ;;  %s4254_s17 = sphi %s4296_s17, %s8325_s17   ;;  %s4250_s16 = sphi %s4294_s16, %s8324_s16   ;;  %s4246_s15 = sphi %s4292_s15, %s8323_s15   ;;  %s4242_s14 = sphi %s4290_s14, %s8322_s14   ;;  %s4238_s13 = sphi %s4288_s13, %s8321_s13   ;;  %s4234_s12 = sphi %s4286_s12, %s8320_s12  }
   0x6   : > { %s25_s22 = sadd.s32 1, %s4254_s17  ;;  %s28_s23 = sadd.s32 1, %s4258_s18 }
   0x7   : > { %p26_p0 = scmp.ge.s32.totalorder %s25_s22, 2  ;;  %p127_p1 = scmp.ne.s32.totalorder %s4242_s14, %s4238_s13 }
   0x8   : > { %p128_p2 = scmp.eq.s32.totalorder %s4064_s20, 3  ;;  %p133_p5 = scmp.ne.s32.totalorder %s4238_s13, %s4234_s12 }
   0x9   : > { %s8328_s22 = smov (%p26_p0, %s25_s22), 0  ;;  %s8330_s23 = smov (!%p26_p0, %s28_s23), %s4258_s18 }
   0xa   : > { %s113_s24 = ssub.s32 %s4254_s17, %s8328_s22  ;;  %p4337_p3 = por %p128_p2, %p127_p1 }
   0xb   : > { %p30_p4 = scmp.ge.s32.totalorder %s8330_s23, 2  ;;  %p134_p6 = scmp.eq.s32.totalorder %s4065_s21, 3 }
   0xc   : > { %p4068_p7 = scmp.ge.s32.totalorder %s4262_s19, 1  ;;  %p182_p9 = scmp.lt.s32.totalorder %s4262_s19, 5 }
   0xd   : > { %s8332_s23 = smov (%p30_p4, %s8330_s23), 0  ;;  %p4346_p8 = por %p134_p6, %p133_p5 }
   0xe   : > { %s112_s27 = ssub.s32 %s4258_s18, %s8332_s23  ;;  %s117_s28 = sadd.s32 1, %s4242_s14 }
   0xf   : > { %s114_s29 = sor.u32 %s113_s24, %s112_s27  ;;  %p183_p10 = pnand %p4068_p7, %p182_p9 }
  0x10   : > { %p115_p11 = scmp.eq.s32.totalorder %s114_s29, 0  ;;  %s4358_s4 = sshll.u32 (!%p183_p10), %s4246_s15, 1 }
  0x11   : > { %186 = sbr.rel (%p183_p10) target bundleno = 1043 (0x413), region = 32  ;;  %p226_p12 = scmp.lt.s32.totalorder (!%p183_p10), %s4250_s16, 1 }
  0x12   : > { %s4355_s30 = scalar_select %p115_p11, %s4242_s14, %s117_s28  }
  0x13   : > { %p221_p13 = scmp.lt.s32.totalorder (!%p183_p10), %s4358_s4, 3 }
  0x16   : > { %s4363_s5 = scalar_select %p226_p12, %s4250_s16, 1  ;;  %v245_v0 = vlaneseq  ;;  %v4264_v18 = vmov 0  }
  0x17   : > { %s222_s6 = scalar_select %p221_p13, %s4358_s4, 3 }
  0x18   : > { %s4075_s7 = sshll.u32 %s4363_s5, 2  ;;  %v4370_v1 = vshrl.u32 %v245_v0, 7  ;;  %s4091_s28 = sshll.u32 %s4363_s5, 4 }
  0x19   : > { %s4071_s8 = sshll.u32 %s222_s6, 2  ;;  %s237_s9 = sadd.s32 %s4075_s7, %s222_s6 }
  0x1a   : > { %s224_s20 = scalar_lea.vmem %s8284_s0, %s4071_s8  ;;  %s4076_s21 = sshll.u32 %s237_s9, 2  ;;  %v4376_v5 = vadd.s32 120, %v4370_v1  ;;  %v4379_v6 = vsub.s32 0, %v4370_v1  ;;  %v4382_v7 = vsub.s32 4, %v4370_v1  ;;  %v4385_v9 = vadd.s32 376, %v4370_v1 }
  0x1b   : > { %s239_s27 = scalar_lea.vmem %s8286_s2, %s4076_s21  ;;  %v242_v2 = vld [vmem:[%s224_s20] sm:$0x77]  ;;  %v4388_v10 = vadd.s32 112, %v4370_v1  ;;  %v4391_v11 = vadd.s32 368, %v4370_v1  ;;  %v4394_v12 = vadd.s32 104, %v4370_v1  ;;  %v4397_v13 = vadd.s32 360, %v4370_v1  ;;  %s8175_s6 = scalar_lea.vmem %s8285_s1, %s4091_s28 }
  0x1c   : > { %v243_v3 = vld [vmem:[%s239_s27] sm:$0x77]  ;;  %v4400_v14 = vadd.s32 96, %v4370_v1  ;;  %v4403_v15 = vadd.s32 352, %v4370_v1  ;;  %v4408_v22 = vadd.s32 88, %v4370_v1  ;;  %s217_s7 = sand.u32 1, %s4238_s13  }
  0x1d   : > { %v244_v4 = vadd.f32 %v243_v3, %v242_v2  ;;  %s4069_s8 = sshll.u32 %s217_s7, 3  ;;  %s4087_s9 = sshll.u32 %s4250_s16, 2 }
  0x1e   : > { %s3957_s10 = sadd.s32 %s4087_s9, %s4358_s4  ;;  %s219_s20 = scalar_lea.vmem [#allocation2], %s4069_s8 }
  0x1f   : > { %v310_v8 = vfloor.f32 %v244_v4  ;;  %s4088_s11 = sshll.u32 %s3957_s10, 6  ;;  %s3961_s21 = sshll.u32 %s219_s20, 4  ;;  %s3962_s21 = int_to_ptr.vmem [resolvable:$true] %s3961_s21 }
  0x20   : > { %s3959_s27 = scalar_lea.hbm %s8287_s3, %s4088_s11  ;;  %s3945_s28 = scalar_lea.sflag [#allocation3], %s217_s7 }
  0x21   : > { %v4405_v16 = vsub.f32 %v244_v4, %v310_v8  ;;  %vm314_vm0 = vcmp.ge.f32.partialorder %v310_v8, 0.0  ;;  %vm315_vm1 = vcmp.le.f32.partialorder %v310_v8, 7.0  ;;  %v345_v17 = vmax.f32 %v310_v8, 0.0  ;;  %s4170_s29 = scalar_lea.vmem %s3962_s21, 128  ;;  %s4265_s16 = smov [#allocation2]  }
  0x22   : > { %v317_v19 = vsel %vm314_vm0, 1, %v4264_v18  ;;  %v322_v20 = vsel %vm315_vm1, 1, %v4264_v18  ;;  %v775_v21 = vadd.f32 1.0, %v310_v8  ;;  %vm4413_vm2 = vmand %vm314_vm0, %vm315_vm1  ;;  %p4171_p0 = scmp.ne.s32.totalorder %s3962_s21, %s4170_s29  ;;  %s4174_s4 = sshll.u32 %s4265_s16, 4  ;;  %s4175_s4 = int_to_ptr.vmem [resolvable:$false] %s4174_s4 }
  0x23   : > { %v4411_v23 = vsub.f32 1.0, %v4405_v16  ;;  %v4077_v25 = vrot.slane %v317_v19, 9  ;;  %v4078_v26 = vrot.slane %v322_v20, 9  ;;  %v4079_v27 = vrot.slane %v317_v19, 10  ;;  %s4176_s5 = scalar_lea.vmem %s4175_s4, 256  ;;  %p4177_p4 = scmp.lt.s32.totalorder %s3962_s21, %s4175_s4 }
  0x24   : > { %v4080_v28 = vrot.slane %v322_v20, 10  ;;  %v346_v29 = vmin.f32 %v345_v17, 7.0  ;;  %vm776_vm3 = vcmp.ge.f32.partialorder %v775_v21, 0.0  ;;  %vm782_vm4 = vcmp.le.f32.partialorder %v775_v21, 7.0  ;;  %p4172_p1 = pnand %p4171_p0, %p4337_p3  ;;  %p4178_p5 = scmp.lt.s32.totalorder %s4176_s5, %s4170_s29 }
  0x25   : > { %vm4417_vm5 = vcmp.ne.s32.totalorder %v4077_v25, 0  ;;  %vm4421_vm6 = vcmp.ne.s32.totalorder %v4078_v26, 0  ;;  %vm4425_vm7 = vcmp.ne.s32.totalorder %v4079_v27, 0  ;;  %v336_v33 = vrot.slane %v4411_v23, 5  ;;  %vm4430_vm8 = vmand %vm776_vm3, %vm782_vm4 }
  0x26   : > { %vm321_vm9 = vmand %vm4413_vm2, %vm4417_vm5  ;;  %vm4438_vm10 = vcmp.ne.s32.totalorder %v4080_v28, 0  ;;  %v340_v36 = vrot.slane %v4411_v23, 6  ;;  %v4092_v37 = vtrunc.f32 %v346_v29  ;;  %v777_v38 = vsel %vm776_vm3, 1, %v4264_v18  ;;  %p4173_p2 = pneg %p4172_p1  ;;  %p4179_p6 = por %p4178_p5, %p4177_p4 }
  0x27   : > { %vm4445_vm11 = vmand %vm321_vm9, %vm4421_vm6  ;;  %v337_v40 = vrot.slane %v336_v33, 4  ;;  %v4081_v41 = vrot.slane %v777_v38, 10  ;;  %v783_v42 = vsel %vm782_vm4, 1, %v4264_v18  ;;  %v789_v43 = vrot.slane %v4405_v16, 6 }
  0x28   : > { %vm330_vm12 = vmand %vm4445_vm11, %vm4425_vm7  ;;  %v341_v44 = vrot.slane %v340_v36, 4  ;;  %v4454_v45 = vcvt.f32.s32 %v4092_v37  ;;  %v4082_v46 = vrot.slane %v783_v42, 10  ;;  %v794_v47 = vmax.f32 %v775_v21, 0.0  ;;  %p4180_p7 = pnand %p4179_p6, %p4173_p2 }
  0x29   : > { %vm4458_vm13 = vmand %vm330_vm12, %vm4438_vm10  ;;  %v339_v49 = vmul.f32 %v337_v40, %v4411_v23  ;;  %vm4463_vm14 = vcmp.ne.s32.totalorder %v4081_v41, 0  ;;  %v790_v51 = vrot.slane %v789_v43, 4  ;;  %v4083_v52 = vrot.slane %v777_v38, 9 }
  0x2a   : > { %v348_v53 = vmul.u32 64, %v4454_v45  ;;  %v349_v54 = vmul.u32 8, %v4454_v45  ;;  %v353_v55 = vrot.slane %v4454_v45, 6  ;;  %vm781_vm15 = vmand %vm4445_vm11, %vm4463_vm14  ;;  %vm4474_vm0 = vcmp.ne.s32.totalorder %v4082_v46, 0 }
  0x2b   : > { %v343_v57 = vmul.f32 %v341_v44, %v339_v49  ;;  %vm787_vm1 = vmand %vm781_vm15, %vm4474_vm0  ;;  %v792_v58 = vmul.f32 %v790_v51, %v339_v49  ;;  %v795_v59 = vmin.f32 %v794_v47, 7.0  ;;  %vm4480_vm3 = vcmp.ne.s32.totalorder %v4083_v52, 0 }
  0x2c   : > { %v350_v61 = vrot.slane %v349_v54, 5  ;;  %v4484_v62 = vrot.slane %v353_v55, 4  ;;  %vm1222_vm4 = vmand %vm4413_vm2, %vm4480_vm3  ;;  %v4084_v63 = vrot.slane %v783_v42, 9  ;;  %v1229_v0 = vrot.slane %v4405_v16, 5 }
  0x2d   : > { %v4493_v2 = vsel %vm4458_vm13, %v343_v57, 0.0  ;;  %v793_v3 = vsel %vm787_vm1, %v792_v58, 0.0  ;;  %v4094_v4 = vtrunc.f32 %v795_v59  ;;  %vm2084_vm9 = vmand %vm4430_vm8, %vm4417_vm5  ;;  %v2088_v8 = vmul.f32 %v337_v40, %v4405_v16 }
  0x2e   : > { %v351_v17 = vrot.slane %v350_v61, 4  ;;  %v508_v18 = vrot.slane %v4493_v2, %v4382_v7  ;;  %v948_v19 = vrot.slane %v793_v3, %v4379_v6  ;;  %v952_v20 = vrot.slane %v793_v3, %v4382_v7  ;;  %vm4506_vm11 = vmand %vm2084_vm9, %vm4421_vm6 }
  0x2f   : > { %v4510_v25 = vcvt.f32.s32 %v4094_v4  ;;  %vm4512_vm12 = vcmp.ne.s32.totalorder %v4084_v63, 0  ;;  %v1230_v27 = vrot.slane %v1229_v0, 4  ;;  %vm2086_vm5 = vmand %vm4506_vm11, %vm4425_vm7  ;;  %v2089_v28 = vmul.f32 %v2088_v8, %v341_v44 }
  0x30   : > { %v352_v29 = vadd.s32 %v351_v17, %v348_v53  ;;  %v4523_v30 = vrot.slane %v508_v18, %v4379_v6  ;;  %v4526_v31 = vrot.slane %v952_v20, %v4379_v6  ;;  %vm4535_vm6 = vmand %vm1222_vm4, %vm4512_vm12  ;;  %v2515_v36 = vmul.f32 %v2088_v8, %v790_v51 }
  0x31   : > { %v797_v37 = vrot.slane %v4510_v25, 6  ;;  %vm1227_vm13 = vmand %vm4535_vm6, %vm4425_vm7  ;;  %v1232_v38 = vmul.f32 %v1230_v27, %v4411_v23  ;;  %v1235_v39 = vmul.u32 8, %v4510_v25  ;;  %v2091_v24 = vmul.u32 64, %v4510_v25 }
  0x32   : > { %v4548_v40 = vadd.s32 %v4484_v62, %v352_v29  ;;  %vm1228_vm2 = vmand %vm1227_vm13, %vm4438_vm10  ;;  %v2941_v41 = vmul.f32 %v1230_v27, %v4405_v16  ;;  %v504_v42 = vrot.slane %v4493_v2, %v4379_v6  ;;  %v4556_v43 = vrot.slane %v948_v19, %v4379_v6 }
  0x33   : > { %v4558_v46 = vrot.slane %v797_v37, 4  ;;  %v1233_v23 = vmul.f32 %v1232_v38, %v341_v44  ;;  %v1236_v47 = vrot.slane %v1235_v39, 5  ;;  %vm1659_vm15 = vmand %vm4535_vm6, %vm4463_vm14  ;;  %v1661_v48 = vmul.f32 %v1232_v38, %v790_v51 }
  0x34   : > { %v363_v49 = vrot.slane %v4548_v40, %v4382_v7  ;;  %vm1660_vm1 = vmand %vm1659_vm15, %vm4474_vm0  ;;  %v2092_v16 = vadd.s32 %v2091_v24, %v351_v17  ;;  %v2942_v52 = vmul.f32 %v2941_v41, %v341_v44  ;;  %v3367_v54 = vmul.f32 %v2941_v41, %v790_v51 }
  0x35   : > { %v4571_v55 = vadd.s32 %v4558_v46, %v352_v29  ;;  %v4573_v57 = vsel %vm1228_vm2, %v1233_v23, 0.0  ;;  %v1237_v58 = vrot.slane %v1236_v47, 4  ;;  %v4575_v59 = vsel %vm1660_vm1, %v1661_v48, 0.0  ;;  %vm2087_vm4 = vmand %vm2086_vm5, %vm4438_vm10 }
  0x36   : > { %v4585_v61 = vrot.slane %v363_v49, %v4379_v6  ;;  %v1388_v44 = vrot.slane %v4573_v57, %v4379_v6  ;;  %v1392_v51 = vrot.slane %v4573_v57, %v4382_v7  ;;  %v1816_v63 = vrot.slane %v4575_v59, %v4382_v7  ;;  %vm2513_vm9 = vmand %vm4506_vm11, %vm4463_vm14 }
  0x37   : > { %v807_v0 = vrot.slane %v4571_v55, %v4382_v7  ;;  %v1238_v3 = vadd.s32 %v1237_v58, %v348_v53  ;;  %v4601_v4 = vsel %vm2087_vm4, %v2089_v28, 0.0  ;;  %v4604_v8 = vadd.s32 %v2092_v16, %v4484_v62  ;;  %vm2514_vm5 = vmand %vm2513_vm9, %vm4474_vm0 }
  0x38   : > { %vm403_vm6 = vcmp.eq.s32.totalorder %v4376_v5, %v4585_v61  ;;  %v4611_v17 = vrot.slane %v1392_v51, %v4379_v6  ;;  %v4614_v18 = vrot.slane %v1816_v63, %v4379_v6  ;;  %v2246_v45 = vrot.slane %v4601_v4, %v4382_v7  ;;  %vm2937_vm11 = vmand %vm4430_vm8, %vm4480_vm3 }
  0x39   : > { %v550_v53 = vsel %vm403_vm6, %v4523_v30, 0.0  ;;  %v4624_v19 = vrot.slane %v807_v0, %v4379_v6  ;;  %v4627_v20 = vadd.s32 %v1238_v3, %v4484_v62  ;;  %v4630_v21 = vadd.s32 %v1238_v3, %v4558_v46  ;;  %vm4634_vm13 = vmand %vm2937_vm11, %vm4512_vm12 }
  0x3a   : > { %v2101_v34 = vrot.slane %v4604_v8, %v4382_v7  ;;  %v4641_v60 = vrot.slane %v2246_v45, %v4379_v6  ;;  %v4643_v28 = vsel %vm2514_vm5, %v2515_v36, 0.0  ;;  %v4646_v29 = vadd.s32 %v2092_v16, %v4558_v46  ;;  %vm2939_vm8 = vmand %vm4634_vm13, %vm4425_vm7 }
  0x3b   : > { %vm847_vm3 = vcmp.eq.s32.totalorder %v4376_v5, %v4624_v19  ;;  %v1247_v26 = vrot.slane %v4627_v20, %v4382_v7  ;;  %v1671_v33 = vrot.slane %v4630_v21, %v4382_v7  ;;  %v2670_v36 = vrot.slane %v4643_v28, %v4382_v7  ;;  %vm2940_vm12 = vmand %vm2939_vm8, %vm4438_vm10 }
  0x3c   : > { %v994_v32 = vsel %vm847_vm3, %v4526_v31, 0.0  ;;  %v4664_v37 = vrot.slane %v2101_v34, %v4379_v6  ;;  %v2525_v38 = vrot.slane %v4646_v29, %v4382_v7  ;;  %v4668_v39 = vsel %vm2940_vm12, %v2942_v52, 0.0  ;;  %vm3365_vm7 = vmand %vm4634_vm13, %vm4463_vm14 }
  0x3d   : > { %v1122_v41 = vadd.f32 %v994_v32, %v550_v53  ;;  %v4675_v23 = vrot.slane %v1247_v26, %v4379_v6  ;;  %v4678_v35 = vrot.slane %v1671_v33, %v4379_v6  ;;  %v4681_v47 = vrot.slane %v2670_v36, %v4379_v6  ;;  %vm3366_vm10 = vmand %vm3365_vm7, %vm4474_vm0 }
  0x3e   : > { %vm2141_vm2 = vcmp.eq.s32.totalorder %v4376_v5, %v4664_v37  ;;  %v4688_v50 = vrot.slane %v2525_v38, %v4379_v6  ;;  %v2944_v48 = vadd.s32 %v2091_v24, %v1237_v58  ;;  %v3098_v49 = vrot.slane %v4668_v39, %v4382_v7 }
  0x3f   : > { %vm1287_vm14 = vcmp.eq.s32.totalorder %v4376_v5, %v4675_v23  ;;  %vm1711_vm15 = vcmp.eq.s32.totalorder %v4376_v5, %v4678_v35  ;;  %v2288_v56 = vsel %vm2141_vm2, %v4641_v60, 0.0  ;;  %v4699_v16 = vsel %vm3366_vm10, %v3367_v54, 0.0 }
  0x40   : > { %v1434_v52 = vsel %vm1287_vm14, %v4611_v17, 0.0  ;;  %v1858_v51 = vsel %vm1711_vm15, %v4614_v18, 0.0  ;;  %vm2565_vm0 = vcmp.eq.s32.totalorder %v4376_v5, %v4688_v50  ;;  %v4706_v25 = vadd.s32 %v2944_v48, %v4484_v62 }
  0x41   : > { %v1562_v24 = vadd.f32 %v1434_v52, %v1122_v41  ;;  %v2712_v58 = vsel %vm2565_vm0, %v4681_v47, 0.0  ;;  %v4710_v63 = vrot.slane %v3098_v49, %v4379_v6  ;;  %v4713_v0 = vadd.s32 %v2944_v48, %v4558_v46 }
  0x42   : > { %v2953_v54 = vrot.slane %v4706_v25, %v4382_v7  ;;  %v3522_v3 = vrot.slane %v4699_v16, %v4382_v7  ;;  %vm467_vm1 = vcmp.eq.s32.totalorder %v4385_v9, %v4585_v61  ;;  %vm911_vm4 = vcmp.eq.s32.totalorder %v4385_v9, %v4624_v19 }
  0x43   : > { %v1986_v62 = vadd.f32 %v1858_v51, %v1562_v24  ;;  %v3377_v45 = vrot.slane %v4713_v0, %v4382_v7  ;;  %v614_v53 = vsel %vm467_vm1, %v4523_v30, 0.0  ;;  %v1058_v46 = vsel %vm911_vm4, %v4526_v31, 0.0 }
  0x44   : > { %v4728_v27 = vrot.slane %v2953_v54, %v4379_v6  ;;  %v4731_v34 = vrot.slane %v3522_v3, %v4379_v6  ;;  %v1186_v26 = vadd.f32 %v1058_v46, %v614_v53  ;;  %vm1351_vm9 = vcmp.eq.s32.totalorder %v4385_v9, %v4675_v23 }
  0x45   : > { %v2416_v33 = vadd.f32 %v2288_v56, %v1986_v62  ;;  %v4736_v36 = vrot.slane %v3377_v45, %v4379_v6  ;;  %v1498_v7 = vsel %vm1351_vm9, %v4611_v17, 0.0  ;;  %vm1775_vm5 = vcmp.eq.s32.totalorder %v4385_v9, %v4678_v35 }
  0x46   : > { %vm2993_vm6 = vcmp.eq.s32.totalorder %v4376_v5, %v4728_v27  ;;  %v1626_v32 = vadd.f32 %v1498_v7, %v1186_v26  ;;  %v1922_v38 = vsel %vm1775_vm5, %v4614_v18, 0.0  ;;  %vm2205_vm11 = vcmp.eq.s32.totalorder %v4385_v9, %v4664_v37 }
  0x47   : > { %v2840_v41 = vadd.f32 %v2712_v58, %v2416_v33  ;;  %v3140_v48 = vsel %vm2993_vm6, %v4710_v63, 0.0  ;;  %vm3417_vm13 = vcmp.eq.s32.totalorder %v4376_v5, %v4736_v36  ;;  %v2352_v49 = vsel %vm2205_vm11, %v4641_v60, 0.0 }
  0x48   : > { %v3564_v56 = vsel %vm3417_vm13, %v4731_v34, 0.0  ;;  %v2050_v52 = vadd.f32 %v1922_v38, %v1626_v32  ;;  %vm2629_vm8 = vcmp.eq.s32.totalorder %v4385_v9, %v4688_v50  ;;  %vm3057_vm3 = vcmp.eq.s32.totalorder %v4385_v9, %v4728_v27 }
  0x49   : > { %v3268_v51 = vadd.f32 %v3140_v48, %v2840_v41  ;;  %v2776_v24 = vsel %vm2629_vm8, %v4681_v47, 0.0  ;;  %v3204_v58 = vsel %vm3057_vm3, %v4710_v63, 0.0  ;;  %vm3481_vm12 = vcmp.eq.s32.totalorder %v4385_v9, %v4736_v36 }
  0x4a   : > { %v2480_v54 = vadd.f32 %v2352_v49, %v2050_v52  ;;  %v3628_v3 = vsel %vm3481_vm12, %v4731_v34, 0.0  ;;  %v359_v62 = vrot.slane %v4548_v40, %v4379_v6  ;;  %v4766_v45 = vrot.slane %v504_v42, %v4379_v6 }
  0x4b   : > { %v3692_v53 = vadd.f32 %v3564_v56, %v3268_v51  ;;  %v803_v46 = vrot.slane %v4571_v55, %v4379_v6  ;;  %v1243_v26 = vrot.slane %v4627_v20, %v4379_v6  ;;  %v4776_v33 = vrot.slane %v1388_v44, %v4379_v6 }
  0x4c   : > { %v2904_v40 = vadd.f32 %v2776_v24, %v2480_v54  ;;  %v4779_v7 = vrot.slane %v359_v62, %v4379_v6  ;;  %v1667_v2 = vrot.slane %v4630_v21, %v4379_v6  ;;  %v1812_v42 = vrot.slane %v4575_v59, %v4379_v6 }
  0x4d   : > { %3797 = vmatprep.subr.mxu0 %v3692_v53  ;;  %v4786_v55 = vrot.slane %v803_v46, %v4379_v6  ;;  %v4789_v20 = vrot.slane %v1243_v26, %v4379_v6  ;;  %v2097_v57 = vrot.slane %v4604_v8, %v4379_v6  ;;  %v2242_v44 = vrot.slane %v4601_v4, %v4379_v6 }
  0x4e   : > { %v3332_v32 = vadd.f32 %v3204_v58, %v2904_v40  ;;  %vm402_vm7 = vcmp.eq.s32.totalorder %v4376_v5, %v4779_v7  ;;  %v4798_v21 = vrot.slane %v1667_v2, %v4379_v6  ;;  %v4801_v59 = vrot.slane %v1812_v42, %v4379_v6 }
  0x4f   : > { %v549_v38 = vsel %vm402_vm7, %v4766_v45, 0.0  ;;  %vm846_vm10 = vcmp.eq.s32.totalorder %v4376_v5, %v4786_v55  ;;  %vm1286_vm2 = vcmp.eq.s32.totalorder %v4376_v5, %v4789_v20  ;;  %v4809_v4 = vrot.slane %v2097_v57, %v4379_v6 }
  0x50   : > { %v3756_v8 = vadd.f32 %v3628_v3, %v3332_v32  ;;  %v993_v41 = vsel %vm846_vm10, %v4556_v43, 0.0  ;;  %v1433_v48 = vsel %vm1286_vm2, %v4776_v33, 0.0  ;;  %vm1710_vm14 = vcmp.eq.s32.totalorder %v4376_v5, %v4798_v21 }
  0x51   : > { %v1121_v49 = vadd.f32 %v993_v41, %v549_v38  ;;  %v1857_v56 = vsel %vm1710_vm14, %v4801_v59, 0.0  ;;  %vm2140_vm15 = vcmp.eq.s32.totalorder %v4376_v5, %v4809_v4  ;;  %v4819_v52 = vrot.slane %v2242_v44, %v4379_v6 }
  0x52   : > { %3868 = vmatprep.subr.mxu1 %v3756_v8  ;;  %v2521_v51 = vrot.slane %v4646_v29, %v4379_v6  ;;  %v2666_v24 = vrot.slane %v4643_v28, %v4379_v6  ;;  %v2949_v58 = vrot.slane %v4706_v25, %v4379_v6  ;;  %v3094_v54 = vrot.slane %v4668_v39, %v4379_v6 }
  0x53   : > { %v1561_v3 = vadd.f32 %v1433_v48, %v1121_v49  ;;  %v2287_v62 = vsel %vm2140_vm15, %v4819_v52, 0.0  ;;  %v3373_v53 = vrot.slane %v4713_v0, %v4379_v6  ;;  %v3518_v46 = vrot.slane %v4699_v16, %v4379_v6 }
  0x54   : > { %v4835_v29 = vrot.slane %v2521_v51, %v4379_v6  ;;  %v4838_v28 = vrot.slane %v2666_v24, %v4379_v6  ;;  %v4841_v25 = vrot.slane %v2949_v58, %v4379_v6  ;;  %v4844_v39 = vrot.slane %v3094_v54, %v4379_v6 }
  0x55   : > { %v1985_v26 = vadd.f32 %v1857_v56, %v1561_v3  ;;  %v4847_v40 = vrot.slane %v3373_v53, %v4379_v6  ;;  %v4850_v0 = vrot.slane %v3518_v46, %v4379_v6  ;;  %vm466_vm0 = vcmp.eq.s32.totalorder %v4385_v9, %v4779_v7 }
  0x56   : > { %vm2564_vm1 = vcmp.eq.s32.totalorder %v4376_v5, %v4835_v29  ;;  %vm2992_vm4 = vcmp.eq.s32.totalorder %v4376_v5, %v4841_v25  ;;  %v613_v16 = vsel %vm466_vm0, %v4766_v45, 0.0  ;;  %vm910_vm9 = vcmp.eq.s32.totalorder %v4385_v9, %v4786_v55 }
  0x57   : > { %v2415_v2 = vadd.f32 %v2287_v62, %v1985_v26  ;;  %v2711_v42 = vsel %vm2564_vm1, %v4838_v28, 0.0  ;;  %vm3416_vm5 = vcmp.eq.s32.totalorder %v4376_v5, %v4847_v40  ;;  %v4865_v6 = vadd.s32 344, %v4370_v1 }
  0x58   : > { %v3139_v57 = vsel %vm2992_vm4, %v4844_v39, 0.0  ;;  %v1057_v44 = vsel %vm910_vm9, %v4556_v43, 0.0  ;;  %vm1350_vm6 = vcmp.eq.s32.totalorder %v4385_v9, %v4789_v20  ;;  %vm1774_vm11 = vcmp.eq.s32.totalorder %v4385_v9, %v4798_v21 }
  0x59   : > { %v2839_v32 = vadd.f32 %v2711_v42, %v2415_v2  ;;  %v3563_v38 = vsel %vm3416_vm5, %v4850_v0, 0.0  ;;  %v1185_v8 = vadd.f32 %v1057_v44, %v613_v16  ;;  %v1497_v41 = vsel %vm1350_vm6, %v4776_v33, 0.0 }
  0x5a   : > { %v1921_v5 = vsel %vm1774_vm11, %v4801_v59, 0.0  ;;  %vm2204_vm13 = vcmp.eq.s32.totalorder %v4385_v9, %v4809_v4  ;;  %vm2628_vm8 = vcmp.eq.s32.totalorder %v4385_v9, %v4835_v29  ;;  %vm3056_vm3 = vcmp.eq.s32.totalorder %v4385_v9, %v4841_v25 }
  0x5b   : > { %v3267_v48 = vadd.f32 %v3139_v57, %v2839_v32  ;;  %v1625_v49 = vadd.f32 %v1497_v41, %v1185_v8  ;;  %v2351_v56 = vsel %vm2204_vm13, %v4819_v52, 0.0  ;;  %vm3480_vm12 = vcmp.eq.s32.totalorder %v4385_v9, %v4847_v40 }
  0x5c   : > { %v2775_v51 = vsel %vm2628_vm8, %v4838_v28, 0.0  ;;  %v3203_v24 = vsel %vm3056_vm3, %v4844_v39, 0.0  ;;  %vm401_vm7 = vcmp.eq.s32.totalorder %v4388_v10, %v4585_v61  ;;  %vm845_vm10 = vcmp.eq.s32.totalorder %v4388_v10, %v4624_v19 }
  0x5d   : > { %v3691_v58 = vadd.f32 %v3563_v38, %v3267_v48  ;;  %v2049_v54 = vadd.f32 %v1921_v5, %v1625_v49  ;;  %v548_v3 = vsel %vm401_vm7, %v4523_v30, 0.0  ;;  %v992_v62 = vsel %vm845_vm10, %v4526_v31, 0.0 }
  0x5e   : > { %v1120_v53 = vadd.f32 %v992_v62, %v548_v3  ;;  %vm1285_vm2 = vcmp.eq.s32.totalorder %v4388_v10, %v4675_v23  ;;  %vm1709_vm14 = vcmp.eq.s32.totalorder %v4388_v10, %v4678_v35  ;;  %vm2139_vm15 = vcmp.eq.s32.totalorder %v4388_v10, %v4664_v37 }
  0x5f   : > { %3798 = vmatpush1.msra.mxu0 %v3691_v58  ;;  %v2479_v9 = vadd.f32 %v2351_v56, %v2049_v54  ;;  %v3627_v46 = vsel %vm3480_vm12, %v4850_v0, 0.0  ;;  %v1432_v26 = vsel %vm1285_vm2, %v4611_v17, 0.0  ;;  %v1856_v16 = vsel %vm1709_vm14, %v4614_v18, 0.0 }
  0x60   : > { %v1560_v2 = vadd.f32 %v1432_v26, %v1120_v53  ;;  %v2286_v42 = vsel %vm2139_vm15, %v4641_v60, 0.0  ;;  %vm2563_vm0 = vcmp.eq.s32.totalorder %v4388_v10, %v4688_v50  ;;  %vm2991_vm1 = vcmp.eq.s32.totalorder %v4388_v10, %v4728_v27 }
  0x61   : > { %v2903_v57 = vadd.f32 %v2775_v51, %v2479_v9  ;;  %v2710_v44 = vsel %vm2563_vm0, %v4681_v47, 0.0  ;;  %v3138_v32 = vsel %vm2991_vm1, %v4710_v63, 0.0  ;;  %vm3415_vm4 = vcmp.eq.s32.totalorder %v4388_v10, %v4736_v36 }
  0x62   : > { %v1984_v38 = vadd.f32 %v1856_v16, %v1560_v2  ;;  %vm465_vm9 = vcmp.eq.s32.totalorder %v4391_v11, %v4585_v61  ;;  %vm909_vm5 = vcmp.eq.s32.totalorder %v4391_v11, %v4624_v19  ;;  %vm1349_vm6 = vcmp.eq.s32.totalorder %v4391_v11, %v4675_v23 }
  0x63   : > { %v3331_v8 = vadd.f32 %v3203_v24, %v2903_v57  ;;  %v612_v41 = vsel %vm465_vm9, %v4523_v30, 0.0  ;;  %v1056_v5 = vsel %vm909_vm5, %v4526_v31, 0.0  ;;  %v1496_v48 = vsel %vm1349_vm6, %v4611_v17, 0.0 }
  0x64   : > { %v2414_v49 = vadd.f32 %v2286_v42, %v1984_v38  ;;  %v1184_v56 = vadd.f32 %v1056_v5, %v612_v41  ;;  %vm1773_vm11 = vcmp.eq.s32.totalorder %v4391_v11, %v4678_v35  ;;  %vm2203_vm13 = vcmp.eq.s32.totalorder %v4391_v11, %v4664_v37 }
  0x65   : > { %v3755_v51 = vadd.f32 %v3627_v46, %v3331_v8  ;;  %v3562_v58 = vsel %vm3415_vm4, %v4731_v34, 0.0  ;;  %v1920_v54 = vsel %vm1773_vm11, %v4614_v18, 0.0  ;;  %vm2627_vm8 = vcmp.eq.s32.totalorder %v4391_v11, %v4688_v50 }
  0x66   : > { %v2838_v24 = vadd.f32 %v2710_v44, %v2414_v49  ;;  %v1624_v3 = vadd.f32 %v1496_v48, %v1184_v56  ;;  %v2350_v62 = vsel %vm2203_vm13, %v4641_v60, 0.0  ;;  %vm3055_vm3 = vcmp.eq.s32.totalorder %v4391_v11, %v4728_v27 }
  0x67   : > { %3869 = vmatpush1.msra.mxu1 %v3755_v51  ;;  %v2774_v53 = vsel %vm2627_vm8, %v4681_v47, 0.0  ;;  %v3202_v9 = vsel %vm3055_vm3, %v4710_v63, 0.0  ;;  %vm400_vm12 = vcmp.eq.s32.totalorder %v4388_v10, %v4779_v7  ;;  %vm844_vm7 = vcmp.eq.s32.totalorder %v4388_v10, %v4786_v55 }
  0x68   : > { %v3266_v46 = vadd.f32 %v3138_v32, %v2838_v24  ;;  %v2048_v26 = vadd.f32 %v1920_v54, %v1624_v3  ;;  %vm3479_vm10 = vcmp.eq.s32.totalorder %v4391_v11, %v4736_v36  ;;  %v547_v16 = vsel %vm400_vm12, %v4766_v45, 0.0 }
  0x69   : > { %v991_v2 = vsel %vm844_vm7, %v4556_v43, 0.0  ;;  %vm1284_vm2 = vcmp.eq.s32.totalorder %v4388_v10, %v4789_v20  ;;  %vm1708_vm14 = vcmp.eq.s32.totalorder %v4388_v10, %v4798_v21  ;;  %vm2138_vm15 = vcmp.eq.s32.totalorder %v4388_v10, %v4809_v4 }
  0x6a   : > { %v3690_v42 = vadd.f32 %v3562_v58, %v3266_v46  ;;  %v2478_v57 = vadd.f32 %v2350_v62, %v2048_v26  ;;  %v1119_v44 = vadd.f32 %v991_v2, %v547_v16  ;;  %v1431_v32 = vsel %vm1284_vm2, %v4776_v33, 0.0 }
  0x6b   : > { %v3626_v38 = vsel %vm3479_vm10, %v4731_v34, 0.0  ;;  %v1855_v8 = vsel %vm1708_vm14, %v4801_v59, 0.0  ;;  %vm2562_vm0 = vcmp.eq.s32.totalorder %v4388_v10, %v4835_v29  ;;  %vm2990_vm1 = vcmp.eq.s32.totalorder %v4388_v10, %v4841_v25 }
  0x6c   : > { %3799 = vmatprep.subr.mxu0 %v3690_v42  ;;  %v2902_v41 = vadd.f32 %v2774_v53, %v2478_v57  ;;  %v1559_v5 = vadd.f32 %v1431_v32, %v1119_v44  ;;  %v2285_v48 = vsel %vm2138_vm15, %v4819_v52, 0.0  ;;  %v2709_v49 = vsel %vm2562_vm0, %v4838_v28, 0.0 }
  0x6d   : > { %vm3414_vm4 = vcmp.eq.s32.totalorder %v4388_v10, %v4847_v40  ;;  %vm464_vm9 = vcmp.eq.s32.totalorder %v4391_v11, %v4779_v7  ;;  %vm908_vm5 = vcmp.eq.s32.totalorder %v4391_v11, %v4786_v55  ;;  %vm1348_vm6 = vcmp.eq.s32.totalorder %v4391_v11, %v4789_v20 }
  0x6e   : > { %v3330_v56 = vadd.f32 %v3202_v9, %v2902_v41  ;;  %v1983_v51 = vadd.f32 %v1855_v8, %v1559_v5  ;;  %v3137_v58 = vsel %vm2990_vm1, %v4844_v39, 0.0  ;;  %v611_v54 = vsel %vm464_vm9, %v4766_v45, 0.0 }
  0x6f   : > { %v1055_v24 = vsel %vm908_vm5, %v4556_v43, 0.0  ;;  %v1495_v3 = vsel %vm1348_vm6, %v4776_v33, 0.0  ;;  %vm1772_vm11 = vcmp.eq.s32.totalorder %v4391_v11, %v4798_v21  ;;  %vm2202_vm13 = vcmp.eq.s32.totalorder %v4391_v11, %v4809_v4 }
  0x70   : > { %v3754_v10 = vadd.f32 %v3626_v38, %v3330_v56  ;;  %v2413_v62 = vadd.f32 %v2285_v48, %v1983_v51  ;;  %v3561_v53 = vsel %vm3414_vm4, %v4850_v0, 0.0  ;;  %v1183_v9 = vadd.f32 %v1055_v24, %v611_v54 }
  0x71   : > { %v1919_v46 = vsel %vm1772_vm11, %v4801_v59, 0.0  ;;  %v2349_v26 = vsel %vm2202_vm13, %v4819_v52, 0.0  ;;  %vm2626_vm8 = vcmp.eq.s32.totalorder %v4391_v11, %v4835_v29  ;;  %vm3054_vm3 = vcmp.eq.s32.totalorder %v4391_v11, %v4841_v25 }
  0x72   : > { %3870 = vmatprep.subr.mxu1 %v3754_v10  ;;  %v2837_v16 = vadd.f32 %v2709_v49, %v2413_v62  ;;  %v1623_v2 = vadd.f32 %v1495_v3, %v1183_v9  ;;  %v2773_v42 = vsel %vm2626_vm8, %v4838_v28, 0.0  ;;  %vm3478_vm12 = vcmp.eq.s32.totalorder %v4391_v11, %v4847_v40 }
  0x73   : > { %v3201_v57 = vsel %vm3054_vm3, %v4844_v39, 0.0  ;;  %vm399_vm7 = vcmp.eq.s32.totalorder %v4394_v12, %v4585_v61  ;;  %vm843_vm10 = vcmp.eq.s32.totalorder %v4394_v12, %v4624_v19  ;;  %vm1283_vm2 = vcmp.eq.s32.totalorder %v4394_v12, %v4675_v23 }
  0x74   : > { %v3265_v44 = vadd.f32 %v3137_v58, %v2837_v16  ;;  %v2047_v32 = vadd.f32 %v1919_v46, %v1623_v2  ;;  %v546_v38 = vsel %vm399_vm7, %v4523_v30, 0.0  ;;  %v990_v8 = vsel %vm843_vm10, %v4526_v31, 0.0 }
  0x75   : > { %v1118_v41 = vadd.f32 %v990_v8, %v546_v38  ;;  %v1430_v11 = vsel %vm1283_vm2, %v4611_v17, 0.0  ;;  %vm1707_vm14 = vcmp.eq.s32.totalorder %v4394_v12, %v4678_v35  ;;  %vm2137_vm15 = vcmp.eq.s32.totalorder %v4394_v12, %v4664_v37 }
  0x76   : > { %v3689_v5 = vadd.f32 %v3561_v53, %v3265_v44  ;;  %v2477_v48 = vadd.f32 %v2349_v26, %v2047_v32  ;;  %v3625_v49 = vsel %vm3478_vm12, %v4850_v0, 0.0  ;;  %v1854_v56 = vsel %vm1707_vm14, %v4614_v18, 0.0 }
  0x77   : > { %v1558_v51 = vadd.f32 %v1430_v11, %v1118_v41  ;;  %v2284_v58 = vsel %vm2137_vm15, %v4641_v60, 0.0  ;;  %vm2561_vm0 = vcmp.eq.s32.totalorder %v4394_v12, %v4688_v50  ;;  %vm2989_vm1 = vcmp.eq.s32.totalorder %v4394_v12, %v4728_v27 }
  0x78   : > { %3800 = vmatpush1.msra.mxu0 %v3689_v5  ;;  %v2901_v54 = vadd.f32 %v2773_v42, %v2477_v48  ;;  %v2708_v24 = vsel %vm2561_vm0, %v4681_v47, 0.0  ;;  %v3136_v3 = vsel %vm2989_vm1, %v4710_v63, 0.0  ;;  %vm3413_vm4 = vcmp.eq.s32.totalorder %v4394_v12, %v4736_v36 }
  0x79   : > { %v1982_v10 = vadd.f32 %v1854_v56, %v1558_v51  ;;  %vm463_vm9 = vcmp.eq.s32.totalorder %v4397_v13, %v4585_v61  ;;  %vm907_vm5 = vcmp.eq.s32.totalorder %v4397_v13, %v4624_v19  ;;  %vm1347_vm6 = vcmp.eq.s32.totalorder %v4397_v13, %v4675_v23 }
  0x7a   : > { %v3329_v62 = vadd.f32 %v3201_v57, %v2901_v54  ;;  %v610_v53 = vsel %vm463_vm9, %v4523_v30, 0.0  ;;  %v1054_v9 = vsel %vm907_vm5, %v4526_v31, 0.0  ;;  %v1494_v46 = vsel %vm1347_vm6, %v4611_v17, 0.0 }
  0x7b   : > { %v2412_v26 = vadd.f32 %v2284_v58, %v1982_v10  ;;  %v1182_v16 = vadd.f32 %v1054_v9, %v610_v53  ;;  %vm1771_vm11 = vcmp.eq.s32.totalorder %v4397_v13, %v4678_v35  ;;  %vm2201_vm13 = vcmp.eq.s32.totalorder %v4397_v13, %v4664_v37 }
  0x7c   : > { %v3753_v2 = vadd.f32 %v3625_v49, %v3329_v62  ;;  %v3560_v42 = vsel %vm3413_vm4, %v4731_v34, 0.0  ;;  %v1918_v44 = vsel %vm1771_vm11, %v4614_v18, 0.0  ;;  %vm2625_vm8 = vcmp.eq.s32.totalorder %v4397_v13, %v4688_v50 }
  0x7d   : > { %v2836_v57 = vadd.f32 %v2708_v24, %v2412_v26  ;;  %v1622_v32 = vadd.f32 %v1494_v46, %v1182_v16  ;;  %v2348_v38 = vsel %vm2201_vm13, %v4641_v60, 0.0  ;;  %vm3053_vm3 = vcmp.eq.s32.totalorder %v4397_v13, %v4728_v27 }
  0x7e   : > { %3871 = vmatpush1.msra.mxu1 %v3753_v2  ;;  %v2772_v8 = vsel %vm2625_vm8, %v4681_v47, 0.0  ;;  %v3200_v41 = vsel %vm3053_vm3, %v4710_v63, 0.0  ;;  %vm398_vm12 = vcmp.eq.s32.totalorder %v4394_v12, %v4779_v7  ;;  %vm842_vm7 = vcmp.eq.s32.totalorder %v4394_v12, %v4786_v55 }
  0x7f   : > { %v3264_v11 = vadd.f32 %v3136_v3, %v2836_v57  ;;  %v2046_v5 = vadd.f32 %v1918_v44, %v1622_v32  ;;  %vm3477_vm10 = vcmp.eq.s32.totalorder %v4397_v13, %v4736_v36  ;;  %v545_v48 = vsel %vm398_vm12, %v4766_v45, 0.0 }
  0x80   : > { %v989_v49 = vsel %vm842_vm7, %v4556_v43, 0.0  ;;  %vm1282_vm2 = vcmp.eq.s32.totalorder %v4394_v12, %v4789_v20  ;;  %vm1706_vm14 = vcmp.eq.s32.totalorder %v4394_v12, %v4798_v21  ;;  %vm2136_vm15 = vcmp.eq.s32.totalorder %v4394_v12, %v4809_v4 }
  0x81   : > { %v3688_v56 = vadd.f32 %v3560_v42, %v3264_v11  ;;  %v2476_v51 = vadd.f32 %v2348_v38, %v2046_v5  ;;  %v1117_v58 = vadd.f32 %v989_v49, %v545_v48  ;;  %v1429_v54 = vsel %vm1282_vm2, %v4776_v33, 0.0 }
  0x82   : > { %v3624_v24 = vsel %vm3477_vm10, %v4731_v34, 0.0  ;;  %v1853_v3 = vsel %vm1706_vm14, %v4801_v59, 0.0  ;;  %vm2560_vm0 = vcmp.eq.s32.totalorder %v4394_v12, %v4835_v29  ;;  %vm2988_vm1 = vcmp.eq.s32.totalorder %v4394_v12, %v4841_v25 }
  0x83   : > { %3801 = vmatprep.subr.mxu0 %v3688_v56  ;;  %v2900_v10 = vadd.f32 %v2772_v8, %v2476_v51  ;;  %v1557_v62 = vadd.f32 %v1429_v54, %v1117_v58  ;;  %v2283_v53 = vsel %vm2136_vm15, %v4819_v52, 0.0  ;;  %v2707_v9 = vsel %vm2560_vm0, %v4838_v28, 0.0 }
  0x84   : > { %vm3412_vm4 = vcmp.eq.s32.totalorder %v4394_v12, %v4847_v40  ;;  %vm462_vm9 = vcmp.eq.s32.totalorder %v4397_v13, %v4779_v7  ;;  %vm906_vm5 = vcmp.eq.s32.totalorder %v4397_v13, %v4786_v55  ;;  %vm1346_vm6 = vcmp.eq.s32.totalorder %v4397_v13, %v4789_v20 }
  0x85   : > { %v3328_v46 = vadd.f32 %v3200_v41, %v2900_v10  ;;  %v1981_v26 = vadd.f32 %v1853_v3, %v1557_v62  ;;  %v3135_v16 = vsel %vm2988_vm1, %v4844_v39, 0.0  ;;  %v609_v2 = vsel %vm462_vm9, %v4766_v45, 0.0 }
  0x86   : > { %v1053_v42 = vsel %vm906_vm5, %v4556_v43, 0.0  ;;  %v1493_v44 = vsel %vm1346_vm6, %v4776_v33, 0.0  ;;  %vm1770_vm11 = vcmp.eq.s32.totalorder %v4397_v13, %v4798_v21  ;;  %vm2200_vm13 = vcmp.eq.s32.totalorder %v4397_v13, %v4809_v4 }
  0x87   : > { %v3752_v12 = vadd.f32 %v3624_v24, %v3328_v46  ;;  %v2411_v57 = vadd.f32 %v2283_v53, %v1981_v26  ;;  %v3559_v32 = vsel %vm3412_vm4, %v4850_v0, 0.0  ;;  %v1181_v38 = vadd.f32 %v1053_v42, %v609_v2 }
  0x88   : > { %v1917_v8 = vsel %vm1770_vm11, %v4801_v59, 0.0  ;;  %v2347_v41 = vsel %vm2200_vm13, %v4819_v52, 0.0  ;;  %vm2624_vm8 = vcmp.eq.s32.totalorder %v4397_v13, %v4835_v29  ;;  %vm3052_vm3 = vcmp.eq.s32.totalorder %v4397_v13, %v4841_v25 }
  0x89   : > { %3872 = vmatprep.subr.mxu1 %v3752_v12  ;;  %v2835_v11 = vadd.f32 %v2707_v9, %v2411_v57  ;;  %v1621_v5 = vadd.f32 %v1493_v44, %v1181_v38  ;;  %v2771_v48 = vsel %vm2624_vm8, %v4838_v28, 0.0  ;;  %vm3476_vm12 = vcmp.eq.s32.totalorder %v4397_v13, %v4847_v40 }
  0x8a   : > { %v3199_v49 = vsel %vm3052_vm3, %v4844_v39, 0.0  ;;  %vm397_vm7 = vcmp.eq.s32.totalorder %v4400_v14, %v4585_v61  ;;  %vm841_vm10 = vcmp.eq.s32.totalorder %v4400_v14, %v4624_v19  ;;  %vm1281_vm2 = vcmp.eq.s32.totalorder %v4400_v14, %v4675_v23 }
  0x8b   : > { %v3263_v56 = vadd.f32 %v3135_v16, %v2835_v11  ;;  %v2045_v51 = vadd.f32 %v1917_v8, %v1621_v5  ;;  %v544_v58 = vsel %vm397_vm7, %v4523_v30, 0.0  ;;  %v988_v54 = vsel %vm841_vm10, %v4526_v31, 0.0 }
  0x8c   : > { %v1116_v24 = vadd.f32 %v988_v54, %v544_v58  ;;  %v1428_v13 = vsel %vm1281_vm2, %v4611_v17, 0.0  ;;  %vm1705_vm14 = vcmp.eq.s32.totalorder %v4400_v14, %v4678_v35  ;;  %vm2135_vm15 = vcmp.eq.s32.totalorder %v4400_v14, %v4664_v37 }
  0x8d   : > { %v3687_v3 = vadd.f32 %v3559_v32, %v3263_v56  ;;  %v2475_v10 = vadd.f32 %v2347_v41, %v2045_v51  ;;  %v3623_v62 = vsel %vm3476_vm12, %v4850_v0, 0.0  ;;  %v1852_v53 = vsel %vm1705_vm14, %v4614_v18, 0.0 }
  0x8e   : > { %v1556_v9 = vadd.f32 %v1428_v13, %v1116_v24  ;;  %v2282_v46 = vsel %vm2135_vm15, %v4641_v60, 0.0  ;;  %vm2559_vm0 = vcmp.eq.s32.totalorder %v4400_v14, %v4688_v50  ;;  %vm2987_vm1 = vcmp.eq.s32.totalorder %v4400_v14, %v4728_v27 }
  0x8f   : > { %3802 = vmatpush1.msra.mxu0 %v3687_v3  ;;  %v2899_v26 = vadd.f32 %v2771_v48, %v2475_v10  ;;  %v2706_v16 = vsel %vm2559_vm0, %v4681_v47, 0.0  ;;  %v3134_v2 = vsel %vm2987_vm1, %v4710_v63, 0.0  ;;  %vm3411_vm4 = vcmp.eq.s32.totalorder %v4400_v14, %v4736_v36 }
  0x90   : > { %v1980_v42 = vadd.f32 %v1852_v53, %v1556_v9  ;;  %vm461_vm9 = vcmp.eq.s32.totalorder %v4403_v15, %v4585_v61  ;;  %vm905_vm5 = vcmp.eq.s32.totalorder %v4403_v15, %v4624_v19  ;;  %vm1345_vm6 = vcmp.eq.s32.totalorder %v4403_v15, %v4675_v23 }
  0x91   : > { %v3327_v44 = vadd.f32 %v3199_v49, %v2899_v26  ;;  %v608_v12 = vsel %vm461_vm9, %v4523_v30, 0.0  ;;  %v1052_v57 = vsel %vm905_vm5, %v4526_v31, 0.0  ;;  %v1492_v32 = vsel %vm1345_vm6, %v4611_v17, 0.0 }
  0x92   : > { %v2410_v38 = vadd.f32 %v2282_v46, %v1980_v42  ;;  %v1180_v8 = vadd.f32 %v1052_v57, %v608_v12  ;;  %vm1769_vm11 = vcmp.eq.s32.totalorder %v4403_v15, %v4678_v35  ;;  %vm2199_vm13 = vcmp.eq.s32.totalorder %v4403_v15, %v4664_v37 }
  0x93   : > { %v3751_v41 = vadd.f32 %v3623_v62, %v3327_v44  ;;  %v3558_v11 = vsel %vm3411_vm4, %v4731_v34, 0.0  ;;  %v1916_v5 = vsel %vm1769_vm11, %v4614_v18, 0.0  ;;  %vm2623_vm8 = vcmp.eq.s32.totalorder %v4403_v15, %v4688_v50 }
  0x94   : > { %v2834_v48 = vadd.f32 %v2706_v16, %v2410_v38  ;;  %v1620_v49 = vadd.f32 %v1492_v32, %v1180_v8  ;;  %v2346_v56 = vsel %vm2199_vm13, %v4641_v60, 0.0  ;;  %vm3051_vm3 = vcmp.eq.s32.totalorder %v4403_v15, %v4728_v27 }
  0x95   : > { %3873 = vmatpush1.msra.mxu1 %v3751_v41  ;;  %v2770_v51 = vsel %vm2623_vm8, %v4681_v47, 0.0  ;;  %v3198_v58 = vsel %vm3051_vm3, %v4710_v63, 0.0  ;;  %vm396_vm12 = vcmp.eq.s32.totalorder %v4400_v14, %v4779_v7  ;;  %vm840_vm7 = vcmp.eq.s32.totalorder %v4400_v14, %v4786_v55 }
  0x96   : > { %v3262_v54 = vadd.f32 %v3134_v2, %v2834_v48  ;;  %v2044_v24 = vadd.f32 %v1916_v5, %v1620_v49  ;;  %vm3475_vm10 = vcmp.eq.s32.totalorder %v4403_v15, %v4736_v36  ;;  %v543_v13 = vsel %vm396_vm12, %v4766_v45, 0.0 }
  0x97   : > { %v987_v3 = vsel %vm840_vm7, %v4556_v43, 0.0  ;;  %vm1280_vm2 = vcmp.eq.s32.totalorder %v4400_v14, %v4789_v20  ;;  %vm1704_vm14 = vcmp.eq.s32.totalorder %v4400_v14, %v4798_v21  ;;  %vm2134_vm15 = vcmp.eq.s32.totalorder %v4400_v14, %v4809_v4 }
  0x98   : > { %v3686_v10 = vadd.f32 %v3558_v11, %v3262_v54  ;;  %v2474_v62 = vadd.f32 %v2346_v56, %v2044_v24  ;;  %v1115_v53 = vadd.f32 %v987_v3, %v543_v13  ;;  %v1427_v9 = vsel %vm1280_vm2, %v4776_v33, 0.0 }
  0x99   : > { %v3622_v46 = vsel %vm3475_vm10, %v4731_v34, 0.0  ;;  %v1851_v26 = vsel %vm1704_vm14, %v4801_v59, 0.0  ;;  %vm2558_vm0 = vcmp.eq.s32.totalorder %v4400_v14, %v4835_v29  ;;  %vm2986_vm1 = vcmp.eq.s32.totalorder %v4400_v14, %v4841_v25 }
  0x9a   : > { %3803 = vmatprep.subr.mxu0 %v3686_v10  ;;  %v2898_v16 = vadd.f32 %v2770_v51, %v2474_v62  ;;  %v1555_v2 = vadd.f32 %v1427_v9, %v1115_v53  ;;  %v2281_v42 = vsel %vm2134_vm15, %v4819_v52, 0.0  ;;  %v2705_v44 = vsel %vm2558_vm0, %v4838_v28, 0.0 }
  0x9b   : > { %vm3410_vm4 = vcmp.eq.s32.totalorder %v4400_v14, %v4847_v40  ;;  %vm460_vm9 = vcmp.eq.s32.totalorder %v4403_v15, %v4779_v7  ;;  %vm904_vm5 = vcmp.eq.s32.totalorder %v4403_v15, %v4786_v55  ;;  %vm1344_vm6 = vcmp.eq.s32.totalorder %v4403_v15, %v4789_v20 }
  0x9c   : > { %v3326_v12 = vadd.f32 %v3198_v58, %v2898_v16  ;;  %v1979_v57 = vadd.f32 %v1851_v26, %v1555_v2  ;;  %v3133_v32 = vsel %vm2986_vm1, %v4844_v39, 0.0  ;;  %v607_v38 = vsel %vm460_vm9, %v4766_v45, 0.0 }
  0x9d   : > { %v1051_v8 = vsel %vm904_vm5, %v4556_v43, 0.0  ;;  %v1491_v41 = vsel %vm1344_vm6, %v4776_v33, 0.0  ;;  %vm1768_vm11 = vcmp.eq.s32.totalorder %v4403_v15, %v4798_v21  ;;  %vm2198_vm13 = vcmp.eq.s32.totalorder %v4403_v15, %v4809_v4 }
  0x9e   : > { %v3750_v14 = vadd.f32 %v3622_v46, %v3326_v12  ;;  %v2409_v11 = vadd.f32 %v2281_v42, %v1979_v57  ;;  %v3557_v5 = vsel %vm3410_vm4, %v4850_v0, 0.0  ;;  %v1179_v48 = vadd.f32 %v1051_v8, %v607_v38 }
  0x9f   : > { %v1915_v49 = vsel %vm1768_vm11, %v4801_v59, 0.0  ;;  %v2345_v56 = vsel %vm2198_vm13, %v4819_v52, 0.0  ;;  %vm2622_vm8 = vcmp.eq.s32.totalorder %v4403_v15, %v4835_v29  ;;  %vm3050_vm3 = vcmp.eq.s32.totalorder %v4403_v15, %v4841_v25 }
  0xa0   : > { %3874 = vmatprep.subr.mxu1 %v3750_v14  ;;  %v2833_v51 = vadd.f32 %v2705_v44, %v2409_v11  ;;  %v1619_v58 = vadd.f32 %v1491_v41, %v1179_v48  ;;  %v2769_v54 = vsel %vm2622_vm8, %v4838_v28, 0.0  ;;  %vm3474_vm12 = vcmp.eq.s32.totalorder %v4403_v15, %v4847_v40 }
  0xa1   : > { %v3197_v24 = vsel %vm3050_vm3, %v4844_v39, 0.0  ;;  %vm395_vm7 = vcmp.eq.s32.totalorder %v4408_v22, %v4585_v61  ;;  %vm839_vm10 = vcmp.eq.s32.totalorder %v4408_v22, %v4624_v19  ;;  %vm1279_vm2 = vcmp.eq.s32.totalorder %v4408_v22, %v4675_v23 }
  0xa2   : > { %v3261_v13 = vadd.f32 %v3133_v32, %v2833_v51  ;;  %v2043_v3 = vadd.f32 %v1915_v49, %v1619_v58  ;;  %v542_v10 = vsel %vm395_vm7, %v4523_v30, 0.0  ;;  %v986_v62 = vsel %vm839_vm10, %v4526_v31, 0.0 }
  0xa3   : > { %v1114_v53 = vadd.f32 %v986_v62, %v542_v10  ;;  %v1426_v15 = vsel %vm1279_vm2, %v4611_v17, 0.0  ;;  %vm1703_vm14 = vcmp.eq.s32.totalorder %v4408_v22, %v4678_v35  ;;  %vm2133_vm15 = vcmp.eq.s32.totalorder %v4408_v22, %v4664_v37 }
  0xa4   : > { %v3685_v9 = vadd.f32 %v3557_v5, %v3261_v13  ;;  %v2473_v46 = vadd.f32 %v2345_v56, %v2043_v3  ;;  %v3621_v26 = vsel %vm3474_vm12, %v4850_v0, 0.0  ;;  %v1850_v16 = vsel %vm1703_vm14, %v4614_v18, 0.0 }
  0xa5   : > { %v1554_v2 = vadd.f32 %v1426_v15, %v1114_v53  ;;  %v2280_v42 = vsel %vm2133_vm15, %v4641_v60, 0.0  ;;  %vm2557_vm0 = vcmp.eq.s32.totalorder %v4408_v22, %v4688_v50  ;;  %vm2985_vm1 = vcmp.eq.s32.totalorder %v4408_v22, %v4728_v27 }
  0xa6   : > { %3804 = vmatpush1.msra.mxu0 %v3685_v9  ;;  %v2897_v44 = vadd.f32 %v2769_v54, %v2473_v46  ;;  %v2704_v12 = vsel %vm2557_vm0, %v4681_v47, 0.0  ;;  %v3132_v57 = vsel %vm2985_vm1, %v4710_v63, 0.0  ;;  %vm3409_vm4 = vcmp.eq.s32.totalorder %v4408_v22, %v4736_v36 }
  0xa7   : > { %v1978_v32 = vadd.f32 %v1850_v16, %v1554_v2  ;;  %vm459_vm9 = vcmp.eq.s32.totalorder %v4865_v6, %v4585_v61  ;;  %vm903_vm5 = vcmp.eq.s32.totalorder %v4865_v6, %v4624_v19  ;;  %vm1343_vm6 = vcmp.eq.s32.totalorder %v4865_v6, %v4675_v23 }
  0xa8   : > { %v3325_v38 = vadd.f32 %v3197_v24, %v2897_v44  ;;  %v606_v8 = vsel %vm459_vm9, %v4523_v30, 0.0  ;;  %v1050_v41 = vsel %vm903_vm5, %v4526_v31, 0.0  ;;  %v1490_v14 = vsel %vm1343_vm6, %v4611_v17, 0.0 }
  0xa9   : > { %v2408_v11 = vadd.f32 %v2280_v42, %v1978_v32  ;;  %v1178_v5 = vadd.f32 %v1050_v41, %v606_v8  ;;  %vm1767_vm11 = vcmp.eq.s32.totalorder %v4865_v6, %v4678_v35  ;;  %vm2197_vm13 = vcmp.eq.s32.totalorder %v4865_v6, %v4664_v37 }
  0xaa   : > { %v3749_v48 = vadd.f32 %v3621_v26, %v3325_v38  ;;  %v3556_v49 = vsel %vm3409_vm4, %v4731_v34, 0.0  ;;  %v1914_v56 = vsel %vm1767_vm11, %v4614_v18, 0.0  ;;  %vm2621_vm8 = vcmp.eq.s32.totalorder %v4865_v6, %v4688_v50 }
  0xab   : > { %v2832_v51 = vadd.f32 %v2704_v12, %v2408_v11  ;;  %v1618_v58 = vadd.f32 %v1490_v14, %v1178_v5  ;;  %v2344_v54 = vsel %vm2197_vm13, %v4641_v60, 0.0  ;;  %vm3049_vm3 = vcmp.eq.s32.totalorder %v4865_v6, %v4728_v27 }
  0xac   : > { %3875 = vmatpush1.msra.mxu1 %v3749_v48  ;;  %v2768_v24 = vsel %vm2621_vm8, %v4681_v47, 0.0  ;;  %v3196_v13 = vsel %vm3049_vm3, %v4710_v63, 0.0  ;;  %vm394_vm12 = vcmp.eq.s32.totalorder %v4408_v22, %v4779_v7  ;;  %vm838_vm7 = vcmp.eq.s32.totalorder %v4408_v22, %v4786_v55 }
  0xad   : > { %v3260_v3 = vadd.f32 %v3132_v57, %v2832_v51  ;;  %v2042_v10 = vadd.f32 %v1914_v56, %v1618_v58  ;;  %vm3473_vm10 = vcmp.eq.s32.totalorder %v4865_v6, %v4736_v36  ;;  %v541_v62 = vsel %vm394_vm12, %v4766_v45, 0.0 }
  0xae   : > { %v985_v53 = vsel %vm838_vm7, %v4556_v43, 0.0  ;;  %vm1278_vm2 = vcmp.eq.s32.totalorder %v4408_v22, %v4789_v20  ;;  %vm1702_vm14 = vcmp.eq.s32.totalorder %v4408_v22, %v4798_v21  ;;  %vm2132_vm15 = vcmp.eq.s32.totalorder %v4408_v22, %v4809_v4 }
  0xaf   : > { %v3684_v15 = vadd.f32 %v3556_v49, %v3260_v3  ;;  %v2472_v9 = vadd.f32 %v2344_v54, %v2042_v10  ;;  %v1113_v46 = vadd.f32 %v985_v53, %v541_v62  ;;  %v1425_v26 = vsel %vm1278_vm2, %v4776_v33, 0.0 }
  0xb0   : > { %v3620_v16 = vsel %vm3473_vm10, %v4731_v34, 0.0  ;;  %v1849_v2 = vsel %vm1702_vm14, %v4801_v59, 0.0  ;;  %vm2556_vm0 = vcmp.eq.s32.totalorder %v4408_v22, %v4835_v29  ;;  %vm2984_vm1 = vcmp.eq.s32.totalorder %v4408_v22, %v4841_v25 }
  0xb1   : > { %3805 = vmatprep.subr.mxu0 %v3684_v15  ;;  %v2896_v42 = vadd.f32 %v2768_v24, %v2472_v9  ;;  %v1553_v44 = vadd.f32 %v1425_v26, %v1113_v46  ;;  %v2279_v12 = vsel %vm2132_vm15, %v4819_v52, 0.0  ;;  %v2703_v57 = vsel %vm2556_vm0, %v4838_v28, 0.0 }
  0xb2   : > { %vm3408_vm4 = vcmp.eq.s32.totalorder %v4408_v22, %v4847_v40  ;;  %vm458_vm9 = vcmp.eq.s32.totalorder %v4865_v6, %v4779_v7  ;;  %vm902_vm5 = vcmp.eq.s32.totalorder %v4865_v6, %v4786_v55  ;;  %vm1342_vm6 = vcmp.eq.s32.totalorder %v4865_v6, %v4789_v20 }
  0xb3   : > { %v3324_v32 = vadd.f32 %v3196_v13, %v2896_v42  ;;  %v1977_v38 = vadd.f32 %v1849_v2, %v1553_v44  ;;  %v3131_v8 = vsel %vm2984_vm1, %v4844_v39, 0.0  ;;  %v605_v41 = vsel %vm458_vm9, %v4766_v45, 0.0 }
  0xb4   : > { %v1049_v14 = vsel %vm902_vm5, %v4556_v43, 0.0  ;;  %v1489_v11 = vsel %vm1342_vm6, %v4776_v33, 0.0  ;;  %vm1766_vm11 = vcmp.eq.s32.totalorder %v4865_v6, %v4798_v21  ;;  %vm2196_vm13 = vcmp.eq.s32.totalorder %v4865_v6, %v4809_v4 }
  0xb5   : > { %v3748_v22 = vadd.f32 %v3620_v16, %v3324_v32  ;;  %v2407_v5 = vadd.f32 %v2279_v12, %v1977_v38  ;;  %v3555_v48 = vsel %vm3408_vm4, %v4850_v0, 0.0  ;;  %v1177_v49 = vadd.f32 %v1049_v14, %v605_v41 }
  0xb6   : > { %v1913_v56 = vsel %vm1766_vm11, %v4801_v59, 0.0  ;;  %vm2620_vm8 = vcmp.eq.s32.totalorder %v4865_v6, %v4835_v29  ;;  %vm3048_vm3 = vcmp.eq.s32.totalorder %v4865_v6, %v4841_v25  ;;  %vm3472_vm12 = vcmp.eq.s32.totalorder %v4865_v6, %v4847_v40 }
  0xb7   : > { %3876 = vmatprep.subr.mxu1 %v3748_v22  ;;  %v2831_v51 = vadd.f32 %v2703_v57, %v2407_v5  ;;  %v1617_v58 = vadd.f32 %v1489_v11, %v1177_v49  ;;  %v2343_v54 = vsel %vm2196_vm13, %v4819_v52, 0.0  ;;  %v2767_v24 = vsel %vm2620_vm8, %v4838_v28, 0.0 }
  0xb8   : > { %v3195_v13 = vsel %vm3048_vm3, %v4844_v39, 0.0  ;;  %v3619_v3 = vsel %vm3472_vm12, %v4850_v0, 0.0  ;;  %v5273_v10 = vadd.s32 80, %v4370_v1  ;;  %v5276_v62 = vadd.s32 336, %v4370_v1 }
  0xb9   : > { %v3259_v53 = vadd.f32 %v3131_v8, %v2831_v51  ;;  %v2041_v15 = vadd.f32 %v1913_v56, %v1617_v58  ;;  %v5279_v6 = vadd.s32 72, %v4370_v1  ;;  %v5282_v9 = vadd.s32 328, %v4370_v1 }
  0xba   : > { %vm393_vm7 = vcmp.eq.s32.totalorder %v5273_v10, %v4585_v61  ;;  %vm837_vm10 = vcmp.eq.s32.totalorder %v5273_v10, %v4624_v19  ;;  %vm1277_vm2 = vcmp.eq.s32.totalorder %v5273_v10, %v4675_v23  ;;  %vm1701_vm14 = vcmp.eq.s32.totalorder %v5273_v10, %v4678_v35 }
  0xbb   : > { %v3683_v46 = vadd.f32 %v3555_v48, %v3259_v53  ;;  %v2471_v26 = vadd.f32 %v2343_v54, %v2041_v15  ;;  %v540_v16 = vsel %vm393_vm7, %v4523_v30, 0.0  ;;  %v984_v2 = vsel %vm837_vm10, %v4526_v31, 0.0 }
  0xbc   : > { %v1112_v42 = vadd.f32 %v984_v2, %v540_v16  ;;  %v1424_v44 = vsel %vm1277_vm2, %v4611_v17, 0.0  ;;  %vm2131_vm15 = vcmp.eq.s32.totalorder %v5273_v10, %v4664_v37  ;;  %v5298_v12 = vadd.s32 64, %v4370_v1 }
  0xbd   : > { %3806 = vmatpush1.msra.mxu0 %v3683_v46  ;;  %v2895_v57 = vadd.f32 %v2767_v24, %v2471_v26  ;;  %v1848_v32 = vsel %vm1701_vm14, %v4614_v18, 0.0  ;;  %vm2555_vm0 = vcmp.eq.s32.totalorder %v5273_v10, %v4688_v50  ;;  %vm2983_vm1 = vcmp.eq.s32.totalorder %v5273_v10, %v4728_v27 }
  0xbe   : > { %v1552_v38 = vadd.f32 %v1424_v44, %v1112_v42  ;;  %v2278_v8 = vsel %vm2131_vm15, %v4641_v60, 0.0  ;;  %v2702_v41 = vsel %vm2555_vm0, %v4681_v47, 0.0  ;;  %v3130_v14 = vsel %vm2983_vm1, %v4710_v63, 0.0 }
  0xbf   : > { %v3323_v11 = vadd.f32 %v3195_v13, %v2895_v57  ;;  %vm3407_vm4 = vcmp.eq.s32.totalorder %v5273_v10, %v4736_v36  ;;  %vm457_vm9 = vcmp.eq.s32.totalorder %v5276_v62, %v4585_v61  ;;  %vm901_vm5 = vcmp.eq.s32.totalorder %v5276_v62, %v4624_v19 }
  0xc0   : > { %v1976_v22 = vadd.f32 %v1848_v32, %v1552_v38  ;;  %v604_v5 = vsel %vm457_vm9, %v4523_v30, 0.0  ;;  %v1048_v48 = vsel %vm901_vm5, %v4526_v31, 0.0  ;;  %vm1341_vm6 = vcmp.eq.s32.totalorder %v5276_v62, %v4675_v23 }
  0xc1   : > { %v3747_v49 = vadd.f32 %v3619_v3, %v3323_v11  ;;  %v1176_v56 = vadd.f32 %v1048_v48, %v604_v5  ;;  %v1488_v51 = vsel %vm1341_vm6, %v4611_v17, 0.0  ;;  %vm1765_vm11 = vcmp.eq.s32.totalorder %v5276_v62, %v4678_v35 }
  0xc2   : > { %v2406_v58 = vadd.f32 %v2278_v8, %v1976_v22  ;;  %v1912_v54 = vsel %vm1765_vm11, %v4614_v18, 0.0  ;;  %vm2195_vm13 = vcmp.eq.s32.totalorder %v5276_v62, %v4664_v37  ;;  %vm2619_vm8 = vcmp.eq.s32.totalorder %v5276_v62, %v4688_v50 }
  0xc3   : > { %3877 = vmatpush1.msra.mxu1 %v3747_v49  ;;  %v3554_v24 = vsel %vm3407_vm4, %v4731_v34, 0.0  ;;  %v1616_v13 = vadd.f32 %v1488_v51, %v1176_v56  ;;  %v2342_v3 = vsel %vm2195_vm13, %v4641_v60, 0.0  ;;  %vm3047_vm3 = vcmp.eq.s32.totalorder %v5276_v62, %v4728_v27 }
  0xc4   : > { %v2830_v53 = vadd.f32 %v2702_v41, %v2406_v58  ;;  %v2766_v15 = vsel %vm2619_vm8, %v4681_v47, 0.0  ;;  %v3194_v46 = vsel %vm3047_vm3, %v4710_v63, 0.0  ;;  %vm392_vm12 = vcmp.eq.s32.totalorder %v5273_v10, %v4779_v7 }
  0xc5   : > { %v2040_v26 = vadd.f32 %v1912_v54, %v1616_v13  ;;  %vm3471_vm7 = vcmp.eq.s32.totalorder %v5276_v62, %v4736_v36  ;;  %v539_v16 = vsel %vm392_vm12, %v4766_v45, 0.0  ;;  %vm836_vm10 = vcmp.eq.s32.totalorder %v5273_v10, %v4786_v55 }
  0xc6   : > { %v3258_v2 = vadd.f32 %v3130_v14, %v2830_v53  ;;  %v983_v42 = vsel %vm836_vm10, %v4556_v43, 0.0  ;;  %vm1276_vm2 = vcmp.eq.s32.totalorder %v5273_v10, %v4789_v20  ;;  %vm1700_vm14 = vcmp.eq.s32.totalorder %v5273_v10, %v4798_v21 }
  0xc7   : > { %v2470_v44 = vadd.f32 %v2342_v3, %v2040_v26  ;;  %v1111_v57 = vadd.f32 %v983_v42, %v539_v16  ;;  %v1423_v32 = vsel %vm1276_vm2, %v4776_v33, 0.0  ;;  %v1847_v38 = vsel %vm1700_vm14, %v4801_v59, 0.0 }
  0xc8   : > { %v3682_v8 = vadd.f32 %v3554_v24, %v3258_v2  ;;  %vm2130_vm15 = vcmp.eq.s32.totalorder %v5273_v10, %v4809_v4  ;;  %vm2554_vm0 = vcmp.eq.s32.totalorder %v5273_v10, %v4835_v29  ;;  %vm2982_vm1 = vcmp.eq.s32.totalorder %v5273_v10, %v4841_v25 }
  0xc9   : > { %v2894_v41 = vadd.f32 %v2766_v15, %v2470_v44  ;;  %v3618_v14 = vsel %vm3471_vm7, %v4731_v34, 0.0  ;;  %v1551_v11 = vadd.f32 %v1423_v32, %v1111_v57  ;;  %v2277_v22 = vsel %vm2130_vm15, %v4819_v52, 0.0 }
  0xca   : > { %3807 = vmatprep.subr.mxu0 %v3682_v8  ;;  %v2701_v5 = vsel %vm2554_vm0, %v4838_v28, 0.0  ;;  %v3129_v48 = vsel %vm2982_vm1, %v4844_v39, 0.0  ;;  %vm456_vm4 = vcmp.eq.s32.totalorder %v5276_v62, %v4779_v7  ;;  %vm900_vm9 = vcmp.eq.s32.totalorder %v5276_v62, %v4786_v55 }
  0xcb   : > { %v3322_v49 = vadd.f32 %v3194_v46, %v2894_v41  ;;  %v1975_v56 = vadd.f32 %v1847_v38, %v1551_v11  ;;  %vm3406_vm5 = vcmp.eq.s32.totalorder %v5273_v10, %v4847_v40  ;;  %v603_v51 = vsel %vm456_vm4, %v4766_v45, 0.0 }
  0xcc   : > { %v1047_v58 = vsel %vm900_vm9, %v4556_v43, 0.0  ;;  %vm1340_vm6 = vcmp.eq.s32.totalorder %v5276_v62, %v4789_v20  ;;  %vm1764_vm11 = vcmp.eq.s32.totalorder %v5276_v62, %v4798_v21  ;;  %vm2194_vm13 = vcmp.eq.s32.totalorder %v5276_v62, %v4809_v4 }
  0xcd   : > { %v3746_v54 = vadd.f32 %v3618_v14, %v3322_v49  ;;  %v2405_v24 = vadd.f32 %v2277_v22, %v1975_v56  ;;  %v1175_v13 = vadd.f32 %v1047_v58, %v603_v51  ;;  %v1487_v3 = vsel %vm1340_vm6, %v4776_v33, 0.0 }
  0xce   : > { %v3553_v10 = vsel %vm3406_vm5, %v4850_v0, 0.0  ;;  %v1911_v53 = vsel %vm1764_vm11, %v4801_v59, 0.0  ;;  %vm2618_vm8 = vcmp.eq.s32.totalorder %v5276_v62, %v4835_v29  ;;  %vm3046_vm3 = vcmp.eq.s32.totalorder %v5276_v62, %v4841_v25 }
  0xcf   : > { %3878 = vmatprep.subr.mxu1 %v3746_v54  ;;  %v2829_v15 = vadd.f32 %v2701_v5, %v2405_v24  ;;  %v1615_v46 = vadd.f32 %v1487_v3, %v1175_v13  ;;  %v2341_v26 = vsel %vm2194_vm13, %v4819_v52, 0.0  ;;  %v2765_v16 = vsel %vm2618_vm8, %v4838_v28, 0.0 }
  0xd0   : > { %vm3470_vm12 = vcmp.eq.s32.totalorder %v5276_v62, %v4847_v40  ;;  %vm391_vm7 = vcmp.eq.s32.totalorder %v5279_v6, %v4585_v61  ;;  %vm835_vm10 = vcmp.eq.s32.totalorder %v5279_v6, %v4624_v19  ;;  %vm1275_vm2 = vcmp.eq.s32.totalorder %v5279_v6, %v4675_v23 }
  0xd1   : > { %v3257_v2 = vadd.f32 %v3129_v48, %v2829_v15  ;;  %v2039_v42 = vadd.f32 %v1911_v53, %v1615_v46  ;;  %v3193_v44 = vsel %vm3046_vm3, %v4844_v39, 0.0  ;;  %v538_v57 = vsel %vm391_vm7, %v4523_v30, 0.0 }
  0xd2   : > { %v982_v32 = vsel %vm835_vm10, %v4526_v31, 0.0  ;;  %v1422_v38 = vsel %vm1275_vm2, %v4611_v17, 0.0  ;;  %vm1699_vm14 = vcmp.eq.s32.totalorder %v5279_v6, %v4678_v35  ;;  %vm2129_vm15 = vcmp.eq.s32.totalorder %v5279_v6, %v4664_v37 }
  0xd3   : > { %v3681_v62 = vadd.f32 %v3553_v10, %v3257_v2  ;;  %v2469_v8 = vadd.f32 %v2341_v26, %v2039_v42  ;;  %v3617_v41 = vsel %vm3470_vm12, %v4850_v0, 0.0  ;;  %v1110_v14 = vadd.f32 %v982_v32, %v538_v57 }
  0xd4   : > { %v1846_v11 = vsel %vm1699_vm14, %v4614_v18, 0.0  ;;  %v2276_v22 = vsel %vm2129_vm15, %v4641_v60, 0.0  ;;  %vm2553_vm0 = vcmp.eq.s32.totalorder %v5279_v6, %v4688_v50  ;;  %vm2981_vm1 = vcmp.eq.s32.totalorder %v5279_v6, %v4728_v27 }
  0xd5   : > { %3808 = vmatpush1.msra.mxu0 %v3681_v62  ;;  %v2893_v5 = vadd.f32 %v2765_v16, %v2469_v8  ;;  %v1550_v48 = vadd.f32 %v1422_v38, %v1110_v14  ;;  %v2700_v49 = vsel %vm2553_vm0, %v4681_v47, 0.0  ;;  %vm3405_vm4 = vcmp.eq.s32.totalorder %v5279_v6, %v4736_v36 }
  0xd6   : > { %v3128_v56 = vsel %vm2981_vm1, %v4710_v63, 0.0  ;;  %vm455_vm9 = vcmp.eq.s32.totalorder %v5282_v9, %v4585_v61  ;;  %vm899_vm5 = vcmp.eq.s32.totalorder %v5282_v9, %v4624_v19  ;;  %vm1339_vm6 = vcmp.eq.s32.totalorder %v5282_v9, %v4675_v23 }
  0xd7   : > { %v3321_v51 = vadd.f32 %v3193_v44, %v2893_v5  ;;  %v1974_v58 = vadd.f32 %v1846_v11, %v1550_v48  ;;  %v602_v54 = vsel %vm455_vm9, %v4523_v30, 0.0  ;;  %v1046_v24 = vsel %vm899_vm5, %v4526_v31, 0.0 }
  0xd8   : > { %v1174_v13 = vadd.f32 %v1046_v24, %v602_v54  ;;  %v1486_v3 = vsel %vm1339_vm6, %v4611_v17, 0.0  ;;  %vm1763_vm11 = vcmp.eq.s32.totalorder %v5282_v9, %v4678_v35  ;;  %vm2193_vm13 = vcmp.eq.s32.totalorder %v5282_v9, %v4664_v37 }
  0xd9   : > { %v3745_v10 = vadd.f32 %v3617_v41, %v3321_v51  ;;  %v2404_v53 = vadd.f32 %v2276_v22, %v1974_v58  ;;  %v3552_v15 = vsel %vm3405_vm4, %v4731_v34, 0.0  ;;  %v1910_v46 = vsel %vm1763_vm11, %v4614_v18, 0.0 }
  0xda   : > { %v1614_v26 = vadd.f32 %v1486_v3, %v1174_v13  ;;  %v2340_v16 = vsel %vm2193_vm13, %v4641_v60, 0.0  ;;  %vm2617_vm8 = vcmp.eq.s32.totalorder %v5282_v9, %v4688_v50  ;;  %vm3045_vm3 = vcmp.eq.s32.totalorder %v5282_v9, %v4728_v27 }
  0xdb   : > { %3879 = vmatpush1.msra.mxu1 %v3745_v10  ;;  %v2828_v2 = vadd.f32 %v2700_v49, %v2404_v53  ;;  %v2764_v42 = vsel %vm2617_vm8, %v4681_v47, 0.0  ;;  %v3192_v44 = vsel %vm3045_vm3, %v4710_v63, 0.0  ;;  %vm3469_vm12 = vcmp.eq.s32.totalorder %v5282_v9, %v4736_v36 }
  0xdc   : > { %v2038_v57 = vadd.f32 %v1910_v46, %v1614_v26  ;;  %vm390_vm7 = vcmp.eq.s32.totalorder %v5279_v6, %v4779_v7  ;;  %vm834_vm10 = vcmp.eq.s32.totalorder %v5279_v6, %v4786_v55  ;;  %vm1274_vm2 = vcmp.eq.s32.totalorder %v5279_v6, %v4789_v20 }
  0xdd   : > { %v3256_v32 = vadd.f32 %v3128_v56, %v2828_v2  ;;  %v537_v38 = vsel %vm390_vm7, %v4766_v45, 0.0  ;;  %v981_v62 = vsel %vm834_vm10, %v4556_v43, 0.0  ;;  %v1421_v8 = vsel %vm1274_vm2, %v4776_v33, 0.0 }
  0xde   : > { %v2468_v41 = vadd.f32 %v2340_v16, %v2038_v57  ;;  %v1109_v14 = vadd.f32 %v981_v62, %v537_v38  ;;  %vm1698_vm14 = vcmp.eq.s32.totalorder %v5279_v6, %v4798_v21  ;;  %vm2128_vm15 = vcmp.eq.s32.totalorder %v5279_v6, %v4809_v4 }
  0xdf   : > { %v3680_v11 = vadd.f32 %v3552_v15, %v3256_v32  ;;  %v3616_v22 = vsel %vm3469_vm12, %v4731_v34, 0.0  ;;  %v1845_v5 = vsel %vm1698_vm14, %v4801_v59, 0.0  ;;  %vm2552_vm0 = vcmp.eq.s32.totalorder %v5279_v6, %v4835_v29 }
  0xe0   : > { %v2892_v48 = vadd.f32 %v2764_v42, %v2468_v41  ;;  %v1549_v49 = vadd.f32 %v1421_v8, %v1109_v14  ;;  %v2275_v56 = vsel %vm2128_vm15, %v4819_v52, 0.0  ;;  %vm2980_vm1 = vcmp.eq.s32.totalorder %v5279_v6, %v4841_v25 }
  0xe1   : > { %3809 = vmatprep.subr.mxu0 %v3680_v11  ;;  %v2699_v51 = vsel %vm2552_vm0, %v4838_v28, 0.0  ;;  %v3127_v58 = vsel %vm2980_vm1, %v4844_v39, 0.0  ;;  %vm454_vm4 = vcmp.eq.s32.totalorder %v5282_v9, %v4779_v7  ;;  %vm898_vm9 = vcmp.eq.s32.totalorder %v5282_v9, %v4786_v55 }
  0xe2   : > { %v3320_v54 = vadd.f32 %v3192_v44, %v2892_v48  ;;  %v1973_v24 = vadd.f32 %v1845_v5, %v1549_v49  ;;  %vm3404_vm5 = vcmp.eq.s32.totalorder %v5279_v6, %v4847_v40  ;;  %v601_v13 = vsel %vm454_vm4, %v4766_v45, 0.0 }
  0xe3   : > { %v1045_v3 = vsel %vm898_vm9, %v4556_v43, 0.0  ;;  %vm1338_vm6 = vcmp.eq.s32.totalorder %v5282_v9, %v4789_v20  ;;  %vm1762_vm11 = vcmp.eq.s32.totalorder %v5282_v9, %v4798_v21  ;;  %vm2192_vm13 = vcmp.eq.s32.totalorder %v5282_v9, %v4809_v4 }
  0xe4   : > { %v3744_v10 = vadd.f32 %v3616_v22, %v3320_v54  ;;  %v2403_v53 = vadd.f32 %v2275_v56, %v1973_v24  ;;  %v1173_v15 = vadd.f32 %v1045_v3, %v601_v13  ;;  %v1485_v46 = vsel %vm1338_vm6, %v4776_v33, 0.0 }
  0xe5   : > { %v3551_v6 = vsel %vm3404_vm5, %v4850_v0, 0.0  ;;  %v1909_v26 = vsel %vm1762_vm11, %v4801_v59, 0.0  ;;  %vm2616_vm8 = vcmp.eq.s32.totalorder %v5282_v9, %v4835_v29  ;;  %vm3044_vm3 = vcmp.eq.s32.totalorder %v5282_v9, %v4841_v25 }
  0xe6   : > { %3880 = vmatprep.subr.mxu1 %v3744_v10  ;;  %v2827_v16 = vadd.f32 %v2699_v51, %v2403_v53  ;;  %v1613_v2 = vadd.f32 %v1485_v46, %v1173_v15  ;;  %v2339_v42 = vsel %vm2192_vm13, %v4819_v52, 0.0  ;;  %v2763_v44 = vsel %vm2616_vm8, %v4838_v28, 0.0 }
  0xe7   : > { %vm3468_vm12 = vcmp.eq.s32.totalorder %v5282_v9, %v4847_v40  ;;  %vm389_vm7 = vcmp.eq.s32.totalorder %v5298_v12, %v4585_v61  ;;  %vm833_vm10 = vcmp.eq.s32.totalorder %v5298_v12, %v4624_v19  ;;  %vm1273_vm2 = vcmp.eq.s32.totalorder %v5298_v12, %v4675_v23 }
  0xe8   : > { %v3255_v57 = vadd.f32 %v3127_v58, %v2827_v16  ;;  %v2037_v32 = vadd.f32 %v1909_v26, %v1613_v2  ;;  %v3191_v38 = vsel %vm3044_vm3, %v4844_v39, 0.0  ;;  %v536_v62 = vsel %vm389_vm7, %v4523_v30, 0.0 }
  0xe9   : > { %v980_v8 = vsel %vm833_vm10, %v4526_v31, 0.0  ;;  %v1420_v41 = vsel %vm1273_vm2, %v4611_v17, 0.0  ;;  %vm1697_vm14 = vcmp.eq.s32.totalorder %v5298_v12, %v4678_v35  ;;  %vm2127_vm15 = vcmp.eq.s32.totalorder %v5298_v12, %v4664_v37 }
  0xea   : > { %v3679_v9 = vadd.f32 %v3551_v6, %v3255_v57  ;;  %v2467_v14 = vadd.f32 %v2339_v42, %v2037_v32  ;;  %v3615_v11 = vsel %vm3468_vm12, %v4850_v0, 0.0  ;;  %v1108_v22 = vadd.f32 %v980_v8, %v536_v62 }
  0xeb   : > { %v1844_v5 = vsel %vm1697_vm14, %v4614_v18, 0.0  ;;  %vm2551_vm0 = vcmp.eq.s32.totalorder %v5298_v12, %v4688_v50  ;;  %vm2979_vm1 = vcmp.eq.s32.totalorder %v5298_v12, %v4728_v27  ;;  %vm3403_vm4 = vcmp.eq.s32.totalorder %v5298_v12, %v4736_v36 }
  0xec   : > { %3810 = vmatpush1.msra.mxu0 %v3679_v9  ;;  %v2891_v48 = vadd.f32 %v2763_v44, %v2467_v14  ;;  %v1548_v49 = vadd.f32 %v1420_v41, %v1108_v22  ;;  %v2274_v56 = vsel %vm2127_vm15, %v4641_v60, 0.0  ;;  %v2698_v51 = vsel %vm2551_vm0, %v4681_v47, 0.0 }
  0xed   : > { %v3126_v58 = vsel %vm2979_vm1, %v4710_v63, 0.0  ;;  %v3550_v54 = vsel %vm3403_vm4, %v4731_v34, 0.0  ;;  %v5510_v24 = vadd.s32 320, %v4370_v1  ;;  %vm388_vm9 = vcmp.eq.s32.totalorder %v5298_v12, %v4779_v7 }
  0xee   : > { %v3319_v13 = vadd.f32 %v3191_v38, %v2891_v48  ;;  %v1972_v3 = vadd.f32 %v1844_v5, %v1548_v49  ;;  %v535_v10 = vsel %vm388_vm9, %v4766_v45, 0.0  ;;  %vm832_vm5 = vcmp.eq.s32.totalorder %v5298_v12, %v4786_v55 }
  0xef   : > { %vm453_vm6 = vcmp.eq.s32.totalorder %v5510_v24, %v4585_v61  ;;  %vm897_vm11 = vcmp.eq.s32.totalorder %v5510_v24, %v4624_v19  ;;  %vm1337_vm13 = vcmp.eq.s32.totalorder %v5510_v24, %v4675_v23  ;;  %vm1761_vm8 = vcmp.eq.s32.totalorder %v5510_v24, %v4678_v35 }
  0xf0   : > { %v3743_v53 = vadd.f32 %v3615_v11, %v3319_v13  ;;  %v2402_v15 = vadd.f32 %v2274_v56, %v1972_v3  ;;  %v600_v46 = vsel %vm453_vm6, %v4523_v30, 0.0  ;;  %v1044_v6 = vsel %vm897_vm11, %v4526_v31, 0.0 }
  0xf1   : > { %v1172_v26 = vadd.f32 %v1044_v6, %v600_v46  ;;  %v1484_v16 = vsel %vm1337_vm13, %v4611_v17, 0.0  ;;  %vm2191_vm3 = vcmp.eq.s32.totalorder %v5510_v24, %v4664_v37  ;;  %v979_v2 = vsel %vm832_vm5, %v4556_v43, 0.0 }
  0xf2   : > { %3881 = vmatpush1.msra.mxu1 %v3743_v53  ;;  %v2826_v42 = vadd.f32 %v2698_v51, %v2402_v15  ;;  %v1908_v44 = vsel %vm1761_vm8, %v4614_v18, 0.0  ;;  %vm2615_vm12 = vcmp.eq.s32.totalorder %v5510_v24, %v4688_v50  ;;  %vm3043_vm7 = vcmp.eq.s32.totalorder %v5510_v24, %v4728_v27 }
  0xf3   : > { %v1612_v57 = vadd.f32 %v1484_v16, %v1172_v26  ;;  %v2338_v32 = vsel %vm2191_vm3, %v4641_v60, 0.0  ;;  %v2762_v38 = vsel %vm2615_vm12, %v4681_v47, 0.0  ;;  %vm3467_vm10 = vcmp.eq.s32.totalorder %v5510_v24, %v4736_v36 }
  0xf4   : > { %v3254_v62 = vadd.f32 %v3126_v58, %v2826_v42  ;;  %v3190_v8 = vsel %vm3043_vm7, %v4710_v63, 0.0  ;;  %v1107_v41 = vadd.f32 %v979_v2, %v535_v10  ;;  %vm1272_vm2 = vcmp.eq.s32.totalorder %v5298_v12, %v4789_v20 }
  0xf5   : > { %v2036_v9 = vadd.f32 %v1908_v44, %v1612_v57  ;;  %v1419_v14 = vsel %vm1272_vm2, %v4776_v33, 0.0  ;;  %vm1696_vm14 = vcmp.eq.s32.totalorder %v5298_v12, %v4798_v21  ;;  %vm2126_vm15 = vcmp.eq.s32.totalorder %v5298_v12, %v4809_v4 }
  0xf6   : > { %v3678_v11 = vadd.f32 %v3550_v54, %v3254_v62  ;;  %v3614_v22 = vsel %vm3467_vm10, %v4731_v34, 0.0  ;;  %v1547_v5 = vadd.f32 %v1419_v14, %v1107_v41  ;;  %v1843_v48 = vsel %vm1696_vm14, %v4801_v59, 0.0 }
  0xf7   : > { %v2466_v49 = vadd.f32 %v2338_v32, %v2036_v9  ;;  %v2273_v56 = vsel %vm2126_vm15, %v4819_v52, 0.0  ;;  %vm2550_vm0 = vcmp.eq.s32.totalorder %v5298_v12, %v4835_v29  ;;  %vm2978_vm1 = vcmp.eq.s32.totalorder %v5298_v12, %v4841_v25 }
  0xf8   : > { %3811 = vmatprep.subr.mxu0 %v3678_v11  ;;  %v1971_v51 = vadd.f32 %v1843_v48, %v1547_v5  ;;  %v2697_v58 = vsel %vm2550_vm0, %v4838_v28, 0.0  ;;  %v3125_v54 = vsel %vm2978_vm1, %v4844_v39, 0.0  ;;  %vm3402_vm4 = vcmp.eq.s32.totalorder %v5298_v12, %v4847_v40 }
  0xf9   : > { %v2890_v13 = vadd.f32 %v2762_v38, %v2466_v49  ;;  %vm452_vm9 = vcmp.eq.s32.totalorder %v5510_v24, %v4779_v7  ;;  %vm896_vm5 = vcmp.eq.s32.totalorder %v5510_v24, %v4786_v55  ;;  %vm1336_vm6 = vcmp.eq.s32.totalorder %v5510_v24, %v4789_v20 }
  0xfa   : > { %v2401_v3 = vadd.f32 %v2273_v56, %v1971_v51  ;;  %v599_v10 = vsel %vm452_vm9, %v4766_v45, 0.0  ;;  %v1043_v53 = vsel %vm896_vm5, %v4556_v43, 0.0  ;;  %v1483_v15 = vsel %vm1336_vm6, %v4776_v33, 0.0 }
  0xfb   : > { %v3318_v46 = vadd.f32 %v3190_v8, %v2890_v13  ;;  %v1171_v6 = vadd.f32 %v1043_v53, %v599_v10  ;;  %vm1760_vm11 = vcmp.eq.s32.totalorder %v5510_v24, %v4798_v21  ;;  %vm2190_vm13 = vcmp.eq.s32.totalorder %v5510_v24, %v4809_v4 }
  0xfc   : > { %v2825_v12 = vadd.f32 %v2697_v58, %v2401_v3  ;;  %v3549_v26 = vsel %vm3402_vm4, %v4850_v0, 0.0  ;;  %v1907_v16 = vsel %vm1760_vm11, %v4801_v59, 0.0  ;;  %vm2614_vm8 = vcmp.eq.s32.totalorder %v5510_v24, %v4835_v29 }
  0xfd   : > { %v3742_v2 = vadd.f32 %v3614_v22, %v3318_v46  ;;  %v1611_v42 = vadd.f32 %v1483_v15, %v1171_v6  ;;  %v2337_v44 = vsel %vm2190_vm13, %v4819_v52, 0.0  ;;  %vm3042_vm3 = vcmp.eq.s32.totalorder %v5510_v24, %v4841_v25 }
  0xfe   : > { %v3253_v57 = vadd.f32 %v3125_v54, %v2825_v12  ;;  %v2761_v32 = vsel %vm2614_vm8, %v4838_v28, 0.0  ;;  %vm3466_vm12 = vcmp.eq.s32.totalorder %v5510_v24, %v4847_v40  ;;  %v5583_v38 = vadd.s32 56, %v4370_v1 }
  0xff   : > { %3882 = vmatprep.subr.mxu1 %v3742_v2  ;;  %v2035_v62 = vadd.f32 %v1907_v16, %v1611_v42  ;;  %v3189_v8 = vsel %vm3042_vm3, %v4844_v39, 0.0  ;;  %v3613_v41 = vsel %vm3466_vm12, %v4850_v0, 0.0  ;;  %v5588_v9 = vadd.s32 312, %v4370_v1 }
 0x100   : > { %v3677_v14 = vadd.f32 %v3549_v26, %v3253_v57  ;;  %vm387_vm7 = vcmp.eq.s32.totalorder %v5583_v38, %v4585_v61  ;;  %vm831_vm10 = vcmp.eq.s32.totalorder %v5583_v38, %v4624_v19  ;;  %vm1271_vm2 = vcmp.eq.s32.totalorder %v5583_v38, %v4675_v23 }
 0x101   : > { %v2465_v24 = vadd.f32 %v2337_v44, %v2035_v62  ;;  %v534_v11 = vsel %vm387_vm7, %v4523_v30, 0.0  ;;  %v978_v22 = vsel %vm831_vm10, %v4526_v31, 0.0  ;;  %v1418_v5 = vsel %vm1271_vm2, %v4611_v17, 0.0 }
 0x102   : > { %3812 = vmatpush1.msra.mxu0 %v3677_v14  ;;  %v1106_v48 = vadd.f32 %v978_v22, %v534_v11  ;;  %vm1695_vm14 = vcmp.eq.s32.totalorder %v5583_v38, %v4678_v35  ;;  %vm2125_vm15 = vcmp.eq.s32.totalorder %v5583_v38, %v4664_v37  ;;  %vm2549_vm0 = vcmp.eq.s32.totalorder %v5583_v38, %v4688_v50 }
 0x103   : > { %v2889_v49 = vadd.f32 %v2761_v32, %v2465_v24  ;;  %v1842_v56 = vsel %vm1695_vm14, %v4614_v18, 0.0  ;;  %v2272_v51 = vsel %vm2125_vm15, %v4641_v60, 0.0  ;;  %v5608_v58 = vadd.s32 48, %v4370_v1 }
 0x104   : > { %v1546_v54 = vadd.f32 %v1418_v5, %v1106_v48  ;;  %vm2977_vm1 = vcmp.eq.s32.totalorder %v5583_v38, %v4728_v27  ;;  %vm3401_vm4 = vcmp.eq.s32.totalorder %v5583_v38, %v4736_v36  ;;  %vm451_vm9 = vcmp.eq.s32.totalorder %v5588_v9, %v4585_v61 }
 0x105   : > { %v3317_v13 = vadd.f32 %v3189_v8, %v2889_v49  ;;  %v2696_v3 = vsel %vm2549_vm0, %v4681_v47, 0.0  ;;  %v3124_v10 = vsel %vm2977_vm1, %v4710_v63, 0.0  ;;  %v598_v53 = vsel %vm451_vm9, %v4523_v30, 0.0 }
 0x106   : > { %v1970_v15 = vadd.f32 %v1842_v56, %v1546_v54  ;;  %vm895_vm5 = vcmp.eq.s32.totalorder %v5588_v9, %v4624_v19  ;;  %vm1335_vm6 = vcmp.eq.s32.totalorder %v5588_v9, %v4675_v23  ;;  %vm1759_vm11 = vcmp.eq.s32.totalorder %v5588_v9, %v4678_v35 }
 0x107   : > { %v3741_v46 = vadd.f32 %v3613_v41, %v3317_v13  ;;  %v3548_v6 = vsel %vm3401_vm4, %v4731_v34, 0.0  ;;  %v1042_v12 = vsel %vm895_vm5, %v4526_v31, 0.0  ;;  %v1482_v26 = vsel %vm1335_vm6, %v4611_v17, 0.0 }
 0x108   : > { %v2400_v16 = vadd.f32 %v2272_v51, %v1970_v15  ;;  %v1170_v2 = vadd.f32 %v1042_v12, %v598_v53  ;;  %vm2189_vm13 = vcmp.eq.s32.totalorder %v5588_v9, %v4664_v37  ;;  %vm2613_vm8 = vcmp.eq.s32.totalorder %v5588_v9, %v4688_v50 }
 0x109   : > { %3883 = vmatpush1.msra.mxu1 %v3741_v46  ;;  %v1906_v42 = vsel %vm1759_vm11, %v4614_v18, 0.0  ;;  %v2336_v44 = vsel %vm2189_vm13, %v4641_v60, 0.0  ;;  %v2760_v57 = vsel %vm2613_vm8, %v4681_v47, 0.0  ;;  %vm3041_vm3 = vcmp.eq.s32.totalorder %v5588_v9, %v4728_v27 }
 0x10a   : > { %v2824_v32 = vadd.f32 %v2696_v3, %v2400_v16  ;;  %v1610_v62 = vadd.f32 %v1482_v26, %v1170_v2  ;;  %v3188_v8 = vsel %vm3041_vm3, %v4710_v63, 0.0  ;;  %vm3465_vm12 = vcmp.eq.s32.totalorder %v5588_v9, %v4736_v36 }
 0x10b   : > { %vm386_vm7 = vcmp.eq.s32.totalorder %v5583_v38, %v4779_v7  ;;  %vm830_vm10 = vcmp.eq.s32.totalorder %v5583_v38, %v4786_v55  ;;  %vm1270_vm2 = vcmp.eq.s32.totalorder %v5583_v38, %v4789_v20  ;;  %vm1694_vm14 = vcmp.eq.s32.totalorder %v5583_v38, %v4798_v21 }
 0x10c   : > { %v3252_v41 = vadd.f32 %v3124_v10, %v2824_v32  ;;  %v2034_v14 = vadd.f32 %v1906_v42, %v1610_v62  ;;  %v533_v24 = vsel %vm386_vm7, %v4766_v45, 0.0  ;;  %v977_v11 = vsel %vm830_vm10, %v4556_v43, 0.0 }
 0x10d   : > { %v3612_v22 = vsel %vm3465_vm12, %v4731_v34, 0.0  ;;  %v1105_v5 = vadd.f32 %v977_v11, %v533_v24  ;;  %v1417_v48 = vsel %vm1270_vm2, %v4776_v33, 0.0  ;;  %vm2124_vm15 = vcmp.eq.s32.totalorder %v5583_v38, %v4809_v4 }
 0x10e   : > { %v3676_v49 = vadd.f32 %v3548_v6, %v3252_v41  ;;  %v2464_v56 = vadd.f32 %v2336_v44, %v2034_v14  ;;  %v1841_v51 = vsel %vm1694_vm14, %v4801_v59, 0.0  ;;  %vm2548_vm0 = vcmp.eq.s32.totalorder %v5583_v38, %v4835_v29 }
 0x10f   : > { %v1545_v54 = vadd.f32 %v1417_v48, %v1105_v5  ;;  %v2271_v13 = vsel %vm2124_vm15, %v4819_v52, 0.0  ;;  %v2695_v3 = vsel %vm2548_vm0, %v4838_v28, 0.0  ;;  %vm2976_vm1 = vcmp.eq.s32.totalorder %v5583_v38, %v4841_v25 }
 0x110   : > { %3813 = vmatprep.subr.mxu0 %v3676_v49  ;;  %v2888_v10 = vadd.f32 %v2760_v57, %v2464_v56  ;;  %v3123_v53 = vsel %vm2976_vm1, %v4844_v39, 0.0  ;;  %vm3400_vm4 = vcmp.eq.s32.totalorder %v5583_v38, %v4847_v40  ;;  %vm450_vm9 = vcmp.eq.s32.totalorder %v5588_v9, %v4779_v7 }
 0x111   : > { %v1969_v15 = vadd.f32 %v1841_v51, %v1545_v54  ;;  %v597_v46 = vsel %vm450_vm9, %v4766_v45, 0.0  ;;  %vm894_vm5 = vcmp.eq.s32.totalorder %v5588_v9, %v4786_v55  ;;  %vm1334_vm6 = vcmp.eq.s32.totalorder %v5588_v9, %v4789_v20 }
 0x112   : > { %v3316_v6 = vadd.f32 %v3188_v8, %v2888_v10  ;;  %v1041_v12 = vsel %vm894_vm5, %v4556_v43, 0.0  ;;  %v1481_v26 = vsel %vm1334_vm6, %v4776_v33, 0.0  ;;  %vm1758_vm11 = vcmp.eq.s32.totalorder %v5588_v9, %v4798_v21 }
 0x113   : > { %v2399_v38 = vadd.f32 %v2271_v13, %v1969_v15  ;;  %v3547_v16 = vsel %vm3400_vm4, %v4850_v0, 0.0  ;;  %v1169_v2 = vadd.f32 %v1041_v12, %v597_v46  ;;  %vm2188_vm13 = vcmp.eq.s32.totalorder %v5588_v9, %v4809_v4 }
 0x114   : > { %v3740_v42 = vadd.f32 %v3612_v22, %v3316_v6  ;;  %v1905_v44 = vsel %vm1758_vm11, %v4801_v59, 0.0  ;;  %vm2612_vm8 = vcmp.eq.s32.totalorder %v5588_v9, %v4835_v29  ;;  %vm3040_vm3 = vcmp.eq.s32.totalorder %v5588_v9, %v4841_v25 }
 0x115   : > { %v2823_v57 = vadd.f32 %v2695_v3, %v2399_v38  ;;  %v1609_v32 = vadd.f32 %v1481_v26, %v1169_v2  ;;  %v2335_v62 = vsel %vm2188_vm13, %v4819_v52, 0.0  ;;  %v2759_v8 = vsel %vm2612_vm8, %v4838_v28, 0.0 }
 0x116   : > { %3884 = vmatprep.subr.mxu1 %v3740_v42  ;;  %vm3464_vm12 = vcmp.eq.s32.totalorder %v5588_v9, %v4847_v40  ;;  %vm385_vm7 = vcmp.eq.s32.totalorder %v5608_v58, %v4585_v61  ;;  %vm829_vm10 = vcmp.eq.s32.totalorder %v5608_v58, %v4624_v19  ;;  %vm1269_vm2 = vcmp.eq.s32.totalorder %v5608_v58, %v4675_v23 }
 0x117   : > { %v3251_v41 = vadd.f32 %v3123_v53, %v2823_v57  ;;  %v2033_v14 = vadd.f32 %v1905_v44, %v1609_v32  ;;  %v3187_v24 = vsel %vm3040_vm3, %v4844_v39, 0.0  ;;  %v532_v11 = vsel %vm385_vm7, %v4523_v30, 0.0 }
 0x118   : > { %v976_v22 = vsel %vm829_vm10, %v4526_v31, 0.0  ;;  %v1416_v5 = vsel %vm1269_vm2, %v4611_v17, 0.0  ;;  %vm1693_vm14 = vcmp.eq.s32.totalorder %v5608_v58, %v4678_v35  ;;  %vm2123_vm15 = vcmp.eq.s32.totalorder %v5608_v58, %v4664_v37 }
 0x119   : > { %v3675_v9 = vadd.f32 %v3547_v16, %v3251_v41  ;;  %v2463_v48 = vadd.f32 %v2335_v62, %v2033_v14  ;;  %v3611_v49 = vsel %vm3464_vm12, %v4850_v0, 0.0  ;;  %v1104_v56 = vadd.f32 %v976_v22, %v532_v11 }
 0x11a   : > { %v1840_v51 = vsel %vm1693_vm14, %v4614_v18, 0.0  ;;  %vm2547_vm0 = vcmp.eq.s32.totalorder %v5608_v58, %v4688_v50  ;;  %vm2975_vm1 = vcmp.eq.s32.totalorder %v5608_v58, %v4728_v27  ;;  %vm3399_vm4 = vcmp.eq.s32.totalorder %v5608_v58, %v4736_v36 }
 0x11b   : > { %3814 = vmatpush1.msra.mxu0 %v3675_v9  ;;  %v2887_v54 = vadd.f32 %v2759_v8, %v2463_v48  ;;  %v1544_v13 = vadd.f32 %v1416_v5, %v1104_v56  ;;  %v2270_v3 = vsel %vm2123_vm15, %v4641_v60, 0.0  ;;  %v2694_v10 = vsel %vm2547_vm0, %v4681_v47, 0.0 }
 0x11c   : > { %v3122_v53 = vsel %vm2975_vm1, %v4710_v63, 0.0  ;;  %v3546_v15 = vsel %vm3399_vm4, %v4731_v34, 0.0  ;;  %v5714_v46 = vadd.s32 304, %v4370_v1  ;;  %vm384_vm9 = vcmp.eq.s32.totalorder %v5608_v58, %v4779_v7 }
 0x11d   : > { %v3315_v6 = vadd.f32 %v3187_v24, %v2887_v54  ;;  %v1968_v12 = vadd.f32 %v1840_v51, %v1544_v13  ;;  %v531_v26 = vsel %vm384_vm9, %v4766_v45, 0.0  ;;  %vm828_vm5 = vcmp.eq.s32.totalorder %v5608_v58, %v4786_v55 }
 0x11e   : > { %vm449_vm6 = vcmp.eq.s32.totalorder %v5714_v46, %v4585_v61  ;;  %vm893_vm11 = vcmp.eq.s32.totalorder %v5714_v46, %v4624_v19  ;;  %vm1333_vm13 = vcmp.eq.s32.totalorder %v5714_v46, %v4675_v23  ;;  %vm1757_vm8 = vcmp.eq.s32.totalorder %v5714_v46, %v4678_v35 }
 0x11f   : > { %v3739_v38 = vadd.f32 %v3611_v49, %v3315_v6  ;;  %v2398_v16 = vadd.f32 %v2270_v3, %v1968_v12  ;;  %v596_v2 = vsel %vm449_vm6, %v4523_v30, 0.0  ;;  %v1040_v42 = vsel %vm893_vm11, %v4526_v31, 0.0 }
 0x120   : > { %v1168_v44 = vadd.f32 %v1040_v42, %v596_v2  ;;  %v1480_v57 = vsel %vm1333_vm13, %v4611_v17, 0.0  ;;  %vm2187_vm3 = vcmp.eq.s32.totalorder %v5714_v46, %v4664_v37  ;;  %v975_v32 = vsel %vm828_vm5, %v4556_v43, 0.0 }
 0x121   : > { %3885 = vmatpush1.msra.mxu1 %v3739_v38  ;;  %v2822_v62 = vadd.f32 %v2694_v10, %v2398_v16  ;;  %v1904_v8 = vsel %vm1757_vm8, %v4614_v18, 0.0  ;;  %vm2611_vm12 = vcmp.eq.s32.totalorder %v5714_v46, %v4688_v50  ;;  %vm3039_vm7 = vcmp.eq.s32.totalorder %v5714_v46, %v4728_v27 }
 0x122   : > { %v1608_v41 = vadd.f32 %v1480_v57, %v1168_v44  ;;  %v2334_v14 = vsel %vm2187_vm3, %v4641_v60, 0.0  ;;  %v2758_v24 = vsel %vm2611_vm12, %v4681_v47, 0.0  ;;  %vm3463_vm10 = vcmp.eq.s32.totalorder %v5714_v46, %v4736_v36 }
 0x123   : > { %v3250_v11 = vadd.f32 %v3122_v53, %v2822_v62  ;;  %v3186_v22 = vsel %vm3039_vm7, %v4710_v63, 0.0  ;;  %v1103_v5 = vadd.f32 %v975_v32, %v531_v26  ;;  %vm1268_vm2 = vcmp.eq.s32.totalorder %v5608_v58, %v4789_v20 }
 0x124   : > { %v2032_v9 = vadd.f32 %v1904_v8, %v1608_v41  ;;  %v1415_v48 = vsel %vm1268_vm2, %v4776_v33, 0.0  ;;  %vm1692_vm14 = vcmp.eq.s32.totalorder %v5608_v58, %v4798_v21  ;;  %vm2122_vm15 = vcmp.eq.s32.totalorder %v5608_v58, %v4809_v4 }
 0x125   : > { %v3674_v49 = vadd.f32 %v3546_v15, %v3250_v11  ;;  %v3610_v56 = vsel %vm3463_vm10, %v4731_v34, 0.0  ;;  %v1543_v51 = vadd.f32 %v1415_v48, %v1103_v5  ;;  %v1839_v54 = vsel %vm1692_vm14, %v4801_v59, 0.0 }
 0x126   : > { %v2462_v13 = vadd.f32 %v2334_v14, %v2032_v9  ;;  %v2269_v3 = vsel %vm2122_vm15, %v4819_v52, 0.0  ;;  %vm2546_vm0 = vcmp.eq.s32.totalorder %v5608_v58, %v4835_v29  ;;  %vm2974_vm1 = vcmp.eq.s32.totalorder %v5608_v58, %v4841_v25 }
 0x127   : > { %3815 = vmatprep.subr.mxu0 %v3674_v49  ;;  %v1967_v10 = vadd.f32 %v1839_v54, %v1543_v51  ;;  %v2693_v53 = vsel %vm2546_vm0, %v4838_v28, 0.0  ;;  %v3121_v15 = vsel %vm2974_vm1, %v4844_v39, 0.0  ;;  %vm3398_vm4 = vcmp.eq.s32.totalorder %v5608_v58, %v4847_v40 }
 0x128   : > { %v2886_v6 = vadd.f32 %v2758_v24, %v2462_v13  ;;  %vm448_vm9 = vcmp.eq.s32.totalorder %v5714_v46, %v4779_v7  ;;  %vm892_vm5 = vcmp.eq.s32.totalorder %v5714_v46, %v4786_v55  ;;  %vm1332_vm6 = vcmp.eq.s32.totalorder %v5714_v46, %v4789_v20 }
 0x129   : > { %v2397_v12 = vadd.f32 %v2269_v3, %v1967_v10  ;;  %v595_v26 = vsel %vm448_vm9, %v4766_v45, 0.0  ;;  %v1039_v38 = vsel %vm892_vm5, %v4556_v43, 0.0  ;;  %v1479_v16 = vsel %vm1332_vm6, %v4776_v33, 0.0 }
 0x12a   : > { %v3314_v2 = vadd.f32 %v3186_v22, %v2886_v6  ;;  %v1167_v42 = vadd.f32 %v1039_v38, %v595_v26  ;;  %vm1756_vm11 = vcmp.eq.s32.totalorder %v5714_v46, %v4798_v21  ;;  %vm2186_vm13 = vcmp.eq.s32.totalorder %v5714_v46, %v4809_v4 }
 0x12b   : > { %v2821_v58 = vadd.f32 %v2693_v53, %v2397_v12  ;;  %v3545_v44 = vsel %vm3398_vm4, %v4850_v0, 0.0  ;;  %v1903_v57 = vsel %vm1756_vm11, %v4801_v59, 0.0  ;;  %vm2610_vm8 = vcmp.eq.s32.totalorder %v5714_v46, %v4835_v29 }
 0x12c   : > { %v3738_v32 = vadd.f32 %v3610_v56, %v3314_v2  ;;  %v1607_v62 = vadd.f32 %v1479_v16, %v1167_v42  ;;  %v2333_v8 = vsel %vm2186_vm13, %v4819_v52, 0.0  ;;  %vm3038_vm3 = vcmp.eq.s32.totalorder %v5714_v46, %v4841_v25 }
 0x12d   : > { %v3249_v41 = vadd.f32 %v3121_v15, %v2821_v58  ;;  %v2757_v14 = vsel %vm2610_vm8, %v4838_v28, 0.0  ;;  %vm3462_vm12 = vcmp.eq.s32.totalorder %v5714_v46, %v4847_v40  ;;  %v5787_v24 = vadd.s32 40, %v4370_v1 }
 0x12e   : > { %3886 = vmatprep.subr.mxu1 %v3738_v32  ;;  %v2031_v11 = vadd.f32 %v1903_v57, %v1607_v62  ;;  %v3185_v22 = vsel %vm3038_vm3, %v4844_v39, 0.0  ;;  %v3609_v5 = vsel %vm3462_vm12, %v4850_v0, 0.0  ;;  %v5792_v9 = vadd.s32 296, %v4370_v1 }
 0x12f   : > { %v3673_v48 = vadd.f32 %v3545_v44, %v3249_v41  ;;  %vm383_vm7 = vcmp.eq.s32.totalorder %v5787_v24, %v4585_v61  ;;  %vm827_vm10 = vcmp.eq.s32.totalorder %v5787_v24, %v4624_v19  ;;  %vm1267_vm2 = vcmp.eq.s32.totalorder %v5787_v24, %v4675_v23 }
 0x130   : > { %v2461_v46 = vadd.f32 %v2333_v8, %v2031_v11  ;;  %v530_v49 = vsel %vm383_vm7, %v4523_v30, 0.0  ;;  %v974_v56 = vsel %vm827_vm10, %v4526_v31, 0.0  ;;  %v1414_v51 = vsel %vm1267_vm2, %v4611_v17, 0.0 }
 0x131   : > { %3816 = vmatpush1.msra.mxu0 %v3673_v48  ;;  %v1102_v54 = vadd.f32 %v974_v56, %v530_v49  ;;  %vm1691_vm14 = vcmp.eq.s32.totalorder %v5787_v24, %v4678_v35  ;;  %vm2121_vm15 = vcmp.eq.s32.totalorder %v5787_v24, %v4664_v37  ;;  %vm2545_vm0 = vcmp.eq.s32.totalorder %v5787_v24, %v4688_v50 }
 0x132   : > { %v2885_v13 = vadd.f32 %v2757_v14, %v2461_v46  ;;  %v1838_v3 = vsel %vm1691_vm14, %v4614_v18, 0.0  ;;  %v2268_v10 = vsel %vm2121_vm15, %v4641_v60, 0.0  ;;  %v5812_v53 = vadd.s32 32, %v4370_v1 }
 0x133   : > { %v1542_v15 = vadd.f32 %v1414_v51, %v1102_v54  ;;  %vm2973_vm1 = vcmp.eq.s32.totalorder %v5787_v24, %v4728_v27  ;;  %vm3397_vm4 = vcmp.eq.s32.totalorder %v5787_v24, %v4736_v36  ;;  %vm447_vm9 = vcmp.eq.s32.totalorder %v5792_v9, %v4585_v61 }
 0x134   : > { %v3313_v6 = vadd.f32 %v3185_v22, %v2885_v13  ;;  %v2692_v12 = vsel %vm2545_vm0, %v4681_v47, 0.0  ;;  %v3120_v26 = vsel %vm2973_vm1, %v4710_v63, 0.0  ;;  %v594_v38 = vsel %vm447_vm9, %v4523_v30, 0.0 }
 0x135   : > { %v1966_v16 = vadd.f32 %v1838_v3, %v1542_v15  ;;  %vm891_vm5 = vcmp.eq.s32.totalorder %v5792_v9, %v4624_v19  ;;  %vm1331_vm6 = vcmp.eq.s32.totalorder %v5792_v9, %v4675_v23  ;;  %vm1755_vm11 = vcmp.eq.s32.totalorder %v5792_v9, %v4678_v35 }
 0x136   : > { %v3737_v2 = vadd.f32 %v3609_v5, %v3313_v6  ;;  %v3544_v42 = vsel %vm3397_vm4, %v4731_v34, 0.0  ;;  %v1038_v58 = vsel %vm891_vm5, %v4526_v31, 0.0  ;;  %v1478_v44 = vsel %vm1331_vm6, %v4611_v17, 0.0 }
 0x137   : > { %v2396_v57 = vadd.f32 %v2268_v10, %v1966_v16  ;;  %v1166_v32 = vadd.f32 %v1038_v58, %v594_v38  ;;  %vm2185_vm13 = vcmp.eq.s32.totalorder %v5792_v9, %v4664_v37  ;;  %vm2609_vm8 = vcmp.eq.s32.totalorder %v5792_v9, %v4688_v50 }
 0x138   : > { %3887 = vmatpush1.msra.mxu1 %v3737_v2  ;;  %v1902_v62 = vsel %vm1755_vm11, %v4614_v18, 0.0  ;;  %v2332_v8 = vsel %vm2185_vm13, %v4641_v60, 0.0  ;;  %v2756_v41 = vsel %vm2609_vm8, %v4681_v47, 0.0  ;;  %vm3037_vm3 = vcmp.eq.s32.totalorder %v5792_v9, %v4728_v27 }
 0x139   : > { %v2820_v14 = vadd.f32 %v2692_v12, %v2396_v57  ;;  %v1606_v11 = vadd.f32 %v1478_v44, %v1166_v32  ;;  %v3184_v22 = vsel %vm3037_vm3, %v4710_v63, 0.0  ;;  %vm3461_vm12 = vcmp.eq.s32.totalorder %v5792_v9, %v4736_v36 }
 0x13a   : > { %vm382_vm7 = vcmp.eq.s32.totalorder %v5787_v24, %v4779_v7  ;;  %vm826_vm10 = vcmp.eq.s32.totalorder %v5787_v24, %v4786_v55  ;;  %vm1266_vm2 = vcmp.eq.s32.totalorder %v5787_v24, %v4789_v20  ;;  %vm1690_vm14 = vcmp.eq.s32.totalorder %v5787_v24, %v4798_v21 }
 0x13b   : > { %v3248_v5 = vadd.f32 %v3120_v26, %v2820_v14  ;;  %v2030_v48 = vadd.f32 %v1902_v62, %v1606_v11  ;;  %v529_v46 = vsel %vm382_vm7, %v4766_v45, 0.0  ;;  %v973_v49 = vsel %vm826_vm10, %v4556_v43, 0.0 }
 0x13c   : > { %v3608_v56 = vsel %vm3461_vm12, %v4731_v34, 0.0  ;;  %v1101_v51 = vadd.f32 %v973_v49, %v529_v46  ;;  %v1413_v54 = vsel %vm1266_vm2, %v4776_v33, 0.0  ;;  %vm2120_vm15 = vcmp.eq.s32.totalorder %v5787_v24, %v4809_v4 }
 0x13d   : > { %v3672_v13 = vadd.f32 %v3544_v42, %v3248_v5  ;;  %v2460_v3 = vadd.f32 %v2332_v8, %v2030_v48  ;;  %v1837_v10 = vsel %vm1690_vm14, %v4801_v59, 0.0  ;;  %vm2544_vm0 = vcmp.eq.s32.totalorder %v5787_v24, %v4835_v29 }
 0x13e   : > { %v1541_v15 = vadd.f32 %v1413_v54, %v1101_v51  ;;  %v2267_v6 = vsel %vm2120_vm15, %v4819_v52, 0.0  ;;  %v2691_v12 = vsel %vm2544_vm0, %v4838_v28, 0.0  ;;  %vm2972_vm1 = vcmp.eq.s32.totalorder %v5787_v24, %v4841_v25 }
 0x13f   : > { %3817 = vmatprep.subr.mxu0 %v3672_v13  ;;  %v2884_v26 = vadd.f32 %v2756_v41, %v2460_v3  ;;  %v3119_v38 = vsel %vm2972_vm1, %v4844_v39, 0.0  ;;  %vm3396_vm4 = vcmp.eq.s32.totalorder %v5787_v24, %v4847_v40  ;;  %vm446_vm9 = vcmp.eq.s32.totalorder %v5792_v9, %v4779_v7 }
 0x140   : > { %v1965_v16 = vadd.f32 %v1837_v10, %v1541_v15  ;;  %v593_v2 = vsel %vm446_vm9, %v4766_v45, 0.0  ;;  %vm890_vm5 = vcmp.eq.s32.totalorder %v5792_v9, %v4786_v55  ;;  %vm1330_vm6 = vcmp.eq.s32.totalorder %v5792_v9, %v4789_v20 }
 0x141   : > { %v3312_v42 = vadd.f32 %v3184_v22, %v2884_v26  ;;  %v1037_v58 = vsel %vm890_vm5, %v4556_v43, 0.0  ;;  %v1477_v44 = vsel %vm1330_vm6, %v4776_v33, 0.0  ;;  %vm1754_vm11 = vcmp.eq.s32.totalorder %v5792_v9, %v4798_v21 }
 0x142   : > { %v2395_v24 = vadd.f32 %v2267_v6, %v1965_v16  ;;  %v3543_v57 = vsel %vm3396_vm4, %v4850_v0, 0.0  ;;  %v1165_v32 = vadd.f32 %v1037_v58, %v593_v2  ;;  %vm2184_vm13 = vcmp.eq.s32.totalorder %v5792_v9, %v4809_v4 }
 0x143   : > { %v3736_v62 = vadd.f32 %v3608_v56, %v3312_v42  ;;  %v1901_v8 = vsel %vm1754_vm11, %v4801_v59, 0.0  ;;  %vm2608_vm8 = vcmp.eq.s32.totalorder %v5792_v9, %v4835_v29  ;;  %vm3036_vm3 = vcmp.eq.s32.totalorder %v5792_v9, %v4841_v25 }
 0x144   : > { %v2819_v41 = vadd.f32 %v2691_v12, %v2395_v24  ;;  %v1605_v14 = vadd.f32 %v1477_v44, %v1165_v32  ;;  %v2331_v11 = vsel %vm2184_vm13, %v4819_v52, 0.0  ;;  %v2755_v22 = vsel %vm2608_vm8, %v4838_v28, 0.0 }
 0x145   : > { %3888 = vmatprep.subr.mxu1 %v3736_v62  ;;  %vm3460_vm12 = vcmp.eq.s32.totalorder %v5792_v9, %v4847_v40  ;;  %vm381_vm7 = vcmp.eq.s32.totalorder %v5812_v53, %v4585_v61  ;;  %vm825_vm10 = vcmp.eq.s32.totalorder %v5812_v53, %v4624_v19  ;;  %vm1265_vm2 = vcmp.eq.s32.totalorder %v5812_v53, %v4675_v23 }
 0x146   : > { %v3247_v5 = vadd.f32 %v3119_v38, %v2819_v41  ;;  %v2029_v48 = vadd.f32 %v1901_v8, %v1605_v14  ;;  %v3183_v46 = vsel %vm3036_vm3, %v4844_v39, 0.0  ;;  %v528_v49 = vsel %vm381_vm7, %v4523_v30, 0.0 }
 0x147   : > { %v972_v56 = vsel %vm825_vm10, %v4526_v31, 0.0  ;;  %v1412_v51 = vsel %vm1265_vm2, %v4611_v17, 0.0  ;;  %vm1689_vm14 = vcmp.eq.s32.totalorder %v5812_v53, %v4678_v35  ;;  %vm2119_vm15 = vcmp.eq.s32.totalorder %v5812_v53, %v4664_v37 }
 0x148   : > { %v3671_v9 = vadd.f32 %v3543_v57, %v3247_v5  ;;  %v2459_v54 = vadd.f32 %v2331_v11, %v2029_v48  ;;  %v3607_v13 = vsel %vm3460_vm12, %v4850_v0, 0.0  ;;  %v1100_v3 = vadd.f32 %v972_v56, %v528_v49 }
 0x149   : > { %v1836_v10 = vsel %vm1689_vm14, %v4614_v18, 0.0  ;;  %vm2543_vm0 = vcmp.eq.s32.totalorder %v5812_v53, %v4688_v50  ;;  %vm2971_vm1 = vcmp.eq.s32.totalorder %v5812_v53, %v4728_v27  ;;  %vm3395_vm4 = vcmp.eq.s32.totalorder %v5812_v53, %v4736_v36 }
 0x14a   : > { %3818 = vmatpush1.msra.mxu0 %v3671_v9  ;;  %v2883_v15 = vadd.f32 %v2755_v22, %v2459_v54  ;;  %v1540_v6 = vadd.f32 %v1412_v51, %v1100_v3  ;;  %v2266_v12 = vsel %vm2119_vm15, %v4641_v60, 0.0  ;;  %v2690_v26 = vsel %vm2543_vm0, %v4681_v47, 0.0 }
 0x14b   : > { %v3118_v38 = vsel %vm2971_vm1, %v4710_v63, 0.0  ;;  %v3542_v16 = vsel %vm3395_vm4, %v4731_v34, 0.0  ;;  %v5918_v2 = vadd.s32 288, %v4370_v1  ;;  %vm380_vm9 = vcmp.eq.s32.totalorder %v5812_v53, %v4779_v7 }
 0x14c   : > { %v3311_v42 = vadd.f32 %v3183_v46, %v2883_v15  ;;  %v1964_v58 = vadd.f32 %v1836_v10, %v1540_v6  ;;  %v527_v44 = vsel %vm380_vm9, %v4766_v45, 0.0  ;;  %vm824_vm5 = vcmp.eq.s32.totalorder %v5812_v53, %v4786_v55 }
 0x14d   : > { %vm445_vm6 = vcmp.eq.s32.totalorder %v5918_v2, %v4585_v61  ;;  %vm889_vm11 = vcmp.eq.s32.totalorder %v5918_v2, %v4624_v19  ;;  %vm1329_vm13 = vcmp.eq.s32.totalorder %v5918_v2, %v4675_v23  ;;  %vm1753_vm8 = vcmp.eq.s32.totalorder %v5918_v2, %v4678_v35 }
 0x14e   : > { %v3735_v24 = vadd.f32 %v3607_v13, %v3311_v42  ;;  %v2394_v57 = vadd.f32 %v2266_v12, %v1964_v58  ;;  %v592_v32 = vsel %vm445_vm6, %v4523_v30, 0.0  ;;  %v1036_v62 = vsel %vm889_vm11, %v4526_v31, 0.0 }
 0x14f   : > { %v1164_v8 = vadd.f32 %v1036_v62, %v592_v32  ;;  %v1476_v41 = vsel %vm1329_vm13, %v4611_v17, 0.0  ;;  %vm2183_vm3 = vcmp.eq.s32.totalorder %v5918_v2, %v4664_v37  ;;  %v971_v14 = vsel %vm824_vm5, %v4556_v43, 0.0 }
 0x150   : > { %3889 = vmatpush1.msra.mxu1 %v3735_v24  ;;  %v2818_v11 = vadd.f32 %v2690_v26, %v2394_v57  ;;  %v1900_v22 = vsel %vm1753_vm8, %v4614_v18, 0.0  ;;  %vm2607_vm12 = vcmp.eq.s32.totalorder %v5918_v2, %v4688_v50  ;;  %vm3035_vm7 = vcmp.eq.s32.totalorder %v5918_v2, %v4728_v27 }
 0x151   : > { %v1604_v5 = vadd.f32 %v1476_v41, %v1164_v8  ;;  %v2330_v48 = vsel %vm2183_vm3, %v4641_v60, 0.0  ;;  %v2754_v46 = vsel %vm2607_vm12, %v4681_v47, 0.0  ;;  %vm3459_vm10 = vcmp.eq.s32.totalorder %v5918_v2, %v4736_v36 }
 0x152   : > { %v3246_v49 = vadd.f32 %v3118_v38, %v2818_v11  ;;  %v3182_v56 = vsel %vm3035_vm7, %v4710_v63, 0.0  ;;  %v1099_v51 = vadd.f32 %v971_v14, %v527_v44  ;;  %vm1264_vm2 = vcmp.eq.s32.totalorder %v5812_v53, %v4789_v20 }
 0x153   : > { %v2028_v9 = vadd.f32 %v1900_v22, %v1604_v5  ;;  %v1411_v54 = vsel %vm1264_vm2, %v4776_v33, 0.0  ;;  %vm1688_vm14 = vcmp.eq.s32.totalorder %v5812_v53, %v4798_v21  ;;  %vm2118_vm15 = vcmp.eq.s32.totalorder %v5812_v53, %v4809_v4 }
 0x154   : > { %v3670_v13 = vadd.f32 %v3542_v16, %v3246_v49  ;;  %v3606_v3 = vsel %vm3459_vm10, %v4731_v34, 0.0  ;;  %v1539_v10 = vadd.f32 %v1411_v54, %v1099_v51  ;;  %v1835_v15 = vsel %vm1688_vm14, %v4801_v59, 0.0 }
 0x155   : > { %v2458_v6 = vadd.f32 %v2330_v48, %v2028_v9  ;;  %v2265_v12 = vsel %vm2118_vm15, %v4819_v52, 0.0  ;;  %vm2542_vm0 = vcmp.eq.s32.totalorder %v5812_v53, %v4835_v29  ;;  %vm2970_vm1 = vcmp.eq.s32.totalorder %v5812_v53, %v4841_v25 }
 0x156   : > { %3819 = vmatprep.subr.mxu0 %v3670_v13  ;;  %v1963_v26 = vadd.f32 %v1835_v15, %v1539_v10  ;;  %v2689_v38 = vsel %vm2542_vm0, %v4838_v28, 0.0  ;;  %v3117_v16 = vsel %vm2970_vm1, %v4844_v39, 0.0  ;;  %vm3394_vm4 = vcmp.eq.s32.totalorder %v5812_v53, %v4847_v40 }
 0x157   : > { %v2882_v42 = vadd.f32 %v2754_v46, %v2458_v6  ;;  %vm444_vm9 = vcmp.eq.s32.totalorder %v5918_v2, %v4779_v7  ;;  %vm888_vm5 = vcmp.eq.s32.totalorder %v5918_v2, %v4786_v55  ;;  %vm1328_vm6 = vcmp.eq.s32.totalorder %v5918_v2, %v4789_v20 }
 0x158   : > { %v2393_v58 = vadd.f32 %v2265_v12, %v1963_v26  ;;  %v591_v44 = vsel %vm444_vm9, %v4766_v45, 0.0  ;;  %v1035_v24 = vsel %vm888_vm5, %v4556_v43, 0.0  ;;  %v1475_v57 = vsel %vm1328_vm6, %v4776_v33, 0.0 }
 0x159   : > { %v3310_v32 = vadd.f32 %v3182_v56, %v2882_v42  ;;  %v1163_v62 = vadd.f32 %v1035_v24, %v591_v44  ;;  %vm1752_vm11 = vcmp.eq.s32.totalorder %v5918_v2, %v4798_v21  ;;  %vm2182_vm13 = vcmp.eq.s32.totalorder %v5918_v2, %v4809_v4 }
 0x15a   : > { %v2817_v53 = vadd.f32 %v2689_v38, %v2393_v58  ;;  %v3541_v8 = vsel %vm3394_vm4, %v4850_v0, 0.0  ;;  %v1899_v41 = vsel %vm1752_vm11, %v4801_v59, 0.0  ;;  %vm2606_vm8 = vcmp.eq.s32.totalorder %v5918_v2, %v4835_v29 }
 0x15b   : > { %v3734_v14 = vadd.f32 %v3606_v3, %v3310_v32  ;;  %v1603_v11 = vadd.f32 %v1475_v57, %v1163_v62  ;;  %v2329_v22 = vsel %vm2182_vm13, %v4819_v52, 0.0  ;;  %vm3034_vm3 = vcmp.eq.s32.totalorder %v5918_v2, %v4841_v25 }
 0x15c   : > { %v3245_v5 = vadd.f32 %v3117_v16, %v2817_v53  ;;  %v2753_v48 = vsel %vm2606_vm8, %v4838_v28, 0.0  ;;  %vm3458_vm12 = vcmp.eq.s32.totalorder %v5918_v2, %v4847_v40  ;;  %v5991_v46 = vadd.s32 24, %v4370_v1 }
 0x15d   : > { %3890 = vmatprep.subr.mxu1 %v3734_v14  ;;  %v2027_v49 = vadd.f32 %v1899_v41, %v1603_v11  ;;  %v3181_v56 = vsel %vm3034_vm3, %v4844_v39, 0.0  ;;  %v3605_v51 = vsel %vm3458_vm12, %v4850_v0, 0.0  ;;  %v5996_v9 = vadd.s32 280, %v4370_v1 }
 0x15e   : > { %v3669_v54 = vadd.f32 %v3541_v8, %v3245_v5  ;;  %vm379_vm7 = vcmp.eq.s32.totalorder %v5991_v46, %v4585_v61  ;;  %vm823_vm10 = vcmp.eq.s32.totalorder %v5991_v46, %v4624_v19  ;;  %vm1263_vm2 = vcmp.eq.s32.totalorder %v5991_v46, %v4675_v23 }
 0x15f   : > { %v2457_v2 = vadd.f32 %v2329_v22, %v2027_v49  ;;  %v526_v13 = vsel %vm379_vm7, %v4523_v30, 0.0  ;;  %v970_v3 = vsel %vm823_vm10, %v4526_v31, 0.0  ;;  %v1410_v10 = vsel %vm1263_vm2, %v4611_v17, 0.0 }
 0x160   : > { %3820 = vmatpush1.msra.mxu0 %v3669_v54  ;;  %v1098_v15 = vadd.f32 %v970_v3, %v526_v13  ;;  %vm1687_vm14 = vcmp.eq.s32.totalorder %v5991_v46, %v4678_v35  ;;  %vm2117_vm15 = vcmp.eq.s32.totalorder %v5991_v46, %v4664_v37  ;;  %vm2541_vm0 = vcmp.eq.s32.totalorder %v5991_v46, %v4688_v50 }
 0x161   : > { %v2881_v6 = vadd.f32 %v2753_v48, %v2457_v2  ;;  %v1834_v12 = vsel %vm1687_vm14, %v4614_v18, 0.0  ;;  %v2264_v26 = vsel %vm2117_vm15, %v4641_v60, 0.0  ;;  %v6016_v38 = vadd.s32 16, %v4370_v1 }
 0x162   : > { %v1538_v16 = vadd.f32 %v1410_v10, %v1098_v15  ;;  %vm2969_vm1 = vcmp.eq.s32.totalorder %v5991_v46, %v4728_v27  ;;  %vm3393_vm4 = vcmp.eq.s32.totalorder %v5991_v46, %v4736_v36  ;;  %vm443_vm9 = vcmp.eq.s32.totalorder %v5996_v9, %v4585_v61 }
 0x163   : > { %v3309_v42 = vadd.f32 %v3181_v56, %v2881_v6  ;;  %v2688_v58 = vsel %vm2541_vm0, %v4681_v47, 0.0  ;;  %v3116_v44 = vsel %vm2969_vm1, %v4710_v63, 0.0  ;;  %v590_v24 = vsel %vm443_vm9, %v4523_v30, 0.0 }
 0x164   : > { %v1962_v57 = vadd.f32 %v1834_v12, %v1538_v16  ;;  %vm887_vm5 = vcmp.eq.s32.totalorder %v5996_v9, %v4624_v19  ;;  %vm1327_vm6 = vcmp.eq.s32.totalorder %v5996_v9, %v4675_v23  ;;  %vm1751_vm11 = vcmp.eq.s32.totalorder %v5996_v9, %v4678_v35 }
 0x165   : > { %v3733_v32 = vadd.f32 %v3605_v51, %v3309_v42  ;;  %v3540_v62 = vsel %vm3393_vm4, %v4731_v34, 0.0  ;;  %v1034_v53 = vsel %vm887_vm5, %v4526_v31, 0.0  ;;  %v1474_v8 = vsel %vm1327_vm6, %v4611_v17, 0.0 }
 0x166   : > { %v2392_v41 = vadd.f32 %v2264_v26, %v1962_v57  ;;  %v1162_v14 = vadd.f32 %v1034_v53, %v590_v24  ;;  %vm2181_vm13 = vcmp.eq.s32.totalorder %v5996_v9, %v4664_v37  ;;  %vm2605_vm8 = vcmp.eq.s32.totalorder %v5996_v9, %v4688_v50 }
 0x167   : > { %3891 = vmatpush1.msra.mxu1 %v3733_v32  ;;  %v1898_v11 = vsel %vm1751_vm11, %v4614_v18, 0.0  ;;  %v2328_v22 = vsel %vm2181_vm13, %v4641_v60, 0.0  ;;  %v2752_v5 = vsel %vm2605_vm8, %v4681_v47, 0.0  ;;  %vm3033_vm3 = vcmp.eq.s32.totalorder %v5996_v9, %v4728_v27 }
 0x168   : > { %v2816_v48 = vadd.f32 %v2688_v58, %v2392_v41  ;;  %v1602_v49 = vadd.f32 %v1474_v8, %v1162_v14  ;;  %v3180_v56 = vsel %vm3033_vm3, %v4710_v63, 0.0  ;;  %vm3457_vm12 = vcmp.eq.s32.totalorder %v5996_v9, %v4736_v36 }
 0x169   : > { %vm378_vm7 = vcmp.eq.s32.totalorder %v5991_v46, %v4779_v7  ;;  %vm822_vm10 = vcmp.eq.s32.totalorder %v5991_v46, %v4786_v55  ;;  %vm1262_vm2 = vcmp.eq.s32.totalorder %v5991_v46, %v4789_v20  ;;  %vm1686_vm14 = vcmp.eq.s32.totalorder %v5991_v46, %v4798_v21 }
 0x16a   : > { %v3244_v51 = vadd.f32 %v3116_v44, %v2816_v48  ;;  %v2026_v54 = vadd.f32 %v1898_v11, %v1602_v49  ;;  %v525_v2 = vsel %vm378_vm7, %v4766_v45, 0.0  ;;  %v969_v13 = vsel %vm822_vm10, %v4556_v43, 0.0 }
 0x16b   : > { %v3604_v3 = vsel %vm3457_vm12, %v4731_v34, 0.0  ;;  %v1097_v10 = vadd.f32 %v969_v13, %v525_v2  ;;  %v1409_v15 = vsel %vm1262_vm2, %v4776_v33, 0.0  ;;  %vm2116_vm15 = vcmp.eq.s32.totalorder %v5991_v46, %v4809_v4 }
 0x16c   : > { %v3668_v6 = vadd.f32 %v3540_v62, %v3244_v51  ;;  %v2456_v12 = vadd.f32 %v2328_v22, %v2026_v54  ;;  %v1833_v26 = vsel %vm1686_vm14, %v4801_v59, 0.0  ;;  %vm2540_vm0 = vcmp.eq.s32.totalorder %v5991_v46, %v4835_v29 }
 0x16d   : > { %v1537_v16 = vadd.f32 %v1409_v15, %v1097_v10  ;;  %v2263_v42 = vsel %vm2116_vm15, %v4819_v52, 0.0  ;;  %v2687_v58 = vsel %vm2540_vm0, %v4838_v28, 0.0  ;;  %vm2968_vm1 = vcmp.eq.s32.totalorder %v5991_v46, %v4841_v25 }
 0x16e   : > { %3821 = vmatprep.subr.mxu0 %v3668_v6  ;;  %v2880_v44 = vadd.f32 %v2752_v5, %v2456_v12  ;;  %v3115_v24 = vsel %vm2968_vm1, %v4844_v39, 0.0  ;;  %vm3392_vm4 = vcmp.eq.s32.totalorder %v5991_v46, %v4847_v40  ;;  %vm442_vm9 = vcmp.eq.s32.totalorder %v5996_v9, %v4779_v7 }
 0x16f   : > { %v1961_v57 = vadd.f32 %v1833_v26, %v1537_v16  ;;  %v589_v32 = vsel %vm442_vm9, %v4766_v45, 0.0  ;;  %vm886_vm5 = vcmp.eq.s32.totalorder %v5996_v9, %v4786_v55  ;;  %vm1326_vm6 = vcmp.eq.s32.totalorder %v5996_v9, %v4789_v20 }
 0x170   : > { %v3308_v62 = vadd.f32 %v3180_v56, %v2880_v44  ;;  %v1033_v53 = vsel %vm886_vm5, %v4556_v43, 0.0  ;;  %v1473_v8 = vsel %vm1326_vm6, %v4776_v33, 0.0  ;;  %vm1750_vm11 = vcmp.eq.s32.totalorder %v5996_v9, %v4798_v21 }
 0x171   : > { %v2391_v46 = vadd.f32 %v2263_v42, %v1961_v57  ;;  %v3539_v41 = vsel %vm3392_vm4, %v4850_v0, 0.0  ;;  %v1161_v14 = vadd.f32 %v1033_v53, %v589_v32  ;;  %vm2180_vm13 = vcmp.eq.s32.totalorder %v5996_v9, %v4809_v4 }
 0x172   : > { %v3732_v11 = vadd.f32 %v3604_v3, %v3308_v62  ;;  %v1897_v22 = vsel %vm1750_vm11, %v4801_v59, 0.0  ;;  %vm2604_vm8 = vcmp.eq.s32.totalorder %v5996_v9, %v4835_v29  ;;  %vm3032_vm3 = vcmp.eq.s32.totalorder %v5996_v9, %v4841_v25 }
 0x173   : > { %v2815_v5 = vadd.f32 %v2687_v58, %v2391_v46  ;;  %v1601_v48 = vadd.f32 %v1473_v8, %v1161_v14  ;;  %v2327_v49 = vsel %vm2180_vm13, %v4819_v52, 0.0  ;;  %v2751_v56 = vsel %vm2604_vm8, %v4838_v28, 0.0 }
 0x174   : > { %3892 = vmatprep.subr.mxu1 %v3732_v11  ;;  %vm3456_vm12 = vcmp.eq.s32.totalorder %v5996_v9, %v4847_v40  ;;  %vm377_vm7 = vcmp.eq.s32.totalorder %v6016_v38, %v4585_v61  ;;  %vm821_vm10 = vcmp.eq.s32.totalorder %v6016_v38, %v4624_v19  ;;  %vm1261_vm2 = vcmp.eq.s32.totalorder %v6016_v38, %v4675_v23 }
 0x175   : > { %v3243_v51 = vadd.f32 %v3115_v24, %v2815_v5  ;;  %v2025_v54 = vadd.f32 %v1897_v22, %v1601_v48  ;;  %v3179_v2 = vsel %vm3032_vm3, %v4844_v39, 0.0  ;;  %v524_v13 = vsel %vm377_vm7, %v4523_v30, 0.0 }
 0x176   : > { %v968_v3 = vsel %vm821_vm10, %v4526_v31, 0.0  ;;  %v1408_v10 = vsel %vm1261_vm2, %v4611_v17, 0.0  ;;  %vm1685_vm14 = vcmp.eq.s32.totalorder %v6016_v38, %v4678_v35  ;;  %vm2115_vm15 = vcmp.eq.s32.totalorder %v6016_v38, %v4664_v37 }
 0x177   : > { %v3667_v9 = vadd.f32 %v3539_v41, %v3243_v51  ;;  %v2455_v15 = vadd.f32 %v2327_v49, %v2025_v54  ;;  %v3603_v6 = vsel %vm3456_vm12, %v4850_v0, 0.0  ;;  %v1096_v12 = vadd.f32 %v968_v3, %v524_v13 }
 0x178   : > { %v1832_v26 = vsel %vm1685_vm14, %v4614_v18, 0.0  ;;  %vm2539_vm0 = vcmp.eq.s32.totalorder %v6016_v38, %v4688_v50  ;;  %vm2967_vm1 = vcmp.eq.s32.totalorder %v6016_v38, %v4728_v27  ;;  %vm3391_vm4 = vcmp.eq.s32.totalorder %v6016_v38, %v4736_v36 }
 0x179   : > { %3822 = vmatpush1.msra.mxu0 %v3667_v9  ;;  %v2879_v16 = vadd.f32 %v2751_v56, %v2455_v15  ;;  %v1536_v42 = vadd.f32 %v1408_v10, %v1096_v12  ;;  %v2262_v58 = vsel %vm2115_vm15, %v4641_v60, 0.0  ;;  %v2686_v44 = vsel %vm2539_vm0, %v4681_v47, 0.0 }
 0x17a   : > { %v3114_v24 = vsel %vm2967_vm1, %v4710_v63, 0.0  ;;  %v3538_v57 = vsel %vm3391_vm4, %v4731_v34, 0.0  ;;  %v6122_v32 = vadd.s32 272, %v4370_v1  ;;  %vm376_vm9 = vcmp.eq.s32.totalorder %v6016_v38, %v4779_v7 }
 0x17b   : > { %v3307_v62 = vadd.f32 %v3179_v2, %v2879_v16  ;;  %v1960_v53 = vadd.f32 %v1832_v26, %v1536_v42  ;;  %v523_v8 = vsel %vm376_vm9, %v4766_v45, 0.0  ;;  %vm820_vm5 = vcmp.eq.s32.totalorder %v6016_v38, %v4786_v55 }
 0x17c   : > { %vm441_vm6 = vcmp.eq.s32.totalorder %v6122_v32, %v4585_v61  ;;  %vm885_vm11 = vcmp.eq.s32.totalorder %v6122_v32, %v4624_v19  ;;  %vm1325_vm13 = vcmp.eq.s32.totalorder %v6122_v32, %v4675_v23  ;;  %vm1749_vm8 = vcmp.eq.s32.totalorder %v6122_v32, %v4678_v35 }
 0x17d   : > { %v3731_v46 = vadd.f32 %v3603_v6, %v3307_v62  ;;  %v2390_v41 = vadd.f32 %v2262_v58, %v1960_v53  ;;  %v588_v14 = vsel %vm441_vm6, %v4523_v30, 0.0  ;;  %v1032_v11 = vsel %vm885_vm11, %v4526_v31, 0.0 }
 0x17e   : > { %v1160_v22 = vadd.f32 %v1032_v11, %v588_v14  ;;  %v1472_v5 = vsel %vm1325_vm13, %v4611_v17, 0.0  ;;  %vm2179_vm3 = vcmp.eq.s32.totalorder %v6122_v32, %v4664_v37  ;;  %v967_v48 = vsel %vm820_vm5, %v4556_v43, 0.0 }
 0x17f   : > { %3893 = vmatpush1.msra.mxu1 %v3731_v46  ;;  %v2814_v49 = vadd.f32 %v2686_v44, %v2390_v41  ;;  %v1896_v56 = vsel %vm1749_vm8, %v4614_v18, 0.0  ;;  %vm2603_vm12 = vcmp.eq.s32.totalorder %v6122_v32, %v4688_v50  ;;  %vm3031_vm7 = vcmp.eq.s32.totalorder %v6122_v32, %v4728_v27 }
 0x180   : > { %v1600_v51 = vadd.f32 %v1472_v5, %v1160_v22  ;;  %v2326_v54 = vsel %vm2179_vm3, %v4641_v60, 0.0  ;;  %v2750_v2 = vsel %vm2603_vm12, %v4681_v47, 0.0  ;;  %vm3455_vm10 = vcmp.eq.s32.totalorder %v6122_v32, %v4736_v36 }
 0x181   : > { %v3242_v13 = vadd.f32 %v3114_v24, %v2814_v49  ;;  %v3178_v3 = vsel %vm3031_vm7, %v4710_v63, 0.0  ;;  %v1095_v10 = vadd.f32 %v967_v48, %v523_v8  ;;  %vm1260_vm2 = vcmp.eq.s32.totalorder %v6016_v38, %v4789_v20 }
 0x182   : > { %v2024_v9 = vadd.f32 %v1896_v56, %v1600_v51  ;;  %v1407_v15 = vsel %vm1260_vm2, %v4776_v33, 0.0  ;;  %vm1684_vm14 = vcmp.eq.s32.totalorder %v6016_v38, %v4798_v21  ;;  %vm2114_vm15 = vcmp.eq.s32.totalorder %v6016_v38, %v4809_v4 }
 0x183   : > { %v3666_v6 = vadd.f32 %v3538_v57, %v3242_v13  ;;  %v3602_v12 = vsel %vm3455_vm10, %v4731_v34, 0.0  ;;  %v1535_v26 = vadd.f32 %v1407_v15, %v1095_v10  ;;  %v1831_v16 = vsel %vm1684_vm14, %v4801_v59, 0.0 }
 0x184   : > { %v2454_v42 = vadd.f32 %v2326_v54, %v2024_v9  ;;  %v2261_v58 = vsel %vm2114_vm15, %v4819_v52, 0.0  ;;  %vm2538_vm0 = vcmp.eq.s32.totalorder %v6016_v38, %v4835_v29  ;;  %vm2966_vm1 = vcmp.eq.s32.totalorder %v6016_v38, %v4841_v25 }
 0x185   : > { %3823 = vmatprep.subr.mxu0 %v3666_v6  ;;  %v1959_v44 = vadd.f32 %v1831_v16, %v1535_v26  ;;  %v2685_v24 = vsel %vm2538_vm0, %v4838_v28, 0.0  ;;  %v3113_v57 = vsel %vm2966_vm1, %v4844_v39, 0.0  ;;  %vm3390_vm4 = vcmp.eq.s32.totalorder %v6016_v38, %v4847_v40 }
 0x186   : > { %v2878_v62 = vadd.f32 %v2750_v2, %v2454_v42  ;;  %vm440_vm9 = vcmp.eq.s32.totalorder %v6122_v32, %v4779_v7  ;;  %vm884_vm5 = vcmp.eq.s32.totalorder %v6122_v32, %v4786_v55  ;;  %vm1324_vm6 = vcmp.eq.s32.totalorder %v6122_v32, %v4789_v20 }
 0x187   : > { %v2389_v53 = vadd.f32 %v2261_v58, %v1959_v44  ;;  %v587_v8 = vsel %vm440_vm9, %v4766_v45, 0.0  ;;  %v1031_v46 = vsel %vm884_vm5, %v4556_v43, 0.0  ;;  %v1471_v41 = vsel %vm1324_vm6, %v4776_v33, 0.0 }
 0x188   : > { %v3306_v14 = vadd.f32 %v3178_v3, %v2878_v62  ;;  %v1159_v11 = vadd.f32 %v1031_v46, %v587_v8  ;;  %vm1748_vm11 = vcmp.eq.s32.totalorder %v6122_v32, %v4798_v21  ;;  %vm2178_vm13 = vcmp.eq.s32.totalorder %v6122_v32, %v4809_v4 }
 0x189   : > { %v2813_v22 = vadd.f32 %v2685_v24, %v2389_v53  ;;  %v1895_v5 = vsel %vm1748_vm11, %v4801_v59, 0.0  ;;  %vm2602_vm8 = vcmp.eq.s32.totalorder %v6122_v32, %v4835_v29  ;;  %v3537_v49 = vsel %vm3390_vm4, %v4850_v0, 0.0 }
 0x18a   : > { %v3730_v48 = vadd.f32 %v3602_v12, %v3306_v14  ;;  %v1599_v56 = vadd.f32 %v1471_v41, %v1159_v11  ;;  %vm3030_vm3 = vcmp.eq.s32.totalorder %v6122_v32, %v4841_v25  ;;  %v2325_v54 = vsel %vm2178_vm13, %v4819_v52, 0.0 }
 0x18b   : > { %v3241_v51 = vadd.f32 %v3113_v57, %v2813_v22  ;;  %v2749_v2 = vsel %vm2602_vm8, %v4838_v28, 0.0  ;;  %v6196_v13 = vadd.s32 8, %v4370_v1  ;;  %v3177_v10 = vsel %vm3030_vm3, %v4844_v39, 0.0 }
 0x18c   : > { %3894 = vmatprep.subr.mxu1 %v3730_v48  ;;  %v2023_v3 = vadd.f32 %v1895_v5, %v1599_v56  ;;  %vm3454_vm12 = vcmp.eq.s32.totalorder %v6122_v32, %v4847_v40  ;;  %v6202_v38 = vadd.s32 264, %v4370_v1 }
 0x18d   : > { %v3665_v9 = vadd.f32 %v3537_v49, %v3241_v51  ;;  %vm375_vm7 = vcmp.eq.s32.totalorder %v6196_v13, %v4585_v61  ;;  %vm819_vm10 = vcmp.eq.s32.totalorder %v6196_v13, %v4624_v19  ;;  %vm1259_vm2 = vcmp.eq.s32.totalorder %v6196_v13, %v4675_v23 }
 0x18e   : > { %v2453_v15 = vadd.f32 %v2325_v54, %v2023_v3  ;;  %v522_v6 = vsel %vm375_vm7, %v4523_v30, 0.0  ;;  %v966_v12 = vsel %vm819_vm10, %v4526_v31, 0.0  ;;  %v1406_v26 = vsel %vm1259_vm2, %v4611_v17, 0.0 }
 0x18f   : > { %3824 = vmatpush1.msra.mxu0 %v3665_v9  ;;  %v1094_v16 = vadd.f32 %v966_v12, %v522_v6  ;;  %vm1683_vm14 = vcmp.eq.s32.totalorder %v6196_v13, %v4678_v35  ;;  %vm2113_vm15 = vcmp.eq.s32.totalorder %v6196_v13, %v4664_v37  ;;  %vm2537_vm0 = vcmp.eq.s32.totalorder %v6196_v13, %v4688_v50 }
 0x190   : > { %v2877_v42 = vadd.f32 %v2749_v2, %v2453_v15  ;;  %v3601_v58 = vsel %vm3454_vm12, %v4850_v0, 0.0  ;;  %v1830_v44 = vsel %vm1683_vm14, %v4614_v18, 0.0  ;;  %v2260_v24 = vsel %vm2113_vm15, %v4641_v60, 0.0 }
 0x191   : > { %v1534_v57 = vadd.f32 %v1406_v26, %v1094_v16  ;;  %vm2965_vm1 = vcmp.eq.s32.totalorder %v6196_v13, %v4728_v27  ;;  %vm3389_vm4 = vcmp.eq.s32.totalorder %v6196_v13, %v4736_v36  ;;  %vm439_vm9 = vcmp.eq.s32.totalorder %v6202_v38, %v4585_v61 }
 0x192   : > { %v3305_v62 = vadd.f32 %v3177_v10, %v2877_v42  ;;  %v2684_v53 = vsel %vm2537_vm0, %v4681_v47, 0.0  ;;  %v3112_v32 = vsel %vm2965_vm1, %v4710_v63, 0.0  ;;  %v586_v8 = vsel %vm439_vm9, %v4523_v30, 0.0 }
 0x193   : > { %v1958_v46 = vadd.f32 %v1830_v44, %v1534_v57  ;;  %vm883_vm5 = vcmp.eq.s32.totalorder %v6202_v38, %v4624_v19  ;;  %vm1323_vm6 = vcmp.eq.s32.totalorder %v6202_v38, %v4675_v23  ;;  %vm1747_vm11 = vcmp.eq.s32.totalorder %v6202_v38, %v4678_v35 }
 0x194   : > { %v3729_v41 = vadd.f32 %v3601_v58, %v3305_v62  ;;  %v3536_v14 = vsel %vm3389_vm4, %v4731_v34, 0.0  ;;  %v1030_v11 = vsel %vm883_vm5, %v4526_v31, 0.0  ;;  %v1470_v22 = vsel %vm1323_vm6, %v4611_v17, 0.0 }
 0x195   : > { %v2388_v5 = vadd.f32 %v2260_v24, %v1958_v46  ;;  %v1158_v48 = vadd.f32 %v1030_v11, %v586_v8  ;;  %vm2177_vm13 = vcmp.eq.s32.totalorder %v6202_v38, %v4664_v37  ;;  %vm2601_vm8 = vcmp.eq.s32.totalorder %v6202_v38, %v4688_v50 }
 0x196   : > { %3895 = vmatpush1.msra.mxu1 %v3729_v41  ;;  %v1894_v49 = vsel %vm1747_vm11, %v4614_v18, 0.0  ;;  %v2324_v56 = vsel %vm2177_vm13, %v4641_v60, 0.0  ;;  %v2748_v51 = vsel %vm2601_vm8, %v4681_v47, 0.0  ;;  %vm3029_vm3 = vcmp.eq.s32.totalorder %v6202_v38, %v4728_v27 }
 0x197   : > { %v2812_v54 = vadd.f32 %v2684_v53, %v2388_v5  ;;  %v1598_v2 = vadd.f32 %v1470_v22, %v1158_v48  ;;  %v3176_v3 = vsel %vm3029_vm3, %v4710_v63, 0.0  ;;  %vm3453_vm12 = vcmp.eq.s32.totalorder %v6202_v38, %v4736_v36 }
 0x198   : > { %vm374_vm7 = vcmp.eq.s32.totalorder %v6196_v13, %v4779_v7  ;;  %vm818_vm10 = vcmp.eq.s32.totalorder %v6196_v13, %v4786_v55  ;;  %vm1258_vm2 = vcmp.eq.s32.totalorder %v6196_v13, %v4789_v20  ;;  %vm1682_vm14 = vcmp.eq.s32.totalorder %v6196_v13, %v4798_v21 }
 0x199   : > { %vm373_vm15 = vcmp.eq.s32.totalorder %v4370_v1, %v4585_v61  ;;  %v3240_v10 = vadd.f32 %v3112_v32, %v2812_v54  ;;  %v2022_v9 = vadd.f32 %v1894_v49, %v1598_v2  ;;  %v521_v15 = vsel %vm374_vm7, %v4766_v45, 0.0 }
 0x19a   : > { %v965_v6 = vsel %vm818_vm10, %v4556_v43, 0.0  ;;  %v3600_v12 = vsel %vm3453_vm12, %v4731_v34, 0.0  ;;  %v1405_v16 = vsel %vm1258_vm2, %v4776_v33, 0.0  ;;  %vm2112_vm0 = vcmp.eq.s32.totalorder %v6196_v13, %v4809_v4 }
 0x19b   : > { %v1093_v26 = vadd.f32 %v965_v6, %v521_v15  ;;  %v3664_v42 = vadd.f32 %v3536_v14, %v3240_v10  ;;  %v2452_v58 = vadd.f32 %v2324_v56, %v2022_v9  ;;  %v1829_v44 = vsel %vm1682_vm14, %v4801_v59, 0.0 }
 0x19c   : > { %vm2536_vm1 = vcmp.eq.s32.totalorder %v6196_v13, %v4835_v29  ;;  %v2259_v57 = vsel %vm2112_vm0, %v4819_v52, 0.0  ;;  %vm2964_vm4 = vcmp.eq.s32.totalorder %v6196_v13, %v4841_v25  ;;  %vm3388_vm9 = vcmp.eq.s32.totalorder %v6196_v13, %v4847_v40 }
 0x19d   : > { %v1533_v24 = vadd.f32 %v1405_v16, %v1093_v26  ;;  %v2683_v62 = vsel %vm2536_vm1, %v4838_v28, 0.0  ;;  %3825 = vmatprep.subr.mxu0 %v3664_v42  ;;  %v2876_v53 = vadd.f32 %v2748_v51, %v2452_v58  ;;  %v3111_v32 = vsel %vm2964_vm4, %v4844_v39, 0.0 }
 0x19e   : > { %vm438_vm5 = vcmp.eq.s32.totalorder %v6202_v38, %v4779_v7  ;;  %vm882_vm6 = vcmp.eq.s32.totalorder %v6202_v38, %v4786_v55  ;;  %vm1322_vm11 = vcmp.eq.s32.totalorder %v6202_v38, %v4789_v20  ;;  %vm1746_vm13 = vcmp.eq.s32.totalorder %v6202_v38, %v4798_v21 }
 0x19f   : > { %v1957_v8 = vadd.f32 %v1829_v44, %v1533_v24  ;;  %v585_v46 = vsel %vm438_vm5, %v4766_v45, 0.0  ;;  %v3304_v41 = vadd.f32 %v3176_v3, %v2876_v53  ;;  %v1029_v14 = vsel %vm882_vm6, %v4556_v43, 0.0 }
 0x1a0   : > { %v1469_v11 = vsel %vm1322_vm11, %v4776_v33, 0.0  ;;  %v3535_v22 = vsel %vm3388_vm9, %v4850_v0, 0.0  ;;  %v1157_v5 = vadd.f32 %v1029_v14, %v585_v46  ;;  %vm2176_vm8 = vcmp.eq.s32.totalorder %v6202_v38, %v4809_v4 }
 0x1a1   : > { %v2387_v13 = vadd.f32 %v2259_v57, %v1957_v8  ;;  %v3728_v48 = vadd.f32 %v3600_v12, %v3304_v41  ;;  %v1893_v49 = vsel %vm1746_vm13, %v4801_v59, 0.0  ;;  %vm2600_vm3 = vcmp.eq.s32.totalorder %v6202_v38, %v4835_v29 }
 0x1a2   : > { %vm3028_vm12 = vcmp.eq.s32.totalorder %v6202_v38, %v4841_v25  ;;  %v1597_v51 = vadd.f32 %v1469_v11, %v1157_v5  ;;  %v2323_v54 = vsel %vm2176_vm8, %v4819_v52, 0.0  ;;  %v2747_v2 = vsel %vm2600_vm3, %v4838_v28, 0.0 }
 0x1a3   : > { %v2811_v56 = vadd.f32 %v2683_v62, %v2387_v13  ;;  %3896 = vmatprep.subr.mxu1 %v3728_v48  ;;  %vm3452_vm7 = vcmp.eq.s32.totalorder %v6202_v38, %v4847_v40  ;;  %v520_v3 = vsel %vm373_vm15, %v4523_v30, 0.0  ;;  %vm817_vm10 = vcmp.eq.s32.totalorder %v4370_v1, %v4624_v19 }
 0x1a4   : > { %vm1257_vm2 = vcmp.eq.s32.totalorder %v4370_v1, %v4675_v23  ;;  %v2021_v9 = vadd.f32 %v1893_v49, %v1597_v51  ;;  %v3175_v15 = vsel %vm3028_vm12, %v4844_v39, 0.0  ;;  %v964_v6 = vsel %vm817_vm10, %v4526_v31, 0.0 }
 0x1a5   : > { %v3239_v10 = vadd.f32 %v3111_v32, %v2811_v56  ;;  %v1092_v12 = vadd.f32 %v964_v6, %v520_v3  ;;  %v1404_v38 = vsel %vm1257_vm2, %v4611_v17, 0.0  ;;  %vm1681_vm14 = vcmp.eq.s32.totalorder %v4370_v1, %v4678_v35 }
 0x1a6   : > { %vm2111_vm15 = vcmp.eq.s32.totalorder %v4370_v1, %v4664_v37  ;;  %v2451_v16 = vadd.f32 %v2323_v54, %v2021_v9  ;;  %v3599_v42 = vsel %vm3452_vm7, %v4850_v0, 0.0  ;;  %v1828_v58 = vsel %vm1681_vm14, %v4614_v18, 0.0 }
 0x1a7   : > { %v3663_v26 = vadd.f32 %v3535_v22, %v3239_v10  ;;  %v1532_v44 = vadd.f32 %v1404_v38, %v1092_v12  ;;  %v2258_v24 = vsel %vm2111_vm15, %v4641_v60, 0.0  ;;  %vm2535_vm0 = vcmp.eq.s32.totalorder %v4370_v1, %v4688_v50 }
 0x1a8   : > { %vm2963_vm1 = vcmp.eq.s32.totalorder %v4370_v1, %v4728_v27  ;;  %v2875_v57 = vadd.f32 %v2747_v2, %v2451_v16  ;;  %v2682_v62 = vsel %vm2535_vm0, %v4681_v47, 0.0  ;;  %vm3387_vm4 = vcmp.eq.s32.totalorder %v4370_v1, %v4736_v36 }
 0x1a9   : > { %3826 = vmatpush1.msra.mxu0 %v3663_v26  ;;  %v3110_v53 = vsel %vm2963_vm1, %v4710_v63, 0.0  ;;  %v1956_v32 = vadd.f32 %v1828_v58, %v1532_v44  ;;  %v6331_v8 = vadd.s32 256, %v4370_v1  ;;  %vm372_vm9 = vcmp.eq.s32.totalorder %v4370_v1, %v4779_v7 }
 0x1aa   : > { %vm816_vm5 = vcmp.eq.s32.totalorder %v4370_v1, %v4786_v55  ;;  %v3303_v46 = vadd.f32 %v3175_v15, %v2875_v57  ;;  %v519_v41 = vsel %vm372_vm9, %v4766_v45, 0.0  ;;  %vm1256_vm6 = vcmp.eq.s32.totalorder %v4370_v1, %v4789_v20 }
 0x1ab   : > { %v963_v14 = vsel %vm816_vm5, %v4556_v43, 0.0  ;;  %v2386_v11 = vadd.f32 %v2258_v24, %v1956_v32  ;;  %vm437_vm11 = vcmp.eq.s32.totalorder %v6331_v8, %v4585_v61  ;;  %vm881_vm13 = vcmp.eq.s32.totalorder %v6331_v8, %v4624_v19 }
 0x1ac   : > { %vm1321_vm8 = vcmp.eq.s32.totalorder %v6331_v8, %v4675_v23  ;;  %v3727_v13 = vadd.f32 %v3599_v42, %v3303_v46  ;;  %v584_v22 = vsel %vm437_vm11, %v4523_v30, 0.0  ;;  %v1028_v5 = vsel %vm881_vm13, %v4526_v31, 0.0 }
 0x1ad   : > { %v1468_v48 = vsel %vm1321_vm8, %v4611_v17, 0.0  ;;  %v2810_v49 = vadd.f32 %v2682_v62, %v2386_v11  ;;  %v1156_v56 = vadd.f32 %v1028_v5, %v584_v22  ;;  %vm1745_vm3 = vcmp.eq.s32.totalorder %v6331_v8, %v4678_v35 }
 0x1ae   : > { %vm2175_vm12 = vcmp.eq.s32.totalorder %v6331_v8, %v4664_v37  ;;  %3897 = vmatpush1.msra.mxu1 %v3727_v13  ;;  %v3534_v51 = vsel %vm3387_vm4, %v4731_v34, 0.0  ;;  %v1892_v54 = vsel %vm1745_vm3, %v4614_v18, 0.0  ;;  %vm2599_vm7 = vcmp.eq.s32.totalorder %v6331_v8, %v4688_v50 }
 0x1af   : > { %vm3027_vm10 = vcmp.eq.s32.totalorder %v6331_v8, %v4728_v27  ;;  %v3238_v2 = vadd.f32 %v3110_v53, %v2810_v49  ;;  %v1596_v3 = vadd.f32 %v1468_v48, %v1156_v56  ;;  %v2322_v10 = vsel %vm2175_vm12, %v4641_v60, 0.0 }
 0x1b0   : > { %v2746_v9 = vsel %vm2599_vm7, %v4681_v47, 0.0  ;;  %vm3451_vm2 = vcmp.eq.s32.totalorder %v6331_v8, %v4736_v36  ;;  %v1091_v15 = vadd.f32 %v963_v14, %v519_v41  ;;  %v1403_v6 = vsel %vm1256_vm6, %v4776_v33, 0.0 }
 0x1b1   : > { %vm1680_vm14 = vcmp.eq.s32.totalorder %v4370_v1, %v4798_v21  ;;  %v3662_v12 = vadd.f32 %v3534_v51, %v3238_v2  ;;  %v2020_v38 = vadd.f32 %v1892_v54, %v1596_v3  ;;  %v3174_v26 = vsel %vm3027_vm10, %v4710_v63, 0.0 }
 0x1b2   : > { %v1827_v16 = vsel %vm1680_vm14, %v4801_v59, 0.0  ;;  %v1531_v42 = vadd.f32 %v1403_v6, %v1091_v15  ;;  %vm2110_vm15 = vcmp.eq.s32.totalorder %v4370_v1, %v4809_v4  ;;  %vm2534_vm0 = vcmp.eq.s32.totalorder %v4370_v1, %v4835_v29 }
 0x1b3   : > { %vm2962_vm1 = vcmp.eq.s32.totalorder %v4370_v1, %v4841_v25  ;;  %3827 = vmatprep.subr.mxu0 %v3662_v12  ;;  %v2450_v58 = vadd.f32 %v2322_v10, %v2020_v38  ;;  %v3598_v44 = vsel %vm3451_vm2, %v4731_v34, 0.0  ;;  %v2257_v24 = vsel %vm2110_vm15, %v4819_v52, 0.0 }
 0x1b4   : > { %v2681_v57 = vsel %vm2534_vm0, %v4838_v28, 0.0  ;;  %v1955_v62 = vadd.f32 %v1827_v16, %v1531_v42  ;;  %v3109_v53 = vsel %vm2962_vm1, %v4844_v39, 0.0  ;;  %vm436_vm4 = vcmp.eq.s32.totalorder %v6331_v8, %v4779_v7 }
 0x1b5   : > { %vm880_vm9 = vcmp.eq.s32.totalorder %v6331_v8, %v4786_v55  ;;  %v2874_v32 = vadd.f32 %v2746_v9, %v2450_v58  ;;  %vm3386_vm5 = vcmp.eq.s32.totalorder %v4370_v1, %v4847_v40  ;;  %v583_v46 = vsel %vm436_vm4, %v4766_v45, 0.0 }
 0x1b6   : > { %v1027_v41 = vsel %vm880_vm9, %v4556_v43, 0.0  ;;  %v2385_v14 = vadd.f32 %v2257_v24, %v1955_v62  ;;  %vm1320_vm6 = vcmp.eq.s32.totalorder %v6331_v8, %v4789_v20  ;;  %vm1744_vm11 = vcmp.eq.s32.totalorder %v6331_v8, %v4798_v21 }
 0x1b7   : > { %v1155_v11 = vadd.f32 %v1027_v41, %v583_v46  ;;  %v3302_v13 = vadd.f32 %v3174_v26, %v2874_v32  ;;  %v1467_v22 = vsel %vm1320_vm6, %v4776_v33, 0.0  ;;  %v1891_v5 = vsel %vm1744_vm11, %v4801_v59, 0.0 }
 0x1b8   : > { %vm2174_vm13 = vcmp.eq.s32.totalorder %v6331_v8, %v4809_v4  ;;  %v2809_v48 = vadd.f32 %v2681_v57, %v2385_v14  ;;  %v3533_v49 = vsel %vm3386_vm5, %v4850_v0, 0.0  ;;  %vm2598_vm8 = vcmp.eq.s32.totalorder %v6331_v8, %v4835_v29 }
 0x1b9   : > { %v1595_v56 = vadd.f32 %v1467_v22, %v1155_v11  ;;  %v3726_v51 = vadd.f32 %v3598_v44, %v3302_v13  ;;  %v2321_v54 = vsel %vm2174_vm13, %v4819_v52, 0.0  ;;  %vm3026_vm3 = vcmp.eq.s32.totalorder %v6331_v8, %v4841_v25 }
 0x1ba   : > { %vm3450_vm12 = vcmp.eq.s32.totalorder %v6331_v8, %v4847_v40  ;;  %v3237_v2 = vadd.f32 %v3109_v53, %v2809_v48  ;;  %v2745_v10 = vsel %vm2598_vm8, %v4838_v28, 0.0  ;;  %v3173_v9 = vsel %vm3026_vm3, %v4844_v39, 0.0 }
 0x1bb   : > { %v2019_v3 = vadd.f32 %v1891_v5, %v1595_v56  ;;  %3898 = vmatprep.subr.mxu1 %v3726_v51  ;;  %v3597_v15 = vsel %vm3450_vm12, %v4850_v0, 0.0  ;;  %v6413_v6 = vadd.s32 248, %v4370_v1  ;;  %v6416_v12 = vadd.s32 504, %v4370_v1 }
 0x1bc   : > { %v3661_v38 = vadd.f32 %v3533_v49, %v3237_v2  ;;  %v6419_v16 = vadd.s32 240, %v4370_v1  ;;  %v6422_v8 = vadd.s32 496, %v4370_v1  ;;  %v6440_v62 = vadd.s32 232, %v4370_v1 }
 0x1bd   : > { %v2449_v26 = vadd.f32 %v2321_v54, %v2019_v3  ;;  %vm435_vm7 = vcmp.eq.s32.totalorder %v6413_v6, %v4585_v61  ;;  %vm879_vm10 = vcmp.eq.s32.totalorder %v6413_v6, %v4624_v19  ;;  %vm1319_vm2 = vcmp.eq.s32.totalorder %v6413_v6, %v4675_v23 }
 0x1be   : > { %vm1743_vm14 = vcmp.eq.s32.totalorder %v6413_v6, %v4678_v35  ;;  %3828 = vmatpush1.msra.mxu0 %v3661_v38  ;;  %v582_v58 = vsel %vm435_vm7, %v4523_v30, 0.0  ;;  %v1026_v44 = vsel %vm879_vm10, %v4526_v31, 0.0  ;;  %v1466_v24 = vsel %vm1319_vm2, %v4611_v17, 0.0 }
 0x1bf   : > { %v2873_v42 = vadd.f32 %v2745_v10, %v2449_v26  ;;  %v1154_v57 = vadd.f32 %v1026_v44, %v582_v58  ;;  %vm2173_vm15 = vcmp.eq.s32.totalorder %v6413_v6, %v4664_v37  ;;  %vm2597_vm0 = vcmp.eq.s32.totalorder %v6413_v6, %v4688_v50 }
 0x1c0   : > { %v1890_v32 = vsel %vm1743_vm14, %v4614_v18, 0.0  ;;  %v2320_v46 = vsel %vm2173_vm15, %v4641_v60, 0.0  ;;  %v6445_v41 = vadd.s32 488, %v4370_v1  ;;  %v2744_v11 = vsel %vm2597_vm0, %v4681_v47, 0.0 }
 0x1c1   : > { %v3301_v53 = vadd.f32 %v3173_v9, %v2873_v42  ;;  %v1594_v14 = vadd.f32 %v1466_v24, %v1154_v57  ;;  %vm3025_vm1 = vcmp.eq.s32.totalorder %v6413_v6, %v4728_v27  ;;  %vm499_vm4 = vcmp.eq.s32.totalorder %v6416_v12, %v4585_v61 }
 0x1c2   : > { %vm3449_vm9 = vcmp.eq.s32.totalorder %v6413_v6, %v4736_v36  ;;  %v646_v22 = vsel %vm499_vm4, %v4523_v30, 0.0  ;;  %vm943_vm5 = vcmp.eq.s32.totalorder %v6416_v12, %v4624_v19  ;;  %vm1383_vm6 = vcmp.eq.s32.totalorder %v6416_v12, %v4675_v23 }
 0x1c3   : > { %v3725_v13 = vadd.f32 %v3597_v15, %v3301_v53  ;;  %v2018_v5 = vadd.f32 %v1890_v32, %v1594_v14  ;;  %v1090_v48 = vsel %vm943_vm5, %v4526_v31, 0.0  ;;  %vm1807_vm11 = vcmp.eq.s32.totalorder %v6416_v12, %v4678_v35 }
 0x1c4   : > { %v3172_v49 = vsel %vm3025_vm1, %v4710_v63, 0.0  ;;  %v1218_v56 = vadd.f32 %v1090_v48, %v646_v22  ;;  %v1530_v51 = vsel %vm1383_vm6, %v4611_v17, 0.0  ;;  %vm2237_vm13 = vcmp.eq.s32.totalorder %v6416_v12, %v4664_v37 }
 0x1c5   : > { %3899 = vmatpush1.msra.mxu1 %v3725_v13  ;;  %v2448_v54 = vadd.f32 %v2320_v46, %v2018_v5  ;;  %v3596_v2 = vsel %vm3449_vm9, %v4731_v34, 0.0  ;;  %v1954_v3 = vsel %vm1807_vm11, %v4614_v18, 0.0  ;;  %vm2661_vm8 = vcmp.eq.s32.totalorder %v6416_v12, %v4688_v50 }
 0x1c6   : > { %v1658_v10 = vadd.f32 %v1530_v51, %v1218_v56  ;;  %v2384_v9 = vsel %vm2237_vm13, %v4641_v60, 0.0  ;;  %v2808_v15 = vsel %vm2661_vm8, %v4681_v47, 0.0  ;;  %vm3089_vm3 = vcmp.eq.s32.totalorder %v6416_v12, %v4728_v27 }
 0x1c7   : > { %v2872_v38 = vadd.f32 %v2744_v11, %v2448_v54  ;;  %vm3513_vm12 = vcmp.eq.s32.totalorder %v6416_v12, %v4736_v36  ;;  %vm434_vm7 = vcmp.eq.s32.totalorder %v6413_v6, %v4779_v7  ;;  %vm878_vm10 = vcmp.eq.s32.totalorder %v6413_v6, %v4786_v55 }
 0x1c8   : > { %v2082_v26 = vadd.f32 %v1954_v3, %v1658_v10  ;;  %v581_v42 = vsel %vm434_vm7, %v4766_v45, 0.0  ;;  %v1025_v58 = vsel %vm878_vm10, %v4556_v43, 0.0  ;;  %vm1318_vm2 = vcmp.eq.s32.totalorder %v6413_v6, %v4789_v20 }
 0x1c9   : > { %v3300_v44 = vadd.f32 %v3172_v49, %v2872_v38  ;;  %v1153_v24 = vadd.f32 %v1025_v58, %v581_v42  ;;  %v1465_v57 = vsel %vm1318_vm2, %v4776_v33, 0.0  ;;  %vm1742_vm14 = vcmp.eq.s32.totalorder %v6413_v6, %v4798_v21 }
 0x1ca   : > { %v2512_v53 = vadd.f32 %v2384_v9, %v2082_v26  ;;  %v1889_v32 = vsel %vm1742_vm14, %v4801_v59, 0.0  ;;  %vm2172_vm15 = vcmp.eq.s32.totalorder %v6413_v6, %v4809_v4  ;;  %vm2596_vm0 = vcmp.eq.s32.totalorder %v6413_v6, %v4835_v29 }
 0x1cb   : > { %v3724_v46 = vadd.f32 %v3596_v2, %v3300_v44  ;;  %v3236_v14 = vsel %vm3089_vm3, %v4710_v63, 0.0  ;;  %v3660_v11 = vsel %vm3513_vm12, %v4731_v34, 0.0  ;;  %v1593_v13 = vadd.f32 %v1465_v57, %v1153_v24 }
 0x1cc   : > { %v2936_v22 = vadd.f32 %v2808_v15, %v2512_v53  ;;  %v2319_v5 = vsel %vm2172_vm15, %v4819_v52, 0.0  ;;  %vm3024_vm1 = vcmp.eq.s32.totalorder %v6413_v6, %v4841_v25  ;;  %vm498_vm4 = vcmp.eq.s32.totalorder %v6416_v12, %v4779_v7 }
 0x1cd   : > { %3829 = vmatprep.subr.mxu0 %v3724_v46  ;;  %v2017_v48 = vadd.f32 %v1889_v32, %v1593_v13  ;;  %v2743_v49 = vsel %vm2596_vm0, %v4838_v28, 0.0  ;;  %vm3448_vm9 = vcmp.eq.s32.totalorder %v6413_v6, %v4847_v40  ;;  %v645_v56 = vsel %vm498_vm4, %v4766_v45, 0.0 }
 0x1ce   : > { %v3364_v51 = vadd.f32 %v3236_v14, %v2936_v22  ;;  %vm942_vm5 = vcmp.eq.s32.totalorder %v6416_v12, %v4786_v55  ;;  %vm1382_vm6 = vcmp.eq.s32.totalorder %v6416_v12, %v4789_v20  ;;  %vm1806_vm11 = vcmp.eq.s32.totalorder %v6416_v12, %v4798_v21 }
 0x1cf   : > { %v2447_v54 = vadd.f32 %v2319_v5, %v2017_v48  ;;  %v3171_v2 = vsel %vm3024_vm1, %v4844_v39, 0.0  ;;  %v1089_v3 = vsel %vm942_vm5, %v4556_v43, 0.0  ;;  %v1529_v10 = vsel %vm1382_vm6, %v4776_v33, 0.0 }
 0x1d0   : > { %v3788_v6 = vadd.f32 %v3660_v11, %v3364_v51  ;;  %v1217_v9 = vadd.f32 %v1089_v3, %v645_v56  ;;  %vm2236_vm13 = vcmp.eq.s32.totalorder %v6416_v12, %v4809_v4  ;;  %vm2660_vm8 = vcmp.eq.s32.totalorder %v6416_v12, %v4835_v29 }
 0x1d1   : > { %v2871_v15 = vadd.f32 %v2743_v49, %v2447_v54  ;;  %v3595_v38 = vsel %vm3448_vm9, %v4850_v0, 0.0  ;;  %v1953_v26 = vsel %vm1806_vm11, %v4801_v59, 0.0  ;;  %v2383_v42 = vsel %vm2236_vm13, %v4819_v52, 0.0 }
 0x1d2   : > { %3900 = vmatprep.subr.mxu1 %v3788_v6  ;;  %v1657_v58 = vadd.f32 %v1529_v10, %v1217_v9  ;;  %v2807_v44 = vsel %vm2660_vm8, %v4838_v28, 0.0  ;;  %vm3088_vm3 = vcmp.eq.s32.totalorder %v6416_v12, %v4841_v25  ;;  %vm433_vm12 = vcmp.eq.s32.totalorder %v6419_v16, %v4585_v61 }
 0x1d3   : > { %v3299_v24 = vadd.f32 %v3171_v2, %v2871_v15  ;;  %vm3512_vm7 = vcmp.eq.s32.totalorder %v6416_v12, %v4847_v40  ;;  %v580_v57 = vsel %vm433_vm12, %v4523_v30, 0.0  ;;  %vm877_vm10 = vcmp.eq.s32.totalorder %v6419_v16, %v4624_v19 }
 0x1d4   : > { %v2081_v53 = vadd.f32 %v1953_v26, %v1657_v58  ;;  %v1024_v32 = vsel %vm877_vm10, %v4526_v31, 0.0  ;;  %vm1317_vm2 = vcmp.eq.s32.totalorder %v6419_v16, %v4675_v23  ;;  %vm1741_vm14 = vcmp.eq.s32.totalorder %v6419_v16, %v4678_v35 }
 0x1d5   : > { %v3723_v46 = vadd.f32 %v3595_v38, %v3299_v24  ;;  %v3235_v14 = vsel %vm3088_vm3, %v4844_v39, 0.0  ;;  %v1152_v11 = vadd.f32 %v1024_v32, %v580_v57  ;;  %v1464_v13 = vsel %vm1317_vm2, %v4611_v17, 0.0 }
 0x1d6   : > { %v2511_v22 = vadd.f32 %v2383_v42, %v2081_v53  ;;  %v1888_v5 = vsel %vm1741_vm14, %v4614_v18, 0.0  ;;  %vm2171_vm15 = vcmp.eq.s32.totalorder %v6419_v16, %v4664_v37  ;;  %vm2595_vm0 = vcmp.eq.s32.totalorder %v6419_v16, %v4688_v50 }
 0x1d7   : > { %3830 = vmatpush2.msra.mxu0 %v3723_v46  ;;  %v3659_v48 = vsel %vm3512_vm7, %v4850_v0, 0.0  ;;  %v1592_v49 = vadd.f32 %v1464_v13, %v1152_v11  ;;  %v2318_v56 = vsel %vm2171_vm15, %v4641_v60, 0.0  ;;  %vm3023_vm1 = vcmp.eq.s32.totalorder %v6419_v16, %v4728_v27 }
 0x1d8   : > { %v2935_v51 = vadd.f32 %v2807_v44, %v2511_v22  ;;  %v2742_v54 = vsel %vm2595_vm0, %v4681_v47, 0.0  ;;  %vm497_vm4 = vcmp.eq.s32.totalorder %v6422_v8, %v4585_v61  ;;  %vm941_vm9 = vcmp.eq.s32.totalorder %v6422_v8, %v4624_v19 }
 0x1d9   : > { %v2016_v2 = vadd.f32 %v1888_v5, %v1592_v49  ;;  %vm3447_vm5 = vcmp.eq.s32.totalorder %v6419_v16, %v4736_v36  ;;  %v644_v12 = vsel %vm497_vm4, %v4523_v30, 0.0  ;;  %v1088_v3 = vsel %vm941_vm9, %v4526_v31, 0.0 }
 0x1da   : > { %v3363_v10 = vadd.f32 %v3235_v14, %v2935_v51  ;;  %v1216_v6 = vadd.f32 %v1088_v3, %v644_v12  ;;  %vm1381_vm6 = vcmp.eq.s32.totalorder %v6422_v8, %v4675_v23  ;;  %vm1805_vm11 = vcmp.eq.s32.totalorder %v6422_v8, %v4678_v35 }
 0x1db   : > { %v2446_v9 = vadd.f32 %v2318_v56, %v2016_v2  ;;  %v1528_v15 = vsel %vm1381_vm6, %v4611_v17, 0.0  ;;  %v1952_v38 = vsel %vm1805_vm11, %v4614_v18, 0.0  ;;  %vm2235_vm13 = vcmp.eq.s32.totalorder %v6422_v8, %v4664_v37 }
 0x1dc   : > { %v3787_v26 = vadd.f32 %v3659_v48, %v3363_v10  ;;  %v3170_v42 = vsel %vm3023_vm1, %v4710_v63, 0.0  ;;  %v1656_v58 = vadd.f32 %v1528_v15, %v1216_v6  ;;  %vm2659_vm8 = vcmp.eq.s32.totalorder %v6422_v8, %v4688_v50 }
 0x1dd   : > { %v2870_v44 = vadd.f32 %v2742_v54, %v2446_v9  ;;  %v3594_v24 = vsel %vm3447_vm5, %v4731_v34, 0.0  ;;  %v2382_v57 = vsel %vm2235_vm13, %v4641_v60, 0.0  ;;  %v2806_v53 = vsel %vm2659_vm8, %v4681_v47, 0.0 }
 0x1de   : > { %3901 = vmatpush2.msra.mxu1 %v3787_v26  ;;  %v2080_v32 = vadd.f32 %v1952_v38, %v1656_v58  ;;  %vm3087_vm3 = vcmp.eq.s32.totalorder %v6422_v8, %v4728_v27  ;;  %vm3511_vm12 = vcmp.eq.s32.totalorder %v6422_v8, %v4736_v36  ;;  %vm432_vm7 = vcmp.eq.s32.totalorder %v6419_v16, %v4779_v7 }
 0x1df   : > { %v3298_v46 = vadd.f32 %v3170_v42, %v2870_v44  ;;  %v579_v14 = vsel %vm432_vm7, %v4766_v45, 0.0  ;;  %vm876_vm10 = vcmp.eq.s32.totalorder %v6419_v16, %v4786_v55  ;;  %vm1316_vm2 = vcmp.eq.s32.totalorder %v6419_v16, %v4789_v20 }
 0x1e0   : > { %v2510_v11 = vadd.f32 %v2382_v57, %v2080_v32  ;;  %v1023_v13 = vsel %vm876_vm10, %v4556_v43, 0.0  ;;  %v1463_v22 = vsel %vm1316_vm2, %v4776_v33, 0.0  ;;  %vm1740_vm14 = vcmp.eq.s32.totalorder %v6419_v16, %v4798_v21 }
 0x1e1   : > { %v3722_v5 = vadd.f32 %v3594_v24, %v3298_v46  ;;  %v3234_v48 = vsel %vm3087_vm3, %v4710_v63, 0.0  ;;  %v1151_v49 = vadd.f32 %v1023_v13, %v579_v14  ;;  %vm2170_vm15 = vcmp.eq.s32.totalorder %v6419_v16, %v4809_v4 }
 0x1e2   : > { %v2934_v56 = vadd.f32 %v2806_v53, %v2510_v11  ;;  %v3658_v51 = vsel %vm3511_vm12, %v4731_v34, 0.0  ;;  %v1887_v54 = vsel %vm1740_vm14, %v4801_v59, 0.0  ;;  %vm2594_vm0 = vcmp.eq.s32.totalorder %v6419_v16, %v4835_v29 }
 0x1e3   : > { %3831 = vmatprep.subr.mxu0 %v3722_v5  ;;  %v1591_v2 = vadd.f32 %v1463_v22, %v1151_v49  ;;  %v2317_v12 = vsel %vm2170_vm15, %v4819_v52, 0.0  ;;  %v2741_v3 = vsel %vm2594_vm0, %v4838_v28, 0.0  ;;  %vm3022_vm1 = vcmp.eq.s32.totalorder %v6419_v16, %v4841_v25 }
 0x1e4   : > { %v3362_v10 = vadd.f32 %v3234_v48, %v2934_v56  ;;  %vm3446_vm4 = vcmp.eq.s32.totalorder %v6419_v16, %v4847_v40  ;;  %vm496_vm9 = vcmp.eq.s32.totalorder %v6422_v8, %v4779_v7  ;;  %vm940_vm5 = vcmp.eq.s32.totalorder %v6422_v8, %v4786_v55 }
 0x1e5   : > { %v2015_v6 = vadd.f32 %v1887_v54, %v1591_v2  ;;  %v643_v9 = vsel %vm496_vm9, %v4766_v45, 0.0  ;;  %v1087_v15 = vsel %vm940_vm5, %v4556_v43, 0.0  ;;  %vm1380_vm6 = vcmp.eq.s32.totalorder %v6422_v8, %v4789_v20 }
 0x1e6   : > { %v3786_v38 = vadd.f32 %v3658_v51, %v3362_v10  ;;  %v1215_v26 = vadd.f32 %v1087_v15, %v643_v9  ;;  %v1527_v42 = vsel %vm1380_vm6, %v4776_v33, 0.0  ;;  %vm1804_vm11 = vcmp.eq.s32.totalorder %v6422_v8, %v4798_v21 }
 0x1e7   : > { %v2445_v58 = vadd.f32 %v2317_v12, %v2015_v6  ;;  %v1951_v44 = vsel %vm1804_vm11, %v4801_v59, 0.0  ;;  %vm2234_vm13 = vcmp.eq.s32.totalorder %v6422_v8, %v4809_v4  ;;  %vm2658_vm8 = vcmp.eq.s32.totalorder %v6422_v8, %v4835_v29 }
 0x1e8   : > { %3902 = vmatprep.subr.mxu1 %v3786_v38  ;;  %v3169_v24 = vsel %vm3022_vm1, %v4844_v39, 0.0  ;;  %v3593_v57 = vsel %vm3446_vm4, %v4850_v0, 0.0  ;;  %v1655_v53 = vadd.f32 %v1527_v42, %v1215_v26  ;;  %v2381_v32 = vsel %vm2234_vm13, %v4819_v52, 0.0 }
 0x1e9   : > { %v2869_v46 = vadd.f32 %v2741_v3, %v2445_v58  ;;  %v2805_v14 = vsel %vm2658_vm8, %v4838_v28, 0.0  ;;  %vm3086_vm3 = vcmp.eq.s32.totalorder %v6422_v8, %v4841_v25  ;;  %vm431_vm12 = vcmp.eq.s32.totalorder %v6440_v62, %v4585_v61 }
 0x1ea   : > { %v2079_v11 = vadd.f32 %v1951_v44, %v1655_v53  ;;  %vm3510_vm7 = vcmp.eq.s32.totalorder %v6422_v8, %v4847_v40  ;;  %v578_v13 = vsel %vm431_vm12, %v4523_v30, 0.0  ;;  %vm875_vm10 = vcmp.eq.s32.totalorder %v6440_v62, %v4624_v19 }
 0x1eb   : > { %v3297_v16 = vadd.f32 %v3169_v24, %v2869_v46  ;;  %v1022_v22 = vsel %vm875_vm10, %v4526_v31, 0.0  ;;  %vm1315_vm2 = vcmp.eq.s32.totalorder %v6440_v62, %v4675_v23  ;;  %vm1739_vm14 = vcmp.eq.s32.totalorder %v6440_v62, %v4678_v35 }
 0x1ec   : > { %v2509_v5 = vadd.f32 %v2381_v32, %v2079_v11  ;;  %v3233_v48 = vsel %vm3086_vm3, %v4844_v39, 0.0  ;;  %v1150_v49 = vadd.f32 %v1022_v22, %v578_v13  ;;  %v1462_v56 = vsel %vm1315_vm2, %v4611_v17, 0.0 }
 0x1ed   : > { %v3721_v51 = vadd.f32 %v3593_v57, %v3297_v16  ;;  %v1886_v54 = vsel %vm1739_vm14, %v4614_v18, 0.0  ;;  %vm2169_vm15 = vcmp.eq.s32.totalorder %v6440_v62, %v4664_v37  ;;  %vm2593_vm0 = vcmp.eq.s32.totalorder %v6440_v62, %v4688_v50 }
 0x1ee   : > { %v2933_v2 = vadd.f32 %v2805_v14, %v2509_v5  ;;  %v3657_v12 = vsel %vm3510_vm7, %v4850_v0, 0.0  ;;  %v1590_v3 = vadd.f32 %v1462_v56, %v1150_v49  ;;  %vm3021_vm1 = vcmp.eq.s32.totalorder %v6440_v62, %v4728_v27 }
 0x1ef   : > { %3832 = vmatpush2.msra.mxu0 %v3721_v51  ;;  %v2316_v10 = vsel %vm2169_vm15, %v4641_v60, 0.0  ;;  %v2740_v6 = vsel %vm2593_vm0, %v4681_v47, 0.0  ;;  %vm495_vm4 = vcmp.eq.s32.totalorder %v6445_v41, %v4585_v61  ;;  %vm939_vm9 = vcmp.eq.s32.totalorder %v6445_v41, %v4624_v19 }
 0x1f0   : > { %v3361_v9 = vadd.f32 %v3233_v48, %v2933_v2  ;;  %v2014_v15 = vadd.f32 %v1886_v54, %v1590_v3  ;;  %vm3445_vm5 = vcmp.eq.s32.totalorder %v6440_v62, %v4736_v36  ;;  %v642_v8 = vsel %vm495_vm4, %v4523_v30, 0.0 }
 0x1f1   : > { %v1086_v38 = vsel %vm939_vm9, %v4526_v31, 0.0  ;;  %vm1379_vm6 = vcmp.eq.s32.totalorder %v6445_v41, %v4675_v23  ;;  %vm1803_vm11 = vcmp.eq.s32.totalorder %v6445_v41, %v4678_v35  ;;  %vm2233_vm13 = vcmp.eq.s32.totalorder %v6445_v41, %v4664_v37 }
 0x1f2   : > { %v3785_v26 = vadd.f32 %v3657_v12, %v3361_v9  ;;  %v2444_v42 = vadd.f32 %v2316_v10, %v2014_v15  ;;  %v1214_v58 = vadd.f32 %v1086_v38, %v642_v8  ;;  %v1526_v44 = vsel %vm1379_vm6, %v4611_v17, 0.0 }
 0x1f3   : > { %v3168_v24 = vsel %vm3021_vm1, %v4710_v63, 0.0  ;;  %v3592_v57 = vsel %vm3445_vm5, %v4731_v34, 0.0  ;;  %v1950_v53 = vsel %vm1803_vm11, %v4614_v18, 0.0  ;;  %vm2657_vm8 = vcmp.eq.s32.totalorder %v6445_v41, %v4688_v50 }
 0x1f4   : > { %3903 = vmatpush2.msra.mxu1 %v3785_v26  ;;  %v2868_v32 = vadd.f32 %v2740_v6, %v2444_v42  ;;  %v1654_v46 = vadd.f32 %v1526_v44, %v1214_v58  ;;  %v2380_v14 = vsel %vm2233_vm13, %v4641_v60, 0.0  ;;  %vm3085_vm3 = vcmp.eq.s32.totalorder %v6445_v41, %v4728_v27 }
 0x1f5   : > { %v2804_v11 = vsel %vm2657_vm8, %v4681_v47, 0.0  ;;  %vm430_vm12 = vcmp.eq.s32.totalorder %v6440_v62, %v4779_v7  ;;  %vm874_vm7 = vcmp.eq.s32.totalorder %v6440_v62, %v4786_v55  ;;  %vm1314_vm10 = vcmp.eq.s32.totalorder %v6440_v62, %v4789_v20 }
 0x1f6   : > { %v3296_v13 = vadd.f32 %v3168_v24, %v2868_v32  ;;  %v2078_v16 = vadd.f32 %v1950_v53, %v1654_v46  ;;  %vm3509_vm2 = vcmp.eq.s32.totalorder %v6445_v41, %v4736_v36  ;;  %v577_v22 = vsel %vm430_vm12, %v4766_v45, 0.0 }
 0x1f7   : > { %v1021_v5 = vsel %vm874_vm7, %v4556_v43, 0.0  ;;  %v1461_v48 = vsel %vm1314_vm10, %v4776_v33, 0.0  ;;  %vm1738_vm14 = vcmp.eq.s32.totalorder %v6440_v62, %v4798_v21  ;;  %vm2168_vm15 = vcmp.eq.s32.totalorder %v6440_v62, %v4809_v4 }
 0x1f8   : > { %v3720_v49 = vadd.f32 %v3592_v57, %v3296_v13  ;;  %v2508_v56 = vadd.f32 %v2380_v14, %v2078_v16  ;;  %v3232_v51 = vsel %vm3085_vm3, %v4710_v63, 0.0  ;;  %v1149_v54 = vadd.f32 %v1021_v5, %v577_v22 }
 0x1f9   : > { %v3656_v2 = vsel %vm3509_vm2, %v4731_v34, 0.0  ;;  %v1885_v12 = vsel %vm1738_vm14, %v4801_v59, 0.0  ;;  %v2315_v3 = vsel %vm2168_vm15, %v4819_v52, 0.0  ;;  %vm2592_vm0 = vcmp.eq.s32.totalorder %v6440_v62, %v4835_v29 }
 0x1fa   : > { %3833 = vmatprep.subr.mxu0 %v3720_v49  ;;  %v2932_v10 = vadd.f32 %v2804_v11, %v2508_v56  ;;  %v1589_v6 = vadd.f32 %v1461_v48, %v1149_v54  ;;  %vm3020_vm1 = vcmp.eq.s32.totalorder %v6440_v62, %v4841_v25  ;;  %vm3444_vm4 = vcmp.eq.s32.totalorder %v6440_v62, %v4847_v40 }
 0x1fb   : > { %v2739_v9 = vsel %vm2592_vm0, %v4838_v28, 0.0  ;;  %vm494_vm9 = vcmp.eq.s32.totalorder %v6445_v41, %v4779_v7  ;;  %vm938_vm5 = vcmp.eq.s32.totalorder %v6445_v41, %v4786_v55  ;;  %vm1378_vm6 = vcmp.eq.s32.totalorder %v6445_v41, %v4789_v20 }
 0x1fc   : > { %v3360_v15 = vadd.f32 %v3232_v51, %v2932_v10  ;;  %v2013_v8 = vadd.f32 %v1885_v12, %v1589_v6  ;;  %v641_v38 = vsel %vm494_vm9, %v4766_v45, 0.0  ;;  %v1085_v26 = vsel %vm938_vm5, %v4556_v43, 0.0 }
 0x1fd   : > { %v1213_v42 = vadd.f32 %v1085_v26, %v641_v38  ;;  %v1525_v58 = vsel %vm1378_vm6, %v4776_v33, 0.0  ;;  %vm1802_vm11 = vcmp.eq.s32.totalorder %v6445_v41, %v4798_v21  ;;  %vm2232_vm13 = vcmp.eq.s32.totalorder %v6445_v41, %v4809_v4 }
 0x1fe   : > { %v3784_v44 = vadd.f32 %v3656_v2, %v3360_v15  ;;  %v2443_v24 = vadd.f32 %v2315_v3, %v2013_v8  ;;  %v3167_v57 = vsel %vm3020_vm1, %v4844_v39, 0.0  ;;  %v1949_v53 = vsel %vm1802_vm11, %v4801_v59, 0.0 }
 0x1ff   : > { %v1653_v32 = vadd.f32 %v1525_v58, %v1213_v42  ;;  %vm2656_vm8 = vcmp.eq.s32.totalorder %v6445_v41, %v4835_v29  ;;  %vm3084_vm3 = vcmp.eq.s32.totalorder %v6445_v41, %v4841_v25  ;;  %vm3508_vm12 = vcmp.eq.s32.totalorder %v6445_v41, %v4847_v40 }
 0x200   : > { %3904 = vmatprep.subr.mxu1 %v3784_v44  ;;  %v2867_v46 = vadd.f32 %v2739_v9, %v2443_v24  ;;  %v3591_v14 = vsel %vm3444_vm4, %v4850_v0, 0.0  ;;  %v2379_v11 = vsel %vm2232_vm13, %v4819_v52, 0.0  ;;  %v2803_v13 = vsel %vm2656_vm8, %v4838_v28, 0.0 }
 0x201   : > { %v2077_v16 = vadd.f32 %v1949_v53, %v1653_v32  ;;  %v3231_v22 = vsel %vm3084_vm3, %v4844_v39, 0.0  ;;  %v3655_v5 = vsel %vm3508_vm12, %v4850_v0, 0.0  ;;  %v6752_v48 = vadd.s32 224, %v4370_v1 }
 0x202   : > { %v3295_v41 = vadd.f32 %v3167_v57, %v2867_v46  ;;  %v6755_v49 = vadd.s32 480, %v4370_v1  ;;  %v6758_v56 = vadd.s32 216, %v4370_v1  ;;  %v6761_v62 = vadd.s32 472, %v4370_v1 }
 0x203   : > { %v2507_v51 = vadd.f32 %v2379_v11, %v2077_v16  ;;  %vm429_vm7 = vcmp.eq.s32.totalorder %v6752_v48, %v4585_v61  ;;  %vm873_vm10 = vcmp.eq.s32.totalorder %v6752_v48, %v4624_v19  ;;  %vm1313_vm2 = vcmp.eq.s32.totalorder %v6752_v48, %v4675_v23 }
 0x204   : > { %v3719_v54 = vadd.f32 %v3591_v14, %v3295_v41  ;;  %v576_v2 = vsel %vm429_vm7, %v4523_v30, 0.0  ;;  %v1020_v12 = vsel %vm873_vm10, %v4526_v31, 0.0  ;;  %v1460_v3 = vsel %vm1313_vm2, %v4611_v17, 0.0 }
 0x205   : > { %v2931_v10 = vadd.f32 %v2803_v13, %v2507_v51  ;;  %v1148_v6 = vadd.f32 %v1020_v12, %v576_v2  ;;  %vm1737_vm14 = vcmp.eq.s32.totalorder %v6752_v48, %v4678_v35  ;;  %vm2167_vm15 = vcmp.eq.s32.totalorder %v6752_v48, %v4664_v37 }
 0x206   : > { %3834 = vmatpush2.msra.mxu0 %v3719_v54  ;;  %v1884_v9 = vsel %vm1737_vm14, %v4614_v18, 0.0  ;;  %vm2591_vm0 = vcmp.eq.s32.totalorder %v6752_v48, %v4688_v50  ;;  %v6780_v15 = vadd.s32 208, %v4370_v1  ;;  %v6783_v8 = vadd.s32 464, %v4370_v1 }
 0x207   : > { %v3359_v38 = vadd.f32 %v3231_v22, %v2931_v10  ;;  %v1588_v26 = vadd.f32 %v1460_v3, %v1148_v6  ;;  %v2314_v42 = vsel %vm2167_vm15, %v4641_v60, 0.0  ;;  %vm3019_vm1 = vcmp.eq.s32.totalorder %v6752_v48, %v4728_v27 }
 0x208   : > { %vm3443_vm4 = vcmp.eq.s32.totalorder %v6752_v48, %v4736_v36  ;;  %vm493_vm9 = vcmp.eq.s32.totalorder %v6755_v49, %v4585_v61  ;;  %vm937_vm5 = vcmp.eq.s32.totalorder %v6755_v49, %v4624_v19  ;;  %vm1377_vm6 = vcmp.eq.s32.totalorder %v6755_v49, %v4675_v23 }
 0x209   : > { %v3783_v58 = vadd.f32 %v3655_v5, %v3359_v38  ;;  %v2012_v44 = vadd.f32 %v1884_v9, %v1588_v26  ;;  %v2738_v24 = vsel %vm2591_vm0, %v4681_v47, 0.0  ;;  %v640_v57 = vsel %vm493_vm9, %v4523_v30, 0.0 }
 0x20a   : > { %v1084_v53 = vsel %vm937_vm5, %v4526_v31, 0.0  ;;  %v1524_v32 = vsel %vm1377_vm6, %v4611_v17, 0.0  ;;  %vm1801_vm11 = vcmp.eq.s32.totalorder %v6755_v49, %v4678_v35  ;;  %vm2231_vm13 = vcmp.eq.s32.totalorder %v6755_v49, %v4664_v37 }
 0x20b   : > { %3905 = vmatpush2.msra.mxu1 %v3783_v58  ;;  %v2442_v46 = vadd.f32 %v2314_v42, %v2012_v44  ;;  %v3166_v14 = vsel %vm3019_vm1, %v4710_v63, 0.0  ;;  %v3590_v11 = vsel %vm3443_vm4, %v4731_v34, 0.0  ;;  %v1212_v13 = vadd.f32 %v1084_v53, %v640_v57 }
 0x20c   : > { %v1948_v16 = vsel %vm1801_vm11, %v4614_v18, 0.0  ;;  %v2378_v22 = vsel %vm2231_vm13, %v4641_v60, 0.0  ;;  %vm2655_vm8 = vcmp.eq.s32.totalorder %v6755_v49, %v4688_v50  ;;  %vm428_vm3 = vcmp.eq.s32.totalorder %v6752_v48, %v4779_v7 }
 0x20d   : > { %v2866_v5 = vadd.f32 %v2738_v24, %v2442_v46  ;;  %v1652_v41 = vadd.f32 %v1524_v32, %v1212_v13  ;;  %vm3083_vm12 = vcmp.eq.s32.totalorder %v6755_v49, %v4728_v27  ;;  %vm3507_vm7 = vcmp.eq.s32.totalorder %v6755_v49, %v4736_v36 }
 0x20e   : > { %v2802_v51 = vsel %vm2655_vm8, %v4681_v47, 0.0  ;;  %v575_v54 = vsel %vm428_vm3, %v4766_v45, 0.0  ;;  %vm872_vm10 = vcmp.eq.s32.totalorder %v6752_v48, %v4786_v55  ;;  %vm1312_vm2 = vcmp.eq.s32.totalorder %v6752_v48, %v4789_v20 }
 0x20f   : > { %v3294_v2 = vadd.f32 %v3166_v14, %v2866_v5  ;;  %v2076_v12 = vadd.f32 %v1948_v16, %v1652_v41  ;;  %v1019_v3 = vsel %vm872_vm10, %v4556_v43, 0.0  ;;  %v1459_v10 = vsel %vm1312_vm2, %v4776_v33, 0.0 }
 0x210   : > { %v1147_v6 = vadd.f32 %v1019_v3, %v575_v54  ;;  %vm1736_vm14 = vcmp.eq.s32.totalorder %v6752_v48, %v4798_v21  ;;  %vm2166_vm15 = vcmp.eq.s32.totalorder %v6752_v48, %v4809_v4  ;;  %vm2590_vm0 = vcmp.eq.s32.totalorder %v6752_v48, %v4835_v29 }
 0x211   : > { %v3718_v9 = vadd.f32 %v3590_v11, %v3294_v2  ;;  %v2506_v38 = vadd.f32 %v2378_v22, %v2076_v12  ;;  %v3230_v26 = vsel %vm3083_vm12, %v4710_v63, 0.0  ;;  %v1883_v42 = vsel %vm1736_vm14, %v4801_v59, 0.0 }
 0x212   : > { %v3654_v58 = vsel %vm3507_vm7, %v4731_v34, 0.0  ;;  %v1587_v44 = vadd.f32 %v1459_v10, %v1147_v6  ;;  %v2313_v24 = vsel %vm2166_vm15, %v4819_v52, 0.0  ;;  %v2737_v57 = vsel %vm2590_vm0, %v4838_v28, 0.0 }
 0x213   : > { %3835 = vmatprep.subr.mxu0 %v3718_v9  ;;  %v2930_v53 = vadd.f32 %v2802_v51, %v2506_v38  ;;  %vm3018_vm1 = vcmp.eq.s32.totalorder %v6752_v48, %v4841_v25  ;;  %vm3442_vm4 = vcmp.eq.s32.totalorder %v6752_v48, %v4847_v40  ;;  %vm492_vm9 = vcmp.eq.s32.totalorder %v6755_v49, %v4779_v7 }
 0x214   : > { %v2011_v32 = vadd.f32 %v1883_v42, %v1587_v44  ;;  %v639_v46 = vsel %vm492_vm9, %v4766_v45, 0.0  ;;  %vm936_vm5 = vcmp.eq.s32.totalorder %v6755_v49, %v4786_v55  ;;  %vm1376_vm6 = vcmp.eq.s32.totalorder %v6755_v49, %v4789_v20 }
 0x215   : > { %v3358_v14 = vadd.f32 %v3230_v26, %v2930_v53  ;;  %v1083_v11 = vsel %vm936_vm5, %v4556_v43, 0.0  ;;  %v1523_v13 = vsel %vm1376_vm6, %v4776_v33, 0.0  ;;  %vm1800_vm11 = vcmp.eq.s32.totalorder %v6755_v49, %v4798_v21 }
 0x216   : > { %v2441_v48 = vadd.f32 %v2313_v24, %v2011_v32  ;;  %v3165_v16 = vsel %vm3018_vm1, %v4844_v39, 0.0  ;;  %v1211_v22 = vadd.f32 %v1083_v11, %v639_v46  ;;  %vm2230_vm13 = vcmp.eq.s32.totalorder %v6755_v49, %v4809_v4 }
 0x217   : > { %v3782_v5 = vadd.f32 %v3654_v58, %v3358_v14  ;;  %v3589_v41 = vsel %vm3442_vm4, %v4850_v0, 0.0  ;;  %v1947_v51 = vsel %vm1800_vm11, %v4801_v59, 0.0  ;;  %vm2654_vm8 = vcmp.eq.s32.totalorder %v6755_v49, %v4835_v29 }
 0x218   : > { %v2865_v54 = vadd.f32 %v2737_v57, %v2441_v48  ;;  %v1651_v2 = vadd.f32 %v1523_v13, %v1211_v22  ;;  %v2377_v12 = vsel %vm2230_vm13, %v4819_v52, 0.0  ;;  %vm3082_vm3 = vcmp.eq.s32.totalorder %v6755_v49, %v4841_v25 }
 0x219   : > { %3906 = vmatprep.subr.mxu1 %v3782_v5  ;;  %v2801_v3 = vsel %vm2654_vm8, %v4838_v28, 0.0  ;;  %vm427_vm12 = vcmp.eq.s32.totalorder %v6758_v56, %v4585_v61  ;;  %vm871_vm7 = vcmp.eq.s32.totalorder %v6758_v56, %v4624_v19  ;;  %vm1311_vm10 = vcmp.eq.s32.totalorder %v6758_v56, %v4675_v23 }
 0x21a   : > { %v3293_v10 = vadd.f32 %v3165_v16, %v2865_v54  ;;  %v2075_v6 = vadd.f32 %v1947_v51, %v1651_v2  ;;  %vm3506_vm2 = vcmp.eq.s32.totalorder %v6755_v49, %v4847_v40  ;;  %v574_v9 = vsel %vm427_vm12, %v4523_v30, 0.0 }
 0x21b   : > { %v1018_v38 = vsel %vm871_vm7, %v4526_v31, 0.0  ;;  %v1458_v26 = vsel %vm1311_vm10, %v4611_v17, 0.0  ;;  %vm1735_vm14 = vcmp.eq.s32.totalorder %v6758_v56, %v4678_v35  ;;  %vm2165_vm15 = vcmp.eq.s32.totalorder %v6758_v56, %v4664_v37 }
 0x21c   : > { %v3717_v42 = vadd.f32 %v3589_v41, %v3293_v10  ;;  %v2505_v58 = vadd.f32 %v2377_v12, %v2075_v6  ;;  %v3229_v44 = vsel %vm3082_vm3, %v4844_v39, 0.0  ;;  %v1146_v24 = vadd.f32 %v1018_v38, %v574_v9 }
 0x21d   : > { %v3653_v57 = vsel %vm3506_vm2, %v4850_v0, 0.0  ;;  %v1882_v53 = vsel %vm1735_vm14, %v4614_v18, 0.0  ;;  %v2312_v32 = vsel %vm2165_vm15, %v4641_v60, 0.0  ;;  %vm2589_vm0 = vcmp.eq.s32.totalorder %v6758_v56, %v4688_v50 }
 0x21e   : > { %3836 = vmatpush2.msra.mxu0 %v3717_v42  ;;  %v2929_v46 = vadd.f32 %v2801_v3, %v2505_v58  ;;  %v1586_v14 = vadd.f32 %v1458_v26, %v1146_v24  ;;  %vm3017_vm1 = vcmp.eq.s32.totalorder %v6758_v56, %v4728_v27  ;;  %vm3441_vm4 = vcmp.eq.s32.totalorder %v6758_v56, %v4736_v36 }
 0x21f   : > { %v2736_v49 = vsel %vm2589_vm0, %v4681_v47, 0.0  ;;  %vm491_vm9 = vcmp.eq.s32.totalorder %v6761_v62, %v4585_v61  ;;  %vm935_vm5 = vcmp.eq.s32.totalorder %v6761_v62, %v4624_v19  ;;  %vm1375_vm6 = vcmp.eq.s32.totalorder %v6761_v62, %v4675_v23 }
 0x220   : > { %v3357_v11 = vadd.f32 %v3229_v44, %v2929_v46  ;;  %v2010_v13 = vadd.f32 %v1882_v53, %v1586_v14  ;;  %v638_v48 = vsel %vm491_vm9, %v4523_v30, 0.0  ;;  %v1082_v16 = vsel %vm935_vm5, %v4526_v31, 0.0 }
 0x221   : > { %v1210_v22 = vadd.f32 %v1082_v16, %v638_v48  ;;  %v1522_v5 = vsel %vm1375_vm6, %v4611_v17, 0.0  ;;  %vm1799_vm11 = vcmp.eq.s32.totalorder %v6761_v62, %v4678_v35  ;;  %vm2229_vm13 = vcmp.eq.s32.totalorder %v6761_v62, %v4664_v37 }
 0x222   : > { %v3781_v41 = vadd.f32 %v3653_v57, %v3357_v11  ;;  %v2440_v51 = vadd.f32 %v2312_v32, %v2010_v13  ;;  %v3164_v54 = vsel %vm3017_vm1, %v4710_v63, 0.0  ;;  %v1946_v2 = vsel %vm1799_vm11, %v4614_v18, 0.0 }
 0x223   : > { %v3588_v12 = vsel %vm3441_vm4, %v4731_v34, 0.0  ;;  %v1650_v3 = vadd.f32 %v1522_v5, %v1210_v22  ;;  %v2376_v10 = vsel %vm2229_vm13, %v4641_v60, 0.0  ;;  %vm2653_vm8 = vcmp.eq.s32.totalorder %v6761_v62, %v4688_v50 }
 0x224   : > { %3907 = vmatpush2.msra.mxu1 %v3781_v41  ;;  %v2864_v6 = vadd.f32 %v2736_v49, %v2440_v51  ;;  %v2800_v9 = vsel %vm2653_vm8, %v4681_v47, 0.0  ;;  %vm3081_vm3 = vcmp.eq.s32.totalorder %v6761_v62, %v4728_v27  ;;  %vm3505_vm12 = vcmp.eq.s32.totalorder %v6761_v62, %v4736_v36 }
 0x225   : > { %v2074_v38 = vadd.f32 %v1946_v2, %v1650_v3  ;;  %vm426_vm7 = vcmp.eq.s32.totalorder %v6758_v56, %v4779_v7  ;;  %vm870_vm10 = vcmp.eq.s32.totalorder %v6758_v56, %v4786_v55  ;;  %vm1310_vm2 = vcmp.eq.s32.totalorder %v6758_v56, %v4789_v20 }
 0x226   : > { %v3292_v26 = vadd.f32 %v3164_v54, %v2864_v6  ;;  %v573_v42 = vsel %vm426_vm7, %v4766_v45, 0.0  ;;  %v1017_v58 = vsel %vm870_vm10, %v4556_v43, 0.0  ;;  %v1457_v44 = vsel %vm1310_vm2, %v4776_v33, 0.0 }
 0x227   : > { %v2504_v24 = vadd.f32 %v2376_v10, %v2074_v38  ;;  %v1145_v57 = vadd.f32 %v1017_v58, %v573_v42  ;;  %vm1734_vm14 = vcmp.eq.s32.totalorder %v6758_v56, %v4798_v21  ;;  %vm2164_vm15 = vcmp.eq.s32.totalorder %v6758_v56, %v4809_v4 }
 0x228   : > { %v3716_v53 = vadd.f32 %v3588_v12, %v3292_v26  ;;  %v3228_v32 = vsel %vm3081_vm3, %v4710_v63, 0.0  ;;  %v1881_v46 = vsel %vm1734_vm14, %v4801_v59, 0.0  ;;  %vm2588_vm0 = vcmp.eq.s32.totalorder %v6758_v56, %v4835_v29 }
 0x229   : > { %v2928_v14 = vadd.f32 %v2800_v9, %v2504_v24  ;;  %v3652_v49 = vsel %vm3505_vm12, %v4731_v34, 0.0  ;;  %v1585_v11 = vadd.f32 %v1457_v44, %v1145_v57  ;;  %v2311_v13 = vsel %vm2164_vm15, %v4819_v52, 0.0 }
 0x22a   : > { %3837 = vmatprep.subr.mxu0 %v3716_v53  ;;  %v2735_v48 = vsel %vm2588_vm0, %v4838_v28, 0.0  ;;  %vm3016_vm1 = vcmp.eq.s32.totalorder %v6758_v56, %v4841_v25  ;;  %vm490_vm4 = vcmp.eq.s32.totalorder %v6761_v62, %v4779_v7  ;;  %vm934_vm9 = vcmp.eq.s32.totalorder %v6761_v62, %v4786_v55 }
 0x22b   : > { %v3356_v16 = vadd.f32 %v3228_v32, %v2928_v14  ;;  %v2009_v22 = vadd.f32 %v1881_v46, %v1585_v11  ;;  %vm3440_vm5 = vcmp.eq.s32.totalorder %v6758_v56, %v4847_v40  ;;  %v637_v5 = vsel %vm490_vm4, %v4766_v45, 0.0 }
 0x22c   : > { %v1081_v41 = vsel %vm934_vm9, %v4556_v43, 0.0  ;;  %vm1374_vm6 = vcmp.eq.s32.totalorder %v6761_v62, %v4789_v20  ;;  %vm1798_vm11 = vcmp.eq.s32.totalorder %v6761_v62, %v4798_v21  ;;  %vm2228_vm13 = vcmp.eq.s32.totalorder %v6761_v62, %v4809_v4 }
 0x22d   : > { %v3780_v51 = vadd.f32 %v3652_v49, %v3356_v16  ;;  %v2439_v54 = vadd.f32 %v2311_v13, %v2009_v22  ;;  %v1209_v2 = vadd.f32 %v1081_v41, %v637_v5  ;;  %v1521_v12 = vsel %vm1374_vm6, %v4776_v33, 0.0 }
 0x22e   : > { %v3163_v56 = vsel %vm3016_vm1, %v4844_v39, 0.0  ;;  %v3587_v3 = vsel %vm3440_vm5, %v4850_v0, 0.0  ;;  %v1945_v10 = vsel %vm1798_vm11, %v4801_v59, 0.0  ;;  %vm2652_vm8 = vcmp.eq.s32.totalorder %v6761_v62, %v4835_v29 }
 0x22f   : > { %3908 = vmatprep.subr.mxu1 %v3780_v51  ;;  %v2863_v6 = vadd.f32 %v2735_v48, %v2439_v54  ;;  %v1649_v9 = vadd.f32 %v1521_v12, %v1209_v2  ;;  %v2375_v38 = vsel %vm2228_vm13, %v4819_v52, 0.0  ;;  %vm3080_vm3 = vcmp.eq.s32.totalorder %v6761_v62, %v4841_v25 }
 0x230   : > { %v2799_v26 = vsel %vm2652_vm8, %v4838_v28, 0.0  ;;  %vm425_vm12 = vcmp.eq.s32.totalorder %v6780_v15, %v4585_v61  ;;  %vm869_vm7 = vcmp.eq.s32.totalorder %v6780_v15, %v4624_v19  ;;  %vm1309_vm10 = vcmp.eq.s32.totalorder %v6780_v15, %v4675_v23 }
 0x231   : > { %v3291_v42 = vadd.f32 %v3163_v56, %v2863_v6  ;;  %v2073_v58 = vadd.f32 %v1945_v10, %v1649_v9  ;;  %vm3504_vm2 = vcmp.eq.s32.totalorder %v6761_v62, %v4847_v40  ;;  %v572_v44 = vsel %vm425_vm12, %v4523_v30, 0.0 }
 0x232   : > { %v1016_v24 = vsel %vm869_vm7, %v4526_v31, 0.0  ;;  %v1456_v57 = vsel %vm1309_vm10, %v4611_v17, 0.0  ;;  %vm1733_vm14 = vcmp.eq.s32.totalorder %v6780_v15, %v4678_v35  ;;  %vm2163_vm15 = vcmp.eq.s32.totalorder %v6780_v15, %v4664_v37 }
 0x233   : > { %v3715_v53 = vadd.f32 %v3587_v3, %v3291_v42  ;;  %v2503_v32 = vadd.f32 %v2375_v38, %v2073_v58  ;;  %v3227_v46 = vsel %vm3080_vm3, %v4844_v39, 0.0  ;;  %v1144_v14 = vadd.f32 %v1016_v24, %v572_v44 }
 0x234   : > { %v3651_v49 = vsel %vm3504_vm2, %v4850_v0, 0.0  ;;  %v1880_v62 = vsel %vm1733_vm14, %v4614_v18, 0.0  ;;  %v2310_v11 = vsel %vm2163_vm15, %v4641_v60, 0.0  ;;  %vm2587_vm0 = vcmp.eq.s32.totalorder %v6780_v15, %v4688_v50 }
 0x235   : > { %3838 = vmatpush2.msra.mxu0 %v3715_v53  ;;  %v2927_v13 = vadd.f32 %v2799_v26, %v2503_v32  ;;  %v1584_v48 = vadd.f32 %v1456_v57, %v1144_v14  ;;  %vm3015_vm1 = vcmp.eq.s32.totalorder %v6780_v15, %v4728_v27  ;;  %vm3439_vm4 = vcmp.eq.s32.totalorder %v6780_v15, %v4736_v36 }
 0x236   : > { %v2734_v16 = vsel %vm2587_vm0, %v4681_v47, 0.0  ;;  %vm489_vm9 = vcmp.eq.s32.totalorder %v6783_v8, %v4585_v61  ;;  %vm933_vm5 = vcmp.eq.s32.totalorder %v6783_v8, %v4624_v19  ;;  %vm1373_vm6 = vcmp.eq.s32.totalorder %v6783_v8, %v4675_v23 }
 0x237   : > { %v3355_v22 = vadd.f32 %v3227_v46, %v2927_v13  ;;  %v2008_v5 = vadd.f32 %v1880_v62, %v1584_v48  ;;  %v636_v41 = vsel %vm489_vm9, %v4523_v30, 0.0  ;;  %v1080_v51 = vsel %vm933_vm5, %v4526_v31, 0.0 }
 0x238   : > { %v1208_v54 = vadd.f32 %v1080_v51, %v636_v41  ;;  %v1520_v2 = vsel %vm1373_vm6, %v4611_v17, 0.0  ;;  %vm1797_vm11 = vcmp.eq.s32.totalorder %v6783_v8, %v4678_v35  ;;  %vm2227_vm13 = vcmp.eq.s32.totalorder %v6783_v8, %v4664_v37 }
 0x239   : > { %v3779_v12 = vadd.f32 %v3651_v49, %v3355_v22  ;;  %v2438_v56 = vadd.f32 %v2310_v11, %v2008_v5  ;;  %v3162_v3 = vsel %vm3015_vm1, %v4710_v63, 0.0  ;;  %v1944_v10 = vsel %vm1797_vm11, %v4614_v18, 0.0 }
 0x23a   : > { %v3586_v6 = vsel %vm3439_vm4, %v4731_v34, 0.0  ;;  %v1648_v9 = vadd.f32 %v1520_v2, %v1208_v54  ;;  %v2374_v38 = vsel %vm2227_vm13, %v4641_v60, 0.0  ;;  %vm2651_vm8 = vcmp.eq.s32.totalorder %v6783_v8, %v4688_v50 }
 0x23b   : > { %3909 = vmatpush2.msra.mxu1 %v3779_v12  ;;  %v2862_v26 = vadd.f32 %v2734_v16, %v2438_v56  ;;  %v2798_v42 = vsel %vm2651_vm8, %v4681_v47, 0.0  ;;  %vm3079_vm3 = vcmp.eq.s32.totalorder %v6783_v8, %v4728_v27  ;;  %vm3503_vm12 = vcmp.eq.s32.totalorder %v6783_v8, %v4736_v36 }
 0x23c   : > { %v2072_v58 = vadd.f32 %v1944_v10, %v1648_v9  ;;  %vm424_vm7 = vcmp.eq.s32.totalorder %v6780_v15, %v4779_v7  ;;  %vm868_vm10 = vcmp.eq.s32.totalorder %v6780_v15, %v4786_v55  ;;  %vm1308_vm2 = vcmp.eq.s32.totalorder %v6780_v15, %v4789_v20 }
 0x23d   : > { %v3290_v44 = vadd.f32 %v3162_v3, %v2862_v26  ;;  %v571_v24 = vsel %vm424_vm7, %v4766_v45, 0.0  ;;  %v1015_v57 = vsel %vm868_vm10, %v4556_v43, 0.0  ;;  %v1455_v53 = vsel %vm1308_vm2, %v4776_v33, 0.0 }
 0x23e   : > { %v2502_v32 = vadd.f32 %v2374_v38, %v2072_v58  ;;  %v1143_v46 = vadd.f32 %v1015_v57, %v571_v24  ;;  %vm1732_vm14 = vcmp.eq.s32.totalorder %v6780_v15, %v4798_v21  ;;  %vm2162_vm15 = vcmp.eq.s32.totalorder %v6780_v15, %v4809_v4 }
 0x23f   : > { %v3714_v14 = vadd.f32 %v3586_v6, %v3290_v44  ;;  %v3226_v49 = vsel %vm3079_vm3, %v4710_v63, 0.0  ;;  %v1879_v62 = vsel %vm1732_vm14, %v4801_v59, 0.0  ;;  %vm2586_vm0 = vcmp.eq.s32.totalorder %v6780_v15, %v4835_v29 }
 0x240   : > { %v2926_v11 = vadd.f32 %v2798_v42, %v2502_v32  ;;  %v3650_v13 = vsel %vm3503_vm12, %v4731_v34, 0.0  ;;  %v1583_v48 = vadd.f32 %v1455_v53, %v1143_v46  ;;  %v2309_v16 = vsel %vm2162_vm15, %v4819_v52, 0.0 }
 0x241   : > { %3839 = vmatprep.subr.mxu0 %v3714_v14  ;;  %v2733_v22 = vsel %vm2586_vm0, %v4838_v28, 0.0  ;;  %vm3014_vm1 = vcmp.eq.s32.totalorder %v6780_v15, %v4841_v25  ;;  %vm488_vm4 = vcmp.eq.s32.totalorder %v6783_v8, %v4779_v7  ;;  %vm932_vm9 = vcmp.eq.s32.totalorder %v6783_v8, %v4786_v55 }
 0x242   : > { %v3354_v5 = vadd.f32 %v3226_v49, %v2926_v11  ;;  %v2007_v41 = vadd.f32 %v1879_v62, %v1583_v48  ;;  %vm3438_vm5 = vcmp.eq.s32.totalorder %v6780_v15, %v4847_v40  ;;  %v635_v51 = vsel %vm488_vm4, %v4766_v45, 0.0 }
 0x243   : > { %v1079_v54 = vsel %vm932_vm9, %v4556_v43, 0.0  ;;  %vm1372_vm6 = vcmp.eq.s32.totalorder %v6783_v8, %v4789_v20  ;;  %vm1796_vm11 = vcmp.eq.s32.totalorder %v6783_v8, %v4798_v21  ;;  %vm2226_vm13 = vcmp.eq.s32.totalorder %v6783_v8, %v4809_v4 }
 0x244   : > { %v3778_v2 = vadd.f32 %v3650_v13, %v3354_v5  ;;  %v2437_v12 = vadd.f32 %v2309_v16, %v2007_v41  ;;  %v1207_v56 = vadd.f32 %v1079_v54, %v635_v51  ;;  %v1519_v3 = vsel %vm1372_vm6, %v4776_v33, 0.0 }
 0x245   : > { %v3161_v10 = vsel %vm3014_vm1, %v4844_v39, 0.0  ;;  %v1943_v6 = vsel %vm1796_vm11, %v4801_v59, 0.0  ;;  %vm2650_vm8 = vcmp.eq.s32.totalorder %v6783_v8, %v4835_v29  ;;  %vm3078_vm3 = vcmp.eq.s32.totalorder %v6783_v8, %v4841_v25 }
 0x246   : > { %3910 = vmatprep.subr.mxu1 %v3778_v2  ;;  %v2861_v9 = vadd.f32 %v2733_v22, %v2437_v12  ;;  %v3585_v38 = vsel %vm3438_vm5, %v4850_v0, 0.0  ;;  %v1647_v26 = vadd.f32 %v1519_v3, %v1207_v56  ;;  %v2373_v42 = vsel %vm2226_vm13, %v4819_v52, 0.0 }
 0x247   : > { %v2797_v58 = vsel %vm2650_vm8, %v4838_v28, 0.0  ;;  %v3225_v44 = vsel %vm3078_vm3, %v4844_v39, 0.0  ;;  %vm3502_vm12 = vcmp.eq.s32.totalorder %v6783_v8, %v4847_v40  ;;  %v7087_v24 = vadd.s32 200, %v4370_v1 }
 0x248   : > { %v3289_v57 = vadd.f32 %v3161_v10, %v2861_v9  ;;  %v2071_v53 = vadd.f32 %v1943_v6, %v1647_v26  ;;  %v7090_v32 = vadd.s32 456, %v4370_v1  ;;  %v7093_v15 = vadd.s32 192, %v4370_v1 }
 0x249   : > { %vm423_vm7 = vcmp.eq.s32.totalorder %v7087_v24, %v4585_v61  ;;  %vm867_vm10 = vcmp.eq.s32.totalorder %v7087_v24, %v4624_v19  ;;  %vm1307_vm2 = vcmp.eq.s32.totalorder %v7087_v24, %v4675_v23  ;;  %vm1731_vm14 = vcmp.eq.s32.totalorder %v7087_v24, %v4678_v35 }
 0x24a   : > { %v3713_v8 = vadd.f32 %v3585_v38, %v3289_v57  ;;  %v2501_v46 = vadd.f32 %v2373_v42, %v2071_v53  ;;  %v570_v14 = vsel %vm423_vm7, %v4523_v30, 0.0  ;;  %v1014_v49 = vsel %vm867_vm10, %v4526_v31, 0.0 }
 0x24b   : > { %v3649_v62 = vsel %vm3502_vm12, %v4850_v0, 0.0  ;;  %v1142_v11 = vadd.f32 %v1014_v49, %v570_v14  ;;  %v1454_v13 = vsel %vm1307_vm2, %v4611_v17, 0.0  ;;  %vm2161_vm15 = vcmp.eq.s32.totalorder %v7087_v24, %v4664_v37 }
 0x24c   : > { %3840 = vmatpush2.msra.mxu0 %v3713_v8  ;;  %v2925_v48 = vadd.f32 %v2797_v58, %v2501_v46  ;;  %v1878_v16 = vsel %vm1731_vm14, %v4614_v18, 0.0  ;;  %vm2585_vm0 = vcmp.eq.s32.totalorder %v7087_v24, %v4688_v50  ;;  %v7113_v22 = vadd.s32 448, %v4370_v1 }
 0x24d   : > { %v1582_v5 = vadd.f32 %v1454_v13, %v1142_v11  ;;  %v2308_v41 = vsel %vm2161_vm15, %v4641_v60, 0.0  ;;  %v2732_v51 = vsel %vm2585_vm0, %v4681_v47, 0.0  ;;  %vm3013_vm1 = vcmp.eq.s32.totalorder %v7087_v24, %v4728_v27 }
 0x24e   : > { %v3353_v54 = vadd.f32 %v3225_v44, %v2925_v48  ;;  %vm3437_vm4 = vcmp.eq.s32.totalorder %v7087_v24, %v4736_v36  ;;  %vm487_vm9 = vcmp.eq.s32.totalorder %v7090_v32, %v4585_v61  ;;  %vm931_vm5 = vcmp.eq.s32.totalorder %v7090_v32, %v4624_v19 }
 0x24f   : > { %v2006_v2 = vadd.f32 %v1878_v16, %v1582_v5  ;;  %v634_v12 = vsel %vm487_vm9, %v4523_v30, 0.0  ;;  %v1078_v56 = vsel %vm931_vm5, %v4526_v31, 0.0  ;;  %vm1371_vm6 = vcmp.eq.s32.totalorder %v7090_v32, %v4675_v23 }
 0x250   : > { %v3777_v3 = vadd.f32 %v3649_v62, %v3353_v54  ;;  %v1206_v10 = vadd.f32 %v1078_v56, %v634_v12  ;;  %v1518_v6 = vsel %vm1371_vm6, %v4611_v17, 0.0  ;;  %vm1795_vm11 = vcmp.eq.s32.totalorder %v7090_v32, %v4678_v35 }
 0x251   : > { %v2436_v9 = vadd.f32 %v2308_v41, %v2006_v2  ;;  %v1942_v38 = vsel %vm1795_vm11, %v4614_v18, 0.0  ;;  %vm2225_vm13 = vcmp.eq.s32.totalorder %v7090_v32, %v4664_v37  ;;  %vm2649_vm8 = vcmp.eq.s32.totalorder %v7090_v32, %v4688_v50 }
 0x252   : > { %3911 = vmatpush2.msra.mxu1 %v3777_v3  ;;  %v3160_v26 = vsel %vm3013_vm1, %v4710_v63, 0.0  ;;  %v3584_v42 = vsel %vm3437_vm4, %v4731_v34, 0.0  ;;  %v1646_v58 = vadd.f32 %v1518_v6, %v1206_v10  ;;  %v2372_v44 = vsel %vm2225_vm13, %v4641_v60, 0.0 }
 0x253   : > { %v2860_v57 = vadd.f32 %v2732_v51, %v2436_v9  ;;  %v2796_v53 = vsel %vm2649_vm8, %v4681_v47, 0.0  ;;  %vm3077_vm3 = vcmp.eq.s32.totalorder %v7090_v32, %v4728_v27  ;;  %vm422_vm12 = vcmp.eq.s32.totalorder %v7087_v24, %v4779_v7 }
 0x254   : > { %v2070_v8 = vadd.f32 %v1942_v38, %v1646_v58  ;;  %vm3501_vm7 = vcmp.eq.s32.totalorder %v7090_v32, %v4736_v36  ;;  %v569_v46 = vsel %vm422_vm12, %v4766_v45, 0.0  ;;  %vm866_vm10 = vcmp.eq.s32.totalorder %v7087_v24, %v4786_v55 }
 0x255   : > { %v3288_v14 = vadd.f32 %v3160_v26, %v2860_v57  ;;  %v1013_v49 = vsel %vm866_vm10, %v4556_v43, 0.0  ;;  %vm1306_vm2 = vcmp.eq.s32.totalorder %v7087_v24, %v4789_v20  ;;  %vm1730_vm14 = vcmp.eq.s32.totalorder %v7087_v24, %v4798_v21 }
 0x256   : > { %v2500_v62 = vadd.f32 %v2372_v44, %v2070_v8  ;;  %v3224_v11 = vsel %vm3077_vm3, %v4710_v63, 0.0  ;;  %v1141_v13 = vadd.f32 %v1013_v49, %v569_v46  ;;  %v1453_v48 = vsel %vm1306_vm2, %v4776_v33, 0.0 }
 0x257   : > { %v3712_v16 = vadd.f32 %v3584_v42, %v3288_v14  ;;  %v1877_v5 = vsel %vm1730_vm14, %v4801_v59, 0.0  ;;  %vm2160_vm15 = vcmp.eq.s32.totalorder %v7087_v24, %v4809_v4  ;;  %vm2584_vm0 = vcmp.eq.s32.totalorder %v7087_v24, %v4835_v29 }
 0x258   : > { %v2924_v41 = vadd.f32 %v2796_v53, %v2500_v62  ;;  %v3648_v51 = vsel %vm3501_vm7, %v4731_v34, 0.0  ;;  %v1581_v54 = vadd.f32 %v1453_v48, %v1141_v13  ;;  %vm3012_vm1 = vcmp.eq.s32.totalorder %v7087_v24, %v4841_v25 }
 0x259   : > { %3841 = vmatprep.subr.mxu0 %v3712_v16  ;;  %v2307_v2 = vsel %vm2160_vm15, %v4819_v52, 0.0  ;;  %v2731_v12 = vsel %vm2584_vm0, %v4838_v28, 0.0  ;;  %vm486_vm4 = vcmp.eq.s32.totalorder %v7090_v32, %v4779_v7  ;;  %vm930_vm9 = vcmp.eq.s32.totalorder %v7090_v32, %v4786_v55 }
 0x25a   : > { %v3352_v56 = vadd.f32 %v3224_v11, %v2924_v41  ;;  %v2005_v3 = vadd.f32 %v1877_v5, %v1581_v54  ;;  %vm3436_vm5 = vcmp.eq.s32.totalorder %v7087_v24, %v4847_v40  ;;  %v633_v10 = vsel %vm486_vm4, %v4766_v45, 0.0 }
 0x25b   : > { %v1077_v6 = vsel %vm930_vm9, %v4556_v43, 0.0  ;;  %vm1370_vm6 = vcmp.eq.s32.totalorder %v7090_v32, %v4789_v20  ;;  %vm1794_vm11 = vcmp.eq.s32.totalorder %v7090_v32, %v4798_v21  ;;  %vm2224_vm13 = vcmp.eq.s32.totalorder %v7090_v32, %v4809_v4 }
 0x25c   : > { %v3776_v9 = vadd.f32 %v3648_v51, %v3352_v56  ;;  %v2435_v38 = vadd.f32 %v2307_v2, %v2005_v3  ;;  %v1205_v26 = vadd.f32 %v1077_v6, %v633_v10  ;;  %v1517_v42 = vsel %vm1370_vm6, %v4776_v33, 0.0 }
 0x25d   : > { %v3159_v58 = vsel %vm3012_vm1, %v4844_v39, 0.0  ;;  %v3583_v44 = vsel %vm3436_vm5, %v4850_v0, 0.0  ;;  %v1941_v57 = vsel %vm1794_vm11, %v4801_v59, 0.0  ;;  %vm2648_vm8 = vcmp.eq.s32.totalorder %v7090_v32, %v4835_v29 }
 0x25e   : > { %3912 = vmatprep.subr.mxu1 %v3776_v9  ;;  %v2859_v53 = vadd.f32 %v2731_v12, %v2435_v38  ;;  %v1645_v8 = vadd.f32 %v1517_v42, %v1205_v26  ;;  %v2371_v46 = vsel %vm2224_vm13, %v4819_v52, 0.0  ;;  %vm3076_vm3 = vcmp.eq.s32.totalorder %v7090_v32, %v4841_v25 }
 0x25f   : > { %v2795_v14 = vsel %vm2648_vm8, %v4838_v28, 0.0  ;;  %vm421_vm12 = vcmp.eq.s32.totalorder %v7093_v15, %v4585_v61  ;;  %vm865_vm7 = vcmp.eq.s32.totalorder %v7093_v15, %v4624_v19  ;;  %vm1305_vm10 = vcmp.eq.s32.totalorder %v7093_v15, %v4675_v23 }
 0x260   : > { %v3287_v24 = vadd.f32 %v3159_v58, %v2859_v53  ;;  %v2069_v49 = vadd.f32 %v1941_v57, %v1645_v8  ;;  %vm3500_vm2 = vcmp.eq.s32.totalorder %v7090_v32, %v4847_v40  ;;  %v568_v62 = vsel %vm421_vm12, %v4523_v30, 0.0 }
 0x261   : > { %v1012_v11 = vsel %vm865_vm7, %v4526_v31, 0.0  ;;  %v1452_v13 = vsel %vm1305_vm10, %v4611_v17, 0.0  ;;  %vm1729_vm14 = vcmp.eq.s32.totalorder %v7093_v15, %v4678_v35  ;;  %vm2159_vm15 = vcmp.eq.s32.totalorder %v7093_v15, %v4664_v37 }
 0x262   : > { %v3711_v48 = vadd.f32 %v3583_v44, %v3287_v24  ;;  %v2499_v16 = vadd.f32 %v2371_v46, %v2069_v49  ;;  %v3223_v5 = vsel %vm3076_vm3, %v4844_v39, 0.0  ;;  %v1140_v41 = vadd.f32 %v1012_v11, %v568_v62 }
 0x263   : > { %v3647_v51 = vsel %vm3500_vm2, %v4850_v0, 0.0  ;;  %v1876_v32 = vsel %vm1729_vm14, %v4614_v18, 0.0  ;;  %v2306_v54 = vsel %vm2159_vm15, %v4641_v60, 0.0  ;;  %vm2583_vm0 = vcmp.eq.s32.totalorder %v7093_v15, %v4688_v50 }
 0x264   : > { %3842 = vmatpush2.msra.mxu0 %v3711_v48  ;;  %v2923_v2 = vadd.f32 %v2795_v14, %v2499_v16  ;;  %v1580_v12 = vadd.f32 %v1452_v13, %v1140_v41  ;;  %vm3011_vm1 = vcmp.eq.s32.totalorder %v7093_v15, %v4728_v27  ;;  %vm3435_vm4 = vcmp.eq.s32.totalorder %v7093_v15, %v4736_v36 }
 0x265   : > { %v2730_v56 = vsel %vm2583_vm0, %v4681_v47, 0.0  ;;  %vm485_vm9 = vcmp.eq.s32.totalorder %v7113_v22, %v4585_v61  ;;  %vm929_vm5 = vcmp.eq.s32.totalorder %v7113_v22, %v4624_v19  ;;  %vm1369_vm6 = vcmp.eq.s32.totalorder %v7113_v22, %v4675_v23 }
 0x266   : > { %v3351_v3 = vadd.f32 %v3223_v5, %v2923_v2  ;;  %v2004_v10 = vadd.f32 %v1876_v32, %v1580_v12  ;;  %v632_v6 = vsel %vm485_vm9, %v4523_v30, 0.0  ;;  %v1076_v9 = vsel %vm929_vm5, %v4526_v31, 0.0 }
 0x267   : > { %v1204_v38 = vadd.f32 %v1076_v9, %v632_v6  ;;  %v1516_v26 = vsel %vm1369_vm6, %v4611_v17, 0.0  ;;  %vm1793_vm11 = vcmp.eq.s32.totalorder %v7113_v22, %v4678_v35  ;;  %vm2223_vm13 = vcmp.eq.s32.totalorder %v7113_v22, %v4664_v37 }
 0x268   : > { %v3775_v42 = vadd.f32 %v3647_v51, %v3351_v3  ;;  %v2434_v58 = vadd.f32 %v2306_v54, %v2004_v10  ;;  %v3158_v44 = vsel %vm3011_vm1, %v4710_v63, 0.0  ;;  %v1940_v57 = vsel %vm1793_vm11, %v4614_v18, 0.0 }
 0x269   : > { %v3582_v53 = vsel %vm3435_vm4, %v4731_v34, 0.0  ;;  %v1644_v8 = vadd.f32 %v1516_v26, %v1204_v38  ;;  %v2370_v46 = vsel %vm2223_vm13, %v4641_v60, 0.0  ;;  %vm2647_vm8 = vcmp.eq.s32.totalorder %v7113_v22, %v4688_v50 }
 0x26a   : > { %3913 = vmatpush2.msra.mxu1 %v3775_v42  ;;  %v2858_v14 = vadd.f32 %v2730_v56, %v2434_v58  ;;  %v2794_v24 = vsel %vm2647_vm8, %v4681_v47, 0.0  ;;  %vm3075_vm3 = vcmp.eq.s32.totalorder %v7113_v22, %v4728_v27  ;;  %vm3499_vm12 = vcmp.eq.s32.totalorder %v7113_v22, %v4736_v36 }
 0x26b   : > { %v2068_v49 = vadd.f32 %v1940_v57, %v1644_v8  ;;  %vm420_vm7 = vcmp.eq.s32.totalorder %v7093_v15, %v4779_v7  ;;  %vm864_vm10 = vcmp.eq.s32.totalorder %v7093_v15, %v4786_v55  ;;  %vm1304_vm2 = vcmp.eq.s32.totalorder %v7093_v15, %v4789_v20 }
 0x26c   : > { %v3286_v62 = vadd.f32 %v3158_v44, %v2858_v14  ;;  %v567_v11 = vsel %vm420_vm7, %v4766_v45, 0.0  ;;  %v1011_v13 = vsel %vm864_vm10, %v4556_v43, 0.0  ;;  %v1451_v48 = vsel %vm1304_vm2, %v4776_v33, 0.0 }
 0x26d   : > { %v2498_v16 = vadd.f32 %v2370_v46, %v2068_v49  ;;  %v1139_v5 = vadd.f32 %v1011_v13, %v567_v11  ;;  %vm1728_vm14 = vcmp.eq.s32.totalorder %v7093_v15, %v4798_v21  ;;  %vm2158_vm15 = vcmp.eq.s32.totalorder %v7093_v15, %v4809_v4 }
 0x26e   : > { %v3710_v41 = vadd.f32 %v3582_v53, %v3286_v62  ;;  %v3222_v51 = vsel %vm3075_vm3, %v4710_v63, 0.0  ;;  %v1875_v32 = vsel %vm1728_vm14, %v4801_v59, 0.0  ;;  %vm2582_vm0 = vcmp.eq.s32.totalorder %v7093_v15, %v4835_v29 }
 0x26f   : > { %v2922_v54 = vadd.f32 %v2794_v24, %v2498_v16  ;;  %v3646_v2 = vsel %vm3499_vm12, %v4731_v34, 0.0  ;;  %v1579_v12 = vadd.f32 %v1451_v48, %v1139_v5  ;;  %v2305_v56 = vsel %vm2158_vm15, %v4819_v52, 0.0 }
 0x270   : > { %3843 = vmatprep.subr.mxu0 %v3710_v41  ;;  %v2729_v3 = vsel %vm2582_vm0, %v4838_v28, 0.0  ;;  %vm3010_vm1 = vcmp.eq.s32.totalorder %v7093_v15, %v4841_v25  ;;  %vm484_vm4 = vcmp.eq.s32.totalorder %v7113_v22, %v4779_v7  ;;  %vm928_vm9 = vcmp.eq.s32.totalorder %v7113_v22, %v4786_v55 }
 0x271   : > { %v3350_v10 = vadd.f32 %v3222_v51, %v2922_v54  ;;  %v2003_v6 = vadd.f32 %v1875_v32, %v1579_v12  ;;  %vm3434_vm5 = vcmp.eq.s32.totalorder %v7093_v15, %v4847_v40  ;;  %v631_v9 = vsel %vm484_vm4, %v4766_v45, 0.0 }
 0x272   : > { %v1075_v38 = vsel %vm928_vm9, %v4556_v43, 0.0  ;;  %vm1368_vm6 = vcmp.eq.s32.totalorder %v7113_v22, %v4789_v20  ;;  %vm1792_vm11 = vcmp.eq.s32.totalorder %v7113_v22, %v4798_v21  ;;  %vm2222_vm13 = vcmp.eq.s32.totalorder %v7113_v22, %v4809_v4 }
 0x273   : > { %v3774_v26 = vadd.f32 %v3646_v2, %v3350_v10  ;;  %v2433_v42 = vadd.f32 %v2305_v56, %v2003_v6  ;;  %v1203_v58 = vadd.f32 %v1075_v38, %v631_v9  ;;  %v1515_v44 = vsel %vm1368_vm6, %v4776_v33, 0.0 }
 0x274   : > { %v3157_v57 = vsel %vm3010_vm1, %v4844_v39, 0.0  ;;  %v1939_v53 = vsel %vm1792_vm11, %v4801_v59, 0.0  ;;  %vm2646_vm8 = vcmp.eq.s32.totalorder %v7113_v22, %v4835_v29  ;;  %vm3074_vm3 = vcmp.eq.s32.totalorder %v7113_v22, %v4841_v25 }
 0x275   : > { %3914 = vmatprep.subr.mxu1 %v3774_v26  ;;  %v2857_v8 = vadd.f32 %v2729_v3, %v2433_v42  ;;  %v3581_v46 = vsel %vm3434_vm5, %v4850_v0, 0.0  ;;  %v1643_v14 = vadd.f32 %v1515_v44, %v1203_v58  ;;  %v2369_v24 = vsel %vm2222_vm13, %v4819_v52, 0.0 }
 0x276   : > { %v2793_v49 = vsel %vm2646_vm8, %v4838_v28, 0.0  ;;  %v3221_v62 = vsel %vm3074_vm3, %v4844_v39, 0.0  ;;  %vm3498_vm12 = vcmp.eq.s32.totalorder %v7113_v22, %v4847_v40  ;;  %v7315_v11 = vadd.s32 184, %v4370_v1 }
 0x277   : > { %v3285_v13 = vadd.f32 %v3157_v57, %v2857_v8  ;;  %v2067_v48 = vadd.f32 %v1939_v53, %v1643_v14  ;;  %v7318_v16 = vadd.s32 440, %v4370_v1  ;;  %v7321_v15 = vadd.s32 176, %v4370_v1 }
 0x278   : > { %vm419_vm7 = vcmp.eq.s32.totalorder %v7315_v11, %v4585_v61  ;;  %vm863_vm10 = vcmp.eq.s32.totalorder %v7315_v11, %v4624_v19  ;;  %vm1303_vm2 = vcmp.eq.s32.totalorder %v7315_v11, %v4675_v23  ;;  %vm1727_vm14 = vcmp.eq.s32.totalorder %v7315_v11, %v4678_v35 }
 0x279   : > { %v3709_v22 = vadd.f32 %v3581_v46, %v3285_v13  ;;  %v2497_v5 = vadd.f32 %v2369_v24, %v2067_v48  ;;  %v566_v41 = vsel %vm419_vm7, %v4523_v30, 0.0  ;;  %v1010_v51 = vsel %vm863_vm10, %v4526_v31, 0.0 }
 0x27a   : > { %v3645_v32 = vsel %vm3498_vm12, %v4850_v0, 0.0  ;;  %v1138_v54 = vadd.f32 %v1010_v51, %v566_v41  ;;  %v1450_v2 = vsel %vm1303_vm2, %v4611_v17, 0.0  ;;  %vm2157_vm15 = vcmp.eq.s32.totalorder %v7315_v11, %v4664_v37 }
 0x27b   : > { %3844 = vmatpush2.msra.mxu0 %v3709_v22  ;;  %v2921_v12 = vadd.f32 %v2793_v49, %v2497_v5  ;;  %v1874_v56 = vsel %vm1727_vm14, %v4614_v18, 0.0  ;;  %vm2581_vm0 = vcmp.eq.s32.totalorder %v7315_v11, %v4688_v50  ;;  %v7341_v3 = vadd.s32 432, %v4370_v1 }
 0x27c   : > { %v1578_v10 = vadd.f32 %v1450_v2, %v1138_v54  ;;  %v2304_v6 = vsel %vm2157_vm15, %v4641_v60, 0.0  ;;  %v2728_v9 = vsel %vm2581_vm0, %v4681_v47, 0.0  ;;  %vm3009_vm1 = vcmp.eq.s32.totalorder %v7315_v11, %v4728_v27 }
 0x27d   : > { %v3349_v38 = vadd.f32 %v3221_v62, %v2921_v12  ;;  %vm3433_vm4 = vcmp.eq.s32.totalorder %v7315_v11, %v4736_v36  ;;  %vm483_vm9 = vcmp.eq.s32.totalorder %v7318_v16, %v4585_v61  ;;  %vm927_vm5 = vcmp.eq.s32.totalorder %v7318_v16, %v4624_v19 }
 0x27e   : > { %v2002_v26 = vadd.f32 %v1874_v56, %v1578_v10  ;;  %v630_v42 = vsel %vm483_vm9, %v4523_v30, 0.0  ;;  %v1074_v58 = vsel %vm927_vm5, %v4526_v31, 0.0  ;;  %vm1367_vm6 = vcmp.eq.s32.totalorder %v7318_v16, %v4675_v23 }
 0x27f   : > { %v3773_v44 = vadd.f32 %v3645_v32, %v3349_v38  ;;  %v1202_v57 = vadd.f32 %v1074_v58, %v630_v42  ;;  %v1514_v53 = vsel %vm1367_vm6, %v4611_v17, 0.0  ;;  %vm1791_vm11 = vcmp.eq.s32.totalorder %v7318_v16, %v4678_v35 }
 0x280   : > { %v2432_v8 = vadd.f32 %v2304_v6, %v2002_v26  ;;  %v1938_v46 = vsel %vm1791_vm11, %v4614_v18, 0.0  ;;  %vm2221_vm13 = vcmp.eq.s32.totalorder %v7318_v16, %v4664_v37  ;;  %vm2645_vm8 = vcmp.eq.s32.totalorder %v7318_v16, %v4688_v50 }
 0x281   : > { %3915 = vmatpush2.msra.mxu1 %v3773_v44  ;;  %v3156_v14 = vsel %vm3009_vm1, %v4710_v63, 0.0  ;;  %v3580_v24 = vsel %vm3433_vm4, %v4731_v34, 0.0  ;;  %v1642_v49 = vadd.f32 %v1514_v53, %v1202_v57  ;;  %v2368_v62 = vsel %vm2221_vm13, %v4641_v60, 0.0 }
 0x282   : > { %v2856_v13 = vadd.f32 %v2728_v9, %v2432_v8  ;;  %v2792_v48 = vsel %vm2645_vm8, %v4681_v47, 0.0  ;;  %vm3073_vm3 = vcmp.eq.s32.totalorder %v7318_v16, %v4728_v27  ;;  %vm418_vm12 = vcmp.eq.s32.totalorder %v7315_v11, %v4779_v7 }
 0x283   : > { %v2066_v22 = vadd.f32 %v1938_v46, %v1642_v49  ;;  %vm3497_vm7 = vcmp.eq.s32.totalorder %v7318_v16, %v4736_v36  ;;  %v565_v5 = vsel %vm418_vm12, %v4766_v45, 0.0  ;;  %vm862_vm10 = vcmp.eq.s32.totalorder %v7315_v11, %v4786_v55 }
 0x284   : > { %v3284_v41 = vadd.f32 %v3156_v14, %v2856_v13  ;;  %v1009_v51 = vsel %vm862_vm10, %v4556_v43, 0.0  ;;  %vm1302_vm2 = vcmp.eq.s32.totalorder %v7315_v11, %v4789_v20  ;;  %vm1726_vm14 = vcmp.eq.s32.totalorder %v7315_v11, %v4798_v21 }
 0x285   : > { %v2496_v32 = vadd.f32 %v2368_v62, %v2066_v22  ;;  %v3220_v54 = vsel %vm3073_vm3, %v4710_v63, 0.0  ;;  %v1137_v2 = vadd.f32 %v1009_v51, %v565_v5  ;;  %v1449_v12 = vsel %vm1302_vm2, %v4776_v33, 0.0 }
 0x286   : > { %v3708_v56 = vadd.f32 %v3580_v24, %v3284_v41  ;;  %v1873_v10 = vsel %vm1726_vm14, %v4801_v59, 0.0  ;;  %vm2156_vm15 = vcmp.eq.s32.totalorder %v7315_v11, %v4809_v4  ;;  %vm2580_vm0 = vcmp.eq.s32.totalorder %v7315_v11, %v4835_v29 }
 0x287   : > { %v2920_v6 = vadd.f32 %v2792_v48, %v2496_v32  ;;  %v3644_v9 = vsel %vm3497_vm7, %v4731_v34, 0.0  ;;  %v1577_v38 = vadd.f32 %v1449_v12, %v1137_v2  ;;  %vm3008_vm1 = vcmp.eq.s32.totalorder %v7315_v11, %v4841_v25 }
 0x288   : > { %3845 = vmatprep.subr.mxu0 %v3708_v56  ;;  %v2303_v26 = vsel %vm2156_vm15, %v4819_v52, 0.0  ;;  %v2727_v42 = vsel %vm2580_vm0, %v4838_v28, 0.0  ;;  %vm482_vm4 = vcmp.eq.s32.totalorder %v7318_v16, %v4779_v7  ;;  %vm926_vm9 = vcmp.eq.s32.totalorder %v7318_v16, %v4786_v55 }
 0x289   : > { %v3348_v58 = vadd.f32 %v3220_v54, %v2920_v6  ;;  %v2001_v44 = vadd.f32 %v1873_v10, %v1577_v38  ;;  %vm3432_vm5 = vcmp.eq.s32.totalorder %v7315_v11, %v4847_v40  ;;  %v629_v57 = vsel %vm482_vm4, %v4766_v45, 0.0 }
 0x28a   : > { %v1073_v53 = vsel %vm926_vm9, %v4556_v43, 0.0  ;;  %vm1366_vm6 = vcmp.eq.s32.totalorder %v7318_v16, %v4789_v20  ;;  %vm1790_vm11 = vcmp.eq.s32.totalorder %v7318_v16, %v4798_v21  ;;  %vm2220_vm13 = vcmp.eq.s32.totalorder %v7318_v16, %v4809_v4 }
 0x28b   : > { %v3772_v8 = vadd.f32 %v3644_v9, %v3348_v58  ;;  %v2431_v46 = vadd.f32 %v2303_v26, %v2001_v44  ;;  %v1201_v14 = vadd.f32 %v1073_v53, %v629_v57  ;;  %v1513_v24 = vsel %vm1366_vm6, %v4776_v33, 0.0 }
 0x28c   : > { %v3155_v49 = vsel %vm3008_vm1, %v4844_v39, 0.0  ;;  %v3579_v62 = vsel %vm3432_vm5, %v4850_v0, 0.0  ;;  %v1937_v13 = vsel %vm1790_vm11, %v4801_v59, 0.0  ;;  %vm2644_vm8 = vcmp.eq.s32.totalorder %v7318_v16, %v4835_v29 }
 0x28d   : > { %3916 = vmatprep.subr.mxu1 %v3772_v8  ;;  %v2855_v48 = vadd.f32 %v2727_v42, %v2431_v46  ;;  %v1641_v22 = vadd.f32 %v1513_v24, %v1201_v14  ;;  %v2367_v5 = vsel %vm2220_vm13, %v4819_v52, 0.0  ;;  %vm3072_vm3 = vcmp.eq.s32.totalorder %v7318_v16, %v4841_v25 }
 0x28e   : > { %v2791_v41 = vsel %vm2644_vm8, %v4838_v28, 0.0  ;;  %vm417_vm12 = vcmp.eq.s32.totalorder %v7321_v15, %v4585_v61  ;;  %vm861_vm7 = vcmp.eq.s32.totalorder %v7321_v15, %v4624_v19  ;;  %vm1301_vm10 = vcmp.eq.s32.totalorder %v7321_v15, %v4675_v23 }
 0x28f   : > { %v3283_v11 = vadd.f32 %v3155_v49, %v2855_v48  ;;  %v2065_v51 = vadd.f32 %v1937_v13, %v1641_v22  ;;  %vm3496_vm2 = vcmp.eq.s32.totalorder %v7318_v16, %v4847_v40  ;;  %v564_v32 = vsel %vm417_vm12, %v4523_v30, 0.0 }
 0x290   : > { %v1008_v54 = vsel %vm861_vm7, %v4526_v31, 0.0  ;;  %v1448_v2 = vsel %vm1301_vm10, %v4611_v17, 0.0  ;;  %vm1725_vm14 = vcmp.eq.s32.totalorder %v7321_v15, %v4678_v35  ;;  %vm2155_vm15 = vcmp.eq.s32.totalorder %v7321_v15, %v4664_v37 }
 0x291   : > { %v3707_v12 = vadd.f32 %v3579_v62, %v3283_v11  ;;  %v2495_v56 = vadd.f32 %v2367_v5, %v2065_v51  ;;  %v3219_v10 = vsel %vm3072_vm3, %v4844_v39, 0.0  ;;  %v1136_v6 = vadd.f32 %v1008_v54, %v564_v32 }
 0x292   : > { %v3643_v9 = vsel %vm3496_vm2, %v4850_v0, 0.0  ;;  %v1872_v16 = vsel %vm1725_vm14, %v4614_v18, 0.0  ;;  %v2302_v38 = vsel %vm2155_vm15, %v4641_v60, 0.0  ;;  %vm2579_vm0 = vcmp.eq.s32.totalorder %v7321_v15, %v4688_v50 }
 0x293   : > { %3846 = vmatpush2.msra.mxu0 %v3707_v12  ;;  %v2919_v26 = vadd.f32 %v2791_v41, %v2495_v56  ;;  %v1576_v42 = vadd.f32 %v1448_v2, %v1136_v6  ;;  %vm3007_vm1 = vcmp.eq.s32.totalorder %v7321_v15, %v4728_v27  ;;  %vm3431_vm4 = vcmp.eq.s32.totalorder %v7321_v15, %v4736_v36 }
 0x294   : > { %v2726_v58 = vsel %vm2579_vm0, %v4681_v47, 0.0  ;;  %vm481_vm9 = vcmp.eq.s32.totalorder %v7341_v3, %v4585_v61  ;;  %vm925_vm5 = vcmp.eq.s32.totalorder %v7341_v3, %v4624_v19  ;;  %vm1365_vm6 = vcmp.eq.s32.totalorder %v7341_v3, %v4675_v23 }
 0x295   : > { %v3347_v44 = vadd.f32 %v3219_v10, %v2919_v26  ;;  %v2000_v57 = vadd.f32 %v1872_v16, %v1576_v42  ;;  %v628_v53 = vsel %vm481_vm9, %v4523_v30, 0.0  ;;  %v1072_v8 = vsel %vm925_vm5, %v4526_v31, 0.0 }
 0x296   : > { %v1200_v46 = vadd.f32 %v1072_v8, %v628_v53  ;;  %v1512_v14 = vsel %vm1365_vm6, %v4611_v17, 0.0  ;;  %vm1789_vm11 = vcmp.eq.s32.totalorder %v7341_v3, %v4678_v35  ;;  %vm2219_vm13 = vcmp.eq.s32.totalorder %v7341_v3, %v4664_v37 }
 0x297   : > { %v3771_v24 = vadd.f32 %v3643_v9, %v3347_v44  ;;  %v2430_v49 = vadd.f32 %v2302_v38, %v2000_v57  ;;  %v3154_v62 = vsel %vm3007_vm1, %v4710_v63, 0.0  ;;  %v1936_v13 = vsel %vm1789_vm11, %v4614_v18, 0.0 }
 0x298   : > { %v3578_v48 = vsel %vm3431_vm4, %v4731_v34, 0.0  ;;  %v1640_v22 = vadd.f32 %v1512_v14, %v1200_v46  ;;  %v2366_v5 = vsel %vm2219_vm13, %v4641_v60, 0.0  ;;  %vm2643_vm8 = vcmp.eq.s32.totalorder %v7341_v3, %v4688_v50 }
 0x299   : > { %3917 = vmatpush2.msra.mxu1 %v3771_v24  ;;  %v2854_v41 = vadd.f32 %v2726_v58, %v2430_v49  ;;  %v2790_v11 = vsel %vm2643_vm8, %v4681_v47, 0.0  ;;  %vm3071_vm3 = vcmp.eq.s32.totalorder %v7341_v3, %v4728_v27  ;;  %vm3495_vm12 = vcmp.eq.s32.totalorder %v7341_v3, %v4736_v36 }
 0x29a   : > { %v2064_v51 = vadd.f32 %v1936_v13, %v1640_v22  ;;  %vm416_vm7 = vcmp.eq.s32.totalorder %v7321_v15, %v4779_v7  ;;  %vm860_vm10 = vcmp.eq.s32.totalorder %v7321_v15, %v4786_v55  ;;  %vm1300_vm2 = vcmp.eq.s32.totalorder %v7321_v15, %v4789_v20 }
 0x29b   : > { %v3282_v32 = vadd.f32 %v3154_v62, %v2854_v41  ;;  %v563_v54 = vsel %vm416_vm7, %v4766_v45, 0.0  ;;  %v1007_v2 = vsel %vm860_vm10, %v4556_v43, 0.0  ;;  %v1447_v12 = vsel %vm1300_vm2, %v4776_v33, 0.0 }
 0x29c   : > { %v2494_v56 = vadd.f32 %v2366_v5, %v2064_v51  ;;  %v1135_v10 = vadd.f32 %v1007_v2, %v563_v54  ;;  %vm1724_vm14 = vcmp.eq.s32.totalorder %v7321_v15, %v4798_v21  ;;  %vm2154_vm15 = vcmp.eq.s32.totalorder %v7321_v15, %v4809_v4 }
 0x29d   : > { %v3706_v6 = vadd.f32 %v3578_v48, %v3282_v32  ;;  %v3218_v9 = vsel %vm3071_vm3, %v4710_v63, 0.0  ;;  %v1871_v16 = vsel %vm1724_vm14, %v4801_v59, 0.0  ;;  %vm2578_vm0 = vcmp.eq.s32.totalorder %v7321_v15, %v4835_v29 }
 0x29e   : > { %v2918_v38 = vadd.f32 %v2790_v11, %v2494_v56  ;;  %v3642_v26 = vsel %vm3495_vm12, %v4731_v34, 0.0  ;;  %v1575_v42 = vadd.f32 %v1447_v12, %v1135_v10  ;;  %v2301_v58 = vsel %vm2154_vm15, %v4819_v52, 0.0 }
 0x29f   : > { %3847 = vmatprep.subr.mxu0 %v3706_v6  ;;  %v2725_v44 = vsel %vm2578_vm0, %v4838_v28, 0.0  ;;  %vm3006_vm1 = vcmp.eq.s32.totalorder %v7321_v15, %v4841_v25  ;;  %vm480_vm4 = vcmp.eq.s32.totalorder %v7341_v3, %v4779_v7  ;;  %vm924_vm9 = vcmp.eq.s32.totalorder %v7341_v3, %v4786_v55 }
 0x2a0   : > { %v3346_v57 = vadd.f32 %v3218_v9, %v2918_v38  ;;  %v1999_v53 = vadd.f32 %v1871_v16, %v1575_v42  ;;  %vm3430_vm5 = vcmp.eq.s32.totalorder %v7321_v15, %v4847_v40  ;;  %v627_v8 = vsel %vm480_vm4, %v4766_v45, 0.0 }
 0x2a1   : > { %v1071_v46 = vsel %vm924_vm9, %v4556_v43, 0.0  ;;  %vm1364_vm6 = vcmp.eq.s32.totalorder %v7341_v3, %v4789_v20  ;;  %vm1788_vm11 = vcmp.eq.s32.totalorder %v7341_v3, %v4798_v21  ;;  %vm2218_vm13 = vcmp.eq.s32.totalorder %v7341_v3, %v4809_v4 }
 0x2a2   : > { %v3770_v14 = vadd.f32 %v3642_v26, %v3346_v57  ;;  %v2429_v24 = vadd.f32 %v2301_v58, %v1999_v53  ;;  %v1199_v49 = vadd.f32 %v1071_v46, %v627_v8  ;;  %v1511_v62 = vsel %vm1364_vm6, %v4776_v33, 0.0 }
 0x2a3   : > { %v3153_v13 = vsel %vm3006_vm1, %v4844_v39, 0.0  ;;  %v1935_v48 = vsel %vm1788_vm11, %v4801_v59, 0.0  ;;  %vm2642_vm8 = vcmp.eq.s32.totalorder %v7341_v3, %v4835_v29  ;;  %vm3070_vm3 = vcmp.eq.s32.totalorder %v7341_v3, %v4841_v25 }
 0x2a4   : > { %3918 = vmatprep.subr.mxu1 %v3770_v14  ;;  %v2853_v22 = vadd.f32 %v2725_v44, %v2429_v24  ;;  %v3577_v5 = vsel %vm3430_vm5, %v4850_v0, 0.0  ;;  %v1639_v41 = vadd.f32 %v1511_v62, %v1199_v49  ;;  %v2365_v11 = vsel %vm2218_vm13, %v4819_v52, 0.0 }
 0x2a5   : > { %v2789_v51 = vsel %vm2642_vm8, %v4838_v28, 0.0  ;;  %v3217_v32 = vsel %vm3070_vm3, %v4844_v39, 0.0  ;;  %vm3494_vm12 = vcmp.eq.s32.totalorder %v7341_v3, %v4847_v40  ;;  %v7543_v54 = vadd.s32 168, %v4370_v1 }
 0x2a6   : > { %v3281_v2 = vadd.f32 %v3153_v13, %v2853_v22  ;;  %v2063_v12 = vadd.f32 %v1935_v48, %v1639_v41  ;;  %v7546_v56 = vadd.s32 424, %v4370_v1  ;;  %v7549_v15 = vadd.s32 160, %v4370_v1 }
 0x2a7   : > { %vm415_vm7 = vcmp.eq.s32.totalorder %v7543_v54, %v4585_v61  ;;  %vm859_vm10 = vcmp.eq.s32.totalorder %v7543_v54, %v4624_v19  ;;  %vm1299_vm2 = vcmp.eq.s32.totalorder %v7543_v54, %v4675_v23  ;;  %vm1723_vm14 = vcmp.eq.s32.totalorder %v7543_v54, %v4678_v35 }
 0x2a8   : > { %v3705_v3 = vadd.f32 %v3577_v5, %v3281_v2  ;;  %v2493_v10 = vadd.f32 %v2365_v11, %v2063_v12  ;;  %v562_v6 = vsel %vm415_vm7, %v4523_v30, 0.0  ;;  %v1006_v9 = vsel %vm859_vm10, %v4526_v31, 0.0 }
 0x2a9   : > { %v3641_v16 = vsel %vm3494_vm12, %v4850_v0, 0.0  ;;  %v1134_v38 = vadd.f32 %v1006_v9, %v562_v6  ;;  %v1446_v26 = vsel %vm1299_vm2, %v4611_v17, 0.0  ;;  %vm2153_vm15 = vcmp.eq.s32.totalorder %v7543_v54, %v4664_v37 }
 0x2aa   : > { %3848 = vmatpush2.msra.mxu0 %v3705_v3  ;;  %v2917_v42 = vadd.f32 %v2789_v51, %v2493_v10  ;;  %v1870_v58 = vsel %vm1723_vm14, %v4614_v18, 0.0  ;;  %vm2577_vm0 = vcmp.eq.s32.totalorder %v7543_v54, %v4688_v50  ;;  %v7569_v44 = vadd.s32 416, %v4370_v1 }
 0x2ab   : > { %v1574_v57 = vadd.f32 %v1446_v26, %v1134_v38  ;;  %v2300_v53 = vsel %vm2153_vm15, %v4641_v60, 0.0  ;;  %v2724_v8 = vsel %vm2577_vm0, %v4681_v47, 0.0  ;;  %vm3005_vm1 = vcmp.eq.s32.totalorder %v7543_v54, %v4728_v27 }
 0x2ac   : > { %v3345_v46 = vadd.f32 %v3217_v32, %v2917_v42  ;;  %vm3429_vm4 = vcmp.eq.s32.totalorder %v7543_v54, %v4736_v36  ;;  %vm479_vm9 = vcmp.eq.s32.totalorder %v7546_v56, %v4585_v61  ;;  %vm923_vm5 = vcmp.eq.s32.totalorder %v7546_v56, %v4624_v19 }
 0x2ad   : > { %v1998_v14 = vadd.f32 %v1870_v58, %v1574_v57  ;;  %v626_v24 = vsel %vm479_vm9, %v4523_v30, 0.0  ;;  %v1070_v49 = vsel %vm923_vm5, %v4526_v31, 0.0  ;;  %vm1363_vm6 = vcmp.eq.s32.totalorder %v7546_v56, %v4675_v23 }
 0x2ae   : > { %v3769_v62 = vadd.f32 %v3641_v16, %v3345_v46  ;;  %v1198_v13 = vadd.f32 %v1070_v49, %v626_v24  ;;  %v1510_v48 = vsel %vm1363_vm6, %v4611_v17, 0.0  ;;  %vm1787_vm11 = vcmp.eq.s32.totalorder %v7546_v56, %v4678_v35 }
 0x2af   : > { %v2428_v22 = vadd.f32 %v2300_v53, %v1998_v14  ;;  %v1934_v5 = vsel %vm1787_vm11, %v4614_v18, 0.0  ;;  %vm2217_vm13 = vcmp.eq.s32.totalorder %v7546_v56, %v4664_v37  ;;  %vm2641_vm8 = vcmp.eq.s32.totalorder %v7546_v56, %v4688_v50 }
 0x2b0   : > { %3919 = vmatpush2.msra.mxu1 %v3769_v62  ;;  %v3152_v41 = vsel %vm3005_vm1, %v4710_v63, 0.0  ;;  %v3576_v11 = vsel %vm3429_vm4, %v4731_v34, 0.0  ;;  %v1638_v51 = vadd.f32 %v1510_v48, %v1198_v13  ;;  %v2364_v32 = vsel %vm2217_vm13, %v4641_v60, 0.0 }
 0x2b1   : > { %v2852_v2 = vadd.f32 %v2724_v8, %v2428_v22  ;;  %v2788_v12 = vsel %vm2641_vm8, %v4681_v47, 0.0  ;;  %vm3069_vm3 = vcmp.eq.s32.totalorder %v7546_v56, %v4728_v27  ;;  %vm414_vm12 = vcmp.eq.s32.totalorder %v7543_v54, %v4779_v7 }
 0x2b2   : > { %v2062_v3 = vadd.f32 %v1934_v5, %v1638_v51  ;;  %vm3493_vm7 = vcmp.eq.s32.totalorder %v7546_v56, %v4736_v36  ;;  %v561_v10 = vsel %vm414_vm12, %v4766_v45, 0.0  ;;  %vm858_vm10 = vcmp.eq.s32.totalorder %v7543_v54, %v4786_v55 }
 0x2b3   : > { %v3280_v6 = vadd.f32 %v3152_v41, %v2852_v2  ;;  %v1005_v9 = vsel %vm858_vm10, %v4556_v43, 0.0  ;;  %vm1298_vm2 = vcmp.eq.s32.totalorder %v7543_v54, %v4789_v20  ;;  %vm1722_vm14 = vcmp.eq.s32.totalorder %v7543_v54, %v4798_v21 }
 0x2b4   : > { %v2492_v16 = vadd.f32 %v2364_v32, %v2062_v3  ;;  %v3216_v38 = vsel %vm3069_vm3, %v4710_v63, 0.0  ;;  %v1133_v26 = vadd.f32 %v1005_v9, %v561_v10  ;;  %v1445_v42 = vsel %vm1298_vm2, %v4776_v33, 0.0 }
 0x2b5   : > { %v3704_v58 = vadd.f32 %v3576_v11, %v3280_v6  ;;  %v1869_v57 = vsel %vm1722_vm14, %v4801_v59, 0.0  ;;  %vm2152_vm15 = vcmp.eq.s32.totalorder %v7543_v54, %v4809_v4  ;;  %vm2576_vm0 = vcmp.eq.s32.totalorder %v7543_v54, %v4835_v29 }
 0x2b6   : > { %v2916_v53 = vadd.f32 %v2788_v12, %v2492_v16  ;;  %v3640_v8 = vsel %vm3493_vm7, %v4731_v34, 0.0  ;;  %v1573_v46 = vadd.f32 %v1445_v42, %v1133_v26  ;;  %vm3004_vm1 = vcmp.eq.s32.totalorder %v7543_v54, %v4841_v25 }
 0x2b7   : > { %3849 = vmatprep.subr.mxu0 %v3704_v58  ;;  %v2299_v14 = vsel %vm2152_vm15, %v4819_v52, 0.0  ;;  %v2723_v24 = vsel %vm2576_vm0, %v4838_v28, 0.0  ;;  %vm478_vm4 = vcmp.eq.s32.totalorder %v7546_v56, %v4779_v7  ;;  %vm922_vm9 = vcmp.eq.s32.totalorder %v7546_v56, %v4786_v55 }
 0x2b8   : > { %v3344_v49 = vadd.f32 %v3216_v38, %v2916_v53  ;;  %v1997_v62 = vadd.f32 %v1869_v57, %v1573_v46  ;;  %vm3428_vm5 = vcmp.eq.s32.totalorder %v7543_v54, %v4847_v40  ;;  %v625_v13 = vsel %vm478_vm4, %v4766_v45, 0.0 }
 0x2b9   : > { %v1069_v48 = vsel %vm922_vm9, %v4556_v43, 0.0  ;;  %vm1362_vm6 = vcmp.eq.s32.totalorder %v7546_v56, %v4789_v20  ;;  %vm1786_vm11 = vcmp.eq.s32.totalorder %v7546_v56, %v4798_v21  ;;  %vm2216_vm13 = vcmp.eq.s32.totalorder %v7546_v56, %v4809_v4 }
 0x2ba   : > { %v3768_v22 = vadd.f32 %v3640_v8, %v3344_v49  ;;  %v2427_v5 = vadd.f32 %v2299_v14, %v1997_v62  ;;  %v1197_v41 = vadd.f32 %v1069_v48, %v625_v13  ;;  %v1509_v11 = vsel %vm1362_vm6, %v4776_v33, 0.0 }
 0x2bb   : > { %v3151_v51 = vsel %vm3004_vm1, %v4844_v39, 0.0  ;;  %v3575_v32 = vsel %vm3428_vm5, %v4850_v0, 0.0  ;;  %v1933_v2 = vsel %vm1786_vm11, %v4801_v59, 0.0  ;;  %vm2640_vm8 = vcmp.eq.s32.totalorder %v7546_v56, %v4835_v29 }
 0x2bc   : > { %3920 = vmatprep.subr.mxu1 %v3768_v22  ;;  %v2851_v12 = vadd.f32 %v2723_v24, %v2427_v5  ;;  %v1637_v3 = vadd.f32 %v1509_v11, %v1197_v41  ;;  %v2363_v10 = vsel %vm2216_vm13, %v4819_v52, 0.0  ;;  %vm3068_vm3 = vcmp.eq.s32.totalorder %v7546_v56, %v4841_v25 }
 0x2bd   : > { %v2787_v6 = vsel %vm2640_vm8, %v4838_v28, 0.0  ;;  %vm413_vm12 = vcmp.eq.s32.totalorder %v7549_v15, %v4585_v61  ;;  %vm857_vm7 = vcmp.eq.s32.totalorder %v7549_v15, %v4624_v19  ;;  %vm1297_vm10 = vcmp.eq.s32.totalorder %v7549_v15, %v4675_v23 }
 0x2be   : > { %v3279_v54 = vadd.f32 %v3151_v51, %v2851_v12  ;;  %v2061_v9 = vadd.f32 %v1933_v2, %v1637_v3  ;;  %vm3492_vm2 = vcmp.eq.s32.totalorder %v7546_v56, %v4847_v40  ;;  %v560_v16 = vsel %vm413_vm12, %v4523_v30, 0.0 }
 0x2bf   : > { %v1004_v38 = vsel %vm857_vm7, %v4526_v31, 0.0  ;;  %v1444_v26 = vsel %vm1297_vm10, %v4611_v17, 0.0  ;;  %vm1721_vm14 = vcmp.eq.s32.totalorder %v7549_v15, %v4678_v35  ;;  %vm2151_vm15 = vcmp.eq.s32.totalorder %v7549_v15, %v4664_v37 }
 0x2c0   : > { %v3703_v42 = vadd.f32 %v3575_v32, %v3279_v54  ;;  %v2491_v58 = vadd.f32 %v2363_v10, %v2061_v9  ;;  %v3215_v57 = vsel %vm3068_vm3, %v4844_v39, 0.0  ;;  %v1132_v53 = vadd.f32 %v1004_v38, %v560_v16 }
 0x2c1   : > { %v3639_v8 = vsel %vm3492_vm2, %v4850_v0, 0.0  ;;  %v1868_v56 = vsel %vm1721_vm14, %v4614_v18, 0.0  ;;  %v2298_v46 = vsel %vm2151_vm15, %v4641_v60, 0.0  ;;  %vm2575_vm0 = vcmp.eq.s32.totalorder %v7549_v15, %v4688_v50 }
 0x2c2   : > { %3850 = vmatpush2.msra.mxu0 %v3703_v42  ;;  %v2915_v14 = vadd.f32 %v2787_v6, %v2491_v58  ;;  %v1572_v24 = vadd.f32 %v1444_v26, %v1132_v53  ;;  %vm3003_vm1 = vcmp.eq.s32.totalorder %v7549_v15, %v4728_v27  ;;  %vm3427_vm4 = vcmp.eq.s32.totalorder %v7549_v15, %v4736_v36 }
 0x2c3   : > { %v2722_v49 = vsel %vm2575_vm0, %v4681_v47, 0.0  ;;  %vm477_vm9 = vcmp.eq.s32.totalorder %v7569_v44, %v4585_v61  ;;  %vm921_vm5 = vcmp.eq.s32.totalorder %v7569_v44, %v4624_v19  ;;  %vm1361_vm6 = vcmp.eq.s32.totalorder %v7569_v44, %v4675_v23 }
 0x2c4   : > { %v3343_v62 = vadd.f32 %v3215_v57, %v2915_v14  ;;  %v1996_v13 = vadd.f32 %v1868_v56, %v1572_v24  ;;  %v624_v48 = vsel %vm477_vm9, %v4523_v30, 0.0  ;;  %v1068_v22 = vsel %vm921_vm5, %v4526_v31, 0.0 }
 0x2c5   : > { %v1196_v5 = vadd.f32 %v1068_v22, %v624_v48  ;;  %v1508_v41 = vsel %vm1361_vm6, %v4611_v17, 0.0  ;;  %vm1785_vm11 = vcmp.eq.s32.totalorder %v7569_v44, %v4678_v35  ;;  %vm2215_vm13 = vcmp.eq.s32.totalorder %v7569_v44, %v4664_v37 }
 0x2c6   : > { %v3767_v11 = vadd.f32 %v3639_v8, %v3343_v62  ;;  %v2426_v51 = vadd.f32 %v2298_v46, %v1996_v13  ;;  %v3150_v32 = vsel %vm3003_vm1, %v4710_v63, 0.0  ;;  %v1932_v2 = vsel %vm1785_vm11, %v4614_v18, 0.0 }
 0x2c7   : > { %v3574_v12 = vsel %vm3427_vm4, %v4731_v34, 0.0  ;;  %v1636_v3 = vadd.f32 %v1508_v41, %v1196_v5  ;;  %v2362_v10 = vsel %vm2215_vm13, %v4641_v60, 0.0  ;;  %vm2639_vm8 = vcmp.eq.s32.totalorder %v7569_v44, %v4688_v50 }
 0x2c8   : > { %3921 = vmatpush2.msra.mxu1 %v3767_v11  ;;  %v2850_v6 = vadd.f32 %v2722_v49, %v2426_v51  ;;  %v2786_v54 = vsel %vm2639_vm8, %v4681_v47, 0.0  ;;  %vm3067_vm3 = vcmp.eq.s32.totalorder %v7569_v44, %v4728_v27  ;;  %vm3491_vm12 = vcmp.eq.s32.totalorder %v7569_v44, %v4736_v36 }
 0x2c9   : > { %v2060_v9 = vadd.f32 %v1932_v2, %v1636_v3  ;;  %vm412_vm7 = vcmp.eq.s32.totalorder %v7549_v15, %v4779_v7  ;;  %vm856_vm10 = vcmp.eq.s32.totalorder %v7549_v15, %v4786_v55  ;;  %vm1296_vm2 = vcmp.eq.s32.totalorder %v7549_v15, %v4789_v20 }
 0x2ca   : > { %v3278_v16 = vadd.f32 %v3150_v32, %v2850_v6  ;;  %v559_v38 = vsel %vm412_vm7, %v4766_v45, 0.0  ;;  %v1003_v26 = vsel %vm856_vm10, %v4556_v43, 0.0  ;;  %v1443_v42 = vsel %vm1296_vm2, %v4776_v33, 0.0 }
 0x2cb   : > { %v2490_v58 = vadd.f32 %v2362_v10, %v2060_v9  ;;  %v1131_v57 = vadd.f32 %v1003_v26, %v559_v38  ;;  %vm1720_vm14 = vcmp.eq.s32.totalorder %v7549_v15, %v4798_v21  ;;  %vm2150_vm15 = vcmp.eq.s32.totalorder %v7549_v15, %v4809_v4 }
 0x2cc   : > { %v3702_v53 = vadd.f32 %v3574_v12, %v3278_v16  ;;  %v3214_v8 = vsel %vm3067_vm3, %v4710_v63, 0.0  ;;  %v1867_v56 = vsel %vm1720_vm14, %v4801_v59, 0.0  ;;  %vm2574_vm0 = vcmp.eq.s32.totalorder %v7549_v15, %v4835_v29 }
 0x2cd   : > { %v2914_v46 = vadd.f32 %v2786_v54, %v2490_v58  ;;  %v3638_v14 = vsel %vm3491_vm12, %v4731_v34, 0.0  ;;  %v1571_v24 = vadd.f32 %v1443_v42, %v1131_v57  ;;  %v2297_v49 = vsel %vm2150_vm15, %v4819_v52, 0.0 }
 0x2ce   : > { %3851 = vmatprep.subr.mxu0 %v3702_v53  ;;  %v2721_v62 = vsel %vm2574_vm0, %v4838_v28, 0.0  ;;  %vm3002_vm1 = vcmp.eq.s32.totalorder %v7549_v15, %v4841_v25  ;;  %vm476_vm4 = vcmp.eq.s32.totalorder %v7569_v44, %v4779_v7  ;;  %vm920_vm9 = vcmp.eq.s32.totalorder %v7569_v44, %v4786_v55 }
 0x2cf   : > { %v3342_v13 = vadd.f32 %v3214_v8, %v2914_v46  ;;  %v1995_v48 = vadd.f32 %v1867_v56, %v1571_v24  ;;  %vm3426_vm5 = vcmp.eq.s32.totalorder %v7549_v15, %v4847_v40  ;;  %v623_v22 = vsel %vm476_vm4, %v4766_v45, 0.0 }
 0x2d0   : > { %v1067_v5 = vsel %vm920_vm9, %v4556_v43, 0.0  ;;  %vm1360_vm6 = vcmp.eq.s32.totalorder %v7569_v44, %v4789_v20  ;;  %vm1784_vm11 = vcmp.eq.s32.totalorder %v7569_v44, %v4798_v21  ;;  %vm2214_vm13 = vcmp.eq.s32.totalorder %v7569_v44, %v4809_v4 }
 0x2d1   : > { %v3766_v41 = vadd.f32 %v3638_v14, %v3342_v13  ;;  %v2425_v11 = vadd.f32 %v2297_v49, %v1995_v48  ;;  %v1195_v51 = vadd.f32 %v1067_v5, %v623_v22  ;;  %v1507_v32 = vsel %vm1360_vm6, %v4776_v33, 0.0 }
 0x2d2   : > { %v3149_v2 = vsel %vm3002_vm1, %v4844_v39, 0.0  ;;  %v1931_v12 = vsel %vm1784_vm11, %v4801_v59, 0.0  ;;  %vm2638_vm8 = vcmp.eq.s32.totalorder %v7569_v44, %v4835_v29  ;;  %vm3066_vm3 = vcmp.eq.s32.totalorder %v7569_v44, %v4841_v25 }
 0x2d3   : > { %3922 = vmatprep.subr.mxu1 %v3766_v41  ;;  %v2849_v3 = vadd.f32 %v2721_v62, %v2425_v11  ;;  %v3573_v10 = vsel %vm3426_vm5, %v4850_v0, 0.0  ;;  %v1635_v6 = vadd.f32 %v1507_v32, %v1195_v51  ;;  %v2361_v54 = vsel %vm2214_vm13, %v4819_v52, 0.0 }
 0x2d4   : > { %v2785_v9 = vsel %vm2638_vm8, %v4838_v28, 0.0  ;;  %v3213_v16 = vsel %vm3066_vm3, %v4844_v39, 0.0  ;;  %vm3490_vm12 = vcmp.eq.s32.totalorder %v7569_v44, %v4847_v40  ;;  %v7771_v38 = vadd.s32 152, %v4370_v1 }
 0x2d5   : > { %v3277_v26 = vadd.f32 %v3149_v2, %v2849_v3  ;;  %v2059_v42 = vadd.f32 %v1931_v12, %v1635_v6  ;;  %v7774_v58 = vadd.s32 408, %v4370_v1  ;;  %v7777_v15 = vadd.s32 144, %v4370_v1 }
 0x2d6   : > { %vm411_vm7 = vcmp.eq.s32.totalorder %v7771_v38, %v4585_v61  ;;  %vm855_vm10 = vcmp.eq.s32.totalorder %v7771_v38, %v4624_v19  ;;  %vm1295_vm2 = vcmp.eq.s32.totalorder %v7771_v38, %v4675_v23  ;;  %vm1719_vm14 = vcmp.eq.s32.totalorder %v7771_v38, %v4678_v35 }
 0x2d7   : > { %v3701_v44 = vadd.f32 %v3573_v10, %v3277_v26  ;;  %v2489_v57 = vadd.f32 %v2361_v54, %v2059_v42  ;;  %v558_v53 = vsel %vm411_vm7, %v4523_v30, 0.0  ;;  %v1002_v8 = vsel %vm855_vm10, %v4526_v31, 0.0 }
 0x2d8   : > { %v3637_v56 = vsel %vm3490_vm12, %v4850_v0, 0.0  ;;  %v1130_v46 = vadd.f32 %v1002_v8, %v558_v53  ;;  %v1442_v14 = vsel %vm1295_vm2, %v4611_v17, 0.0  ;;  %vm2149_vm15 = vcmp.eq.s32.totalorder %v7771_v38, %v4664_v37 }
 0x2d9   : > { %3852 = vmatpush2.msra.mxu0 %v3701_v44  ;;  %v2913_v24 = vadd.f32 %v2785_v9, %v2489_v57  ;;  %v1866_v49 = vsel %vm1719_vm14, %v4614_v18, 0.0  ;;  %vm2573_vm0 = vcmp.eq.s32.totalorder %v7771_v38, %v4688_v50  ;;  %v7797_v62 = vadd.s32 400, %v4370_v1 }
 0x2da   : > { %v1570_v13 = vadd.f32 %v1442_v14, %v1130_v46  ;;  %v2296_v48 = vsel %vm2149_vm15, %v4641_v60, 0.0  ;;  %v2720_v22 = vsel %vm2573_vm0, %v4681_v47, 0.0  ;;  %vm3001_vm1 = vcmp.eq.s32.totalorder %v7771_v38, %v4728_v27 }
 0x2db   : > { %v3341_v5 = vadd.f32 %v3213_v16, %v2913_v24  ;;  %vm3425_vm4 = vcmp.eq.s32.totalorder %v7771_v38, %v4736_v36  ;;  %vm475_vm9 = vcmp.eq.s32.totalorder %v7774_v58, %v4585_v61  ;;  %vm919_vm5 = vcmp.eq.s32.totalorder %v7774_v58, %v4624_v19 }
 0x2dc   : > { %v1994_v41 = vadd.f32 %v1866_v49, %v1570_v13  ;;  %v622_v11 = vsel %vm475_vm9, %v4523_v30, 0.0  ;;  %v1066_v51 = vsel %vm919_vm5, %v4526_v31, 0.0  ;;  %vm1359_vm6 = vcmp.eq.s32.totalorder %v7774_v58, %v4675_v23 }
 0x2dd   : > { %v3765_v32 = vadd.f32 %v3637_v56, %v3341_v5  ;;  %v1194_v2 = vadd.f32 %v1066_v51, %v622_v11  ;;  %v1506_v12 = vsel %vm1359_vm6, %v4611_v17, 0.0  ;;  %vm1783_vm11 = vcmp.eq.s32.totalorder %v7774_v58, %v4678_v35 }
 0x2de   : > { %v2424_v3 = vadd.f32 %v2296_v48, %v1994_v41  ;;  %v1930_v10 = vsel %vm1783_vm11, %v4614_v18, 0.0  ;;  %vm2213_vm13 = vcmp.eq.s32.totalorder %v7774_v58, %v4664_v37  ;;  %vm2637_vm8 = vcmp.eq.s32.totalorder %v7774_v58, %v4688_v50 }
 0x2df   : > { %3923 = vmatpush2.msra.mxu1 %v3765_v32  ;;  %v3148_v6 = vsel %vm3001_vm1, %v4710_v63, 0.0  ;;  %v3572_v54 = vsel %vm3425_vm4, %v4731_v34, 0.0  ;;  %v1634_v9 = vadd.f32 %v1506_v12, %v1194_v2  ;;  %v2360_v16 = vsel %vm2213_vm13, %v4641_v60, 0.0 }
 0x2e0   : > { %v2848_v26 = vadd.f32 %v2720_v22, %v2424_v3  ;;  %v2784_v42 = vsel %vm2637_vm8, %v4681_v47, 0.0  ;;  %vm3065_vm3 = vcmp.eq.s32.totalorder %v7774_v58, %v4728_v27  ;;  %vm410_vm12 = vcmp.eq.s32.totalorder %v7771_v38, %v4779_v7 }
 0x2e1   : > { %v2058_v44 = vadd.f32 %v1930_v10, %v1634_v9  ;;  %vm3489_vm7 = vcmp.eq.s32.totalorder %v7774_v58, %v4736_v36  ;;  %v557_v57 = vsel %vm410_vm12, %v4766_v45, 0.0  ;;  %vm854_vm10 = vcmp.eq.s32.totalorder %v7771_v38, %v4786_v55 }
 0x2e2   : > { %v3276_v53 = vadd.f32 %v3148_v6, %v2848_v26  ;;  %v1001_v8 = vsel %vm854_vm10, %v4556_v43, 0.0  ;;  %vm1294_vm2 = vcmp.eq.s32.totalorder %v7771_v38, %v4789_v20  ;;  %vm1718_vm14 = vcmp.eq.s32.totalorder %v7771_v38, %v4798_v21 }
 0x2e3   : > { %v2488_v56 = vadd.f32 %v2360_v16, %v2058_v44  ;;  %v3212_v46 = vsel %vm3065_vm3, %v4710_v63, 0.0  ;;  %v1129_v14 = vadd.f32 %v1001_v8, %v557_v57  ;;  %v1441_v24 = vsel %vm1294_vm2, %v4776_v33, 0.0 }
 0x2e4   : > { %v3700_v49 = vadd.f32 %v3572_v54, %v3276_v53  ;;  %v1865_v13 = vsel %vm1718_vm14, %v4801_v59, 0.0  ;;  %vm2148_vm15 = vcmp.eq.s32.totalorder %v7771_v38, %v4809_v4  ;;  %vm2572_vm0 = vcmp.eq.s32.totalorder %v7771_v38, %v4835_v29 }
 0x2e5   : > { %v2912_v48 = vadd.f32 %v2784_v42, %v2488_v56  ;;  %v3636_v22 = vsel %vm3489_vm7, %v4731_v34, 0.0  ;;  %v1569_v5 = vadd.f32 %v1441_v24, %v1129_v14  ;;  %vm3000_vm1 = vcmp.eq.s32.totalorder %v7771_v38, %v4841_v25 }
 0x2e6   : > { %3853 = vmatprep.subr.mxu0 %v3700_v49  ;;  %v2295_v41 = vsel %vm2148_vm15, %v4819_v52, 0.0  ;;  %v2719_v11 = vsel %vm2572_vm0, %v4838_v28, 0.0  ;;  %vm474_vm4 = vcmp.eq.s32.totalorder %v7774_v58, %v4779_v7  ;;  %vm918_vm9 = vcmp.eq.s32.totalorder %v7774_v58, %v4786_v55 }
 0x2e7   : > { %v3340_v51 = vadd.f32 %v3212_v46, %v2912_v48  ;;  %v1993_v32 = vadd.f32 %v1865_v13, %v1569_v5  ;;  %vm3424_vm5 = vcmp.eq.s32.totalorder %v7771_v38, %v4847_v40  ;;  %v621_v2 = vsel %vm474_vm4, %v4766_v45, 0.0 }
 0x2e8   : > { %v1065_v12 = vsel %vm918_vm9, %v4556_v43, 0.0  ;;  %vm1358_vm6 = vcmp.eq.s32.totalorder %v7774_v58, %v4789_v20  ;;  %vm1782_vm11 = vcmp.eq.s32.totalorder %v7774_v58, %v4798_v21  ;;  %vm2212_vm13 = vcmp.eq.s32.totalorder %v7774_v58, %v4809_v4 }
 0x2e9   : > { %v3764_v3 = vadd.f32 %v3636_v22, %v3340_v51  ;;  %v2423_v10 = vadd.f32 %v2295_v41, %v1993_v32  ;;  %v1193_v6 = vadd.f32 %v1065_v12, %v621_v2  ;;  %v1505_v54 = vsel %vm1358_vm6, %v4776_v33, 0.0 }
 0x2ea   : > { %v3147_v9 = vsel %vm3000_vm1, %v4844_v39, 0.0  ;;  %v3571_v16 = vsel %vm3424_vm5, %v4850_v0, 0.0  ;;  %v1929_v26 = vsel %vm1782_vm11, %v4801_v59, 0.0  ;;  %vm2636_vm8 = vcmp.eq.s32.totalorder %v7774_v58, %v4835_v29 }
 0x2eb   : > { %3924 = vmatprep.subr.mxu1 %v3764_v3  ;;  %v2847_v42 = vadd.f32 %v2719_v11, %v2423_v10  ;;  %v1633_v44 = vadd.f32 %v1505_v54, %v1193_v6  ;;  %v2359_v57 = vsel %vm2212_vm13, %v4819_v52, 0.0  ;;  %vm3064_vm3 = vcmp.eq.s32.totalorder %v7774_v58, %v4841_v25 }
 0x2ec   : > { %v2783_v53 = vsel %vm2636_vm8, %v4838_v28, 0.0  ;;  %vm409_vm12 = vcmp.eq.s32.totalorder %v7777_v15, %v4585_v61  ;;  %vm853_vm7 = vcmp.eq.s32.totalorder %v7777_v15, %v4624_v19  ;;  %vm1293_vm10 = vcmp.eq.s32.totalorder %v7777_v15, %v4675_v23 }
 0x2ed   : > { %v3275_v38 = vadd.f32 %v3147_v9, %v2847_v42  ;;  %v2057_v8 = vadd.f32 %v1929_v26, %v1633_v44  ;;  %vm3488_vm2 = vcmp.eq.s32.totalorder %v7774_v58, %v4847_v40  ;;  %v556_v56 = vsel %vm409_vm12, %v4523_v30, 0.0 }
 0x2ee   : > { %v1000_v46 = vsel %vm853_vm7, %v4526_v31, 0.0  ;;  %v1440_v14 = vsel %vm1293_vm10, %v4611_v17, 0.0  ;;  %vm1717_vm14 = vcmp.eq.s32.totalorder %v7777_v15, %v4678_v35  ;;  %vm2147_vm15 = vcmp.eq.s32.totalorder %v7777_v15, %v4664_v37 }
 0x2ef   : > { %v3699_v24 = vadd.f32 %v3571_v16, %v3275_v38  ;;  %v2487_v49 = vadd.f32 %v2359_v57, %v2057_v8  ;;  %v3211_v13 = vsel %vm3064_vm3, %v4844_v39, 0.0  ;;  %v1128_v48 = vadd.f32 %v1000_v46, %v556_v56 }
 0x2f0   : > { %v3635_v22 = vsel %vm3488_vm2, %v4850_v0, 0.0  ;;  %v1864_v58 = vsel %vm1717_vm14, %v4614_v18, 0.0  ;;  %v2294_v5 = vsel %vm2147_vm15, %v4641_v60, 0.0  ;;  %vm2571_vm0 = vcmp.eq.s32.totalorder %v7777_v15, %v4688_v50 }
 0x2f1   : > { %3854 = vmatpush2.msra.mxu0 %v3699_v24  ;;  %v2911_v41 = vadd.f32 %v2783_v53, %v2487_v49  ;;  %v1568_v11 = vadd.f32 %v1440_v14, %v1128_v48  ;;  %vm2999_vm1 = vcmp.eq.s32.totalorder %v7777_v15, %v4728_v27  ;;  %vm3423_vm4 = vcmp.eq.s32.totalorder %v7777_v15, %v4736_v36 }
 0x2f2   : > { %v2718_v51 = vsel %vm2571_vm0, %v4681_v47, 0.0  ;;  %vm473_vm9 = vcmp.eq.s32.totalorder %v7797_v62, %v4585_v61  ;;  %vm917_vm5 = vcmp.eq.s32.totalorder %v7797_v62, %v4624_v19  ;;  %vm1357_vm6 = vcmp.eq.s32.totalorder %v7797_v62, %v4675_v23 }
 0x2f3   : > { %v3339_v32 = vadd.f32 %v3211_v13, %v2911_v41  ;;  %v1992_v2 = vadd.f32 %v1864_v58, %v1568_v11  ;;  %v620_v12 = vsel %vm473_vm9, %v4523_v30, 0.0  ;;  %v1064_v3 = vsel %vm917_vm5, %v4526_v31, 0.0 }
 0x2f4   : > { %v1192_v10 = vadd.f32 %v1064_v3, %v620_v12  ;;  %v1504_v6 = vsel %vm1357_vm6, %v4611_v17, 0.0  ;;  %vm1781_vm11 = vcmp.eq.s32.totalorder %v7797_v62, %v4678_v35  ;;  %vm2211_vm13 = vcmp.eq.s32.totalorder %v7797_v62, %v4664_v37 }
 0x2f5   : > { %v3763_v54 = vadd.f32 %v3635_v22, %v3339_v32  ;;  %v2422_v9 = vadd.f32 %v2294_v5, %v1992_v2  ;;  %v3146_v16 = vsel %vm2999_vm1, %v4710_v63, 0.0  ;;  %v1928_v26 = vsel %vm1781_vm11, %v4614_v18, 0.0 }
 0x2f6   : > { %v3570_v42 = vsel %vm3423_vm4, %v4731_v34, 0.0  ;;  %v1632_v44 = vadd.f32 %v1504_v6, %v1192_v10  ;;  %v2358_v57 = vsel %vm2211_vm13, %v4641_v60, 0.0  ;;  %vm2635_vm8 = vcmp.eq.s32.totalorder %v7797_v62, %v4688_v50 }
 0x2f7   : > { %3925 = vmatpush2.msra.mxu1 %v3763_v54  ;;  %v2846_v53 = vadd.f32 %v2718_v51, %v2422_v9  ;;  %v2782_v38 = vsel %vm2635_vm8, %v4681_v47, 0.0  ;;  %vm3063_vm3 = vcmp.eq.s32.totalorder %v7797_v62, %v4728_v27  ;;  %vm3487_vm12 = vcmp.eq.s32.totalorder %v7797_v62, %v4736_v36 }
 0x2f8   : > { %v2056_v8 = vadd.f32 %v1928_v26, %v1632_v44  ;;  %vm408_vm7 = vcmp.eq.s32.totalorder %v7777_v15, %v4779_v7  ;;  %vm852_vm10 = vcmp.eq.s32.totalorder %v7777_v15, %v4786_v55  ;;  %vm1292_vm2 = vcmp.eq.s32.totalorder %v7777_v15, %v4789_v20 }
 0x2f9   : > { %v3274_v56 = vadd.f32 %v3146_v16, %v2846_v53  ;;  %v555_v46 = vsel %vm408_vm7, %v4766_v45, 0.0  ;;  %v999_v14 = vsel %vm852_vm10, %v4556_v43, 0.0  ;;  %v1439_v24 = vsel %vm1292_vm2, %v4776_v33, 0.0 }
 0x2fa   : > { %v2486_v49 = vadd.f32 %v2358_v57, %v2056_v8  ;;  %v1127_v13 = vadd.f32 %v999_v14, %v555_v46  ;;  %vm1716_vm14 = vcmp.eq.s32.totalorder %v7777_v15, %v4798_v21  ;;  %vm2146_vm15 = vcmp.eq.s32.totalorder %v7777_v15, %v4809_v4 }
 0x2fb   : > { %v3698_v48 = vadd.f32 %v3570_v42, %v3274_v56  ;;  %v3210_v22 = vsel %vm3063_vm3, %v4710_v63, 0.0  ;;  %v1863_v58 = vsel %vm1716_vm14, %v4801_v59, 0.0  ;;  %vm2570_vm0 = vcmp.eq.s32.totalorder %v7777_v15, %v4835_v29 }
 0x2fc   : > { %v2910_v5 = vadd.f32 %v2782_v38, %v2486_v49  ;;  %v3634_v41 = vsel %vm3487_vm12, %v4731_v34, 0.0  ;;  %v1567_v11 = vadd.f32 %v1439_v24, %v1127_v13  ;;  %v2293_v51 = vsel %vm2146_vm15, %v4819_v52, 0.0 }
 0x2fd   : > { %3855 = vmatprep.subr.mxu0 %v3698_v48  ;;  %v2717_v32 = vsel %vm2570_vm0, %v4838_v28, 0.0  ;;  %vm2998_vm1 = vcmp.eq.s32.totalorder %v7777_v15, %v4841_v25  ;;  %vm472_vm4 = vcmp.eq.s32.totalorder %v7797_v62, %v4779_v7  ;;  %vm916_vm9 = vcmp.eq.s32.totalorder %v7797_v62, %v4786_v55 }
 0x2fe   : > { %v3338_v2 = vadd.f32 %v3210_v22, %v2910_v5  ;;  %v1991_v12 = vadd.f32 %v1863_v58, %v1567_v11  ;;  %vm3422_vm5 = vcmp.eq.s32.totalorder %v7777_v15, %v4847_v40  ;;  %v619_v3 = vsel %vm472_vm4, %v4766_v45, 0.0 }
 0x2ff   : > { %v1063_v10 = vsel %vm916_vm9, %v4556_v43, 0.0  ;;  %vm1356_vm6 = vcmp.eq.s32.totalorder %v7797_v62, %v4789_v20  ;;  %vm1780_vm11 = vcmp.eq.s32.totalorder %v7797_v62, %v4798_v21  ;;  %vm2210_vm13 = vcmp.eq.s32.totalorder %v7797_v62, %v4809_v4 }
 0x300   : > { %v3762_v6 = vadd.f32 %v3634_v41, %v3338_v2  ;;  %v2421_v54 = vadd.f32 %v2293_v51, %v1991_v12  ;;  %v1191_v9 = vadd.f32 %v1063_v10, %v619_v3  ;;  %v1503_v16 = vsel %vm1356_vm6, %v4776_v33, 0.0 }
 0x301   : > { %v3145_v26 = vsel %vm2998_vm1, %v4844_v39, 0.0  ;;  %v1927_v42 = vsel %vm1780_vm11, %v4801_v59, 0.0  ;;  %vm2634_vm8 = vcmp.eq.s32.totalorder %v7797_v62, %v4835_v29  ;;  %vm3062_vm3 = vcmp.eq.s32.totalorder %v7797_v62, %v4841_v25 }
 0x302   : > { %3926 = vmatprep.subr.mxu1 %v3762_v6  ;;  %v2845_v44 = vadd.f32 %v2717_v32, %v2421_v54  ;;  %v3569_v57 = vsel %vm3422_vm5, %v4850_v0, 0.0  ;;  %v1631_v53 = vadd.f32 %v1503_v16, %v1191_v9  ;;  %v2357_v38 = vsel %vm2210_vm13, %v4819_v52, 0.0 }
 0x303   : > { %v2781_v8 = vsel %vm2634_vm8, %v4838_v28, 0.0  ;;  %v3209_v56 = vsel %vm3062_vm3, %v4844_v39, 0.0  ;;  %vm3486_vm12 = vcmp.eq.s32.totalorder %v7797_v62, %v4847_v40  ;;  %v7999_v46 = vadd.s32 136, %v4370_v1 }
 0x304   : > { %v3273_v14 = vadd.f32 %v3145_v26, %v2845_v44  ;;  %v2055_v24 = vadd.f32 %v1927_v42, %v1631_v53  ;;  %v8002_v49 = vadd.s32 392, %v4370_v1  ;;  %v8005_v15 = vadd.s32 128, %v4370_v1 }
 0x305   : > { %vm407_vm7 = vcmp.eq.s32.totalorder %v7999_v46, %v4585_v61  ;;  %vm851_vm10 = vcmp.eq.s32.totalorder %v7999_v46, %v4624_v19  ;;  %vm1291_vm2 = vcmp.eq.s32.totalorder %v7999_v46, %v4675_v23  ;;  %vm1715_vm14 = vcmp.eq.s32.totalorder %v7999_v46, %v4678_v35 }
 0x306   : > { %v3697_v62 = vadd.f32 %v3569_v57, %v3273_v14  ;;  %v2485_v13 = vadd.f32 %v2357_v38, %v2055_v24  ;;  %v554_v48 = vsel %vm407_vm7, %v4523_v30, 0.0  ;;  %v998_v22 = vsel %vm851_vm10, %v4526_v31, 0.0 }
 0x307   : > { %v3633_v58 = vsel %vm3486_vm12, %v4850_v0, 0.0  ;;  %v1126_v5 = vadd.f32 %v998_v22, %v554_v48  ;;  %v1438_v41 = vsel %vm1291_vm2, %v4611_v17, 0.0  ;;  %vm2145_vm15 = vcmp.eq.s32.totalorder %v7999_v46, %v4664_v37 }
 0x308   : > { %3856 = vmatpush2.msra.mxu0 %v3697_v62  ;;  %v2909_v11 = vadd.f32 %v2781_v8, %v2485_v13  ;;  %v1862_v51 = vsel %vm1715_vm14, %v4614_v18, 0.0  ;;  %vm2569_vm0 = vcmp.eq.s32.totalorder %v7999_v46, %v4688_v50  ;;  %v8025_v32 = vadd.s32 384, %v4370_v1 }
 0x309   : > { %v1566_v2 = vadd.f32 %v1438_v41, %v1126_v5  ;;  %v2292_v12 = vsel %vm2145_vm15, %v4641_v60, 0.0  ;;  %v2716_v3 = vsel %vm2569_vm0, %v4681_v47, 0.0  ;;  %vm2997_vm1 = vcmp.eq.s32.totalorder %v7999_v46, %v4728_v27 }
 0x30a   : > { %v3337_v10 = vadd.f32 %v3209_v56, %v2909_v11  ;;  %vm3421_vm4 = vcmp.eq.s32.totalorder %v7999_v46, %v4736_v36  ;;  %vm471_vm9 = vcmp.eq.s32.totalorder %v8002_v49, %v4585_v61  ;;  %vm915_vm5 = vcmp.eq.s32.totalorder %v8002_v49, %v4624_v19 }
 0x30b   : > { %v1990_v1 = vadd.f32 %v1862_v51, %v1566_v2  ;;  %v618_v6 = vsel %vm471_vm9, %v4523_v30, 0.0  ;;  %v1062_v54 = vsel %vm915_vm5, %v4526_v31, 0.0  ;;  %vm1355_vm6 = vcmp.eq.s32.totalorder %v8002_v49, %v4675_v23 }
 0x30c   : > { %v3761_v9 = vadd.f32 %v3633_v58, %v3337_v10  ;;  %v1190_v16 = vadd.f32 %v1062_v54, %v618_v6  ;;  %v1502_v26 = vsel %vm1355_vm6, %v4611_v17, 0.0  ;;  %vm1779_vm11 = vcmp.eq.s32.totalorder %v8002_v49, %v4678_v35 }
 0x30d   : > { %v2420_v42 = vadd.f32 %v2292_v12, %v1990_v1  ;;  %v1926_v44 = vsel %vm1779_vm11, %v4614_v18, 0.0  ;;  %vm2209_vm13 = vcmp.eq.s32.totalorder %v8002_v49, %v4664_v37  ;;  %vm2633_vm8 = vcmp.eq.s32.totalorder %v8002_v49, %v4688_v50 }
 0x30e   : > { %3927 = vmatpush2.msra.mxu1 %v3761_v9  ;;  %v3144_v57 = vsel %vm2997_vm1, %v4710_v63, 0.0  ;;  %v3568_v53 = vsel %vm3421_vm4, %v4731_v34, 0.0  ;;  %v1630_v38 = vadd.f32 %v1502_v26, %v1190_v16  ;;  %v2356_v8 = vsel %vm2209_vm13, %v4641_v60, 0.0 }
 0x30f   : > { %v2844_v56 = vadd.f32 %v2716_v3, %v2420_v42  ;;  %v2780_v14 = vsel %vm2633_vm8, %v4681_v47, 0.0  ;;  %vm3061_vm3 = vcmp.eq.s32.totalorder %v8002_v49, %v4728_v27  ;;  %vm406_vm12 = vcmp.eq.s32.totalorder %v7999_v46, %v4779_v7 }
 0x310   : > { %v2054_v24 = vadd.f32 %v1926_v44, %v1630_v38  ;;  %vm3485_vm7 = vcmp.eq.s32.totalorder %v8002_v49, %v4736_v36  ;;  %v553_v62 = vsel %vm406_vm12, %v4766_v45, 0.0  ;;  %vm850_vm10 = vcmp.eq.s32.totalorder %v7999_v46, %v4786_v55 }
 0x311   : > { %v3272_v13 = vadd.f32 %v3144_v57, %v2844_v56  ;;  %v997_v48 = vsel %vm850_vm10, %v4556_v43, 0.0  ;;  %vm1290_vm2 = vcmp.eq.s32.totalorder %v7999_v46, %v4789_v20  ;;  %vm1714_vm14 = vcmp.eq.s32.totalorder %v7999_v46, %v4798_v21 }
 0x312   : > { %v2484_v22 = vadd.f32 %v2356_v8, %v2054_v24  ;;  %v3208_v58 = vsel %vm3061_vm3, %v4710_v63, 0.0  ;;  %v1125_v5 = vadd.f32 %v997_v48, %v553_v62  ;;  %v1437_v41 = vsel %vm1290_vm2, %v4776_v33, 0.0 }
 0x313   : > { %v3696_v11 = vadd.f32 %v3568_v53, %v3272_v13  ;;  %v1861_v51 = vsel %vm1714_vm14, %v4801_v59, 0.0  ;;  %vm2144_vm15 = vcmp.eq.s32.totalorder %v7999_v46, %v4809_v4  ;;  %vm2568_vm0 = vcmp.eq.s32.totalorder %v7999_v46, %v4835_v29 }
 0x314   : > { %v2908_v2 = vadd.f32 %v2780_v14, %v2484_v22  ;;  %v3632_v12 = vsel %vm3485_vm7, %v4731_v34, 0.0  ;;  %v1565_v3 = vadd.f32 %v1437_v41, %v1125_v5  ;;  %vm2996_vm1 = vcmp.eq.s32.totalorder %v7999_v46, %v4841_v25 }
 0x315   : > { %3857 = vmatprep.subr.mxu0 %v3696_v11  ;;  %v2291_v10 = vsel %vm2144_vm15, %v4819_v52, 0.0  ;;  %v2715_v1 = vsel %vm2568_vm0, %v4838_v28, 0.0  ;;  %vm470_vm4 = vcmp.eq.s32.totalorder %v8002_v49, %v4779_v7  ;;  %vm914_vm9 = vcmp.eq.s32.totalorder %v8002_v49, %v4786_v55 }
 0x316   : > { %v3336_v6 = vadd.f32 %v3208_v58, %v2908_v2  ;;  %v1989_v54 = vadd.f32 %v1861_v51, %v1565_v3  ;;  %vm3420_vm5 = vcmp.eq.s32.totalorder %v7999_v46, %v4847_v40  ;;  %v617_v9 = vsel %vm470_vm4, %v4766_v45, 0.0 }
 0x317   : > { %v1061_v16 = vsel %vm914_vm9, %v4556_v43, 0.0  ;;  %vm1354_vm6 = vcmp.eq.s32.totalorder %v8002_v49, %v4789_v20  ;;  %vm1778_vm11 = vcmp.eq.s32.totalorder %v8002_v49, %v4798_v21  ;;  %vm2208_vm13 = vcmp.eq.s32.totalorder %v8002_v49, %v4809_v4 }
 0x318   : > { %v3760_v26 = vadd.f32 %v3632_v12, %v3336_v6  ;;  %v2419_v42 = vadd.f32 %v2291_v10, %v1989_v54  ;;  %v1189_v44 = vadd.f32 %v1061_v16, %v617_v9  ;;  %v1501_v57 = vsel %vm1354_vm6, %v4776_v33, 0.0 }
 0x319   : > { %v3143_v53 = vsel %vm2996_vm1, %v4844_v39, 0.0  ;;  %v3567_v38 = vsel %vm3420_vm5, %v4850_v0, 0.0  ;;  %v1925_v8 = vsel %vm1778_vm11, %v4801_v59, 0.0  ;;  %vm2632_vm8 = vcmp.eq.s32.totalorder %v8002_v49, %v4835_v29 }
 0x31a   : > { %3928 = vmatprep.subr.mxu1 %v3760_v26  ;;  %v2843_v56 = vadd.f32 %v2715_v1, %v2419_v42  ;;  %v1629_v14 = vadd.f32 %v1501_v57, %v1189_v44  ;;  %v2355_v24 = vsel %vm2208_vm13, %v4819_v52, 0.0  ;;  %vm3060_vm3 = vcmp.eq.s32.totalorder %v8002_v49, %v4841_v25 }
 0x31b   : > { %v2779_v62 = vsel %vm2632_vm8, %v4838_v28, 0.0  ;;  %vm405_vm12 = vcmp.eq.s32.totalorder %v8005_v15, %v4585_v61  ;;  %vm849_vm7 = vcmp.eq.s32.totalorder %v8005_v15, %v4624_v19  ;;  %vm1289_vm10 = vcmp.eq.s32.totalorder %v8005_v15, %v4675_v23 }
 0x31c   : > { %v3271_v46 = vadd.f32 %v3143_v53, %v2843_v56  ;;  %v2053_v13 = vadd.f32 %v1925_v8, %v1629_v14  ;;  %vm3484_vm2 = vcmp.eq.s32.totalorder %v8002_v49, %v4847_v40  ;;  %v552_v48 = vsel %vm405_vm12, %v4523_v30, 0.0  ;;  %v3789_v8 = vld [vmem:[%s8175_s6] sm:$0xff] }
 0x31d   : > { %v996_v22 = vsel %vm849_vm7, %v4526_v31, 0.0  ;;  %v1436_v58 = vsel %vm1289_vm10, %v4611_v17, 0.0  ;;  %vm1713_vm14 = vcmp.eq.s32.totalorder %v8005_v15, %v4678_v35  ;;  %vm2143_vm15 = vcmp.eq.s32.totalorder %v8005_v15, %v4664_v37 }
 0x31e   : > { %v3695_v5 = vadd.f32 %v3567_v38, %v3271_v46  ;;  %v2483_v41 = vadd.f32 %v2355_v24, %v2053_v13  ;;  %v3207_v11 = vsel %vm3060_vm3, %v4844_v39, 0.0  ;;  %v1124_v51 = vadd.f32 %v996_v22, %v552_v48 }
 0x31f   : > { %v3631_v2 = vsel %vm3484_vm2, %v4850_v0, 0.0  ;;  %v1860_v49 = vsel %vm1713_vm14, %v4614_v18, 0.0  ;;  %v2290_v12 = vsel %vm2143_vm15, %v4641_v60, 0.0  ;;  %vm2567_vm0 = vcmp.eq.s32.totalorder %v8005_v15, %v4688_v50 }
 0x320   : > { %3858 = vmatpush2.msra.mxu0 %v3695_v5  ;;  %v2907_v3 = vadd.f32 %v2779_v62, %v2483_v41  ;;  %v1564_v10 = vadd.f32 %v1436_v58, %v1124_v51  ;;  %vm2995_vm1 = vcmp.eq.s32.totalorder %v8005_v15, %v4728_v27  ;;  %vm3419_vm4 = vcmp.eq.s32.totalorder %v8005_v15, %v4736_v36 }
 0x321   : > { %v2714_v1 = vsel %vm2567_vm0, %v4681_v47, 0.0  ;;  %vm469_vm9 = vcmp.eq.s32.totalorder %v8025_v32, %v4585_v61  ;;  %vm913_vm5 = vcmp.eq.s32.totalorder %v8025_v32, %v4624_v19  ;;  %vm1353_vm6 = vcmp.eq.s32.totalorder %v8025_v32, %v4675_v23 }
 0x322   : > { %v3335_v6 = vadd.f32 %v3207_v11, %v2907_v3  ;;  %v1988_v54 = vadd.f32 %v1860_v49, %v1564_v10  ;;  %v616_v9 = vsel %vm469_vm9, %v4523_v30, 0.0  ;;  %v1060_v16 = vsel %vm913_vm5, %v4526_v31, 0.0 }
 0x323   : > { %v1188_v26 = vadd.f32 %v1060_v16, %v616_v9  ;;  %v1500_v42 = vsel %vm1353_vm6, %v4611_v17, 0.0  ;;  %vm1777_vm11 = vcmp.eq.s32.totalorder %v8025_v32, %v4678_v35  ;;  %vm2207_vm13 = vcmp.eq.s32.totalorder %v8025_v32, %v4664_v37 }
 0x324   : > { %v3759_v61 = vadd.f32 %v3631_v2, %v3335_v6  ;;  %v2418_v19 = vadd.f32 %v2290_v12, %v1988_v54  ;;  %v3142_v23 = vsel %vm2995_vm1, %v4710_v63, 0.0  ;;  %v1924_v30 = vsel %vm1777_vm11, %v4614_v18, 0.0 }
 0x325   : > { %v3566_v31 = vsel %vm3419_vm4, %v4731_v34, 0.0  ;;  %v1628_v17 = vadd.f32 %v1500_v42, %v1188_v26  ;;  %v2354_v35 = vsel %vm2207_vm13, %v4641_v60, 0.0  ;;  %vm2631_vm8 = vcmp.eq.s32.totalorder %v8025_v32, %v4688_v50 }
 0x326   : > { %3929 = vmatpush2.msra.mxu1 %v3759_v61  ;;  %v2842_v37 = vadd.f32 %v2714_v1, %v2418_v19  ;;  %v2778_v44 = vsel %vm2631_vm8, %v4681_v47, 0.0  ;;  %vm3059_vm3 = vcmp.eq.s32.totalorder %v8025_v32, %v4728_v27  ;;  %vm3483_vm12 = vcmp.eq.s32.totalorder %v8025_v32, %v4736_v36 }
 0x327   : > { %v2052_v18 = vadd.f32 %v1924_v30, %v1628_v17  ;;  %vm404_vm7 = vcmp.eq.s32.totalorder %v8005_v15, %v4779_v7  ;;  %vm848_vm10 = vcmp.eq.s32.totalorder %v8005_v15, %v4786_v55  ;;  %vm1288_vm2 = vcmp.eq.s32.totalorder %v8005_v15, %v4789_v20 }
 0x328   : > { %v3270_v60 = vadd.f32 %v3142_v23, %v2842_v37  ;;  %v551_v47 = vsel %vm404_vm7, %v4766_v45, 0.0  ;;  %v995_v50 = vsel %vm848_vm10, %v4556_v43, 0.0  ;;  %v1435_v57 = vsel %vm1288_vm2, %v4776_v33, 0.0 }
 0x329   : > { %v2482_v53 = vadd.f32 %v2354_v35, %v2052_v18  ;;  %v1123_v38 = vadd.f32 %v995_v50, %v551_v47  ;;  %vm1712_vm14 = vcmp.eq.s32.totalorder %v8005_v15, %v4798_v21  ;;  %vm2142_vm15 = vcmp.eq.s32.totalorder %v8005_v15, %v4809_v4 }
 0x32a   : > { %v3694_v56 = vadd.f32 %v3566_v31, %v3270_v60  ;;  %v3206_v14 = vsel %vm3059_vm3, %v4710_v63, 0.0  ;;  %v1859_v24 = vsel %vm1712_vm14, %v4801_v59, 0.0  ;;  %vm2566_vm0 = vcmp.eq.s32.totalorder %v8005_v15, %v4835_v29 }
 0x32b   : > { %v2906_v62 = vadd.f32 %v2778_v44, %v2482_v53  ;;  %v3630_v46 = vsel %vm3483_vm12, %v4731_v34, 0.0  ;;  %v1563_v13 = vadd.f32 %v1435_v57, %v1123_v38  ;;  %v2289_v48 = vsel %vm2142_vm15, %v4819_v52, 0.0 }
 0x32c   : > { %3859 = vmatprep.subr.mxu0 %v3694_v56  ;;  %v2713_v22 = vsel %vm2566_vm0, %v4838_v28, 0.0  ;;  %v3793_v27 = vcombine.high %v3789_v8, %v3789_v8  ;;  %vm468_vm1 = vcmp.eq.s32.totalorder %v8025_v32, %v4779_v7  ;;  %vm2994_vm4 = vcmp.eq.s32.totalorder %v8005_v15, %v4841_v25 }
 0x32d   : > { %v3334_v63 = vadd.f32 %v3206_v14, %v2906_v62  ;;  %v1987_v58 = vadd.f32 %v1859_v24, %v1563_v13  ;;  %v615_v5 = vsel %vm468_vm1, %v4766_v45, 0.0  ;;  %vm3418_vm9 = vcmp.eq.s32.totalorder %v8005_v15, %v4847_v40  ;;  %v3790_v45 = vld [vmem:[%s8175_s6 + $0x8] sm:$0xff] }
 0x32e   : > { %3861 = vmatprep.mubr.f32.mxu0 %v3793_v27  ;;  %vm912_vm5 = vcmp.eq.s32.totalorder %v8025_v32, %v4786_v55  ;;  %vm1352_vm6 = vcmp.eq.s32.totalorder %v8025_v32, %v4789_v20  ;;  %vm1776_vm11 = vcmp.eq.s32.totalorder %v8025_v32, %v4798_v21  ;;  %v3141_v11 = vsel %vm2994_vm4, %v4844_v39, 0.0 }
 0x32f   : > { %v3758_v34 = vadd.f32 %v3630_v46, %v3334_v63  ;;  %v2417_v36 = vadd.f32 %v2289_v48, %v1987_v58  ;;  %v1059_v7 = vsel %vm912_vm5, %v4556_v43, 0.0  ;;  %v1499_v41 = vsel %vm1352_vm6, %v4776_v33, 0.0 }
 0x330   : > { %v1187_v51 = vadd.f32 %v1059_v7, %v615_v5  ;;  %vm2206_vm13 = vcmp.eq.s32.totalorder %v8025_v32, %v4809_v4  ;;  %v1923_v20 = vsel %vm1776_vm11, %v4801_v59, 0.0  ;;  %v3565_v21 = vsel %vm3418_vm9, %v4850_v0, 0.0 }
 0x331   : > { %3930 = vmatprep.subr.mxu1 %v3758_v34  ;;  %v2841_v55 = vadd.f32 %v2713_v22, %v2417_v36  ;;  %vm2630_vm8 = vcmp.eq.s32.totalorder %v8025_v32, %v4835_v29  ;;  %v3794_v43 = vcombine.high %v3790_v45, %v3790_v45  ;;  %v2353_v49 = vsel %vm2206_vm13, %v4819_v52, 0.0 }
 0x332   : > { %v1627_v2 = vadd.f32 %v1499_v41, %v1187_v51  ;;  %vm3058_vm3 = vcmp.eq.s32.totalorder %v8025_v32, %v4841_v25  ;;  %v2777_v4 = vsel %vm2630_vm8, %v4838_v28, 0.0  ;;  %vm3482_vm12 = vcmp.eq.s32.totalorder %v8025_v32, %v4847_v40 }
 0x333   : > { %v3269_v33 = vadd.f32 %v3141_v11, %v2841_v55  ;;  %3932 = vmatprep.mubr.f32.mxu1 %v3794_v43  ;;  %v3205_v29 = vsel %vm3058_vm3, %v4844_v39, 0.0  ;;  %v3629_v52 = vsel %vm3482_vm12, %v4850_v0, 0.0 }
 0x334   : > { %v2051_v12 = vadd.f32 %v1923_v20, %v1627_v2 }
 0x335   : > { %v3693_v59 = vadd.f32 %v3565_v21, %v3269_v33 }
 0x336   : > { %v2481_v15 = vadd.f32 %v2353_v49, %v2051_v12 }
 0x337   : > { %3860 = vmatpush2.msra.mxu0 %v3693_v59 }
 0x338   : > { %v2905_v3 = vadd.f32 %v2777_v4, %v2481_v15  ;;  %3862 = vmatmul.mubr.f32.vlgmr.msra.gmra.mxu0 %v3789_v8 }
 0x33a   : > { %v3333_v10 = vadd.f32 %v3205_v29, %v2905_v3 }
 0x33c   : > { %v3757_v1 = vadd.f32 %v3629_v52, %v3333_v10 }
 0x33e   : > { %3931 = vmatpush2.msra.mxu1 %v3757_v1 }
 0x33f   : > { %3933 = vmatmul.mubr.f32.vlgmr.msra.gmra.mxu1 %v3790_v45 }
 0x3f8   : > { %v3863_v25 = vpop.f32.mrf.mxu0 }
 0x3fa   : > { %v3865_v6 = vpop.f32.mrf.mxu0 }
 0x3ff   : > { %v3934_v28 = vpop.f32.mrf.mxu1 }
 0x400   : > { %v3935_v39 = vadd.f32 %v3934_v28, %v3863_v25 }
 0x401   : > { %v3936_v40 = vpop.f32.mrf.mxu1 }
 0x402   : > { %v3937_v32 = vadd.f32 %v3936_v40, %v3865_v6 }
 0x404   : > { %v3941_v54 = vcombine.low %v3935_v39, %v3937_v32 }
 0x406   : > { %3943 = vst [vmem:[%s219_s20] sm:$0xff] %v3941_v54 }
 0x407   : > { %4183 = shalt.err (!%p4180_p7)
}
 0x408   : > { %s4184_s6 = scalar_lea.hbm %s3959_s27, 128  ;;  %s4188_s9 = scalar_lea.hbm %s8287_s3, 512 }
 0x409   : > { %p4185_p9 = scmp.ne.s32.totalorder %s3959_s27, %s4184_s6  ;;  %p4189_p12 = scmp.lt.s32.totalorder %s3959_s27, %s8287_s3 }
 0x40a   : > { %p4190_p13 = scmp.lt.s32.totalorder %s4188_s9, %s4184_s6 }
 0x40b   : > { %p4186_p10 = pnand %p4185_p9, %p4337_p3 }
 0x40c   : > { %p4191_p0 = por %p4190_p13, %p4189_p12 }
 0x40d   : > { %p4187_p11 = pneg %p4186_p10 }
 0x40f   : > { %p4192_p1 = pnand %p4191_p0, %p4187_p11 }
 0x411   : > { %4195 = shalt.err (!%p4192_p1)
}
 0x412   : > { %4096 = dma.vmem_to_hbm [thread:$0]  (%p4337_p3), %s3962_s21, 128, %s3959_s27, %s3945_s28  }
 0x413 PF: > { %p4102_p2 = scmp.ge.s32.totalorder %s4262_s19, 2  ;;  %s3973_s20 = sand.u32 1, %s4234_s12  }
 0x414   : > { %s3974_s15 = scalar_lea.sflag [#allocation3], %s3973_s20 }
 0x415   : > { %p4099_p4 = pnand %p4102_p2, %p4346_p8 }
 0x417   : > { %p4100_p5 = pneg %p4099_p4 }
 0x419   : > { %4229 = dma.done.wait (%p4100_p5), %s3974_s15, 128  }
 0x41a   : > { %4231 = vsyncadd (%p4100_p5), %s3974_s15, 4294967168  ;;  %s16_s19 = sadd.s32 1, %s4262_s19   ;;  %s8320_s12 = smov %s4238_s13 }
 0x41b   : > { %p13_p6 = scmp.ge.s32.totalorder %s16_s19, 6   ;;  %s8321_s13 = smov %s4242_s14 }
 0x41c   : > { %s8322_s14 = smov %s4355_s30  ;;  %s8323_s15 = smov %s4254_s17 }
 0x41d   : > { %s8324_s16 = smov %s4258_s18  ;;  %s8325_s17 = smov %s8328_s22 }
 0x41e   : > { %s8326_s18 = smov %s8332_s23  ;;  %15 = sbr.rel (!%p13_p6) target bundleno = 5 (0x5), region = 73 }
 0x423   :  { %3979 = vsyncpa [#allocation3], 1 }
 0x424   :  { %3981 = vsyncpa [#allocation3 + $0x1], 1 }

</bundles_post_ra>
